<compile_context>
chip_gen: v5e
topology: v5e:2x2
jax: 0.10.0
libtpu: 0.0.40
codegen_flags: <defaults>
</compile_context>

<pallas_src>
import functools

import jax
import jax.numpy as jnp
from jax.experimental import pallas as pl
from jax.experimental.pallas import tpu as pltpu

IN_DIM = 28 * 28            # 784
H1, H2, H3, OUT = 1024, 512, 256, 1
OUT_PAD = 128               # lane-dense output block width


def _round_up(x, m):
    return ((x + m - 1) // m) * m


def _device_kind():
    try:
        return jax.devices()[0].device_kind.lower()
    except Exception:
        return ""


def _use_bf16_epilogue():
    # bf16 VALU exists on v6e / v7x; keep f32 elementwise on v5e / unknown chips.
    kind = _device_kind()
    return ("v6" in kind) or ("v7" in kind) or ("7x" in kind)


def _is_v7x():
    kind = _device_kind()
    return ("v7" in kind) or ("7x" in kind)


def discriminator_kernel(x_ref,
                         w1_ref, b1_ref,
                         w2_ref, b2_ref,
                         w3_ref, b3_ref,
                         w4_ref, b4_ref,
                         o_ref,
                         *, bf16_epilogue):
    def layer(h_in, w_ref, b_ref):
        acc = jnp.dot(h_in, w_ref[...], preferred_element_type=jnp.float32)
        if bf16_epilogue:
            y = acc.astype(jnp.bfloat16) + b_ref[...]     # bf16 bias add
            y = jnp.maximum(y, 0.2 * y)                   # bf16 LeakyReLU (vmul+vmax)
            return y                                      # already bf16 for next MXU
        y = acc + b_ref[...]                              # f32 bias add
        y = jnp.maximum(y, 0.2 * y)                       # f32 LeakyReLU
        return y.astype(jnp.bfloat16)                     # next MXU input

    h = layer(x_ref[...], w1_ref, b1_ref)                 # (TB, 1024)
    h = layer(h, w2_ref, b2_ref)                          # (TB, 512)
    h = layer(h, w3_ref, b3_ref)                          # (TB, 256)

    # Final (256 -> 1) layer: broadcast-multiply + lane reduction on the VPU/XLU
    # instead of an N=1 MXU matmul.  w4_ref is the (1, 256) weight row (f32).
    h32 = h.astype(jnp.float32)
    logits = jnp.sum(h32 * w4_ref[...], axis=-1, keepdims=True) + b4_ref[...]

    # Exact sigmoid: the (TB, 1) tensor is tiny, so the approx reciprocal's
    # error is not worth saving.
    sig = 1.0 / (1.0 + jnp.exp(-logits))

    # Lane-dense store: broadcast across the 128-wide output block, bf16 halves
    # the writeback bytes (value is sliced to (B, 1) and re-cast in the wrapper).
    o_ref[...] = jnp.broadcast_to(sig, o_ref.shape).astype(o_ref.dtype)


def _build_pallas_call(*, tile_b, B_pad, grid, bf16_epilogue, single_buffer_weights):
    if single_buffer_weights:
        def rep(shape):
            # Constant index map -> fetched exactly once; single-buffer to save VMEM.
            return pl.BlockSpec(shape, lambda i: (0, 0), pipeline_mode=pl.Buffered(1))
    else:
        def rep(shape):
            return pl.BlockSpec(shape, lambda i: (0, 0))

    kernel = functools.partial(discriminator_kernel, bf16_epilogue=bf16_epilogue)
    return pl.pallas_call(
        kernel,
        out_shape=jax.ShapeDtypeStruct((B_pad, OUT_PAD), jnp.bfloat16),
        grid_spec=pltpu.PrefetchScalarGridSpec(
            num_scalar_prefetch=0,
            grid=grid,
            in_specs=[
                pl.BlockSpec((tile_b, IN_DIM), lambda i: (i, 0)),   # x tile
                rep((IN_DIM, H1)), rep((1, H1)),
                rep((H1, H2)),     rep((1, H2)),
                rep((H2, H3)),     rep((1, H3)),
                rep((1, H3)),      rep((1, 1)),                     # w4 row, b4
            ],
            out_specs=pl.BlockSpec((tile_b, OUT_PAD), lambda i: (i, 0)),
        ),
        compiler_params=pltpu.CompilerParams(
            dimension_semantics=("parallel",),
            vmem_limit_bytes=32 * 1024 * 1024,
        ),
    )


def discriminator_forward(x, params, *, tile_b=512, bf16_epilogue=None):
    """x: (B, 1, 28, 28) or (B, 784).  Returns (B, 1) float32 sigmoid outputs."""
    B = x.shape[0]
    if bf16_epilogue is None:
        bf16_epilogue = _use_bf16_epilogue()

    (w1, b1), (w2, b2), (w3, b3), (w4, b4) = params

    # ---- wrapper preprocessing: one bf16 cast, at most one (batch) pad ----
    x_bf = x.reshape(B, -1).astype(jnp.bfloat16)
    assert x_bf.shape[1] == IN_DIM

    # Batch tiling: clamp the tile to the (8-rounded) batch.
    B8 = _round_up(B, 8)
    tile_b = max(8, min(_round_up(tile_b, 8), B8))
    # v7x has 2 TensorCores per chip: make sure the parallel grid has >= 2 steps.
    if _is_v7x() and B8 >= 16:
        tile_b = min(tile_b, _round_up((B8 + 1) // 2, 8))
    B_pad = _round_up(B, tile_b)
    if B_pad != B:
        x_bf = jnp.pad(x_bf, ((0, B_pad - B), (0, 0)))
    grid = (B_pad // tile_b,)

    # MXU operands in bf16 (f32 accumulation); elementwise epilogue dtype per chip.
    ep_dtype = jnp.bfloat16 if bf16_epilogue else jnp.float32
    w1b, w2b, w3b = (w.astype(jnp.bfloat16) for w in (w1, w2, w3))
    b1c, b2c, b3c = (b.reshape(1, -1).astype(ep_dtype) for b in (b1, b2, b3))
    w4_row = w4.reshape(1, H3).astype(jnp.float32)      # used on the VPU, keep f32
    b4_s = b4.reshape(1, 1).astype(jnp.float32)

    args = (x_bf, w1b, b1c, w2b, b2c, w3b, b3c, w4_row, b4_s)
    try:
        out = _build_pallas_call(tile_b=tile_b, B_pad=B_pad, grid=grid,
                                 bf16_epilogue=bf16_epilogue,
                                 single_buffer_weights=True)(*args)
    except Exception:
        # Older jax without BlockSpec pipeline_mode / Buffered(1): double-buffer.
        out = _build_pallas_call(tile_b=tile_b, B_pad=B_pad, grid=grid,
                                 bf16_epilogue=bf16_epilogue,
                                 single_buffer_weights=False)(*args)

    return out[:B, :1].astype(jnp.float32)


def init_params(key):
    """Deterministic synthetic init matching nn.Linear shapes (stored transposed)."""
    dims = [(IN_DIM, H1), (H1, H2), (H2, H3), (H3, OUT)]
    params = []
    for fan_in, fan_out in dims:
        kw, kb, key = jax.random.split(key, 3)
        bound = 1.0 / jnp.sqrt(fan_in)
        w = jax.random.uniform(kw, (fan_in, fan_out), jnp.float32, -bound, bound)
        b = jax.random.uniform(kb, (1, fan_out), jnp.float32, -bound, bound)
        params.append((w, b))
    return params


def reference_forward(x, params, *, bf16_epilogue=False):
    """Pure-JAX reference following the kernel's exact precision path."""
    B = x.shape[0]
    h = x.reshape(B, -1).astype(jnp.bfloat16)
    (w1, b1), (w2, b2), (w3, b3), (w4, b4) = params

    def layer(h_in, w, b):
        acc = jnp.dot(h_in, w.astype(jnp.bfloat16), preferred_element_type=jnp.float32)
        if bf16_epilogue:
            y = acc.astype(jnp.bfloat16) + b.astype(jnp.bfloat16)
        else:
            y = acc + b
        y = jnp.maximum(y, 0.2 * y)
        return y.astype(jnp.bfloat16)

    h = layer(h, w1, b1)
    h = layer(h, w2, b2)
    h = layer(h, w3, b3)
    h32 = h.astype(jnp.float32)
    logits = jnp.sum(h32 * w4.reshape(1, -1), axis=-1, keepdims=True) + b4.reshape(1, 1)
    return jax.nn.sigmoid(logits)


def reference_forward_f32(x, params):
    """Full-f32 reference matching the PyTorch module's math."""
    B = x.shape[0]
    h = x.reshape(B, -1).astype(jnp.float32)
    (w1, b1), (w2, b2), (w3, b3), (w4, b4) = params
    for w, b in ((w1, b1), (w2, b2), (w3, b3)):
        h = h @ w + b
        h = jnp.maximum(h, 0.2 * h)
    return jax.nn.sigmoid(h @ w4 + b4)


if __name__ == "__main__":
    key = jax.random.PRNGKey(0)
    k_x, k_p = jax.random.split(key)

    B = 40                                        # ragged batch: exercises padding
    x = jax.random.normal(k_x, (B, 1, 28, 28), jnp.float32)   # NCHW-style input
    params = init_params(k_p)

    bf16_ep = _use_bf16_epilogue()
    out = discriminator_forward(x, params, tile_b=16)   # small tile: multi-step grid
    out = jax.block_until_ready(out)

    ref = reference_forward(x, params, bf16_epilogue=bf16_ep)
    ref32 = reference_forward_f32(x, params)

    assert out.shape == (B, 1)
    # vs. a reference on the kernel's exact precision path: the only remaining
    # delta is the bf16 rounding of the stored output (< ~2e-3).
    assert jnp.allclose(out, ref, atol=4e-3, rtol=0.0), "mismatch vs matched-precision reference"
    # vs. the full-f32 module semantics (bf16 MXU / epilogue drift; loose bound).
    assert jnp.allclose(out, ref32, atol=2.5e-2, rtol=0.0), "mismatch vs f32 reference"

    print("KERNEL_OK")
</pallas_src>

<mosaic_0001>
module attributes {stable_mosaic.version = 11 : i64} {
  func.func @discriminator_kernel(%arg0: i32, %arg1: memref<16x784xbf16, #tpu.memory_space<vmem>>, %arg2: memref<784x1024xbf16, #tpu.memory_space<vmem>>, %arg3: memref<1x1024xf32, #tpu.memory_space<vmem>>, %arg4: memref<1024x512xbf16, #tpu.memory_space<vmem>>, %arg5: memref<1x512xf32, #tpu.memory_space<vmem>>, %arg6: memref<512x256xbf16, #tpu.memory_space<vmem>>, %arg7: memref<1x256xf32, #tpu.memory_space<vmem>>, %arg8: memref<1x256xf32, #tpu.memory_space<vmem>>, %arg9: memref<1x1xf32, #tpu.memory_space<vmem>>, %arg10: memref<16x128xbf16, #tpu.memory_space<vmem>>) attributes {dimension_semantics = [#tpu.dimension_semantics<parallel>], iteration_bounds = array<i64: 3>, scalar_prefetch = 0 : i64, scratch_operands = 0 : i64, tpu.core_type = #tpu.core_type<tc>, window_params = [{transform_indices = @transform_0, window_bounds = array<i64: 16, 784>}, {pipeline_mode = #tpu.pipeline_mode<synchronous>, transform_indices = @transform_1, window_bounds = array<i64: 784, 1024>}, {pipeline_mode = #tpu.pipeline_mode<synchronous>, transform_indices = @transform_2, window_bounds = array<i64: 1, 1024>}, {pipeline_mode = #tpu.pipeline_mode<synchronous>, transform_indices = @transform_3, window_bounds = array<i64: 1024, 512>}, {pipeline_mode = #tpu.pipeline_mode<synchronous>, transform_indices = @transform_4, window_bounds = array<i64: 1, 512>}, {pipeline_mode = #tpu.pipeline_mode<synchronous>, transform_indices = @transform_5, window_bounds = array<i64: 512, 256>}, {pipeline_mode = #tpu.pipeline_mode<synchronous>, transform_indices = @transform_6, window_bounds = array<i64: 1, 256>}, {pipeline_mode = #tpu.pipeline_mode<synchronous>, transform_indices = @transform_7, window_bounds = array<i64: 1, 256>}, {pipeline_mode = #tpu.pipeline_mode<synchronous>, transform_indices = @transform_8, window_bounds = array<i64: 1, 1>}, {transform_indices = @transform_9, window_bounds = array<i64: 16, 128>}]} {
    %c0 = arith.constant 0 : index
    %c0_0 = arith.constant 0 : index
    %0 = vector.load %arg1[%c0, %c0_0] : memref<16x784xbf16, #tpu.memory_space<vmem>>, vector<16x784xbf16>
    %c0_1 = arith.constant 0 : index
    %c0_2 = arith.constant 0 : index
    %1 = vector.load %arg2[%c0_1, %c0_2] : memref<784x1024xbf16, #tpu.memory_space<vmem>>, vector<784x1024xbf16>
    %cst = arith.constant dense<0.000000e+00> : vector<16x1024xf32>
    %2 = tpu.matmul %0, %1, %cst {dimension_numbers = #tpu.dot_dimension_numbers<[1], [0], [0], [1], [0, 0, 1, 1], [], []>} : vector<16x784xbf16>, vector<784x1024xbf16>, vector<16x1024xf32> -> vector<16x1024xf32>
    %c0_3 = arith.constant 0 : index
    %c0_4 = arith.constant 0 : index
    %3 = vector.load %arg3[%c0_3, %c0_4] : memref<1x1024xf32, #tpu.memory_space<vmem>>, vector<1x1024xf32>
    %4 = vector.broadcast %3 : vector<1x1024xf32> to vector<16x1024xf32>
    %5 = arith.addf %2, %4 : vector<16x1024xf32>
    %cst_5 = arith.constant 2.000000e-01 : f32
    %6 = vector.broadcast %cst_5 : f32 to vector<16x1024xf32>
    %7 = arith.mulf %6, %5 : vector<16x1024xf32>
    %8 = arith.maximumf %5, %7 : vector<16x1024xf32>
    %9 = arith.truncf %8 : vector<16x1024xf32> to vector<16x1024xbf16>
    %c0_6 = arith.constant 0 : index
    %c0_7 = arith.constant 0 : index
    %10 = vector.load %arg4[%c0_6, %c0_7] : memref<1024x512xbf16, #tpu.memory_space<vmem>>, vector<1024x512xbf16>
    %cst_8 = arith.constant dense<0.000000e+00> : vector<16x512xf32>
    %11 = tpu.matmul %9, %10, %cst_8 {dimension_numbers = #tpu.dot_dimension_numbers<[1], [0], [0], [1], [0, 0, 1, 1], [], []>} : vector<16x1024xbf16>, vector<1024x512xbf16>, vector<16x512xf32> -> vector<16x512xf32>
    %c0_9 = arith.constant 0 : index
    %c0_10 = arith.constant 0 : index
    %12 = vector.load %arg5[%c0_9, %c0_10] : memref<1x512xf32, #tpu.memory_space<vmem>>, vector<1x512xf32>
    %13 = vector.broadcast %12 : vector<1x512xf32> to vector<16x512xf32>
    %14 = arith.addf %11, %13 : vector<16x512xf32>
    %cst_11 = arith.constant 2.000000e-01 : f32
    %15 = vector.broadcast %cst_11 : f32 to vector<16x512xf32>
    %16 = arith.mulf %15, %14 : vector<16x512xf32>
    %17 = arith.maximumf %14, %16 : vector<16x512xf32>
    %18 = arith.truncf %17 : vector<16x512xf32> to vector<16x512xbf16>
    %c0_12 = arith.constant 0 : index
    %c0_13 = arith.constant 0 : index
    %19 = vector.load %arg6[%c0_12, %c0_13] : memref<512x256xbf16, #tpu.memory_space<vmem>>, vector<512x256xbf16>
    %cst_14 = arith.constant dense<0.000000e+00> : vector<16x256xf32>
    %20 = tpu.matmul %18, %19, %cst_14 {dimension_numbers = #tpu.dot_dimension_numbers<[1], [0], [0], [1], [0, 0, 1, 1], [], []>} : vector<16x512xbf16>, vector<512x256xbf16>, vector<16x256xf32> -> vector<16x256xf32>
    %c0_15 = arith.constant 0 : index
    %c0_16 = arith.constant 0 : index
    %21 = vector.load %arg7[%c0_15, %c0_16] : memref<1x256xf32, #tpu.memory_space<vmem>>, vector<1x256xf32>
    %22 = vector.broadcast %21 : vector<1x256xf32> to vector<16x256xf32>
    %23 = arith.addf %20, %22 : vector<16x256xf32>
    %cst_17 = arith.constant 2.000000e-01 : f32
    %24 = vector.broadcast %cst_17 : f32 to vector<16x256xf32>
    %25 = arith.mulf %24, %23 : vector<16x256xf32>
    %26 = arith.maximumf %23, %25 : vector<16x256xf32>
    %27 = arith.truncf %26 : vector<16x256xf32> to vector<16x256xbf16>
    %28 = arith.extf %27 : vector<16x256xbf16> to vector<16x256xf32>
    %c0_18 = arith.constant 0 : index
    %c0_19 = arith.constant 0 : index
    %29 = vector.load %arg8[%c0_18, %c0_19] : memref<1x256xf32, #tpu.memory_space<vmem>>, vector<1x256xf32>
    %30 = vector.broadcast %29 : vector<1x256xf32> to vector<16x256xf32>
    %31 = arith.mulf %28, %30 : vector<16x256xf32>
    %cst_20 = arith.constant dense<0.000000e+00> : vector<16xf32>
    %32 = vector.multi_reduction <add>, %31, %cst_20 [1] : vector<16x256xf32> to vector<16xf32>
    %33 = vector.shape_cast %32 : vector<16xf32> to vector<16x1xf32>
    %c0_21 = arith.constant 0 : index
    %c0_22 = arith.constant 0 : index
    %34 = vector.load %arg9[%c0_21, %c0_22] : memref<1x1xf32, #tpu.memory_space<vmem>>, vector<1x1xf32>
    %35 = vector.broadcast %34 : vector<1x1xf32> to vector<16x1xf32>
    %36 = arith.addf %33, %35 : vector<16x1xf32>
    %cst_23 = arith.constant 0.000000e+00 : f32
    %37 = vector.broadcast %cst_23 : f32 to vector<16x1xf32>
    %38 = arith.subf %37, %36 : vector<16x1xf32>
    %39 = math.exp %38 : vector<16x1xf32>
    %cst_24 = arith.constant 1.000000e+00 : f32
    %40 = vector.broadcast %cst_24 : f32 to vector<16x1xf32>
    %41 = arith.addf %40, %39 : vector<16x1xf32>
    %cst_25 = arith.constant 1.000000e+00 : f32
    %42 = vector.broadcast %cst_25 : f32 to vector<16x1xf32>
    %43 = arith.divf %42, %41 : vector<16x1xf32>
    %44 = vector.shape_cast %43 : vector<16x1xf32> to vector<16x1xf32>
    %45 = vector.broadcast %44 : vector<16x1xf32> to vector<16x128xf32>
    %46 = arith.truncf %45 : vector<16x128xf32> to vector<16x128xbf16>
    %c0_26 = arith.constant 0 : index
    %c0_27 = arith.constant 0 : index
    %47 = vector.load %arg10[%c0_26, %c0_27] : memref<16x128xbf16, #tpu.memory_space<vmem>>, vector<16x128xbf16>
    tpu.vector_store %arg10[%c0_26, %c0_27], %46 {strides = array<i32>} : memref<16x128xbf16, #tpu.memory_space<vmem>>, vector<16x128xbf16>,
    return
  }
  func.func @transform_0(%arg0: i32) -> (i32, i32) {
    %c0_i32 = arith.constant 0 : i32
    %c0_i32_0 = arith.constant 0 : i32
    return %arg0, %c0_i32 : i32, i32
  }
  func.func @transform_1(%arg0: i32) -> (i32, i32) {
    %c0_i32 = arith.constant 0 : i32
    %c0_i32_0 = arith.constant 0 : i32
    %c0_i32_1 = arith.constant 0 : i32
    return %c0_i32, %c0_i32_0 : i32, i32
  }
  func.func @transform_2(%arg0: i32) -> (i32, i32) {
    %c0_i32 = arith.constant 0 : i32
    %c0_i32_0 = arith.constant 0 : i32
    %c0_i32_1 = arith.constant 0 : i32
    return %c0_i32, %c0_i32_0 : i32, i32
  }
  func.func @transform_3(%arg0: i32) -> (i32, i32) {
    %c0_i32 = arith.constant 0 : i32
    %c0_i32_0 = arith.constant 0 : i32
    %c0_i32_1 = arith.constant 0 : i32
    return %c0_i32, %c0_i32_0 : i32, i32
  }
  func.func @transform_4(%arg0: i32) -> (i32, i32) {
    %c0_i32 = arith.constant 0 : i32
    %c0_i32_0 = arith.constant 0 : i32
    %c0_i32_1 = arith.constant 0 : i32
    return %c0_i32, %c0_i32_0 : i32, i32
  }
  func.func @transform_5(%arg0: i32) -> (i32, i32) {
    %c0_i32 = arith.constant 0 : i32
    %c0_i32_0 = arith.constant 0 : i32
    %c0_i32_1 = arith.constant 0 : i32
    return %c0_i32, %c0_i32_0 : i32, i32
  }
  func.func @transform_6(%arg0: i32) -> (i32, i32) {
    %c0_i32 = arith.constant 0 : i32
    %c0_i32_0 = arith.constant 0 : i32
    %c0_i32_1 = arith.constant 0 : i32
    return %c0_i32, %c0_i32_0 : i32, i32
  }
  func.func @transform_7(%arg0: i32) -> (i32, i32) {
    %c0_i32 = arith.constant 0 : i32
    %c0_i32_0 = arith.constant 0 : i32
    %c0_i32_1 = arith.constant 0 : i32
    return %c0_i32, %c0_i32_0 : i32, i32
  }
  func.func @transform_8(%arg0: i32) -> (i32, i32) {
    %c0_i32 = arith.constant 0 : i32
    %c0_i32_0 = arith.constant 0 : i32
    %c0_i32_1 = arith.constant 0 : i32
    return %c0_i32, %c0_i32_0 : i32, i32
  }
  func.func @transform_9(%arg0: i32) -> (i32, i32) {
    %c0_i32 = arith.constant 0 : i32
    %c0_i32_0 = arith.constant 0 : i32
    return %arg0, %c0_i32 : i32, i32
  }
}

module attributes {stable_mosaic.version = 11 : i64} {
  func.func @discriminator_kernel(%arg0: i32, %arg1: memref<16x784xbf16, #tpu.memory_space<vmem>>, %arg2: memref<784x1024xbf16, #tpu.memory_space<vmem>>, %arg3: memref<1x1024xf32, #tpu.memory_space<vmem>>, %arg4: memref<1024x512xbf16, #tpu.memory_space<vmem>>, %arg5: memref<1x512xf32, #tpu.memory_space<vmem>>, %arg6: memref<512x256xbf16, #tpu.memory_space<vmem>>, %arg7: memref<1x256xf32, #tpu.memory_space<vmem>>, %arg8: memref<1x256xf32, #tpu.memory_space<vmem>>, %arg9: memref<1x1xf32, #tpu.memory_space<vmem>>, %arg10: memref<16x128xbf16, #tpu.memory_space<vmem>>) attributes {dimension_semantics = [#tpu.dimension_semantics<parallel>], iteration_bounds = array<i64: 3>, scalar_prefetch = 0 : i64, scratch_operands = 0 : i64, tpu.core_type = #tpu.core_type<tc>, window_params = [{transform_indices = @transform_0, window_bounds = array<i64: 16, 784>}, {pipeline_mode = #tpu.pipeline_mode<synchronous>, transform_indices = @transform_1, window_bounds = array<i64: 784, 1024>}, {pipeline_mode = #tpu.pipeline_mode<synchronous>, transform_indices = @transform_2, window_bounds = array<i64: 1, 1024>}, {pipeline_mode = #tpu.pipeline_mode<synchronous>, transform_indices = @transform_3, window_bounds = array<i64: 1024, 512>}, {pipeline_mode = #tpu.pipeline_mode<synchronous>, transform_indices = @transform_4, window_bounds = array<i64: 1, 512>}, {pipeline_mode = #tpu.pipeline_mode<synchronous>, transform_indices = @transform_5, window_bounds = array<i64: 512, 256>}, {pipeline_mode = #tpu.pipeline_mode<synchronous>, transform_indices = @transform_6, window_bounds = array<i64: 1, 256>}, {pipeline_mode = #tpu.pipeline_mode<synchronous>, transform_indices = @transform_7, window_bounds = array<i64: 1, 256>}, {pipeline_mode = #tpu.pipeline_mode<synchronous>, transform_indices = @transform_8, window_bounds = array<i64: 1, 1>}, {transform_indices = @transform_9, window_bounds = array<i64: 16, 128>}]} {
    %c0 = arith.constant 0 : index
    %c0_0 = arith.constant 0 : index
    %0 = vector.load %arg1[%c0, %c0_0] : memref<16x784xbf16, #tpu.memory_space<vmem>>, vector<16x784xbf16>
    %c0_1 = arith.constant 0 : index
    %c0_2 = arith.constant 0 : index
    %1 = vector.load %arg2[%c0_1, %c0_2] : memref<784x1024xbf16, #tpu.memory_space<vmem>>, vector<784x1024xbf16>
    %cst = arith.constant dense<0.000000e+00> : vector<16x1024xf32>
    %2 = tpu.matmul %0, %1, %cst {dimension_numbers = #tpu.dot_dimension_numbers<[1], [0], [0], [1], [0, 0, 1, 1], [], []>} : vector<16x784xbf16>, vector<784x1024xbf16>, vector<16x1024xf32> -> vector<16x1024xf32>
    %c0_3 = arith.constant 0 : index
    %c0_4 = arith.constant 0 : index
    %3 = vector.load %arg3[%c0_3, %c0_4] : memref<1x1024xf32, #tpu.memory_space<vmem>>, vector<1x1024xf32>
    %4 = vector.broadcast %3 : vector<1x1024xf32> to vector<16x1024xf32>
    %5 = arith.addf %2, %4 : vector<16x1024xf32>
    %cst_5 = arith.constant 2.000000e-01 : f32
    %6 = vector.broadcast %cst_5 : f32 to vector<16x1024xf32>
    %7 = arith.mulf %6, %5 : vector<16x1024xf32>
    %8 = arith.maximumf %5, %7 : vector<16x1024xf32>
    %9 = arith.truncf %8 : vector<16x1024xf32> to vector<16x1024xbf16>
    %c0_6 = arith.constant 0 : index
    %c0_7 = arith.constant 0 : index
    %10 = vector.load %arg4[%c0_6, %c0_7] : memref<1024x512xbf16, #tpu.memory_space<vmem>>, vector<1024x512xbf16>
    %cst_8 = arith.constant dense<0.000000e+00> : vector<16x512xf32>
    %11 = tpu.matmul %9, %10, %cst_8 {dimension_numbers = #tpu.dot_dimension_numbers<[1], [0], [0], [1], [0, 0, 1, 1], [], []>} : vector<16x1024xbf16>, vector<1024x512xbf16>, vector<16x512xf32> -> vector<16x512xf32>
    %c0_9 = arith.constant 0 : index
    %c0_10 = arith.constant 0 : index
    %12 = vector.load %arg5[%c0_9, %c0_10] : memref<1x512xf32, #tpu.memory_space<vmem>>, vector<1x512xf32>
    %13 = vector.broadcast %12 : vector<1x512xf32> to vector<16x512xf32>
    %14 = arith.addf %11, %13 : vector<16x512xf32>
    %cst_11 = arith.constant 2.000000e-01 : f32
    %15 = vector.broadcast %cst_11 : f32 to vector<16x512xf32>
    %16 = arith.mulf %15, %14 : vector<16x512xf32>
    %17 = arith.maximumf %14, %16 : vector<16x512xf32>
    %18 = arith.truncf %17 : vector<16x512xf32> to vector<16x512xbf16>
    %c0_12 = arith.constant 0 : index
    %c0_13 = arith.constant 0 : index
    %19 = vector.load %arg6[%c0_12, %c0_13] : memref<512x256xbf16, #tpu.memory_space<vmem>>, vector<512x256xbf16>
    %cst_14 = arith.constant dense<0.000000e+00> : vector<16x256xf32>
    %20 = tpu.matmul %18, %19, %cst_14 {dimension_numbers = #tpu.dot_dimension_numbers<[1], [0], [0], [1], [0, 0, 1, 1], [], []>} : vector<16x512xbf16>, vector<512x256xbf16>, vector<16x256xf32> -> vector<16x256xf32>
    %c0_15 = arith.constant 0 : index
    %c0_16 = arith.constant 0 : index
    %21 = vector.load %arg7[%c0_15, %c0_16] : memref<1x256xf32, #tpu.memory_space<vmem>>, vector<1x256xf32>
    %22 = vector.broadcast %21 : vector<1x256xf32> to vector<16x256xf32>
    %23 = arith.addf %20, %22 : vector<16x256xf32>
    %cst_17 = arith.constant 2.000000e-01 : f32
    %24 = vector.broadcast %cst_17 : f32 to vector<16x256xf32>
    %25 = arith.mulf %24, %23 : vector<16x256xf32>
    %26 = arith.maximumf %23, %25 : vector<16x256xf32>
    %27 = arith.truncf %26 : vector<16x256xf32> to vector<16x256xbf16>
    %28 = arith.extf %27 : vector<16x256xbf16> to vector<16x256xf32>
    %c0_18 = arith.constant 0 : index
    %c0_19 = arith.constant 0 : index
    %29 = vector.load %arg8[%c0_18, %c0_19] : memref<1x256xf32, #tpu.memory_space<vmem>>, vector<1x256xf32>
    %30 = vector.broadcast %29 : vector<1x256xf32> to vector<16x256xf32>
    %31 = arith.mulf %28, %30 : vector<16x256xf32>
    %cst_20 = arith.constant dense<0.000000e+00> : vector<16xf32>
    %32 = vector.multi_reduction <add>, %31, %cst_20 [1] : vector<16x256xf32> to vector<16xf32>
    %33 = vector.shape_cast %32 : vector<16xf32> to vector<16x1xf32>
    %c0_21 = arith.constant 0 : index
    %c0_22 = arith.constant 0 : index
    %34 = vector.load %arg9[%c0_21, %c0_22] : memref<1x1xf32, #tpu.memory_space<vmem>>, vector<1x1xf32>
    %35 = vector.broadcast %34 : vector<1x1xf32> to vector<16x1xf32>
    %36 = arith.addf %33, %35 : vector<16x1xf32>
    %cst_23 = arith.constant 0.000000e+00 : f32
    %37 = vector.broadcast %cst_23 : f32 to vector<16x1xf32>
    %38 = arith.subf %37, %36 : vector<16x1xf32>
    %39 = math.exp %38 : vector<16x1xf32>
    %cst_24 = arith.constant 1.000000e+00 : f32
    %40 = vector.broadcast %cst_24 : f32 to vector<16x1xf32>
    %41 = arith.addf %40, %39 : vector<16x1xf32>
    %cst_25 = arith.constant 1.000000e+00 : f32
    %42 = vector.broadcast %cst_25 : f32 to vector<16x1xf32>
    %43 = arith.divf %42, %41 : vector<16x1xf32>
    %44 = vector.shape_cast %43 : vector<16x1xf32> to vector<16x1xf32>
    %45 = vector.broadcast %44 : vector<16x1xf32> to vector<16x128xf32>
    %46 = arith.truncf %45 : vector<16x128xf32> to vector<16x128xbf16>
    %c0_26 = arith.constant 0 : index
    %c0_27 = arith.constant 0 : index
    %47 = vector.load %arg10[%c0_26, %c0_27] : memref<16x128xbf16, #tpu.memory_space<vmem>>, vector<16x128xbf16>
    tpu.vector_store %arg10[%c0_26, %c0_27], %46 {strides = array<i32>} : memref<16x128xbf16, #tpu.memory_space<vmem>>, vector<16x128xbf16>,
    return
  }
  func.func @transform_0(%arg0: i32) -> (i32, i32) {
    %c0_i32 = arith.constant 0 : i32
    %c0_i32_0 = arith.constant 0 : i32
    return %arg0, %c0_i32 : i32, i32
  }
  func.func @transform_1(%arg0: i32) -> (i32, i32) {
    %c0_i32 = arith.constant 0 : i32
    %c0_i32_0 = arith.constant 0 : i32
    %c0_i32_1 = arith.constant 0 : i32
    return %c0_i32, %c0_i32_0 : i32, i32
  }
  func.func @transform_2(%arg0: i32) -> (i32, i32) {
    %c0_i32 = arith.constant 0 : i32
    %c0_i32_0 = arith.constant 0 : i32
    %c0_i32_1 = arith.constant 0 : i32
    return %c0_i32, %c0_i32_0 : i32, i32
  }
  func.func @transform_3(%arg0: i32) -> (i32, i32) {
    %c0_i32 = arith.constant 0 : i32
    %c0_i32_0 = arith.constant 0 : i32
    %c0_i32_1 = arith.constant 0 : i32
    return %c0_i32, %c0_i32_0 : i32, i32
  }
  func.func @transform_4(%arg0: i32) -> (i32, i32) {
    %c0_i32 = arith.constant 0 : i32
    %c0_i32_0 = arith.constant 0 : i32
    %c0_i32_1 = arith.constant 0 : i32
    return %c0_i32, %c0_i32_0 : i32, i32
  }
  func.func @transform_5(%arg0: i32) -> (i32, i32) {
    %c0_i32 = arith.constant 0 : i32
    %c0_i32_0 = arith.constant 0 : i32
    %c0_i32_1 = arith.constant 0 : i32
    return %c0_i32, %c0_i32_0 : i32, i32
  }
  func.func @transform_6(%arg0: i32) -> (i32, i32) {
    %c0_i32 = arith.constant 0 : i32
    %c0_i32_0 = arith.constant 0 : i32
    %c0_i32_1 = arith.constant 0 : i32
    return %c0_i32, %c0_i32_0 : i32, i32
  }
  func.func @transform_7(%arg0: i32) -> (i32, i32) {
    %c0_i32 = arith.constant 0 : i32
    %c0_i32_0 = arith.constant 0 : i32
    %c0_i32_1 = arith.constant 0 : i32
    return %c0_i32, %c0_i32_0 : i32, i32
  }
  func.func @transform_8(%arg0: i32) -> (i32, i32) {
    %c0_i32 = arith.constant 0 : i32
    %c0_i32_0 = arith.constant 0 : i32
    %c0_i32_1 = arith.constant 0 : i32
    return %c0_i32, %c0_i32_0 : i32, i32
  }
  func.func @transform_9(%arg0: i32) -> (i32, i32) {
    %c0_i32 = arith.constant 0 : i32
    %c0_i32_0 = arith.constant 0 : i32
    return %arg0, %c0_i32 : i32, i32
  }
}

</mosaic_0001>

<bundles_post_ra>
// kernel: tpu_custom_call.1
= control target key start
LH: loop header
LB: loop body
LE: loop exit
PB: predicated region body
PF: predicated region fallthrough
CT: control target
= control target key end

     0   :  { %s11251_s0 = inlined_call_operand.hbm [shape: bf16[48,784], index: 0, kind: input, shape index: {}]   ;;  %s11252_s1 = inlined_call_operand.hbm [shape: bf16[784,1024], index: 1, kind: input, shape index: {}]   ;;  %s11253_s2 = inlined_call_operand.hbm [shape: f32[1,1024], index: 2, kind: input, shape index: {}]   ;;  %s11254_s3 = inlined_call_operand.hbm [shape: bf16[1024,512], index: 3, kind: input, shape index: {}]   ;;  %s11255_s4 = inlined_call_operand.hbm [shape: f32[1,512], index: 4, kind: input, shape index: {}]   ;;  %s11256_s5 = inlined_call_operand.hbm [shape: bf16[512,256], index: 5, kind: input, shape index: {}]   ;;  %s11257_s6 = inlined_call_operand.hbm [shape: f32[1,256], index: 6, kind: input, shape index: {}]   ;;  %s11258_s7 = inlined_call_operand.hbm [shape: f32[1,256], index: 7, kind: input, shape index: {}]   ;;  %s11259_s8 = inlined_call_operand.<no memory space> [shape: f32[1,1], index: 8, kind: input, shape index: {}]   ;;  %s11260_s9 = inlined_call_operand.hbm [shape: bf16[48,128], index: 9, kind: output, shape index: {}]  }
   0x1   :  { %11265 = sst [smem:[#allocation35_spill]] %s11252_s1  ;;  %v14_v0 = vstv %s11259_s8 }
   0x2   :  { %11266 = sst [smem:[#allocation36_spill]] %s11253_s2  ;;  %15 = vst [vmem:[#allocation2] sm:$0x1] %v14_v0 }
   0x3   :  { %11267 = sst [smem:[#allocation37_spill]] %s11254_s3 }
   0x4   :  { %11268 = sst [smem:[#allocation38_spill]] %s11255_s4 }
   0x5   :  { %11269 = sst [smem:[#allocation39_spill]] %s11256_s5 }
   0x6   :  { %16 = vsyncpa [#allocation4], 0 }
   0x7   :  { %18 = vsyncpa [#allocation4 + $0x1], 0 }
   0x8   :  { %19 = vsyncpa [#allocation7], 0 }
   0x9   :  { %20 = vsyncpa [#allocation10], 0 }
   0xa   :  { %21 = vsyncpa [#allocation13], 0 }
   0xb   :  { %22 = vsyncpa [#allocation16], 0 }
   0xc   :  { %23 = vsyncpa [#allocation5], 0 }
   0xd   :  { %25 = vsyncpa [#allocation5 + $0x1], 0  ;;  %s10648_s11 = smov 0   ;;  %s10650_s12 = smov 0  }
   0xe   :  { %s10652_s13 = smov 0   ;;  %s10654_s14 = smov 0  }
   0xf LB: > { %s11270_s1 = sld [smem:[#allocation35_spill]]  ;;  %s10672_s17 = sadd.s32 4294967295, %s10575_s14   ;;  %s10575_s14 = sphi %s10654_s14, %s11310_s14   ;;  %s10571_s13 = sphi %s10652_s13, %s11309_s13   ;;  %s10567_s12 = sphi %s10650_s12, %s11308_s12   ;;  %s10563_s11 = sphi %s10648_s11, %s11307_s11  }
  0x10   : > { %p6469_p0 = scmp.ge.s32.totalorder %s10575_s14, 1  ;;  %p52_p1 = scmp.eq.s32.totalorder %s10672_s17, 0 }
  0x11   : > { %p256_p2 = scmp.lt.s32.totalorder %s10575_s14, 4  ;;  %s10577_s19 = smov [#allocation6]  }
  0x12   : > { %s269_s20 = sshll.u32 %s10577_s19, 4  ;;  %s11272_s3 = sld [smem:[#allocation37_spill]]  ;;  %s270_s20 = int_to_ptr.vmem [resolvable:$true] %s269_s20 }
  0x13   : > { %p10677_p3 = pnand %p6469_p0, %p256_p2  ;;  %s10578_s25 = smov [#allocation9]  }
  0x14   : > { %s295_s26 = sshll.u32 %s10578_s25, 4  ;;  %s10579_s27 = smov 512   ;;  %s296_s26 = int_to_ptr.vmem [resolvable:$true] %s295_s26 }
  0x15   : > { %s267_s16 = sshll.u32 %s11270_s1, 4  ;;  %p10139_p4 = pneg %p10677_p3  ;;  %s268_s16 = int_to_ptr.hbm [resolvable:$true] %s267_s16 }
  0x16   : > { %s10580_s28 = smov 32   ;;  %s10581_s29 = smov 256  }
  0x17   : > { %p10688_p5 = pnand %p10139_p4, %p52_p1  ;;  %s10582_s30 = smov 16  }
  0x18   : > { %s293_s23 = sshll.u32 %s11272_s3, 4  ;;  %s11274_s5 = sld [smem:[#allocation39_spill]]  ;;  %s294_s23 = int_to_ptr.hbm [resolvable:$true] %s293_s23 }
  0x19   : > { %10142 = dma.hbm_to_vmem [thread:$0]  (!%p10688_p5), %s268_s16, 50176, %s270_s20, [#allocation7], %s10579_s27, %s10579_s27, %s10580_s28  }
  0x1a   : > { %10148 = dma.hbm_to_vmem [thread:$0]  (!%p10688_p5), %s294_s23, 32768, %s296_s26, [#allocation10], %s10581_s29, %s10581_s29, %s10582_s30  }
  0x1b   : > { %s10583_s19 = smov [#allocation12]   ;;  %s11275_s2 = sld [smem:[#allocation36_spill]] }
  0x1c   : > { %s321_s21 = sshll.u32 %s10583_s19, 4  ;;  %s10584_s16 = smov 128   ;;  %s322_s21 = int_to_ptr.vmem [resolvable:$true] %s321_s21 }
  0x1d   : > { %s10585_s20 = smov 8   ;;  %s10586_s23 = smov [#allocation8]  }
  0x1e   : > { %s319_s15 = sshll.u32 %s11274_s5, 4  ;;  %s284_s26 = sshll.u32 %s10586_s23, 4  ;;  %s320_s15 = int_to_ptr.hbm [resolvable:$true] %s319_s15  ;;  %s285_s26 = int_to_ptr.vmem [resolvable:$true] %s284_s26 }
  0x1f   : > { %10154 = dma.hbm_to_vmem [thread:$0]  (!%p10688_p5), %s320_s15, 8192, %s322_s21, [#allocation13], %s10584_s16, %s10584_s16, %s10585_s20  }
  0x20   : > { %s11276_s4 = sld [smem:[#allocation38_spill]]  ;;  %s334_s8 = sshll.u32 %s11257_s6, 4  ;;  %s335_s8 = int_to_ptr.hbm [resolvable:$true] %s334_s8 }
  0x21   : > { %s282_s1 = sshll.u32 %s11275_s2, 4  ;;  %s10587_s19 = smov [#allocation11]   ;;  %s283_s1 = int_to_ptr.hbm [resolvable:$true] %s282_s1 }
  0x22   : > { %10145 = dma.hbm_to_vmem [thread:$0]  (!%p10688_p5), %s283_s1, 128, %s285_s26, [#allocation7]  }
  0x23   : > { %s310_s15 = sshll.u32 %s10587_s19, 4  ;;  %s10588_s21 = smov [#allocation14]   ;;  %s311_s15 = int_to_ptr.vmem [resolvable:$true] %s310_s15 }
  0x24   : > { %s336_s1 = sshll.u32 %s10588_s21, 4  ;;  %s346_s16 = sshll.u32 %s11258_s7, 4  ;;  %s337_s1 = int_to_ptr.vmem [resolvable:$true] %s336_s1  ;;  %s347_s16 = int_to_ptr.hbm [resolvable:$true] %s346_s16 }
  0x25   : > { %10157 = dma.hbm_to_vmem [thread:$0]  (!%p10688_p5), %s335_s8, 32, %s337_s1, [#allocation13]  }
  0x26   : > { %s308_s29 = sshll.u32 %s11276_s4, 4  ;;  %s10589_s20 = smov [#allocation15]   ;;  %s309_s29 = int_to_ptr.hbm [resolvable:$true] %s308_s29 }
  0x27   : > { %10151 = dma.hbm_to_vmem [thread:$0]  (!%p10688_p5), %s309_s29, 64, %s311_s15, [#allocation10]  }
  0x28   : > { %s348_s23 = sshll.u32 %s10589_s20, 4  ;;  %s6468_s26 = sadd.s32 4294967294, %s10575_s14   ;;  %s349_s23 = int_to_ptr.vmem [resolvable:$true] %s348_s23 }
  0x29   : > { %10160 = dma.hbm_to_vmem [thread:$0]  (!%p10688_p5), %s347_s16, 32, %s349_s23, [#allocation16]  }
  0x2a   : > { %s10723_s27 = sadd.s32 1, %s10575_s14   ;;  %s38_s28 = sadd.s32 1, %s10571_s13 }
  0x2b   : > { %s35_s29 = ssub.s32 %s10575_s14, %s10723_s27  ;;  %p45_p6 = scmp.ne.s32.totalorder %s10571_s13, %s10567_s12 }
  0x2c   : > { %p36_p7 = scmp.eq.s32.totalorder %s35_s29, 0  ;;  %p46_p8 = scmp.eq.s32.totalorder %s10575_s14, 0 }
  0x2d   : > { %p51_p9 = scmp.ne.s32.totalorder %s10567_s12, %s10563_s11  ;;  %p243_p10 = scmp.eq.s32.totalorder %s10672_s17, 2 }
  0x2e   : > { %s10735_s30 = scalar_select %p36_p7, %s10571_s13, %s38_s28  }
  0x2f   : > { %p47_p11 = por %p46_p8, %p45_p6  ;;  %p10739_p12 = por %p52_p1, %p51_p9 }
  0x30   : > { %p10743_p13 = por %p243_p10, %p45_p6  ;;  %p249_p0 = scmp.eq.s32.totalorder %s6468_s26, 2 }
  0x31   : > { %p10176_p2 = scmp.lt.s32.totalorder %s10575_s14, 3  ;;  %s362_s8 = sand.u32 1, %s10571_s13  }
  0x32   : > { %p10749_p4 = por %p249_p0, %p51_p9  ;;  %s10104_s15 = smul.u32 56, %s362_s8 }
  0x33   : > { %p10753_p5 = pnand %p10176_p2, %p47_p11  ;;  %s10105_s1 = smul.u32 56, %s10575_s14 }
  0x34   : > { %s366_s20 = scalar_lea.vmem [#allocation3], %s10104_s15  ;;  %s363_s28 = scalar_lea.sflag [#allocation4], %s362_s8 }
  0x35   : > { %s372_s16 = scalar_lea.hbm %s11251_s0, %s10105_s1  ;;  %s375_s23 = sshll.u32 %s366_s20, 4  ;;  %s376_s23 = int_to_ptr.vmem [resolvable:$true] %s375_s23 }
  0x36   : > { %s373_s26 = sshll.u32 %s372_s16, 4  ;;  %p10467_p7 = pneg %p10753_p5  ;;  %s374_s26 = int_to_ptr.hbm [resolvable:$true] %s373_s26 }
  0x37   : > { %s10463_s29 = sshra.s32 %s374_s26, 4  ;;  %s10470_s5 = scalar_lea.hbm %s11251_s0, 168  ;;  %s10464_s29 = int_to_ptr.hbm [resolvable:$true] %s10463_s29 }
  0x38   : > { %s10465_s2 = scalar_lea.hbm %s10464_s29, 56  ;;  %p10471_p10 = scmp.lt.s32.totalorder %s10464_s29, %s11251_s0 }
  0x39   : > { %p10466_p6 = scmp.ne.s32.totalorder %s10464_s29, %s10465_s2  ;;  %p10472_p11 = scmp.lt.s32.totalorder %s10470_s5, %s10465_s2 }
  0x3b   : > { %p10468_p8 = pnand %p10467_p7, %p10466_p6  ;;  %p10473_p0 = por %p10472_p11, %p10471_p10 }
  0x3d   : > { %p10469_p9 = pneg %p10468_p8 }
  0x3f   : > { %p10474_p2 = pnand %p10473_p0, %p10469_p9 }
  0x41   : > { %10477 = shalt.err (!%p10474_p2)
}
  0x42   : > { %s10590_s8 = smov 448   ;;  %s10591_s15 = smov 28  }
  0x43   : > { %10164 = dma.hbm_to_vmem [thread:$0]  (!%p10753_p5), %s374_s26, 896, %s376_s23, %s363_s28, %s10590_s8, %s10590_s8, %s10591_s15  }
  0x44   : > { %387 = sbr.rel (%p10677_p3) target bundleno = 1489 (0x5d1), region = 56 }
  0x49   : > { %s10774_s3 = sand.u32 1, %s10567_s12  }
  0x4a   : > { %s10106_s4 = smul.u32 56, %s10774_s3  ;;  %s390_s25 = scalar_lea.sflag [#allocation4], %s10774_s3 }
  0x4c   : > { %s10778_s2 = scalar_lea.vmem [#allocation3], %s10106_s4 }
  0x4d   : > { %10538 = dma.done.wait (%p10739_p12), %s390_s25, 896  }
  0x4e   : > { %10540 = vsyncadd (%p10739_p12), %s390_s25, 4294966400 }
  0x4f   : > { %10542 = dma.done.wait (%p52_p1), [#allocation7], 50304  }
  0x50   : > { %10544 = vsyncadd (%p52_p1), [#allocation7], 4294916992 }
  0x51   : > { %10546 = dma.done.wait (%p52_p1), [#allocation10], 32832  }
  0x52   : > { %10548 = vsyncadd (%p52_p1), [#allocation10], 4294934464 }
  0x53   : > { %10550 = dma.done.wait (%p52_p1), [#allocation13], 8224  }
  0x54   : > { %10552 = vsyncadd (%p52_p1), [#allocation13], 4294959072 }
  0x55   : > { %10554 = dma.done.wait (%p52_p1), [#allocation16], 32  }
  0x56   : > { %10556 = vsyncadd (%p52_p1), [#allocation16], 4294967264  ;;  %v6744_v1 = vld [vmem:[#allocation6 + $0x1c0] sm:$0xf]  ;;  %vm2880_vm0 = vcmask 130048   ;;  %s6489_s5 = sshll.u32 %s10774_s3, 3 }
  0x57   : > { %v9446_v2 = vld [vmem:[#allocation6 + $0x1dc] sm:$0xf0]  ;;  %s10098_s18 = sshll.u32 %s10672_s17, 3  ;;  %s463_s20 = scalar_lea.vmem [#allocation17], %s6489_s5 }
  0x58   : > { %v7000_v3 = vld [vmem:[#allocation6 + $0x3c0] sm:$0xf]  ;;  %v6745_v4 = vor.u32 %v9446_v2, %v6744_v1  ;;  %s6324_s16 = scalar_lea.hbm %s11260_s9, %s10098_s18  ;;  %s6325_s23 = sshll.u32 %s463_s20, 4  ;;  %s6326_s23 = int_to_ptr.vmem [resolvable:$true] %s6325_s23 }
  0x59   : > { %v9510_v5 = vld [vmem:[#allocation6 + $0x3dc] sm:$0xf0]  ;;  %s6327_s26 = sshll.u32 %s6324_s16, 4  ;;  %s6313_s28 = scalar_lea.sflag [#allocation5], %s10774_s3  ;;  %s6328_s26 = int_to_ptr.hbm [resolvable:$true] %s6327_s26 }
  0x5a   : > { %v7256_v6 = vld [vmem:[#allocation6 + $0x5c0] sm:$0xf]  ;;  %v7001_v8 = vor.u32 %v9510_v5, %v7000_v3  ;;  %2884 = vmatpush.bf16.msra.mxu0 %v6745_v4  ;;  %s10507_s29 = sshra.s32 %s6328_s26, 4  ;;  %s10513_s8 = scalar_lea.hbm %s11260_s9, 24  ;;  %s10508_s29 = int_to_ptr.hbm [resolvable:$true] %s10507_s29 }
  0x5b   : > { %v9574_v7 = vld [vmem:[#allocation6 + $0x5dc] sm:$0xf0]  ;;  %s10509_s22 = scalar_lea.hbm %s10508_s29, 8  ;;  %p10514_p5 = scmp.lt.s32.totalorder %s10508_s29, %s11260_s9 }
  0x5c   : > { %v7257_v9 = vor.u32 %v9574_v7, %v7256_v6  ;;  %v7512_v10 = vld [vmem:[#allocation6 + $0x7c0] sm:$0xf]  ;;  %2898 = vmatpush.bf16.msra.mxu1 %v7001_v8  ;;  %p10510_p1 = scmp.ne.s32.totalorder %s10508_s29, %s10509_s22  ;;  %p10515_p6 = scmp.lt.s32.totalorder %s10513_s8, %s10509_s22 }
  0x5d   : > { %v9638_v11 = vld [vmem:[#allocation6 + $0x7dc] sm:$0xf0] }
  0x5e   : > { %v6712_v12 = vld [vmem:[#allocation6 + $0x180] sm:$0xf]  ;;  %v7513_v13 = vor.u32 %v9638_v11, %v7512_v10  ;;  %2912 = vmatpush.bf16.msra.mxu2 %v7257_v9  ;;  %p10511_p3 = pnand %p10510_p1, %p10743_p13  ;;  %p10516_p7 = por %p10515_p6, %p10514_p5 }
  0x5f   : > { %v9438_v14 = vld [vmem:[#allocation6 + $0x19c] sm:$0xf0] }
  0x60   : > { %v6968_v15 = vld [vmem:[#allocation6 + $0x380] sm:$0xf]  ;;  %v6713_v17 = vor.u32 %v9438_v14, %v6712_v12  ;;  %2926 = vmatpush.bf16.msra.mxu3 %v7513_v13  ;;  %p10512_p12 = pneg %p10511_p3 }
  0x61   : > { %v9502_v16 = vld [vmem:[#allocation6 + $0x39c] sm:$0xf0] }
  0x62   : > { %v6969_v18 = vor.u32 %v9502_v16, %v6968_v15  ;;  %v7224_v19 = vld [vmem:[#allocation6 + $0x580] sm:$0xf]  ;;  %2885 = vmatpush.bf16.msra.mxu0 %v6713_v17  ;;  %p10517_p8 = pnand %p10516_p7, %p10512_p12 }
  0x63   : > { %v9566_v20 = vld [vmem:[#allocation6 + $0x59c] sm:$0xf0] }
  0x64   : > { %v7480_v21 = vld [vmem:[#allocation6 + $0x780] sm:$0xf]  ;;  %v7225_v22 = vor.u32 %v9566_v20, %v7224_v19  ;;  %2899 = vmatpush.bf16.msra.mxu1 %v6969_v18 }
  0x65   : > { %v9630_v23 = vld [vmem:[#allocation6 + $0x79c] sm:$0xf0] }
  0x66   : > { %v6680_v24 = vld [vmem:[#allocation6 + $0x140] sm:$0xf]  ;;  %v7481_v26 = vor.u32 %v9630_v23, %v7480_v21  ;;  %2913 = vmatpush.bf16.msra.mxu2 %v7225_v22 }
  0x67   : > { %v9430_v25 = vld [vmem:[#allocation6 + $0x15c] sm:$0xf0] }
  0x68   : > { %v6936_v27 = vld [vmem:[#allocation6 + $0x340] sm:$0xf]  ;;  %v6681_v30 = vor.u32 %v9430_v25, %v6680_v24  ;;  %2927 = vmatpush.bf16.msra.mxu3 %v7481_v26 }
  0x69   : > { %v9494_v28 = vld [vmem:[#allocation6 + $0x35c] sm:$0xf0] }
  0x6a   : > { %v7192_v29 = vld [vmem:[#allocation6 + $0x540] sm:$0xf]  ;;  %v6937_v34 = vor.u32 %v9494_v28, %v6936_v27  ;;  %2886 = vmatpush.bf16.msra.mxu0 %v6681_v30 }
  0x6b   : > { %v9558_v31 = vld [vmem:[#allocation6 + $0x55c] sm:$0xf0] }
  0x6c   : > { %v7448_v32 = vld [vmem:[#allocation6 + $0x740] sm:$0xf]  ;;  %v7193_v35 = vor.u32 %v9558_v31, %v7192_v29  ;;  %2900 = vmatpush.bf16.msra.mxu1 %v6937_v34  ;;  %v6746_v34 = vld [vmem:[#allocation6 + $0x1e0] sm:$0xf0] }
  0x6d   : > { %v9622_v33 = vld [vmem:[#allocation6 + $0x75c] sm:$0xf0] }
  0x6e   : > { %v6648_v36 = vld [vmem:[#allocation6 + $0x100] sm:$0xf]  ;;  %v7449_v39 = vor.u32 %v9622_v33, %v7448_v32  ;;  %2914 = vmatpush.bf16.msra.mxu2 %v7193_v35  ;;  %v9442_v33 = vld [vmem:[#allocation6 + $0x1c4] sm:$0xf]  ;;  %v6500_v35 = vld [vmem:[%s10778_s2 + $0x8] sm:$0xf] }
  0x6f   : > { %v9422_v37 = vld [vmem:[#allocation6 + $0x11c] sm:$0xf0] }
  0x70   : > { %v6904_v38 = vld [vmem:[#allocation6 + $0x300] sm:$0xf]  ;;  %v6649_v45 = vor.u32 %v9422_v37, %v6648_v36  ;;  %2928 = vmatpush.bf16.msra.mxu3 %v7449_v39  ;;  %v9383_v37 = vld [vmem:[%s10778_s2 + $0x20] sm:$0xf0] }
  0x71   : > { %v9486_v40 = vld [vmem:[#allocation6 + $0x31c] sm:$0xf0] }
  0x72   : > { %v7160_v41 = vld [vmem:[#allocation6 + $0x500] sm:$0xf]  ;;  %v6905_v46 = vor.u32 %v9486_v40, %v6904_v38  ;;  %2887 = vmatpush.bf16.msra.mxu0 %v6649_v45 }
  0x73   : > { %v9550_v42 = vld [vmem:[#allocation6 + $0x51c] sm:$0xf0] }
  0x74   : > { %v7416_v43 = vld [vmem:[#allocation6 + $0x700] sm:$0xf]  ;;  %v7161_v47 = vor.u32 %v9550_v42, %v7160_v41  ;;  %2901 = vmatpush.bf16.msra.mxu1 %v6905_v46  ;;  %v9506_v42 = vld [vmem:[#allocation6 + $0x3c4] sm:$0xf] }
  0x75   : > { %v9614_v44 = vld [vmem:[#allocation6 + $0x71c] sm:$0xf0] }
  0x76   : > { %v6616_v48 = vld [vmem:[#allocation6 + $0xc0] sm:$0xf]  ;;  %v7417_v51 = vor.u32 %v9614_v44, %v7416_v43  ;;  %2915 = vmatpush.bf16.msra.mxu2 %v7161_v47  ;;  %v6492_v43 = vld [vmem:[%s10778_s2] sm:$0xf]  ;;  %v9382_v44 = vld [vmem:[%s10778_s2 + $0x18] sm:$0xf0] }
  0x77   : > { %v9414_v49 = vld [vmem:[#allocation6 + $0xdc] sm:$0xf0]  ;;  %v7002_v47 = vld [vmem:[#allocation6 + $0x3e0] sm:$0xf0] }
  0x78   : > { %v6872_v50 = vld [vmem:[#allocation6 + $0x2c0] sm:$0xf]  ;;  %v6617_v57 = vor.u32 %v9414_v49, %v6616_v48  ;;  %2929 = vmatpush.bf16.msra.mxu3 %v7417_v51  ;;  %v9380_v48 = vld [vmem:[%s10778_s2 + $0xc] sm:$0xf]  ;;  %v6502_v49 = vld [vmem:[%s10778_s2 + $0x24] sm:$0xf0]  ;;  %v6749_v51 = vor.u32 %v9442_v33, %v6746_v34 }
  0x79   : > { %v9478_v52 = vld [vmem:[#allocation6 + $0x2dc] sm:$0xf0] }
  0x7a   : > { %v7128_v53 = vld [vmem:[#allocation6 + $0x4c0] sm:$0xf]  ;;  %v6873_v58 = vor.u32 %v9478_v52, %v6872_v50  ;;  %2888 = vmatpush.bf16.msra.mxu0 %v6617_v57 }
  0x7b   : > { %v9542_v54 = vld [vmem:[#allocation6 + $0x4dc] sm:$0xf0] }
  0x7c   : > { %v7384_v55 = vld [vmem:[#allocation6 + $0x6c0] sm:$0xf]  ;;  %v7129_v59 = vor.u32 %v9542_v54, %v7128_v53  ;;  %2902 = vmatpush.bf16.msra.mxu1 %v6873_v58  ;;  %v9434_v58 = vld [vmem:[#allocation6 + $0x184] sm:$0xf] }
  0x7d   : > { %v9606_v56 = vld [vmem:[#allocation6 + $0x6dc] sm:$0xf0] }
  0x7e   : > { %v6584_v60 = vld [vmem:[#allocation6 + $0x80] sm:$0xf]  ;;  %v7385_v63 = vor.u32 %v9606_v56, %v7384_v55  ;;  %2916 = vmatpush.bf16.msra.mxu2 %v7129_v59  ;;  %v10806_v55 = vor.u32 %v9383_v37, %v6500_v35  ;;  %v10808_v56 = vor.u32 %v9382_v44, %v6492_v43  ;;  %v6714_v59 = vld [vmem:[#allocation6 + $0x1a0] sm:$0xf0] }
  0x7f   : > { %v9406_v61 = vld [vmem:[#allocation6 + $0x9c] sm:$0xf0]  ;;  %v9410_v35 = vld [vmem:[#allocation6 + $0xc4] sm:$0xf] }
  0x80   : > { %v6840_v62 = vld [vmem:[#allocation6 + $0x280] sm:$0xf]  ;;  %v6585_v5 = vor.u32 %v9406_v61, %v6584_v60  ;;  %2930 = vmatpush.bf16.msra.mxu3 %v7385_v63  ;;  %v10810_v61 = vor.u32 %v9380_v48, %v6502_v49  ;;  %v6494_v63 = vld [vmem:[%s10778_s2 + $0x1c] sm:$0xf0]  ;;  %v9402_v49 = vld [vmem:[#allocation6 + $0x84] sm:$0xf] }
  0x81   : > { %v9470_v0 = vld [vmem:[#allocation6 + $0x29c] sm:$0xf0] }
  0x82   : > { %v7096_v1 = vld [vmem:[#allocation6 + $0x480] sm:$0xf]  ;;  %v6841_v7 = vor.u32 %v9470_v0, %v6840_v62  ;;  %2889 = vmatpush.bf16.msra.mxu0 %v6585_v5  ;;  %v9379_v62 = vld [vmem:[%s10778_s2 + $0x4] sm:$0xf]  ;;  %v7005_v0 = vor.u32 %v9506_v42, %v7002_v47  ;;  %v6717_v5 = vor.u32 %v9434_v58, %v6714_v59  ;;  %v6874_v42 = vld [vmem:[#allocation6 + $0x2e0] sm:$0xf0] }
  0x83   : > { %v9534_v2 = vld [vmem:[#allocation6 + $0x49c] sm:$0xf0] }
  0x84   : > { %v7352_v3 = vld [vmem:[#allocation6 + $0x680] sm:$0xf]  ;;  %v7097_v8 = vor.u32 %v9534_v2, %v7096_v1  ;;  %2903 = vmatpush.bf16.msra.mxu1 %v6841_v7  ;;  %v9498_v2 = vld [vmem:[#allocation6 + $0x384] sm:$0xf] }
  0x85   : > { %v9598_v4 = vld [vmem:[#allocation6 + $0x69c] sm:$0xf0] }
  0x86   : > { %v6552_v6 = vld [vmem:[#allocation6 + $0x40] sm:$0xf]  ;;  %v7353_v12 = vor.u32 %v9598_v4, %v7352_v3  ;;  %2917 = vmatpush.bf16.msra.mxu2 %v7097_v8  ;;  %v6970_v3 = vld [vmem:[#allocation6 + $0x3a0] sm:$0xf0] }
  0x87   : > { %v9398_v9 = vld [vmem:[#allocation6 + $0x5c] sm:$0xf0] }
  0x88   : > { %v6808_v10 = vld [vmem:[#allocation6 + $0x240] sm:$0xf]  ;;  %v6553_v19 = vor.u32 %v9398_v9, %v6552_v6  ;;  %2931 = vmatpush.bf16.msra.mxu3 %v7353_v12  ;;  %v10816_v9 = vor.u32 %v9379_v62, %v6494_v63  ;;  %v6682_v12 = vld [vmem:[#allocation6 + $0x160] sm:$0xf0] }
  0x89   : > { %v9462_v11 = vld [vmem:[#allocation6 + $0x25c] sm:$0xf0] }
  0x8a   : > { %v7064_v13 = vld [vmem:[#allocation6 + $0x440] sm:$0xf]  ;;  %v6809_v24 = vor.u32 %v9462_v11, %v6808_v10  ;;  %2890 = vmatpush.bf16.msra.mxu0 %v6553_v19  ;;  %v9426_v11 = vld [vmem:[#allocation6 + $0x144] sm:$0xf] }
  0x8b   : > { %v9526_v14 = vld [vmem:[#allocation6 + $0x45c] sm:$0xf0] }
  0x8c   : > { %v7320_v15 = vld [vmem:[#allocation6 + $0x640] sm:$0xf]  ;;  %v7065_v25 = vor.u32 %v9526_v14, %v7064_v13  ;;  %2904 = vmatpush.bf16.msra.mxu1 %v6809_v24  ;;  %v6973_v13 = vor.u32 %v9498_v2, %v6970_v3  ;;  %v6650_v24 = vld [vmem:[#allocation6 + $0x120] sm:$0xf0] }
  0x8d   : > { %v9590_v16 = vld [vmem:[#allocation6 + $0x65c] sm:$0xf0]  ;;  %v6554_v2 = vld [vmem:[#allocation6 + $0x60] sm:$0xf0] }
  0x8e   : > { %v6520_v17 = vld [vmem:[#allocation6] sm:$0xf]  ;;  %v7321_v29 = vor.u32 %v9590_v16, %v7320_v15  ;;  %2918 = vmatpush.bf16.msra.mxu2 %v7065_v25  ;;  %v9490_v15 = vld [vmem:[#allocation6 + $0x344] sm:$0xf] }
  0x8f   : > { %v9390_v18 = vld [vmem:[#allocation6 + $0x1c] sm:$0xf0]  ;;  %v6938_v16 = vld [vmem:[#allocation6 + $0x360] sm:$0xf0] }
  0x90   : > { %v6776_v20 = vld [vmem:[#allocation6 + $0x200] sm:$0xf]  ;;  %v6521_v36 = vor.u32 %v9390_v18, %v6520_v17  ;;  %2932 = vmatpush.bf16.msra.mxu3 %v7321_v29  ;;  %v6685_v18 = vor.u32 %v9426_v11, %v6682_v12  ;;  %v6941_v25 = vor.u32 %v9490_v15, %v6938_v16  ;;  %v9458_v3 = vld [vmem:[#allocation6 + $0x244] sm:$0xf] }
  0x91   : > { %v9454_v21 = vld [vmem:[#allocation6 + $0x21c] sm:$0xf0]  ;;  %v6522_v15 = vld [vmem:[#allocation6 + $0x20] sm:$0xf0] }
  0x92   : > { %v7032_v22 = vld [vmem:[#allocation6 + $0x400] sm:$0xf]  ;;  %v6777_v40 = vor.u32 %v9454_v21, %v6776_v20  ;;  %2891 = vmatpush.bf16.msra.mxu0 %v6521_v36  ;;  %v6618_v36 = vld [vmem:[#allocation6 + $0xe0] sm:$0xf0] }
  0x93   : > { %v9518_v23 = vld [vmem:[#allocation6 + $0x41c] sm:$0xf0]  ;;  %v6621_v44 = vor.u32 %v9410_v35, %v6618_v36  ;;  %v9570_v16 = vld [vmem:[#allocation6 + $0x5c4] sm:$0xf] }
  0x94   : > { %v7288_v26 = vld [vmem:[#allocation6 + $0x600] sm:$0xf]  ;;  %v7033_v41 = vor.u32 %v9518_v23, %v7032_v22  ;;  %2905 = vmatpush.bf16.msra.mxu1 %v6777_v40  ;;  %v9418_v23 = vld [vmem:[#allocation6 + $0x104] sm:$0xf] }
  0x95   : > { %v9582_v27 = vld [vmem:[#allocation6 + $0x61c] sm:$0xf0]  ;;  %2892 = vmatmul.bf16.vlgmr.msra.gmra.mxu0 %v10808_v56  ;;  %v8026_v35 = vld [vmem:[#allocation6 + $0xbe0] sm:$0xf0] }
  0x96   : > { %v7768_v28 = vld [vmem:[#allocation6 + $0x9c0] sm:$0xf]  ;;  %v7289_v45 = vor.u32 %v9582_v27, %v7288_v26  ;;  %2919 = vmatpush.bf16.msra.mxu2 %v7033_v41  ;;  %v9482_v27 = vld [vmem:[#allocation6 + $0x304] sm:$0xf] }
  0x97   : > { %v9702_v30 = vld [vmem:[#allocation6 + $0x9dc] sm:$0xf0]  ;;  %2906 = vmatmul.bf16.vlgmr.msra.gmra.mxu1 %v10816_v9  ;;  %v9474_v41 = vld [vmem:[#allocation6 + $0x2c4] sm:$0xf] }
  0x98   : > { %v8024_v31 = vld [vmem:[#allocation6 + $0xbc0] sm:$0xf]  ;;  %v7769_v46 = vor.u32 %v9702_v30, %v7768_v28  ;;  %2933 = vmatpush.bf16.msra.mxu3 %v7289_v45  ;;  %v6906_v28 = vld [vmem:[#allocation6 + $0x320] sm:$0xf0]  ;;  %v6653_v30 = vor.u32 %v9418_v23, %v6650_v24 }
  0x99   : > { %v9766_v32 = vld [vmem:[#allocation6 + $0xbdc] sm:$0xf0]  ;;  %2920 = vmatmul.bf16.vlgmr.msra.gmra.mxu2 %v10806_v55  ;;  %v9562_v36 = vld [vmem:[#allocation6 + $0x584] sm:$0xf] }
  0x9a   : > { %v8056_v38 = vld [vmem:[#allocation6 + $0xc00] sm:$0xf]  ;;  %v8025_v50 = vor.u32 %v9766_v32, %v8024_v31  ;;  %2940 = vmatpush.bf16.msrb.mxu0 %v7769_v46 }
  0x9b   : > { %v9774_v39 = vld [vmem:[#allocation6 + $0xc1c] sm:$0xf0]  ;;  %2934 = vmatmul.bf16.vlgmr.msra.gmra.mxu3 %v10810_v61 }
  0x9c   : > { %v7736_v52 = vld [vmem:[#allocation6 + $0x980] sm:$0xf]  ;;  %v8057_v60 = vor.u32 %v9774_v39, %v8056_v38  ;;  %2954 = vmatpush.bf16.msrb.mxu1 %v8025_v50  ;;  %2982 = vmatpush.bf16.msrb.mxu3 %v6749_v51  ;;  %v9385_v38 = vld [vmem:[%s10778_s2 + $0x30] sm:$0xf0]  ;;  %v6909_v39 = vor.u32 %v9482_v27, %v6906_v28 }
  0x9d   : > { %v9694_v53 = vld [vmem:[#allocation6 + $0x99c] sm:$0xf0]  ;;  %v6586_v50 = vld [vmem:[#allocation6 + $0xa0] sm:$0xf0] }
  0x9e   : > { %v7992_v54 = vld [vmem:[#allocation6 + $0xb80] sm:$0xf]  ;;  %v7737_v1 = vor.u32 %v9694_v53, %v7736_v52  ;;  %2975 = vmatpush.bf16.msrb.mxu2 %v8057_v60  ;;  %v6877_v52 = vor.u32 %v9474_v41, %v6874_v42  ;;  %v6589_v59 = vor.u32 %v9402_v49, %v6586_v50  ;;  %v7482_v41 = vld [vmem:[#allocation6 + $0x7a0] sm:$0xf0] }
  0x9f   : > { %v9758_v57 = vld [vmem:[#allocation6 + $0xb9c] sm:$0xf0]  ;;  %v9754_v49 = vld [vmem:[#allocation6 + $0xb84] sm:$0xf] }
  0xa0   : > { %v7993_v4 = vor.u32 %v9758_v57, %v7992_v54  ;;  %v7704_v6 = vld [vmem:[#allocation6 + $0x940] sm:$0xf]  ;;  %2941 = vmatpush.bf16.msrb.mxu0 %v7737_v1  ;;  %2983 = vmatpush.bf16.msrb.mxu3 %v6717_v5  ;;  %v9466_v54 = vld [vmem:[#allocation6 + $0x284] sm:$0xf] }
  0xa1   : > { %v9686_v7 = vld [vmem:[#allocation6 + $0x95c] sm:$0xf0]  ;;  %v6842_v57 = vld [vmem:[#allocation6 + $0x2a0] sm:$0xf0] }
  0xa2   : > { %v7960_v8 = vld [vmem:[#allocation6 + $0xb40] sm:$0xf]  ;;  %2996 = vmatpush.bf16.msra.mxu2 %v7005_v0  ;;  %v7705_v14 = vor.u32 %v9686_v7, %v7704_v6  ;;  %2955 = vmatpush.bf16.msrb.mxu1 %v7993_v4  ;;  %v9394_v1 = vld [vmem:[#allocation6 + $0x44] sm:$0xf]  ;;  %v6845_v5 = vor.u32 %v9466_v54, %v6842_v57 }
  0xa3   : > { %v9750_v10 = vld [vmem:[#allocation6 + $0xb5c] sm:$0xf0]  ;;  %v6810_v4 = vld [vmem:[#allocation6 + $0x260] sm:$0xf0]  ;;  %v6557_v12 = vor.u32 %v9394_v1, %v6554_v2 }
  0xa4   : > { %v7961_v17 = vor.u32 %v9750_v10, %v7960_v8  ;;  %v7672_v19 = vld [vmem:[#allocation6 + $0x900] sm:$0xf]  ;;  %2942 = vmatpush.bf16.msrb.mxu0 %v7705_v14  ;;  %2984 = vmatpush.bf16.msrb.mxu3 %v6685_v18  ;;  %v9386_v14 = vld [vmem:[#allocation6 + $0x4] sm:$0xf] }
  0xa5   : > { %v9678_v20 = vld [vmem:[#allocation6 + $0x91c] sm:$0xf0]  ;;  %v9634_v18 = vld [vmem:[#allocation6 + $0x7c4] sm:$0xf]  ;;  %v6525_v28 = vor.u32 %v9386_v14, %v6522_v15 }
  0xa6   : > { %v7928_v21 = vld [vmem:[#allocation6 + $0xb00] sm:$0xf]  ;;  %2997 = vmatpush.bf16.msra.mxu2 %v6973_v13  ;;  %v7673_v26 = vor.u32 %v9678_v20, %v7672_v19  ;;  %2956 = vmatpush.bf16.msrb.mxu1 %v7961_v17  ;;  %v7258_v17 = vld [vmem:[#allocation6 + $0x5e0] sm:$0xf0] }
  0xa7   : > { %v9742_v22 = vld [vmem:[#allocation6 + $0xb1c] sm:$0xf0]  ;;  %v7514_v19 = vld [vmem:[#allocation6 + $0x7e0] sm:$0xf0] }
  0xa8   : > { %v7929_v29 = vor.u32 %v9742_v22, %v7928_v21  ;;  %v7640_v31 = vld [vmem:[#allocation6 + $0x8c0] sm:$0xf]  ;;  %2943 = vmatpush.bf16.msrb.mxu0 %v7673_v26  ;;  %2985 = vmatpush.bf16.msrb.mxu3 %v6653_v30  ;;  %v9698_v20 = vld [vmem:[#allocation6 + $0x9c4] sm:$0xf]  ;;  %v6813_v22 = vor.u32 %v9458_v3, %v6810_v4 }
  0xa9   : > { %v9670_v32 = vld [vmem:[#allocation6 + $0x8dc] sm:$0xf0]  ;;  %v7770_v21 = vld [vmem:[#allocation6 + $0x9e0] sm:$0xf0] }
  0xaa   : > { %v7896_v33 = vld [vmem:[#allocation6 + $0xac0] sm:$0xf]  ;;  %2998 = vmatpush.bf16.msra.mxu2 %v6941_v25  ;;  %v7641_v40 = vor.u32 %v9670_v32, %v7640_v31  ;;  %2957 = vmatpush.bf16.msrb.mxu1 %v7929_v29  ;;  %v9384_v25 = vld [vmem:[%s10778_s2 + $0x28] sm:$0xf0]  ;;  %v9450_v26 = vld [vmem:[#allocation6 + $0x204] sm:$0xf]  ;;  %v7261_v32 = vor.u32 %v9570_v16, %v7258_v17 }
  0xab   : > { %v9734_v34 = vld [vmem:[#allocation6 + $0xadc] sm:$0xf0]  ;;  %v6778_v29 = vld [vmem:[#allocation6 + $0x220] sm:$0xf0] }
  0xac   : > { %v6516_v37 = vld [vmem:[%s10778_s2 + $0x18] sm:$0xf]  ;;  %v7897_v43 = vor.u32 %v9734_v34, %v7896_v33  ;;  %2944 = vmatpush.bf16.msrb.mxu0 %v7641_v40  ;;  %2986 = vmatpush.bf16.msrb.mxu3 %v6621_v44  ;;  %v6508_v24 = vld [vmem:[%s10778_s2 + $0x10] sm:$0xf]  ;;  %v9381_v30 = vld [vmem:[%s10778_s2 + $0x14] sm:$0xf]  ;;  %v7517_v33 = vor.u32 %v9634_v18, %v7514_v19  ;;  %v6781_v42 = vor.u32 %v9450_v26, %v6778_v29 }
  0xad   : > { %v7608_v45 = vld [vmem:[#allocation6 + $0x880] sm:$0xf]  ;;  %v10822_v51 = vor.u32 %v9385_v38, %v6516_v37  ;;  %v9762_v34 = vld [vmem:[#allocation6 + $0xbc4] sm:$0xf]  ;;  %v7773_v37 = vor.u32 %v9698_v20, %v7770_v21  ;;  %v10830_v38 = vor.u32 %v9384_v25, %v6508_v24 }
  0xae   : > { %v9662_v46 = vld [vmem:[#allocation6 + $0x89c] sm:$0xf0]  ;;  %2999 = vmatpush.bf16.msra.mxu2 %v6909_v39  ;;  %2958 = vmatpush.bf16.msrb.mxu1 %v7897_v43  ;;  %v7226_v39 = vld [vmem:[#allocation6 + $0x5a0] sm:$0xf0] }
  0xaf   : > { %v7864_v47 = vld [vmem:[#allocation6 + $0xa80] sm:$0xf]  ;;  %11281 = vst [vmem:[#allocation24_spill] sm:$0xff] %v10822_v51  ;;  %v7609_v53 = vor.u32 %v9662_v46, %v7608_v45  ;;  %8086 = vmatmul.msk.bf16.vlgmr.msrb.gmra.mxu2 %vm2880_vm0, %v10822_v51  ;;  %v9626_v40 = vld [vmem:[#allocation6 + $0x784] sm:$0xf]  ;;  %v8029_v46 = vor.u32 %v9762_v34, %v8026_v35 }
  0xb0   : > { %v9726_v48 = vld [vmem:[#allocation6 + $0xa9c] sm:$0xf0]  ;;  %2987 = vmatpush.bf16.msrb.mxu3 %v6589_v59  ;;  %v9690_v44 = vld [vmem:[#allocation6 + $0x984] sm:$0xf] }
  0xb1   : > { %v7865_v58 = vor.u32 %v9726_v48, %v7864_v47  ;;  %v7576_v60 = vld [vmem:[#allocation6 + $0x840] sm:$0xf]  ;;  %2945 = vmatpush.bf16.msrb.mxu0 %v7609_v53  ;;  %v7738_v45 = vld [vmem:[#allocation6 + $0x9a0] sm:$0xf0]  ;;  %v7229_v47 = vor.u32 %v9562_v36, %v7226_v39  ;;  %v7485_v48 = vor.u32 %v9626_v40, %v7482_v41 }
  0xb2   : > { %v9654_v62 = vld [vmem:[#allocation6 + $0x85c] sm:$0xf0]  ;;  %3000 = vmatpush.bf16.msra.mxu2 %v6877_v52  ;;  %v7994_v50 = vld [vmem:[#allocation6 + $0xba0] sm:$0xf0]  ;;  %v7741_v53 = vor.u32 %v9690_v44, %v7738_v45 }
  0xb3   : > { %v7832_v63 = vld [vmem:[#allocation6 + $0xa40] sm:$0xf]  ;;  %v7577_v6 = vor.u32 %v9654_v62, %v7576_v60  ;;  %2959 = vmatpush.bf16.msrb.mxu1 %v7865_v58  ;;  %v9554_v52 = vld [vmem:[#allocation6 + $0x544] sm:$0xf]  ;;  %v7997_v62 = vor.u32 %v9754_v49, %v7994_v50 }
  0xb4   : > { %v9718_v0 = vld [vmem:[#allocation6 + $0xa5c] sm:$0xf0]  ;;  %2988 = vmatpush.bf16.msrb.mxu3 %v6557_v12  ;;  %v7194_v54 = vld [vmem:[#allocation6 + $0x560] sm:$0xf0] }
  0xb5   : > { %v7544_v7 = vld [vmem:[#allocation6 + $0x800] sm:$0xf]  ;;  %v7833_v11 = vor.u32 %v9718_v0, %v7832_v63  ;;  %2946 = vmatpush.bf16.msrb.mxu0 %v7577_v6  ;;  %v9618_v57 = vld [vmem:[#allocation6 + $0x744] sm:$0xf]  ;;  %v7197_v63 = vor.u32 %v9554_v52, %v7194_v54 }
  0xb6   : > { %v9646_v8 = vld [vmem:[#allocation6 + $0x81c] sm:$0xf0]  ;;  %3001 = vmatpush.bf16.msra.mxu2 %v6845_v5  ;;  %v7450_v58 = vld [vmem:[#allocation6 + $0x760] sm:$0xf0] }
  0xb7   : > { %v7800_v10 = vld [vmem:[#allocation6 + $0xa00] sm:$0xf]  ;;  %v7545_v23 = vor.u32 %v9646_v8, %v7544_v7  ;;  %2960 = vmatpush.bf16.msrb.mxu1 %v7833_v11  ;;  %v9682_v59 = vld [vmem:[#allocation6 + $0x944] sm:$0xf]  ;;  %v7453_v0 = vor.u32 %v9618_v57, %v7450_v58 }
  0xb8   : > { %v9710_v13 = vld [vmem:[#allocation6 + $0xa1c] sm:$0xf0]  ;;  %2989 = vmatpush.bf16.msrb.mxu3 %v6525_v28  ;;  %v7706_v60 = vld [vmem:[#allocation6 + $0x960] sm:$0xf0] }
  0xb9   : > { %v7801_v27 = vor.u32 %v9710_v13, %v7800_v10  ;;  %v6510_v31 = vld [vmem:[%s10778_s2 + $0x2c] sm:$0xf0]  ;;  %2947 = vmatpush.bf16.msrb.mxu0 %v7545_v23  ;;  %v9746_v1 = vld [vmem:[#allocation6 + $0xb44] sm:$0xf]  ;;  %v7709_v4 = vor.u32 %v9682_v59, %v7706_v60 }
  0xba   : > { %3002 = vmatpush.bf16.msra.mxu2 %v6813_v22  ;;  %v10832_v43 = vor.u32 %v9381_v30, %v6510_v31  ;;  %v7962_v2 = vld [vmem:[#allocation6 + $0xb60] sm:$0xf0] }
  0xbb   : > { %2961 = vmatpush.bf16.msrb.mxu1 %v7801_v27  ;;  %2990 = vmatmul.bf16.vlgmr.msrb.gmra.mxu3 %v10808_v56  ;;  %v9546_v3 = vld [vmem:[#allocation6 + $0x504] sm:$0xf]  ;;  %v7965_v11 = vor.u32 %v9746_v1, %v7962_v2  ;;  %v6752_v1 = vld [vmem:[#allocation6 + $0x1c8] sm:$0xf] }
  0xbc   : > { %3038 = vmatpush.bf16.msra.mxu3 %v7773_v37  ;;  %2948 = vmatmul.bf16.vlgmr.msrb.gmra.mxu0 %v10830_v38  ;;  %v7162_v5 = vld [vmem:[#allocation6 + $0x520] sm:$0xf0]  ;;  %v9447_v2 = vld [vmem:[#allocation6 + $0x1e4] sm:$0xf0] }
  0xbd   : > { %3010 = vmatpush.bf16.msra.mxu0 %v7261_v32  ;;  %v9610_v6 = vld [vmem:[#allocation6 + $0x704] sm:$0xf]  ;;  %v7165_v12 = vor.u32 %v9546_v3, %v7162_v5  ;;  %v7264_v3 = vld [vmem:[#allocation6 + $0x5c8] sm:$0xf] }
  0xbe   : > { %3003 = vmatpush.bf16.msra.mxu2 %v6781_v42  ;;  %2962 = vmatmul.bf16.vlgmr.msrb.gmra.mxu1 %v10832_v43  ;;  %v7418_v7 = vld [vmem:[#allocation6 + $0x720] sm:$0xf0]  ;;  %v9575_v5 = vld [vmem:[#allocation6 + $0x5e4] sm:$0xf0] }
  0xbf   : > { %3024 = vmatpush.bf16.msra.mxu1 %v7517_v33  ;;  %v9674_v8 = vld [vmem:[#allocation6 + $0x904] sm:$0xf]  ;;  %v7421_v13 = vor.u32 %v9610_v6, %v7418_v7 }
  0xc0   : > { %3039 = vmatpush.bf16.msra.mxu3 %v7741_v53  ;;  %v7674_v10 = vld [vmem:[#allocation6 + $0x920] sm:$0xf0] }
  0xc1   : > { %3011 = vmatpush.bf16.msra.mxu0 %v7229_v47  ;;  %3004 = vmatmul.bf16.vlgmr.msra.gmra.mxu2 %v10816_v9  ;;  %v9738_v14 = vld [vmem:[#allocation6 + $0xb04] sm:$0xf]  ;;  %v7677_v17 = vor.u32 %v9674_v8, %v7674_v10 }
  0xc2   : > { %3052 = vmatpush.bf16.msrb.mxu2 %v8029_v46  ;;  %v7930_v15 = vld [vmem:[#allocation6 + $0xb20] sm:$0xf0] }
  0xc3   : > { %3025 = vmatpush.bf16.msra.mxu1 %v7485_v48  ;;  %v9538_v16 = vld [vmem:[#allocation6 + $0x4c4] sm:$0xf]  ;;  %v7933_v23 = vor.u32 %v9738_v14, %v7930_v15  ;;  %v6753_v14 = vor.u32 %v9447_v2, %v6752_v1  ;;  %v7520_v15 = vld [vmem:[#allocation6 + $0x7c8] sm:$0xf] }
  0xc4   : > { %3040 = vmatpush.bf16.msra.mxu3 %v7709_v4  ;;  %v7130_v18 = vld [vmem:[#allocation6 + $0x4e0] sm:$0xf0]  ;;  %v9415_v1 = vld [vmem:[#allocation6 + $0xe4] sm:$0xf0] }
  0xc5   : > { %3012 = vmatpush.bf16.msra.mxu0 %v7197_v63  ;;  %v9602_v19 = vld [vmem:[#allocation6 + $0x6c4] sm:$0xf]  ;;  %v7133_v24 = vor.u32 %v9538_v16, %v7130_v18  ;;  %v9639_v16 = vld [vmem:[#allocation6 + $0x7e4] sm:$0xf0] }
  0xc6   : > { %3053 = vmatpush.bf16.msrb.mxu2 %v7997_v62  ;;  %v7386_v20 = vld [vmem:[#allocation6 + $0x6e0] sm:$0xf0]  ;;  %v7136_v2 = vld [vmem:[#allocation6 + $0x4c8] sm:$0xf] }
  0xc7   : > { %3026 = vmatpush.bf16.msra.mxu1 %v7453_v0  ;;  %v9666_v21 = vld [vmem:[#allocation6 + $0x8c4] sm:$0xf]  ;;  %v7389_v25 = vor.u32 %v9602_v19, %v7386_v20  ;;  %v7008_v19 = vld [vmem:[#allocation6 + $0x3c8] sm:$0xf] }
  0xc8   : > { %v7642_v22 = vld [vmem:[#allocation6 + $0x8e0] sm:$0xf0]  ;;  %3041 = vmatpush.bf16.msra.mxu3 %v7677_v17  ;;  %v7265_v17 = vor.u32 %v9575_v5, %v7264_v3  ;;  %v9511_v20 = vld [vmem:[#allocation6 + $0x3e4] sm:$0xf0] }
  0xc9   : > { %3013 = vmatpush.bf16.msra.mxu0 %v7165_v12  ;;  %v9730_v26 = vld [vmem:[#allocation6 + $0xac4] sm:$0xf]  ;;  %v7645_v29 = vor.u32 %v9666_v21, %v7642_v22  ;;  %v6720_v21 = vld [vmem:[#allocation6 + $0x188] sm:$0xf] }
  0xca   : > { %3054 = vmatpush.bf16.msrb.mxu2 %v7965_v11  ;;  %v7898_v27 = vld [vmem:[#allocation6 + $0xae0] sm:$0xf0]  ;;  %v9543_v3 = vld [vmem:[#allocation6 + $0x4e4] sm:$0xf0] }
  0xcb   : > { %3027 = vmatpush.bf16.msra.mxu1 %v7421_v13  ;;  %v9530_v28 = vld [vmem:[#allocation6 + $0x484] sm:$0xf]  ;;  %v7901_v35 = vor.u32 %v9730_v26, %v7898_v27  ;;  %v7521_v26 = vor.u32 %v9639_v16, %v7520_v15  ;;  %v7009_v27 = vor.u32 %v9511_v20, %v7008_v19  ;;  %v7104_v15 = vld [vmem:[#allocation6 + $0x488] sm:$0xf] }
  0xcc   : > { %v7098_v30 = vld [vmem:[#allocation6 + $0x4a0] sm:$0xf0]  ;;  %3042 = vmatpush.bf16.msra.mxu3 %v7645_v29  ;;  %v9631_v29 = vld [vmem:[#allocation6 + $0x7a4] sm:$0xf0] }
  0xcd   : > { %v9594_v31 = vld [vmem:[#allocation6 + $0x684] sm:$0xf]  ;;  %3014 = vmatpush.bf16.msra.mxu0 %v7133_v24  ;;  %v7101_v36 = vor.u32 %v9530_v28, %v7098_v30  ;;  %v7232_v24 = vld [vmem:[#allocation6 + $0x588] sm:$0xf] }
  0xce   : > { %v7354_v32 = vld [vmem:[#allocation6 + $0x6a0] sm:$0xf0]  ;;  %3055 = vmatpush.bf16.msrb.mxu2 %v7933_v23  ;;  %v9439_v23 = vld [vmem:[#allocation6 + $0x1a4] sm:$0xf0] }
  0xcf   : > { %v9658_v33 = vld [vmem:[#allocation6 + $0x884] sm:$0xf]  ;;  %3028 = vmatpush.bf16.msra.mxu1 %v7389_v25  ;;  %v7357_v37 = vor.u32 %v9594_v31, %v7354_v32  ;;  %v9567_v25 = vld [vmem:[#allocation6 + $0x5a4] sm:$0xf0]  ;;  %v6721_v30 = vor.u32 %v9439_v23, %v6720_v21 }
  0xd0   : > { %v7610_v34 = vld [vmem:[#allocation6 + $0x8a0] sm:$0xf0]  ;;  %v7488_v28 = vld [vmem:[#allocation6 + $0x788] sm:$0xf]  ;;  %v7233_v31 = vor.u32 %v9567_v25, %v7232_v24 }
  0xd1   : > { %v9722_v39 = vld [vmem:[#allocation6 + $0xa84] sm:$0xf]  ;;  %v7613_v42 = vor.u32 %v9658_v33, %v7610_v34  ;;  %3015 = vmatpush.bf16.msra.mxu0 %v7101_v36  ;;  %v6976_v32 = vld [vmem:[#allocation6 + $0x388] sm:$0xf] }
  0xd2   : > { %v7866_v40 = vld [vmem:[#allocation6 + $0xaa0] sm:$0xf0]  ;;  %3056 = vmatpush.bf16.msrb.mxu2 %v7901_v35  ;;  %v9503_v33 = vld [vmem:[#allocation6 + $0x3a4] sm:$0xf0] }
  0xd3   : > { %v9522_v41 = vld [vmem:[#allocation6 + $0x444] sm:$0xf]  ;;  %v7869_v49 = vor.u32 %v9722_v39, %v7866_v40  ;;  %3029 = vmatpush.bf16.msra.mxu1 %v7357_v37  ;;  %3043 = vmatpush.bf16.msra.mxu3 %v7613_v42  ;;  %v6688_v34 = vld [vmem:[#allocation6 + $0x148] sm:$0xf]  ;;  %v7489_v39 = vor.u32 %v9631_v29, %v7488_v28  ;;  %v6977_v40 = vor.u32 %v9503_v33, %v6976_v32 }
  0xd4   : > { %v7066_v44 = vld [vmem:[#allocation6 + $0x460] sm:$0xf0]  ;;  %v9431_v35 = vld [vmem:[#allocation6 + $0x164] sm:$0xf0] }
  0xd5   : > { %v9586_v45 = vld [vmem:[#allocation6 + $0x644] sm:$0xf]  ;;  %v7069_v53 = vor.u32 %v9522_v41, %v7066_v44  ;;  %v7200_v36 = vld [vmem:[#allocation6 + $0x548] sm:$0xf]  ;;  %v6689_v44 = vor.u32 %v9431_v35, %v6688_v34 }
  0xd6   : > { %v7322_v46 = vld [vmem:[#allocation6 + $0x660] sm:$0xf0]  ;;  %3057 = vmatpush.bf16.msrb.mxu2 %v7869_v49  ;;  %v9559_v37 = vld [vmem:[#allocation6 + $0x564] sm:$0xf0] }
  0xd7   : > { %v9650_v47 = vld [vmem:[#allocation6 + $0x844] sm:$0xf]  ;;  %v7325_v54 = vor.u32 %v9586_v45, %v7322_v46  ;;  %3016 = vmatpush.bf16.msra.mxu0 %v7069_v53  ;;  %v7456_v41 = vld [vmem:[#allocation6 + $0x748] sm:$0xf]  ;;  %v7201_v45 = vor.u32 %v9559_v37, %v7200_v36 }
  0xd8   : > { %v7578_v48 = vld [vmem:[#allocation6 + $0x860] sm:$0xf0]  ;;  %v9623_v42 = vld [vmem:[#allocation6 + $0x764] sm:$0xf0] }
  0xd9   : > { %v9714_v50 = vld [vmem:[#allocation6 + $0xa44] sm:$0xf]  ;;  %v7581_v60 = vor.u32 %v9650_v47, %v7578_v48  ;;  %3030 = vmatpush.bf16.msra.mxu1 %v7325_v54  ;;  %v6944_v46 = vld [vmem:[#allocation6 + $0x348] sm:$0xf]  ;;  %v7457_v53 = vor.u32 %v9623_v42, %v7456_v41 }
  0xda   : > { %v7834_v52 = vld [vmem:[#allocation6 + $0xa60] sm:$0xf0]  ;;  %v9495_v47 = vld [vmem:[#allocation6 + $0x364] sm:$0xf0] }
  0xdb   : > { %v9514_v57 = vld [vmem:[#allocation6 + $0x404] sm:$0xf]  ;;  %v7837_v4 = vor.u32 %v9714_v50, %v7834_v52  ;;  %3044 = vmatpush.bf16.msra.mxu3 %v7581_v60  ;;  %v6656_v48 = vld [vmem:[#allocation6 + $0x108] sm:$0xf]  ;;  %v6945_v54 = vor.u32 %v9495_v47, %v6944_v46 }
  0xdc   : > { %v7034_v58 = vld [vmem:[#allocation6 + $0x420] sm:$0xf0]  ;;  %v9423_v49 = vld [vmem:[#allocation6 + $0x124] sm:$0xf0] }
  0xdd   : > { %v9578_v59 = vld [vmem:[#allocation6 + $0x604] sm:$0xf]  ;;  %v7037_v8 = vor.u32 %v9514_v57, %v7034_v58  ;;  %3058 = vmatpush.bf16.msrb.mxu2 %v7837_v4  ;;  %v7168_v50 = vld [vmem:[#allocation6 + $0x508] sm:$0xf]  ;;  %v6657_v60 = vor.u32 %v9423_v49, %v6656_v48 }
  0xde   : > { %v7290_v62 = vld [vmem:[#allocation6 + $0x620] sm:$0xf0]  ;;  %v9551_v52 = vld [vmem:[#allocation6 + $0x524] sm:$0xf0] }
  0xdf   : > { %v9642_v63 = vld [vmem:[#allocation6 + $0x804] sm:$0xf]  ;;  %v7293_v10 = vor.u32 %v9578_v59, %v7290_v62  ;;  %3017 = vmatpush.bf16.msra.mxu0 %v7037_v8  ;;  %v6912_v57 = vld [vmem:[#allocation6 + $0x308] sm:$0xf]  ;;  %v7169_v62 = vor.u32 %v9551_v52, %v7168_v50 }
  0xe0   : > { %v7546_v0 = vld [vmem:[#allocation6 + $0x820] sm:$0xf0]  ;;  %v7424_v58 = vld [vmem:[#allocation6 + $0x708] sm:$0xf] }
  0xe1   : > { %v9770_v6 = vld [vmem:[#allocation6 + $0xc04] sm:$0xf]  ;;  %v7549_v13 = vor.u32 %v9642_v63, %v7546_v0  ;;  %3031 = vmatpush.bf16.msra.mxu1 %v7293_v10  ;;  %v9615_v59 = vld [vmem:[#allocation6 + $0x724] sm:$0xf0]  ;;  %v7137_v10 = vor.u32 %v9543_v3, %v7136_v2  ;;  %v7010_v3 = vld [vmem:[#allocation6 + $0x3e8] sm:$0xf0] }
  0xe2   : > { %v8058_v7 = vld [vmem:[#allocation6 + $0xc20] sm:$0xf0]  ;;  %3018 = vmatmul.bf16.vlgmr.msra.gmra.mxu0 %v10806_v55  ;;  %v9487_v63 = vld [vmem:[#allocation6 + $0x324] sm:$0xf0]  ;;  %v7425_v4 = vor.u32 %v9615_v59, %v7424_v58 }
  0xe3   : > { %v9706_v11 = vld [vmem:[#allocation6 + $0xa04] sm:$0xf]  ;;  %v8061_v18 = vor.u32 %v9770_v6, %v8058_v7  ;;  %3045 = vmatpush.bf16.msra.mxu3 %v7549_v13  ;;  %3108 = vmatpush.bf16.msrb.mxu0 %v7265_v17  ;;  %v6624_v0 = vld [vmem:[#allocation6 + $0xc8] sm:$0xf]  ;;  %v6913_v5 = vor.u32 %v9487_v63, %v6912_v57  ;;  %v9443_v63 = vld [vmem:[#allocation6 + $0x1cc] sm:$0xf] }
  0xe4   : > { %v7802_v12 = vld [vmem:[#allocation6 + $0xa20] sm:$0xf0]  ;;  %3032 = vmatmul.bf16.vlgmr.msra.gmra.mxu1 %v10810_v61  ;;  %v7392_v6 = vld [vmem:[#allocation6 + $0x6c8] sm:$0xf]  ;;  %v6625_v8 = vor.u32 %v9415_v1, %v6624_v0  ;;  %v6754_v0 = vld [vmem:[#allocation6 + $0x1e8] sm:$0xf0] }
  0xe5   : > { %v7805_v22 = vor.u32 %v9706_v11, %v7802_v12  ;;  %3080 = vmatpush.bf16.msrb.mxu1 %v6753_v14  ;;  %v9607_v7 = vld [vmem:[#allocation6 + $0x6e4] sm:$0xf0]  ;;  %v9507_v1 = vld [vmem:[#allocation6 + $0x3cc] sm:$0xf] }
  0xe6   : > { %3046 = vmatmul.bf16.vlgmr.msra.gmra.mxu3 %v10830_v38  ;;  %v6880_v11 = vld [vmem:[#allocation6 + $0x2c8] sm:$0xf]  ;;  %v7393_v17 = vor.u32 %v9607_v7, %v7392_v6 }
  0xe7   : > { %3073 = vmatpush.bf16.msrb.mxu3 %v8061_v18  ;;  %3059 = vmatpush.bf16.msrb.mxu2 %v7805_v22  ;;  %v9479_v12 = vld [vmem:[#allocation6 + $0x2e4] sm:$0xf0] }
  0xe8   : > { %3109 = vmatpush.bf16.msrb.mxu0 %v7233_v31  ;;  %v6592_v13 = vld [vmem:[#allocation6 + $0x88] sm:$0xf]  ;;  %v6881_v18 = vor.u32 %v9479_v12, %v6880_v11  ;;  %v7013_v12 = vor.u32 %v9507_v1, %v7010_v3 }
  0xe9   : > { %3081 = vmatpush.bf16.msrb.mxu1 %v6721_v30  ;;  %v9407_v14 = vld [vmem:[#allocation6 + $0xa4] sm:$0xf0] }
  0xea   : > { %3060 = vmatmul.bf16.vlgmr.msrb.gmra.mxu2 %v10832_v43  ;;  %v9535_v16 = vld [vmem:[#allocation6 + $0x4a4] sm:$0xf0]  ;;  %v6593_v21 = vor.u32 %v9407_v14, %v6592_v13  ;;  %v9435_v14 = vld [vmem:[#allocation6 + $0x18c] sm:$0xf] }
  0xeb   : > { %3122 = vmatpush.bf16.msra.mxu2 %v7521_v26  ;;  %3094 = vmatpush.bf16.msra.mxu3 %v7009_v27  ;;  %v7360_v19 = vld [vmem:[#allocation6 + $0x688] sm:$0xf]  ;;  %v7105_v22 = vor.u32 %v9535_v16, %v7104_v15  ;;  %v6722_v15 = vld [vmem:[#allocation6 + $0x1a8] sm:$0xf0] }
  0xec   : > { %3110 = vmatpush.bf16.msrb.mxu0 %v7201_v45  ;;  %v9599_v20 = vld [vmem:[#allocation6 + $0x6a4] sm:$0xf0]  ;;  %v9499_v16 = vld [vmem:[#allocation6 + $0x38c] sm:$0xf] }
  0xed   : > { %3082 = vmatpush.bf16.msrb.mxu1 %v6689_v44  ;;  %v6848_v23 = vld [vmem:[#allocation6 + $0x288] sm:$0xf]  ;;  %v7361_v29 = vor.u32 %v9599_v20, %v7360_v19 }
  0xee   : > { %v9471_v24 = vld [vmem:[#allocation6 + $0x2a4] sm:$0xf0] }
  0xef   : > { %3123 = vmatpush.bf16.msra.mxu2 %v7489_v39  ;;  %3095 = vmatpush.bf16.msra.mxu3 %v6977_v40  ;;  %v6560_v25 = vld [vmem:[#allocation6 + $0x48] sm:$0xf]  ;;  %v6849_v30 = vor.u32 %v9471_v24, %v6848_v23 }
  0xf0   : > { %3111 = vmatpush.bf16.msrb.mxu0 %v7169_v62  ;;  %v9399_v26 = vld [vmem:[#allocation6 + $0x64] sm:$0xf0] }
  0xf1   : > { %3083 = vmatpush.bf16.msrb.mxu1 %v6657_v60  ;;  %v7072_v27 = vld [vmem:[#allocation6 + $0x448] sm:$0xf]  ;;  %v6561_v34 = vor.u32 %v9399_v26, %v6560_v25  ;;  %v9427_v26 = vld [vmem:[#allocation6 + $0x14c] sm:$0xf] }
  0xf2   : > { %v9527_v28 = vld [vmem:[#allocation6 + $0x464] sm:$0xf0] }
  0xf3   : > { %3124 = vmatpush.bf16.msra.mxu2 %v7457_v53  ;;  %3096 = vmatpush.bf16.msra.mxu3 %v6945_v54  ;;  %v6816_v31 = vld [vmem:[#allocation6 + $0x248] sm:$0xf]  ;;  %v7073_v35 = vor.u32 %v9527_v28, %v7072_v27  ;;  %v6690_v27 = vld [vmem:[#allocation6 + $0x168] sm:$0xf0] }
  0xf4   : > { %3112 = vmatpush.bf16.msrb.mxu0 %v7137_v10  ;;  %v7328_v32 = vld [vmem:[#allocation6 + $0x648] sm:$0xf]  ;;  %v9491_v28 = vld [vmem:[#allocation6 + $0x34c] sm:$0xf] }
  0xf5   : > { %3084 = vmatpush.bf16.msrb.mxu1 %v6625_v8  ;;  %v9591_v33 = vld [vmem:[#allocation6 + $0x664] sm:$0xf0]  ;;  %v6757_v8 = vor.u32 %v9443_v63, %v6754_v0 }
  0xf6   : > { %8087 = vmatmul.msk.bf16.vlgmr.msrb.gmra.mxu3 %vm2880_vm0, %v10822_v51  ;;  %v9463_v36 = vld [vmem:[#allocation6 + $0x264] sm:$0xf0]  ;;  %v7329_v44 = vor.u32 %v9591_v33, %v7328_v32  ;;  %v6693_v33 = vor.u32 %v9427_v26, %v6690_v27 }
  0xf7   : > { %3125 = vmatpush.bf16.msra.mxu2 %v7425_v4  ;;  %3097 = vmatpush.bf16.msra.mxu3 %v6913_v5  ;;  %v6528_v37 = vld [vmem:[#allocation6 + $0x8] sm:$0xf]  ;;  %v6817_v48 = vor.u32 %v9463_v36, %v6816_v31 }
  0xf8   : > { %3113 = vmatpush.bf16.msrb.mxu0 %v7105_v22  ;;  %v9391_v39 = vld [vmem:[#allocation6 + $0x24] sm:$0xf0] }
  0xf9   : > { %3085 = vmatpush.bf16.msrb.mxu1 %v6593_v21  ;;  %v7040_v40 = vld [vmem:[#allocation6 + $0x408] sm:$0xf]  ;;  %v6529_v53 = vor.u32 %v9391_v39, %v6528_v37  ;;  %v6725_v21 = vor.u32 %v9435_v14, %v6722_v15  ;;  %v9419_v39 = vld [vmem:[#allocation6 + $0x10c] sm:$0xf] }
  0xfa   : > { %v9519_v41 = vld [vmem:[#allocation6 + $0x424] sm:$0xf0] }
  0xfb   : > { %3126 = vmatpush.bf16.msra.mxu2 %v7393_v17  ;;  %3098 = vmatpush.bf16.msra.mxu3 %v6881_v18  ;;  %v7776_v42 = vld [vmem:[#allocation6 + $0x9c8] sm:$0xf]  ;;  %v7041_v54 = vor.u32 %v9519_v41, %v7040_v40  ;;  %v6978_v17 = vld [vmem:[#allocation6 + $0x3a8] sm:$0xf0] }
  0xfc   : > { %v9703_v45 = vld [vmem:[#allocation6 + $0x9e4] sm:$0xf0]  ;;  %3114 = vmatpush.bf16.msrb.mxu0 %v7073_v35  ;;  %v6981_v24 = vor.u32 %v9499_v16, %v6978_v17  ;;  %v6658_v40 = vld [vmem:[#allocation6 + $0x128] sm:$0xf0] }
  0xfd   : > { %v8064_v46 = vld [vmem:[#allocation6 + $0xc08] sm:$0xf]  ;;  %3086 = vmatpush.bf16.msrb.mxu1 %v6561_v34  ;;  %v7777_v60 = vor.u32 %v9703_v45, %v7776_v42  ;;  %v9483_v41 = vld [vmem:[#allocation6 + $0x30c] sm:$0xf] }
  0xfe   : > { %v9775_v47 = vld [vmem:[#allocation6 + $0xc24] sm:$0xf0]  ;;  %v6914_v42 = vld [vmem:[#allocation6 + $0x328] sm:$0xf0] }
  0xff   : > { %3127 = vmatpush.bf16.msra.mxu2 %v7361_v29  ;;  %3099 = vmatpush.bf16.msra.mxu3 %v6849_v30  ;;  %v6784_v49 = vld [vmem:[#allocation6 + $0x208] sm:$0xf]  ;;  %v8065_v62 = vor.u32 %v9775_v47, %v8064_v46  ;;  %v6946_v29 = vld [vmem:[#allocation6 + $0x368] sm:$0xf0]  ;;  %v6661_v47 = vor.u32 %v9419_v39, %v6658_v40 }
 0x100   : > { %v7296_v50 = vld [vmem:[#allocation6 + $0x608] sm:$0xf]  ;;  %3115 = vmatpush.bf16.msrb.mxu0 %v7041_v54  ;;  %v6949_v36 = vor.u32 %v9491_v28, %v6946_v29  ;;  %v6626_v54 = vld [vmem:[#allocation6 + $0xe8] sm:$0xf0] }
 0x101   : > { %v9583_v52 = vld [vmem:[#allocation6 + $0x624] sm:$0xf0]  ;;  %3087 = vmatpush.bf16.msrb.mxu1 %v6529_v53  ;;  %v9411_v53 = vld [vmem:[#allocation6 + $0xcc] sm:$0xf] }
 0x102   : > { %v9455_v57 = vld [vmem:[#allocation6 + $0x224] sm:$0xf0]  ;;  %v7297_v2 = vor.u32 %v9583_v52, %v7296_v50  ;;  %v6917_v50 = vor.u32 %v9483_v41, %v6914_v42  ;;  %v6629_v63 = vor.u32 %v9411_v53, %v6626_v54  ;;  %v9395_v17 = vld [vmem:[#allocation6 + $0x4c] sm:$0xf] }
 0x103   : > { %v8032_v58 = vld [vmem:[#allocation6 + $0xbc8] sm:$0xf]  ;;  %3128 = vmatpush.bf16.msra.mxu2 %v7329_v44  ;;  %3100 = vmatpush.bf16.msra.mxu3 %v6817_v48  ;;  %v6785_v6 = vor.u32 %v9455_v57, %v6784_v49  ;;  %v9475_v57 = vld [vmem:[#allocation6 + $0x2cc] sm:$0xf] }
 0x104   : > { %v9767_v59 = vld [vmem:[#allocation6 + $0xbe4] sm:$0xf0]  ;;  %3171 = vmatpush.bf16.msra.mxu0 %v8065_v62  ;;  %3088 = vmatmul.bf16.vlgmr.msrb.gmra.mxu1 %v10808_v56  ;;  %v9699_v39 = vld [vmem:[#allocation6 + $0x9cc] sm:$0xf] }
 0x105   : > { %v7744_v4 = vld [vmem:[#allocation6 + $0x988] sm:$0xf]  ;;  %v8033_v7 = vor.u32 %v9767_v59, %v8032_v58  ;;  %3136 = vmatpush.bf16.msra.mxu1 %v7777_v60  ;;  %3116 = vmatmul.bf16.vlgmr.msrb.gmra.mxu0 %v10806_v55  ;;  %v6882_v58 = vld [vmem:[#allocation6 + $0x2e8] sm:$0xf0] }
 0x106   : > { %v9695_v5 = vld [vmem:[#allocation6 + $0x9a4] sm:$0xf0]  ;;  %v7778_v40 = vld [vmem:[#allocation6 + $0x9e8] sm:$0xf0] }
 0x107   : > { %v8000_v10 = vld [vmem:[#allocation6 + $0xb88] sm:$0xf]  ;;  %v7745_v13 = vor.u32 %v9695_v5, %v7744_v4  ;;  %3129 = vmatpush.bf16.msra.mxu2 %v7297_v2  ;;  %3101 = vmatpush.bf16.msra.mxu3 %v6785_v6  ;;  %v6885_v2 = vor.u32 %v9475_v57, %v6882_v58  ;;  %v9403_v4 = vld [vmem:[#allocation6 + $0x8c] sm:$0xf] }
 0x108   : > { %v9759_v11 = vld [vmem:[#allocation6 + $0xba4] sm:$0xf0]  ;;  %3192 = vmatpush.bf16.msrb.mxu0 %v7013_v12  ;;  %v6594_v5 = vld [vmem:[#allocation6 + $0xa8] sm:$0xf0] }
 0x109   : > { %v7712_v18 = vld [vmem:[#allocation6 + $0x948] sm:$0xf]  ;;  %v8001_v20 = vor.u32 %v9759_v11, %v8000_v10  ;;  %3137 = vmatpush.bf16.msra.mxu1 %v7745_v13  ;;  %v9467_v6 = vld [vmem:[#allocation6 + $0x28c] sm:$0xf]  ;;  %v6597_v12 = vor.u32 %v9403_v4, %v6594_v5 }
 0x10a   : > { %v9687_v19 = vld [vmem:[#allocation6 + $0x964] sm:$0xf0]  ;;  %3102 = vmatmul.bf16.vlgmr.msra.gmra.mxu3 %v10816_v9  ;;  %3130 = vmatmul.bf16.vlgmr.msra.gmra.mxu2 %v10810_v61  ;;  %v9763_v41 = vld [vmem:[#allocation6 + $0xbcc] sm:$0xf] }
 0x10b   : > { %3150 = vmatpush.bf16.msrb.mxu3 %v8033_v7  ;;  %3178 = vmatpush.bf16.msrb.mxu2 %v6757_v8  ;;  %v7968_v22 = vld [vmem:[#allocation6 + $0xb48] sm:$0xf]  ;;  %v7713_v25 = vor.u32 %v9687_v19, %v7712_v18  ;;  %v6850_v7 = vld [vmem:[#allocation6 + $0x2a8] sm:$0xf0] }
 0x10c   : > { %v9751_v23 = vld [vmem:[#allocation6 + $0xb64] sm:$0xf0]  ;;  %3193 = vmatpush.bf16.msrb.mxu0 %v6981_v24  ;;  %v6853_v15 = vor.u32 %v9467_v6, %v6850_v7  ;;  %v6562_v18 = vld [vmem:[#allocation6 + $0x68] sm:$0xf0] }
 0x10d   : > { %v7680_v30 = vld [vmem:[#allocation6 + $0x908] sm:$0xf]  ;;  %v7969_v32 = vor.u32 %v9751_v23, %v7968_v22  ;;  %3138 = vmatpush.bf16.msra.mxu1 %v7713_v25  ;;  %v9459_v19 = vld [vmem:[#allocation6 + $0x24c] sm:$0xf]  ;;  %v6565_v26 = vor.u32 %v9395_v17, %v6562_v18 }
 0x10e   : > { %v9679_v31 = vld [vmem:[#allocation6 + $0x924] sm:$0xf0]  ;;  %v9571_v23 = vld [vmem:[#allocation6 + $0x5cc] sm:$0xf] }
 0x10f   : > { %3151 = vmatpush.bf16.msrb.mxu3 %v8001_v20  ;;  %3179 = vmatpush.bf16.msrb.mxu2 %v6725_v21  ;;  %v7936_v34 = vld [vmem:[#allocation6 + $0xb08] sm:$0xf]  ;;  %v7681_v37 = vor.u32 %v9679_v31, %v7680_v30  ;;  %v6818_v20 = vld [vmem:[#allocation6 + $0x268] sm:$0xf0] }
 0x110   : > { %v9743_v35 = vld [vmem:[#allocation6 + $0xb24] sm:$0xf0]  ;;  %3194 = vmatpush.bf16.msrb.mxu0 %v6949_v36  ;;  %v7266_v24 = vld [vmem:[#allocation6 + $0x5e8] sm:$0xf0]  ;;  %v6821_v29 = vor.u32 %v9459_v19, %v6818_v20 }
 0x111   : > { %v7648_v44 = vld [vmem:[#allocation6 + $0x8c8] sm:$0xf]  ;;  %v7937_v46 = vor.u32 %v9743_v35, %v7936_v34  ;;  %3139 = vmatpush.bf16.msra.mxu1 %v7681_v37  ;;  %v9387_v31 = vld [vmem:[#allocation6 + $0xc] sm:$0xf]  ;;  %v7269_v34 = vor.u32 %v9571_v23, %v7266_v24 }
 0x112   : > { %v9671_v45 = vld [vmem:[#allocation6 + $0x8e4] sm:$0xf0]  ;;  %v6786_v35 = vld [vmem:[#allocation6 + $0x228] sm:$0xf0] }
 0x113   : > { %3152 = vmatpush.bf16.msrb.mxu3 %v7969_v32  ;;  %3180 = vmatpush.bf16.msrb.mxu2 %v6693_v33  ;;  %v7904_v48 = vld [vmem:[#allocation6 + $0xac8] sm:$0xf]  ;;  %v7649_v52 = vor.u32 %v9671_v45, %v7648_v44  ;;  %v6530_v32 = vld [vmem:[#allocation6 + $0x28] sm:$0xf0] }
 0x114   : > { %v9735_v49 = vld [vmem:[#allocation6 + $0xae4] sm:$0xf0]  ;;  %3195 = vmatpush.bf16.msrb.mxu0 %v6917_v50  ;;  %v9451_v33 = vld [vmem:[#allocation6 + $0x20c] sm:$0xf]  ;;  %v7781_v50 = vor.u32 %v9699_v39, %v7778_v40 }
 0x115   : > { %v7616_v59 = vld [vmem:[#allocation6 + $0x888] sm:$0xf]  ;;  %v7905_v62 = vor.u32 %v9735_v49, %v7904_v48  ;;  %3140 = vmatpush.bf16.msra.mxu1 %v7649_v52  ;;  %8088 = vmatmul.msk.bf16.vlgmr.msra.gmra.mxu0 %vm2880_vm0, %v10822_v51  ;;  %v9635_v36 = vld [vmem:[#allocation6 + $0x7cc] sm:$0xf]  ;;  %v6789_v48 = vor.u32 %v9451_v33, %v6786_v35 }
 0x116   : > { %v9663_v60 = vld [vmem:[#allocation6 + $0x8a4] sm:$0xf0]  ;;  %v7522_v37 = vld [vmem:[#allocation6 + $0x7e8] sm:$0xf0] }
 0x117   : > { %3153 = vmatpush.bf16.msrb.mxu3 %v7937_v46  ;;  %3181 = vmatpush.bf16.msrb.mxu2 %v6661_v47  ;;  %v7872_v0 = vld [vmem:[#allocation6 + $0xa88] sm:$0xf]  ;;  %v7617_v3 = vor.u32 %v9663_v60, %v7616_v59  ;;  %v8034_v44 = vld [vmem:[#allocation6 + $0xbe8] sm:$0xf0]  ;;  %v6533_v47 = vor.u32 %v9387_v31, %v6530_v32  ;;  %v7525_v49 = vor.u32 %v9635_v36, %v7522_v37 }
 0x118   : > { %v9727_v1 = vld [vmem:[#allocation6 + $0xaa4] sm:$0xf0]  ;;  %3196 = vmatpush.bf16.msrb.mxu0 %v6885_v2  ;;  %v9563_v45 = vld [vmem:[#allocation6 + $0x58c] sm:$0xf]  ;;  %v8037_v54 = vor.u32 %v9763_v41, %v8034_v44 }
 0x119   : > { %v7584_v8 = vld [vmem:[#allocation6 + $0x848] sm:$0xf]  ;;  %v7873_v11 = vor.u32 %v9727_v1, %v7872_v0  ;;  %3141 = vmatpush.bf16.msra.mxu1 %v7617_v3  ;;  %v7234_v46 = vld [vmem:[#allocation6 + $0x5a8] sm:$0xf0]  ;;  %v10851_v1 = vld [vmem:[#allocation8] sm:$0xff] }
 0x11a   : > { %v9655_v10 = vld [vmem:[#allocation6 + $0x864] sm:$0xf0]  ;;  %v9627_v52 = vld [vmem:[#allocation6 + $0x78c] sm:$0xf]  ;;  %v7237_v57 = vor.u32 %v9563_v45, %v7234_v46 }
 0x11b   : > { %3154 = vmatpush.bf16.msrb.mxu3 %v7905_v62  ;;  %3182 = vmatpush.bf16.msrb.mxu2 %v6629_v63  ;;  %v7840_v13 = vld [vmem:[#allocation6 + $0xa48] sm:$0xf]  ;;  %v7585_v16 = vor.u32 %v9655_v10, %v7584_v8  ;;  %v7490_v53 = vld [vmem:[#allocation6 + $0x7a8] sm:$0xf0] }
 0x11c   : > { %v9719_v14 = vld [vmem:[#allocation6 + $0xa64] sm:$0xf0]  ;;  %3197 = vmatpush.bf16.msrb.mxu0 %v6853_v15  ;;  %v9691_v58 = vld [vmem:[#allocation6 + $0x98c] sm:$0xf]  ;;  %v7493_v2 = vor.u32 %v9627_v52, %v7490_v53  ;;  %v11262_v15 = vperm.slane %v10851_v1, 0  ;;  %v2921_v46 = vpop.f32.mrf.mxu2 }
 0x11d   : > { %v7552_v21 = vld [vmem:[#allocation6 + $0x808] sm:$0xf]  ;;  %v7841_v25 = vor.u32 %v9719_v14, %v7840_v13  ;;  %3142 = vmatpush.bf16.msra.mxu1 %v7585_v16  ;;  %v7746_v59 = vld [vmem:[#allocation6 + $0x9a8] sm:$0xf0] }
 0x11e   : > { %v9647_v22 = vld [vmem:[#allocation6 + $0x824] sm:$0xf0]  ;;  %v9755_v60 = vld [vmem:[#allocation6 + $0xb8c] sm:$0xf]  ;;  %v7749_v3 = vor.u32 %v9691_v58, %v7746_v59  ;;  %v2935_v53 = vpop.f32.mrf.mxu3 }
 0x11f   : > { %3155 = vmatpush.bf16.msrb.mxu3 %v7873_v11  ;;  %3183 = vmatpush.bf16.msrb.mxu2 %v6597_v12  ;;  %v7808_v27 = vld [vmem:[#allocation6 + $0xa08] sm:$0xf]  ;;  %v7553_v30 = vor.u32 %v9647_v22, %v7552_v21  ;;  %v8002_v62 = vld [vmem:[#allocation6 + $0xba8] sm:$0xf0]  ;;  %v2893_v22 = vpop.f32.mrf.mxu0 }
 0x120   : > { %v9711_v28 = vld [vmem:[#allocation6 + $0xa24] sm:$0xf0]  ;;  %3198 = vmatpush.bf16.msrb.mxu0 %v6821_v29  ;;  %v9555_v63 = vld [vmem:[#allocation6 + $0x54c] sm:$0xf]  ;;  %v8005_v7 = vor.u32 %v9755_v60, %v8002_v62 }
 0x121   : > { %v7809_v42 = vor.u32 %v9711_v28, %v7808_v27  ;;  %3143 = vmatpush.bf16.msra.mxu1 %v7553_v30  ;;  %v7202_v0 = vld [vmem:[#allocation6 + $0x568] sm:$0xf0] }
 0x122   : > { %v9619_v4 = vld [vmem:[#allocation6 + $0x74c] sm:$0xf]  ;;  %v7205_v8 = vor.u32 %v9555_v63, %v7202_v0 }
 0x123   : > { %3156 = vmatpush.bf16.msrb.mxu3 %v7841_v25  ;;  %3184 = vmatpush.bf16.msrb.mxu2 %v6565_v26  ;;  %v7458_v5 = vld [vmem:[#allocation6 + $0x768] sm:$0xf0]  ;;  %v2894_v26 = vadd.f32 %v2893_v22, %v11262_v15  ;;  %v9629_v15 = vld [vmem:[#allocation6 + $0x79c] sm:$0xf] }
 0x124   : > { %3144 = vmatmul.bf16.vlgmr.msra.gmra.mxu1 %v10830_v38  ;;  %3199 = vmatpush.bf16.msrb.mxu0 %v6789_v48  ;;  %v9683_v6 = vld [vmem:[#allocation6 + $0x94c] sm:$0xf]  ;;  %v7461_v16 = vor.u32 %v9619_v4, %v7458_v5 }
 0x125   : > { %3206 = vmatpush.bf16.msrb.mxu1 %v7269_v34  ;;  %v7714_v10 = vld [vmem:[#allocation6 + $0x968] sm:$0xf0]  ;;  %v2907_v34 = vpop.f32.mrf.mxu1 }
 0x126   : > { %v9747_v11 = vld [vmem:[#allocation6 + $0xb4c] sm:$0xf]  ;;  %v7717_v17 = vor.u32 %v9683_v6, %v7714_v10  ;;  %v2908_v41 = vadd.f32 %v2907_v34, %v2894_v26  ;;  %v9512_v34 = vld [vmem:[#allocation6 + $0x3ec] sm:$0xf0] }
 0x127   : > { %3157 = vmatpush.bf16.msrb.mxu3 %v7809_v42  ;;  %3185 = vmatpush.bf16.msrb.mxu2 %v6533_v47  ;;  %v7970_v12 = vld [vmem:[#allocation6 + $0xb68] sm:$0xf0] }
 0x128   : > { %3248 = vmatpush.bf16.msra.mxu0 %v8037_v54  ;;  %v9547_v13 = vld [vmem:[#allocation6 + $0x50c] sm:$0xf]  ;;  %v7973_v20 = vor.u32 %v9747_v11, %v7970_v12  ;;  %v2922_v47 = vadd.f32 %v2921_v46, %v2908_v41 }
 0x129   : > { %3207 = vmatpush.bf16.msrb.mxu1 %v7237_v57  ;;  %v7170_v14 = vld [vmem:[#allocation6 + $0x528] sm:$0xf0]  ;;  %3200 = vmatmul.bf16.vlgmr.msrb.gmra.mxu0 %v10816_v9 }
 0x12a   : > { %3158 = vmatmul.bf16.vlgmr.msrb.gmra.mxu3 %v10832_v43  ;;  %3186 = vmatmul.bf16.vlgmr.msrb.gmra.mxu2 %v10808_v56  ;;  %v9611_v18 = vld [vmem:[#allocation6 + $0x70c] sm:$0xf]  ;;  %v7173_v21 = vor.u32 %v9547_v13, %v7170_v14  ;;  %v10859_v62 = vadd.f32 %v2935_v53, %v2922_v47  ;;  %v6728_v47 = vld [vmem:[#allocation6 + $0x190] sm:$0xf] }
 0x12b   : > { %3220 = vmatpush.bf16.msra.mxu3 %v7525_v49  ;;  %3234 = vmatpush.bf16.msra.mxu2 %v7781_v50  ;;  %v7426_v19 = vld [vmem:[#allocation6 + $0x728] sm:$0xf0]  ;;  %v6984_v53 = vld [vmem:[#allocation6 + $0x390] sm:$0xf] }
 0x12c   : > { %3249 = vmatpush.bf16.msra.mxu0 %v8005_v7  ;;  %v9675_v23 = vld [vmem:[#allocation6 + $0x90c] sm:$0xf]  ;;  %v7429_v30 = vor.u32 %v9611_v18, %v7426_v19 }
 0x12d   : > { %3208 = vmatpush.bf16.msrb.mxu1 %v7205_v8  ;;  %v7682_v24 = vld [vmem:[#allocation6 + $0x928] sm:$0xf0] }
 0x12e   : > { %v9739_v25 = vld [vmem:[#allocation6 + $0xb0c] sm:$0xf]  ;;  %v7685_v31 = vor.u32 %v9675_v23, %v7682_v24 }
 0x12f   : > { %3221 = vmatpush.bf16.msra.mxu3 %v7493_v2  ;;  %3235 = vmatpush.bf16.msra.mxu2 %v7749_v3  ;;  %v7938_v27 = vld [vmem:[#allocation6 + $0xb28] sm:$0xf0] }
 0x130   : > { %v9539_v28 = vld [vmem:[#allocation6 + $0x4cc] sm:$0xf]  ;;  %3250 = vmatpush.bf16.msra.mxu0 %v7973_v20  ;;  %v7941_v35 = vor.u32 %v9739_v25, %v7938_v27 }
 0x131   : > { %v7138_v29 = vld [vmem:[#allocation6 + $0x4e8] sm:$0xf0]  ;;  %3209 = vmatpush.bf16.msrb.mxu1 %v7173_v21 }
 0x132   : > { %v9603_v32 = vld [vmem:[#allocation6 + $0x6cc] sm:$0xf]  ;;  %v7141_v36 = vor.u32 %v9539_v28, %v7138_v29 }
 0x133   : > { %3222 = vmatpush.bf16.msra.mxu3 %v7461_v16  ;;  %3236 = vmatpush.bf16.msra.mxu2 %v7717_v17  ;;  %v7394_v33 = vld [vmem:[#allocation6 + $0x6e8] sm:$0xf0]  ;;  %v10861_v17 = vpop.f32.mrf.mxu2 }
 0x134   : > { %v9667_v37 = vld [vmem:[#allocation6 + $0x8cc] sm:$0xf]  ;;  %v7397_v48 = vor.u32 %v9603_v32, %v7394_v33  ;;  %3251 = vmatpush.bf16.msra.mxu0 %v7941_v35  ;;  %v9448_v32 = vld [vmem:[#allocation6 + $0x1ec] sm:$0xf0] }
 0x135   : > { %v7650_v39 = vld [vmem:[#allocation6 + $0x8e8] sm:$0xf0]  ;;  %3210 = vmatpush.bf16.msrb.mxu1 %v7141_v36  ;;  %v7016_v33 = vld [vmem:[#allocation6 + $0x3d0] sm:$0xf] }
 0x136   : > { %v9731_v40 = vld [vmem:[#allocation6 + $0xacc] sm:$0xf]  ;;  %v7653_v49 = vor.u32 %v9667_v37, %v7650_v39  ;;  %v7272_v35 = vld [vmem:[#allocation6 + $0x5d0] sm:$0xf]  ;;  %v7017_v46 = vor.u32 %v9512_v34, %v7016_v33 }
 0x137   : > { %v7906_v42 = vld [vmem:[#allocation6 + $0xae8] sm:$0xf0]  ;;  %3223 = vmatpush.bf16.msra.mxu3 %v7429_v30  ;;  %3237 = vmatpush.bf16.msra.mxu2 %v7685_v31  ;;  %v6760_v31 = vld [vmem:[#allocation6 + $0x1d0] sm:$0xf] }
 0x138   : > { %v9531_v44 = vld [vmem:[#allocation6 + $0x48c] sm:$0xf]  ;;  %v7909_v54 = vor.u32 %v9731_v40, %v7906_v42  ;;  %v9576_v37 = vld [vmem:[#allocation6 + $0x5ec] sm:$0xf0] }
 0x139   : > { %v7106_v45 = vld [vmem:[#allocation6 + $0x4a8] sm:$0xf0]  ;;  %v7528_v39 = vld [vmem:[#allocation6 + $0x7d0] sm:$0xf] }
 0x13a   : > { %v9595_v50 = vld [vmem:[#allocation6 + $0x68c] sm:$0xf]  ;;  %v7109_v57 = vor.u32 %v9531_v44, %v7106_v45  ;;  %3252 = vmatpush.bf16.msra.mxu0 %v7909_v54  ;;  %v9640_v40 = vld [vmem:[#allocation6 + $0x7ec] sm:$0xf0]  ;;  %v10863_v44 = vpop.f32.mrf.mxu0  ;;  %v6761_v45 = vor.u32 %v9448_v32, %v6760_v31 }
 0x13b   : > { %v7362_v52 = vld [vmem:[#allocation6 + $0x6a8] sm:$0xf0]  ;;  %3224 = vmatpush.bf16.msra.mxu3 %v7397_v48  ;;  %3238 = vmatpush.bf16.msra.mxu2 %v7653_v49  ;;  %v9440_v48 = vld [vmem:[#allocation6 + $0x1ac] sm:$0xf0]  ;;  %v10865_v49 = vpop.f32.mrf.mxu1 }
 0x13c   : > { %v9659_v58 = vld [vmem:[#allocation6 + $0x88c] sm:$0xf]  ;;  %v7365_v3 = vor.u32 %v9595_v50, %v7362_v52  ;;  %3211 = vmatpush.bf16.msrb.mxu1 %v7109_v57  ;;  %v7273_v50 = vor.u32 %v9576_v37, %v7272_v35  ;;  %v7529_v52 = vor.u32 %v9640_v40, %v7528_v39  ;;  %v9504_v54 = vld [vmem:[#allocation6 + $0x3ac] sm:$0xf0] }
 0x13d   : > { %v7618_v59 = vld [vmem:[#allocation6 + $0x8a8] sm:$0xf0]  ;;  %v7240_v57 = vld [vmem:[#allocation6 + $0x590] sm:$0xf] }
 0x13e   : > { %v9723_v60 = vld [vmem:[#allocation6 + $0xa8c] sm:$0xf]  ;;  %v7621_v4 = vor.u32 %v9659_v58, %v7618_v59  ;;  %v2977_v58 = vpop.f32.mrf.mxu2  ;;  %v9568_v59 = vld [vmem:[#allocation6 + $0x5ac] sm:$0xf0] }
 0x13f   : > { %v7874_v63 = vld [vmem:[#allocation6 + $0xaa8] sm:$0xf0]  ;;  %3225 = vmatpush.bf16.msra.mxu3 %v7365_v3  ;;  %v6696_v3 = vld [vmem:[#allocation6 + $0x150] sm:$0xf] }
 0x140   : > { %v9523_v0 = vld [vmem:[#allocation6 + $0x44c] sm:$0xf]  ;;  %v7877_v7 = vor.u32 %v9723_v60, %v7874_v63  ;;  %3239 = vmatpush.bf16.msra.mxu2 %v7621_v4  ;;  %v7496_v60 = vld [vmem:[#allocation6 + $0x790] sm:$0xf] }
 0x141   : > { %v7074_v2 = vld [vmem:[#allocation6 + $0x468] sm:$0xf0]  ;;  %v9632_v63 = vld [vmem:[#allocation6 + $0x7ac] sm:$0xf0] }
 0x142   : > { %v9587_v5 = vld [vmem:[#allocation6 + $0x64c] sm:$0xf]  ;;  %v7077_v8 = vor.u32 %v9523_v0, %v7074_v2  ;;  %3253 = vmatpush.bf16.msra.mxu0 %v7877_v7  ;;  %v6729_v0 = vor.u32 %v9440_v48, %v6728_v47  ;;  %v6985_v2 = vor.u32 %v9504_v54, %v6984_v53  ;;  %v9432_v4 = vld [vmem:[#allocation6 + $0x16c] sm:$0xf0] }
 0x143   : > { %v7330_v6 = vld [vmem:[#allocation6 + $0x668] sm:$0xf0]  ;;  %v6952_v7 = vld [vmem:[#allocation6 + $0x350] sm:$0xf] }
 0x144   : > { %v9651_v10 = vld [vmem:[#allocation6 + $0x84c] sm:$0xf]  ;;  %v7333_v20 = vor.u32 %v9587_v5, %v7330_v6  ;;  %3212 = vmatpush.bf16.msrb.mxu1 %v7077_v8  ;;  %v7241_v5 = vor.u32 %v9568_v59, %v7240_v57  ;;  %v7497_v6 = vor.u32 %v9632_v63, %v7496_v60  ;;  %v9496_v8 = vld [vmem:[#allocation6 + $0x36c] sm:$0xf0] }
 0x145   : > { %v7586_v11 = vld [vmem:[#allocation6 + $0x868] sm:$0xf0]  ;;  %v7432_v31 = vld [vmem:[#allocation6 + $0x710] sm:$0xf] }
 0x146   : > { %v9715_v12 = vld [vmem:[#allocation6 + $0xa4c] sm:$0xf]  ;;  %v7589_v21 = vor.u32 %v9651_v10, %v7586_v11  ;;  %3226 = vmatpush.bf16.msra.mxu3 %v7333_v20  ;;  %v7208_v10 = vld [vmem:[#allocation6 + $0x550] sm:$0xf] }
 0x147   : > { %v7842_v13 = vld [vmem:[#allocation6 + $0xa68] sm:$0xf0]  ;;  %v9560_v11 = vld [vmem:[#allocation6 + $0x56c] sm:$0xf0] }
 0x148   : > { %v9515_v14 = vld [vmem:[#allocation6 + $0x40c] sm:$0xf]  ;;  %v7845_v24 = vor.u32 %v9715_v12, %v7842_v13  ;;  %3240 = vmatpush.bf16.msra.mxu2 %v7589_v21  ;;  %v7464_v12 = vld [vmem:[#allocation6 + $0x750] sm:$0xf] }
 0x149   : > { %v7042_v16 = vld [vmem:[#allocation6 + $0x428] sm:$0xf0]  ;;  %v9624_v13 = vld [vmem:[#allocation6 + $0x76c] sm:$0xf0] }
 0x14a   : > { %v9771_v18 = vld [vmem:[#allocation6 + $0xc0c] sm:$0xf]  ;;  %v7045_v25 = vor.u32 %v9515_v14, %v7042_v16  ;;  %3254 = vmatpush.bf16.msra.mxu0 %v7845_v24  ;;  %v10871_v14 = vpop.f32.mrf.mxu3  ;;  %v2949_v16 = vpop.f32.mrf.mxu0  ;;  %v6664_v20 = vld [vmem:[#allocation6 + $0x110] sm:$0xf]  ;;  %v7465_v24 = vor.u32 %v9624_v13, %v7464_v12 }
 0x14b   : > { %v8066_v19 = vld [vmem:[#allocation6 + $0xc28] sm:$0xf0]  ;;  %v9424_v21 = vld [vmem:[#allocation6 + $0x12c] sm:$0xf0] }
 0x14c   : > { %v9579_v22 = vld [vmem:[#allocation6 + $0x60c] sm:$0xf]  ;;  %v8069_v30 = vor.u32 %v9771_v18, %v8066_v19  ;;  %3213 = vmatpush.bf16.msrb.mxu1 %v7045_v25  ;;  %v6697_v18 = vor.u32 %v9432_v4, %v6696_v3  ;;  %v6953_v19 = vor.u32 %v9496_v8, %v6952_v7  ;;  %v2963_v25 = vpop.f32.mrf.mxu1  ;;  %v9616_v32 = vld [vmem:[#allocation6 + $0x72c] sm:$0xf0]  ;;  %v6665_v34 = vor.u32 %v9424_v21, %v6664_v20 }
 0x14d   : > { %v7298_v23 = vld [vmem:[#allocation6 + $0x628] sm:$0xf0]  ;;  %v9416_v37 = vld [vmem:[#allocation6 + $0xec] sm:$0xf0] }
 0x14e   : > { %v9643_v26 = vld [vmem:[#allocation6 + $0x80c] sm:$0xf]  ;;  %v7301_v36 = vor.u32 %v9579_v22, %v7298_v23  ;;  %v2950_v22 = vadd.f32 %v2949_v16, %v10859_v62  ;;  %v7209_v23 = vor.u32 %v9560_v11, %v7208_v10  ;;  %v6888_v39 = vld [vmem:[#allocation6 + $0x2d0] sm:$0xf] }
 0x14f   : > { %v7554_v27 = vld [vmem:[#allocation6 + $0x828] sm:$0xf0]  ;;  %3214 = vmatmul.bf16.vlgmr.msrb.gmra.mxu1 %v10806_v55  ;;  %v9544_v47 = vld [vmem:[#allocation6 + $0x4ec] sm:$0xf0] }
 0x150   : > { %v9707_v28 = vld [vmem:[#allocation6 + $0xa0c] sm:$0xf]  ;;  %v7557_v41 = vor.u32 %v9643_v26, %v7554_v27  ;;  %3269 = vmatpush.bf16.msra.mxu1 %v8069_v30  ;;  %3227 = vmatpush.bf16.msra.mxu3 %v7301_v36  ;;  %v6920_v26 = vld [vmem:[#allocation6 + $0x310] sm:$0xf]  ;;  %v2964_v33 = vadd.f32 %v2963_v25, %v2950_v22 }
 0x151   : > { %v7810_v29 = vld [vmem:[#allocation6 + $0xa28] sm:$0xf0]  ;;  %v9488_v27 = vld [vmem:[#allocation6 + $0x32c] sm:$0xf0] }
 0x152   : > { %v7813_v42 = vor.u32 %v9707_v28, %v7810_v29  ;;  %3241 = vmatpush.bf16.msra.mxu2 %v7557_v41  ;;  %v7176_v28 = vld [vmem:[#allocation6 + $0x510] sm:$0xf]  ;;  %v10874_v29 = vpop.f32.mrf.mxu2  ;;  %v6921_v35 = vor.u32 %v9488_v27, %v6920_v26  ;;  %v10876_v62 = vadd.f32 %v2977_v58, %v2964_v33  ;;  %v7433_v41 = vor.u32 %v9616_v32, %v7432_v31  ;;  %v2991_v59 = vpop.f32.mrf.mxu3 }
 0x153   : > { %3228 = vmatmul.bf16.vlgmr.msra.gmra.mxu3 %v10810_v61  ;;  %v9552_v30 = vld [vmem:[#allocation6 + $0x52c] sm:$0xf0] }
 0x154   : > { %3255 = vmatpush.bf16.msra.mxu0 %v7813_v42  ;;  %3276 = vmatpush.bf16.msrb.mxu3 %v6761_v45  ;;  %v6632_v36 = vld [vmem:[#allocation6 + $0xd0] sm:$0xf]  ;;  %v7177_v40 = vor.u32 %v9552_v30, %v7176_v28 }
 0x155   : > { %3290 = vmatpush.bf16.msrb.mxu1 %v7017_v46  ;;  %3242 = vmatmul.bf16.vlgmr.msra.gmra.mxu2 %v10830_v38  ;;  %v9480_v42 = vld [vmem:[#allocation6 + $0x2ec] sm:$0xf0]  ;;  %v11261_v46 = vperm.slane %v10851_v1, 1 }
 0x156   : > { %3304 = vmatpush.bf16.msrb.mxu2 %v7273_v50  ;;  %v7144_v45 = vld [vmem:[#allocation6 + $0x4d0] sm:$0xf]  ;;  %v6889_v53 = vor.u32 %v9480_v42, %v6888_v39 }
 0x157   : > { %3256 = vmatmul.bf16.vlgmr.msra.gmra.mxu0 %v10832_v43  ;;  %v7400_v48 = vld [vmem:[#allocation6 + $0x6d0] sm:$0xf]  ;;  %v7145_v58 = vor.u32 %v9544_v47, %v7144_v45  ;;  %v2992_v3 = vadd.f32 %v2991_v59, %v11261_v46 }
 0x158   : > { %3318 = vmatpush.bf16.msrb.mxu0 %v7529_v52  ;;  %3277 = vmatpush.bf16.msrb.mxu3 %v6729_v0  ;;  %v9608_v50 = vld [vmem:[#allocation6 + $0x6ec] sm:$0xf0]  ;;  %v6633_v52 = vor.u32 %v9416_v37, %v6632_v36 }
 0x159   : > { %3291 = vmatpush.bf16.msrb.mxu1 %v6985_v2  ;;  %v6600_v54 = vld [vmem:[#allocation6 + $0x90] sm:$0xf]  ;;  %v7401_v60 = vor.u32 %v9608_v50, %v7400_v48  ;;  %v9444_v48 = vld [vmem:[#allocation6 + $0x1d4] sm:$0xf] }
 0x15a   : > { %3305 = vmatpush.bf16.msrb.mxu2 %v7241_v5  ;;  %v9408_v57 = vld [vmem:[#allocation6 + $0xac] sm:$0xf0]  ;;  %v3005_v7 = vpop.f32.mrf.mxu2  ;;  %v6762_v50 = vld [vmem:[#allocation6 + $0x1f0] sm:$0xf0] }
 0x15b   : > { %v6856_v63 = vld [vmem:[#allocation6 + $0x290] sm:$0xf]  ;;  %v10883_v8 = vadd.f32 %v3005_v7, %v2992_v3  ;;  %v6601_v10 = vor.u32 %v9408_v57, %v6600_v54  ;;  %v10885_v57 = vpop.f32.mrf.mxu0 }
 0x15c   : > { %3319 = vmatpush.bf16.msrb.mxu0 %v7497_v6  ;;  %3278 = vmatpush.bf16.msrb.mxu3 %v6697_v18  ;;  %v9472_v0 = vld [vmem:[#allocation6 + $0x2ac] sm:$0xf0] }
 0x15d   : > { %3292 = vmatpush.bf16.msrb.mxu1 %v6953_v19  ;;  %v7112_v2 = vld [vmem:[#allocation6 + $0x490] sm:$0xf]  ;;  %v6857_v11 = vor.u32 %v9472_v0, %v6856_v63  ;;  %v9508_v63 = vld [vmem:[#allocation6 + $0x3d4] sm:$0xf] }
 0x15e   : > { %3306 = vmatpush.bf16.msrb.mxu2 %v7209_v23  ;;  %v9536_v4 = vld [vmem:[#allocation6 + $0x4ac] sm:$0xf0]  ;;  %v7018_v0 = vld [vmem:[#allocation6 + $0x3f0] sm:$0xf0] }
 0x15f   : > { %8089 = vmatmul.msk.bf16.vlgmr.msra.gmra.mxu1 %vm2880_vm0, %v10822_v51  ;;  %v7368_v5 = vld [vmem:[#allocation6 + $0x690] sm:$0xf]  ;;  %v7113_v16 = vor.u32 %v9536_v4, %v7112_v2  ;;  %v6765_v2 = vor.u32 %v9444_v48, %v6762_v50  ;;  %v9420_v48 = vld [vmem:[#allocation6 + $0x114] sm:$0xf] }
 0x160   : > { %3320 = vmatpush.bf16.msrb.mxu0 %v7465_v24  ;;  %3279 = vmatpush.bf16.msrb.mxu3 %v6665_v34  ;;  %v9600_v6 = vld [vmem:[#allocation6 + $0x6ac] sm:$0xf0]  ;;  %v6666_v50 = vld [vmem:[#allocation6 + $0x130] sm:$0xf0] }
 0x161   : > { %3293 = vmatpush.bf16.msrb.mxu1 %v6921_v35  ;;  %v6568_v12 = vld [vmem:[#allocation6 + $0x50] sm:$0xf]  ;;  %v7369_v18 = vor.u32 %v9600_v6, %v7368_v5  ;;  %v10887_v6 = vpop.f32.mrf.mxu1 }
 0x162   : > { %3307 = vmatpush.bf16.msrb.mxu2 %v7177_v40  ;;  %v9400_v13 = vld [vmem:[#allocation6 + $0x6c] sm:$0xf0] }
 0x163   : > { %v6824_v19 = vld [vmem:[#allocation6 + $0x250] sm:$0xf]  ;;  %v6569_v25 = vor.u32 %v9400_v13, %v6568_v12  ;;  %v7021_v13 = vor.u32 %v9508_v63, %v7018_v0 }
 0x164   : > { %3321 = vmatpush.bf16.msrb.mxu0 %v7433_v41  ;;  %3280 = vmatpush.bf16.msrb.mxu3 %v6633_v52  ;;  %v9464_v20 = vld [vmem:[#allocation6 + $0x26c] sm:$0xf0] }
 0x165   : > { %3294 = vmatpush.bf16.msrb.mxu1 %v6889_v53  ;;  %v7080_v21 = vld [vmem:[#allocation6 + $0x450] sm:$0xf]  ;;  %v6825_v26 = vor.u32 %v9464_v20, %v6824_v19  ;;  %v6986_v19 = vld [vmem:[#allocation6 + $0x3b0] sm:$0xf0] }
 0x166   : > { %3308 = vmatpush.bf16.msrb.mxu2 %v7145_v58  ;;  %v9528_v22 = vld [vmem:[#allocation6 + $0x46c] sm:$0xf0] }
 0x167   : > { %v7336_v23 = vld [vmem:[#allocation6 + $0x650] sm:$0xf]  ;;  %v7081_v31 = vor.u32 %v9528_v22, %v7080_v21 }
 0x168   : > { %3322 = vmatpush.bf16.msrb.mxu0 %v7401_v60  ;;  %v9592_v24 = vld [vmem:[#allocation6 + $0x66c] sm:$0xf0]  ;;  %3281 = vmatpush.bf16.msrb.mxu3 %v6601_v10  ;;  %v9436_v10 = vld [vmem:[#allocation6 + $0x194] sm:$0xf] }
 0x169   : > { %3295 = vmatpush.bf16.msrb.mxu1 %v6857_v11  ;;  %v6536_v27 = vld [vmem:[#allocation6 + $0x10] sm:$0xf]  ;;  %v7337_v32 = vor.u32 %v9592_v24, %v7336_v23  ;;  %v6730_v11 = vld [vmem:[#allocation6 + $0x1b0] sm:$0xf0] }
 0x16a   : > { %v9392_v28 = vld [vmem:[#allocation6 + $0x2c] sm:$0xf0]  ;;  %3309 = vmatpush.bf16.msrb.mxu2 %v7113_v16  ;;  %v6733_v21 = vor.u32 %v9436_v10, %v6730_v11 }
 0x16b   : > { %v6792_v30 = vld [vmem:[#allocation6 + $0x210] sm:$0xf]  ;;  %v6537_v45 = vor.u32 %v9392_v28, %v6536_v27  ;;  %v6698_v27 = vld [vmem:[#allocation6 + $0x170] sm:$0xf0]  ;;  %v10892_v28 = vpop.f32.mrf.mxu3 }
 0x16c   : > { %3323 = vmatpush.bf16.msrb.mxu0 %v7369_v18  ;;  %v9456_v33 = vld [vmem:[#allocation6 + $0x22c] sm:$0xf0]  ;;  %3282 = vmatpush.bf16.msrb.mxu3 %v6569_v25  ;;  %v9500_v18 = vld [vmem:[#allocation6 + $0x394] sm:$0xf] }
 0x16d   : > { %v7048_v34 = vld [vmem:[#allocation6 + $0x410] sm:$0xf]  ;;  %3296 = vmatpush.bf16.msrb.mxu1 %v6825_v26  ;;  %v6793_v47 = vor.u32 %v9456_v33, %v6792_v30  ;;  %v9428_v26 = vld [vmem:[#allocation6 + $0x154] sm:$0xf]  ;;  %v6989_v30 = vor.u32 %v9500_v18, %v6986_v19 }
 0x16e   : > { %v9520_v35 = vld [vmem:[#allocation6 + $0x42c] sm:$0xf0]  ;;  %3310 = vmatpush.bf16.msrb.mxu2 %v7081_v31  ;;  %v3019_v31 = vpop.f32.mrf.mxu0  ;;  %v9492_v33 = vld [vmem:[#allocation6 + $0x354] sm:$0xf] }
 0x16f   : > { %v7304_v36 = vld [vmem:[#allocation6 + $0x610] sm:$0xf]  ;;  %v7049_v52 = vor.u32 %v9520_v35, %v7048_v34  ;;  %v6954_v34 = vld [vmem:[#allocation6 + $0x370] sm:$0xf0]  ;;  %v3020_v35 = vadd.f32 %v3019_v31, %v10883_v8 }
 0x170   : > { %v9584_v37 = vld [vmem:[#allocation6 + $0x62c] sm:$0xf0]  ;;  %3324 = vmatpush.bf16.msrb.mxu0 %v7337_v32  ;;  %3283 = vmatpush.bf16.msrb.mxu3 %v6537_v45  ;;  %v3033_v45 = vpop.f32.mrf.mxu1 }
 0x171   : > { %v7784_v39 = vld [vmem:[#allocation6 + $0x9d0] sm:$0xf]  ;;  %v7305_v53 = vor.u32 %v9584_v37, %v7304_v36  ;;  %3297 = vmatpush.bf16.msrb.mxu1 %v6793_v47  ;;  %v6701_v37 = vor.u32 %v9428_v26, %v6698_v27  ;;  %v6602_v26 = vld [vmem:[#allocation6 + $0xb0] sm:$0xf0] }
 0x172   : > { %v9704_v40 = vld [vmem:[#allocation6 + $0x9ec] sm:$0xf0]  ;;  %3311 = vmatpush.bf16.msrb.mxu2 %v7049_v52  ;;  %v3034_v52 = vadd.f32 %v3033_v45, %v3020_v35  ;;  %v6570_v45 = vld [vmem:[#allocation6 + $0x70] sm:$0xf0] }
 0x173   : > { %v8040_v41 = vld [vmem:[#allocation6 + $0xbd0] sm:$0xf]  ;;  %v7785_v59 = vor.u32 %v9704_v40, %v7784_v39  ;;  %3284 = vmatmul.bf16.vlgmr.msrb.gmra.mxu3 %v10808_v56 }
 0x174   : > { %v9768_v42 = vld [vmem:[#allocation6 + $0xbec] sm:$0xf0]  ;;  %3325 = vmatpush.bf16.msrb.mxu0 %v7305_v53  ;;  %3298 = vmatmul.bf16.vlgmr.msrb.gmra.mxu1 %v10816_v9  ;;  %v6957_v53 = vor.u32 %v9492_v33, %v6954_v34  ;;  %v6858_v33 = vld [vmem:[#allocation6 + $0x2b0] sm:$0xf0] }
 0x175   : > { %v8072_v54 = vld [vmem:[#allocation6 + $0xc10] sm:$0xf]  ;;  %v8041_v58 = vor.u32 %v9768_v42, %v8040_v41  ;;  %3332 = vmatpush.bf16.msra.mxu3 %v7785_v59  ;;  %3312 = vmatmul.bf16.vlgmr.msrb.gmra.mxu2 %v10806_v55  ;;  %v10896_v42 = vpop.f32.mrf.mxu2  ;;  %v9484_v59 = vld [vmem:[#allocation6 + $0x314] sm:$0xf] }
 0x176   : > { %v9776_v60 = vld [vmem:[#allocation6 + $0xc2c] sm:$0xf0] }
 0x177   : > { %v7752_v3 = vld [vmem:[#allocation6 + $0x990] sm:$0xf]  ;;  %v8073_v12 = vor.u32 %v9776_v60, %v8072_v54  ;;  %3346 = vmatpush.bf16.msra.mxu1 %v8041_v58  ;;  %3326 = vmatmul.bf16.vlgmr.msrb.gmra.mxu0 %v10810_v61  ;;  %v6922_v58 = vld [vmem:[#allocation6 + $0x330] sm:$0xf0]  ;;  %v6669_v60 = vor.u32 %v9420_v48, %v6666_v50 }
 0x178   : > { %v9696_v4 = vld [vmem:[#allocation6 + $0x9ac] sm:$0xf0]  ;;  %3374 = vmatpush.bf16.msra.mxu0 %v6765_v2  ;;  %v6925_v11 = vor.u32 %v9484_v59, %v6922_v58 }
 0x179   : > { %v8008_v5 = vld [vmem:[#allocation6 + $0xb90] sm:$0xf]  ;;  %v7753_v16 = vor.u32 %v9696_v4, %v7752_v3  ;;  %3367 = vmatpush.bf16.msra.mxu2 %v8073_v12  ;;  %v9412_v4 = vld [vmem:[#allocation6 + $0xd4] sm:$0xf] }
 0x17a   : > { %v9760_v7 = vld [vmem:[#allocation6 + $0xbac] sm:$0xf0] }
 0x17b   : > { %v8009_v20 = vor.u32 %v9760_v7, %v8008_v5  ;;  %v7720_v22 = vld [vmem:[#allocation6 + $0x950] sm:$0xf]  ;;  %3333 = vmatpush.bf16.msra.mxu3 %v7753_v16  ;;  %v6634_v5 = vld [vmem:[#allocation6 + $0xf0] sm:$0xf0]  ;;  %v3047_v7 = vpop.f32.mrf.mxu3 }
 0x17c   : > { %v9688_v23 = vld [vmem:[#allocation6 + $0x96c] sm:$0xf0]  ;;  %3375 = vmatpush.bf16.msra.mxu0 %v6733_v21  ;;  %v3048_v10 = vadd.f32 %v3047_v7, %v3034_v52  ;;  %v6890_v16 = vld [vmem:[#allocation6 + $0x2f0] sm:$0xf0]  ;;  %v6637_v19 = vor.u32 %v9412_v4, %v6634_v5 }
 0x17d   : > { %v7976_v24 = vld [vmem:[#allocation6 + $0xb50] sm:$0xf]  ;;  %3388 = vmatpush.bf16.msrb.mxu2 %v7021_v13  ;;  %v7721_v32 = vor.u32 %v9688_v23, %v7720_v22  ;;  %3347 = vmatpush.bf16.msra.mxu1 %v8009_v20  ;;  %v9476_v13 = vld [vmem:[#allocation6 + $0x2d4] sm:$0xf]  ;;  %v3061_v23 = vpop.f32.mrf.mxu2 }
 0x17e   : > { %v9752_v25 = vld [vmem:[#allocation6 + $0xb6c] sm:$0xf0]  ;;  %v10898_v27 = vadd.f32 %v3061_v23, %v3048_v10  ;;  %v9460_v52 = vld [vmem:[#allocation6 + $0x254] sm:$0xf] }
 0x17f   : > { %v7977_v36 = vor.u32 %v9752_v25, %v7976_v24  ;;  %v7688_v39 = vld [vmem:[#allocation6 + $0x910] sm:$0xf]  ;;  %3334 = vmatpush.bf16.msra.mxu3 %v7721_v32  ;;  %v9404_v25 = vld [vmem:[#allocation6 + $0x94] sm:$0xf] }
 0x180   : > { %v9680_v40 = vld [vmem:[#allocation6 + $0x92c] sm:$0xf0]  ;;  %3376 = vmatpush.bf16.msra.mxu0 %v6701_v37  ;;  %v9468_v32 = vld [vmem:[#allocation6 + $0x294] sm:$0xf]  ;;  %v6605_v35 = vor.u32 %v9404_v25, %v6602_v26 }
 0x181   : > { %v7944_v41 = vld [vmem:[#allocation6 + $0xb10] sm:$0xf]  ;;  %3389 = vmatpush.bf16.msrb.mxu2 %v6989_v30  ;;  %v7689_v54 = vor.u32 %v9680_v40, %v7688_v39  ;;  %3348 = vmatpush.bf16.msra.mxu1 %v7977_v36  ;;  %v6893_v30 = vor.u32 %v9476_v13, %v6890_v16  ;;  %v6861_v48 = vor.u32 %v9468_v32, %v6858_v33  ;;  %v7274_v4 = vld [vmem:[#allocation6 + $0x5f0] sm:$0xf0] }
 0x182   : > { %v9744_v47 = vld [vmem:[#allocation6 + $0xb2c] sm:$0xf0]  ;;  %v9636_v5 = vld [vmem:[#allocation6 + $0x7d4] sm:$0xf] }
 0x183   : > { %v7945_v8 = vor.u32 %v9744_v47, %v7944_v41  ;;  %v7656_v63 = vld [vmem:[#allocation6 + $0x8d0] sm:$0xf]  ;;  %3335 = vmatpush.bf16.msra.mxu3 %v7689_v54  ;;  %v9396_v41 = vld [vmem:[#allocation6 + $0x54] sm:$0xf]  ;;  %v10902_v47 = vpop.f32.mrf.mxu3 }
 0x184   : > { %v9672_v0 = vld [vmem:[#allocation6 + $0x8ec] sm:$0xf0]  ;;  %3377 = vmatpush.bf16.msra.mxu0 %v6669_v60  ;;  %v6573_v58 = vor.u32 %v9396_v41, %v6570_v45  ;;  %v7530_v7 = vld [vmem:[#allocation6 + $0x7f0] sm:$0xf0] }
 0x185   : > { %v7912_v2 = vld [vmem:[#allocation6 + $0xad0] sm:$0xf]  ;;  %3390 = vmatpush.bf16.msrb.mxu2 %v6957_v53  ;;  %v7657_v12 = vor.u32 %v9672_v0, %v7656_v63  ;;  %3349 = vmatpush.bf16.msra.mxu1 %v7945_v8  ;;  %v6826_v53 = vld [vmem:[#allocation6 + $0x270] sm:$0xf0] }
 0x186   : > { %v9736_v3 = vld [vmem:[#allocation6 + $0xaec] sm:$0xf0]  ;;  %8090 = vmatmul.msk.bf16.vlgmr.msra.gmra.mxu2 %vm2880_vm0, %v10822_v51  ;;  %v9388_v0 = vld [vmem:[#allocation6 + $0x14] sm:$0xf]  ;;  %v6829_v10 = vor.u32 %v9460_v52, %v6826_v53 }
 0x187   : > { %v7913_v18 = vor.u32 %v9736_v3, %v7912_v2  ;;  %v7624_v20 = vld [vmem:[#allocation6 + $0x890] sm:$0xf]  ;;  %3336 = vmatpush.bf16.msra.mxu3 %v7657_v12  ;;  %v6538_v2 = vld [vmem:[#allocation6 + $0x30] sm:$0xf0] }
 0x188   : > { %v9664_v21 = vld [vmem:[#allocation6 + $0x8ac] sm:$0xf0]  ;;  %3378 = vmatpush.bf16.msra.mxu0 %v6637_v19  ;;  %v9572_v3 = vld [vmem:[#allocation6 + $0x5d4] sm:$0xf] }
 0x189   : > { %v7880_v22 = vld [vmem:[#allocation6 + $0xa90] sm:$0xf]  ;;  %3391 = vmatpush.bf16.msrb.mxu2 %v6925_v11  ;;  %v7625_v31 = vor.u32 %v9664_v21, %v7624_v20  ;;  %3350 = vmatpush.bf16.msra.mxu1 %v7913_v18  ;;  %v9700_v12 = vld [vmem:[#allocation6 + $0x9d4] sm:$0xf]  ;;  %v6541_v18 = vor.u32 %v9388_v0, %v6538_v2  ;;  %v7277_v21 = vor.u32 %v9572_v3, %v7274_v4 }
 0x18a   : > { %v9728_v24 = vld [vmem:[#allocation6 + $0xaac] sm:$0xf0]  ;;  %v7786_v13 = vld [vmem:[#allocation6 + $0x9f0] sm:$0xf0] }
 0x18b   : > { %v7881_v34 = vor.u32 %v9728_v24, %v7880_v22  ;;  %v7592_v36 = vld [vmem:[#allocation6 + $0x850] sm:$0xf]  ;;  %3337 = vmatpush.bf16.msra.mxu3 %v7625_v31  ;;  %v9452_v19 = vld [vmem:[#allocation6 + $0x214] sm:$0xf]  ;;  %v7533_v22 = vor.u32 %v9636_v5, %v7530_v7  ;;  %v7789_v26 = vor.u32 %v9700_v12, %v7786_v13 }
 0x18c   : > { %v9656_v37 = vld [vmem:[#allocation6 + $0x86c] sm:$0xf0]  ;;  %3379 = vmatpush.bf16.msra.mxu0 %v6605_v35  ;;  %v6794_v20 = vld [vmem:[#allocation6 + $0x230] sm:$0xf0] }
 0x18d   : > { %v7848_v39 = vld [vmem:[#allocation6 + $0xa50] sm:$0xf]  ;;  %3392 = vmatpush.bf16.msrb.mxu2 %v6893_v30  ;;  %v7593_v50 = vor.u32 %v9656_v37, %v7592_v36  ;;  %3351 = vmatpush.bf16.msra.mxu1 %v7881_v34  ;;  %v9764_v23 = vld [vmem:[#allocation6 + $0xbd4] sm:$0xf]  ;;  %v3075_v30 = vpop.f32.mrf.mxu3  ;;  %v6797_v35 = vor.u32 %v9452_v19, %v6794_v20 }
 0x18e   : > { %v9720_v40 = vld [vmem:[#allocation6 + $0xa6c] sm:$0xf0]  ;;  %v8042_v24 = vld [vmem:[#allocation6 + $0xbf0] sm:$0xf0]  ;;  %v10905_v34 = vadd.f32 %v3075_v30, %v10898_v27 }
 0x18f   : > { %v7560_v54 = vld [vmem:[#allocation6 + $0x810] sm:$0xf]  ;;  %v7849_v59 = vor.u32 %v9720_v40, %v7848_v39  ;;  %3338 = vmatpush.bf16.msra.mxu3 %v7593_v50  ;;  %v9564_v25 = vld [vmem:[#allocation6 + $0x594] sm:$0xf]  ;;  %v8045_v39 = vor.u32 %v9764_v23, %v8042_v24 }
 0x190   : > { %v9648_v8 = vld [vmem:[#allocation6 + $0x82c] sm:$0xf0]  ;;  %3380 = vmatpush.bf16.msra.mxu0 %v6573_v58  ;;  %v7242_v31 = vld [vmem:[#allocation6 + $0x5b0] sm:$0xf0]  ;;  %11282 = vst [vmem:[#allocation25_spill] sm:$0xff] %v10905_v34 }
 0x191   : > { %v7816_v60 = vld [vmem:[#allocation6 + $0xa10] sm:$0xf]  ;;  %3393 = vmatpush.bf16.msrb.mxu2 %v6861_v48  ;;  %v7561_v11 = vor.u32 %v9648_v8, %v7560_v54  ;;  %3352 = vmatpush.bf16.msra.mxu1 %v7849_v59  ;;  %v9628_v32 = vld [vmem:[#allocation6 + $0x794] sm:$0xf]  ;;  %v7245_v40 = vor.u32 %v9564_v25, %v7242_v31  ;;  %v7090_v34 = vld [vmem:[#allocation6 + $0x478] sm:$0xf0] }
 0x192   : > { %v9712_v63 = vld [vmem:[#allocation6 + $0xa2c] sm:$0xf0]  ;;  %v7498_v33 = vld [vmem:[#allocation6 + $0x7b0] sm:$0xf0] }
 0x193   : > { %v7817_v16 = vor.u32 %v9712_v63, %v7816_v60  ;;  %3339 = vmatpush.bf16.msra.mxu3 %v7561_v11  ;;  %v9692_v36 = vld [vmem:[#allocation6 + $0x994] sm:$0xf]  ;;  %v7501_v41 = vor.u32 %v9628_v32, %v7498_v33 }
 0x194   : > { %v7754_v37 = vld [vmem:[#allocation6 + $0x9b0] sm:$0xf0]  ;;  %3381 = vmatpush.bf16.msra.mxu0 %v6541_v18 }
 0x195   : > { %3394 = vmatpush.bf16.msrb.mxu2 %v6829_v10  ;;  %3353 = vmatpush.bf16.msra.mxu1 %v7817_v16  ;;  %v9756_v45 = vld [vmem:[#allocation6 + $0xb94] sm:$0xf]  ;;  %v7757_v52 = vor.u32 %v9692_v36, %v7754_v37 }
 0x196   : > { %v8010_v48 = vld [vmem:[#allocation6 + $0xbb0] sm:$0xf0]  ;;  %3340 = vmatmul.bf16.vlgmr.msra.gmra.mxu3 %v10830_v38 }
 0x197   : > { %3402 = vmatpush.bf16.msrb.mxu3 %v7277_v21  ;;  %v9556_v50 = vld [vmem:[#allocation6 + $0x554] sm:$0xf]  ;;  %v8013_v8 = vor.u32 %v9756_v45, %v8010_v48  ;;  %3382 = vmatmul.bf16.vlgmr.msra.gmra.mxu0 %v10808_v56 }
 0x198   : > { %3430 = vmatpush.bf16.msrb.mxu0 %v7789_v26  ;;  %v7210_v53 = vld [vmem:[#allocation6 + $0x570] sm:$0xf0]  ;;  %3354 = vmatmul.bf16.vlgmr.msra.gmra.mxu1 %v10832_v43 }
 0x199   : > { %3416 = vmatpush.bf16.msrb.mxu1 %v7533_v22  ;;  %v9620_v27 = vld [vmem:[#allocation6 + $0x754] sm:$0xf]  ;;  %3395 = vmatpush.bf16.msrb.mxu2 %v6797_v35  ;;  %v7213_v60 = vor.u32 %v9556_v50, %v7210_v53 }
 0x19a   : > { %v7466_v54 = vld [vmem:[#allocation6 + $0x770] sm:$0xf0] }
 0x19b   : > { %v9684_v59 = vld [vmem:[#allocation6 + $0x954] sm:$0xf]  ;;  %3403 = vmatpush.bf16.msrb.mxu3 %v7245_v40  ;;  %v7469_v63 = vor.u32 %v9620_v27, %v7466_v54 }
 0x19c   : > { %v7722_v58 = vld [vmem:[#allocation6 + $0x970] sm:$0xf0]  ;;  %3431 = vmatpush.bf16.msrb.mxu0 %v7757_v52  ;;  %3396 = vmatmul.bf16.vlgmr.msrb.gmra.mxu2 %v10816_v9 }
 0x19d   : > { %3444 = vmatpush.bf16.msra.mxu2 %v8045_v39  ;;  %3417 = vmatpush.bf16.msrb.mxu1 %v7501_v41  ;;  %v9748_v0 = vld [vmem:[#allocation6 + $0xb54] sm:$0xf]  ;;  %v7725_v4 = vor.u32 %v9684_v59, %v7722_v58 }
 0x19e   : > { %v7978_v2 = vld [vmem:[#allocation6 + $0xb70] sm:$0xf0] }
 0x19f   : > { %v9548_v3 = vld [vmem:[#allocation6 + $0x514] sm:$0xf]  ;;  %v7981_v13 = vor.u32 %v9748_v0, %v7978_v2  ;;  %3404 = vmatpush.bf16.msrb.mxu3 %v7213_v60 }
 0x1a0   : > { %v7178_v5 = vld [vmem:[#allocation6 + $0x530] sm:$0xf0]  ;;  %3432 = vmatpush.bf16.msrb.mxu0 %v7725_v4 }
 0x1a1   : > { %v9612_v7 = vld [vmem:[#allocation6 + $0x714] sm:$0xf]  ;;  %3445 = vmatpush.bf16.msra.mxu2 %v8013_v8  ;;  %3418 = vmatpush.bf16.msrb.mxu1 %v7469_v63  ;;  %v7181_v16 = vor.u32 %v9548_v3, %v7178_v5 }
 0x1a2   : > { %v7434_v10 = vld [vmem:[#allocation6 + $0x730] sm:$0xf0] }
 0x1a3   : > { %v9676_v11 = vld [vmem:[#allocation6 + $0x914] sm:$0xf]  ;;  %v7437_v18 = vor.u32 %v9612_v7, %v7434_v10  ;;  %3405 = vmatpush.bf16.msrb.mxu3 %v7181_v16 }
 0x1a4   : > { %v7690_v12 = vld [vmem:[#allocation6 + $0x930] sm:$0xf0] }
 0x1a5   : > { %v9740_v19 = vld [vmem:[#allocation6 + $0xb14] sm:$0xf]  ;;  %v7693_v22 = vor.u32 %v9676_v11, %v7690_v12  ;;  %3446 = vmatpush.bf16.msra.mxu2 %v7981_v13  ;;  %3419 = vmatpush.bf16.msrb.mxu1 %v7437_v18 }
 0x1a6   : > { %v7946_v20 = vld [vmem:[#allocation6 + $0xb30] sm:$0xf0] }
 0x1a7   : > { %v9540_v21 = vld [vmem:[#allocation6 + $0x4d4] sm:$0xf]  ;;  %v7949_v31 = vor.u32 %v9740_v19, %v7946_v20  ;;  %3433 = vmatpush.bf16.msrb.mxu0 %v7693_v22  ;;  %v6768_v22 = vld [vmem:[#allocation6 + $0x1d8] sm:$0xf] }
 0x1a8   : > { %v7146_v23 = vld [vmem:[#allocation6 + $0x4f0] sm:$0xf0] }
 0x1a9   : > { %v9604_v24 = vld [vmem:[#allocation6 + $0x6d4] sm:$0xf]  ;;  %v7149_v32 = vor.u32 %v9540_v21, %v7146_v23  ;;  %3447 = vmatpush.bf16.msra.mxu2 %v7949_v31  ;;  %v9449_v23 = vld [vmem:[#allocation6 + $0x1f4] sm:$0xf0] }
 0x1aa   : > { %v7402_v25 = vld [vmem:[#allocation6 + $0x6f0] sm:$0xf0] }
 0x1ab   : > { %v9668_v26 = vld [vmem:[#allocation6 + $0x8d4] sm:$0xf]  ;;  %v7405_v33 = vor.u32 %v9604_v24, %v7402_v25  ;;  %3406 = vmatpush.bf16.msrb.mxu3 %v7149_v32  ;;  %v7280_v24 = vld [vmem:[#allocation6 + $0x5d8] sm:$0xf] }
 0x1ac   : > { %v7658_v30 = vld [vmem:[#allocation6 + $0x8f0] sm:$0xf0] }
 0x1ad   : > { %v9732_v35 = vld [vmem:[#allocation6 + $0xad4] sm:$0xf]  ;;  %v7661_v39 = vor.u32 %v9668_v26, %v7658_v30  ;;  %3420 = vmatpush.bf16.msrb.mxu1 %v7405_v33  ;;  %v9577_v26 = vld [vmem:[#allocation6 + $0x5f4] sm:$0xf0] }
 0x1ae   : > { %v7914_v36 = vld [vmem:[#allocation6 + $0xaf0] sm:$0xf0] }
 0x1af   : > { %v9532_v37 = vld [vmem:[#allocation6 + $0x494] sm:$0xf]  ;;  %v7917_v52 = vor.u32 %v9732_v35, %v7914_v36  ;;  %3434 = vmatpush.bf16.msrb.mxu0 %v7661_v39 }
 0x1b0   : > { %v7114_v40 = vld [vmem:[#allocation6 + $0x4b0] sm:$0xf0] }
 0x1b1   : > { %v9596_v41 = vld [vmem:[#allocation6 + $0x694] sm:$0xf]  ;;  %v7117_v53 = vor.u32 %v9532_v37, %v7114_v40  ;;  %3448 = vmatpush.bf16.msra.mxu2 %v7917_v52  ;;  %v7024_v37 = vld [vmem:[#allocation6 + $0x3d8] sm:$0xf]  ;;  %v6769_v40 = vor.u32 %v9449_v23, %v6768_v22 }
 0x1b2   : > { %v7370_v45 = vld [vmem:[#allocation6 + $0x6b0] sm:$0xf0]  ;;  %v9625_v22 = vld [vmem:[#allocation6 + $0x774] sm:$0xf0] }
 0x1b3   : > { %v9660_v48 = vld [vmem:[#allocation6 + $0x894] sm:$0xf]  ;;  %v7373_v27 = vor.u32 %v9596_v41, %v7370_v45  ;;  %3407 = vmatpush.bf16.msrb.mxu3 %v7117_v53  ;;  %v9513_v41 = vld [vmem:[#allocation6 + $0x3f4] sm:$0xf0] }
 0x1b4   : > { %v7626_v50 = vld [vmem:[#allocation6 + $0x8b0] sm:$0xf0]  ;;  %v7536_v45 = vld [vmem:[#allocation6 + $0x7d8] sm:$0xf] }
 0x1b5   : > { %v9724_v54 = vld [vmem:[#allocation6 + $0xa94] sm:$0xf]  ;;  %v7629_v8 = vor.u32 %v9660_v48, %v7626_v50  ;;  %3421 = vmatpush.bf16.msrb.mxu1 %v7373_v27  ;;  %v9641_v48 = vld [vmem:[#allocation6 + $0x7f4] sm:$0xf0]  ;;  %v7281_v50 = vor.u32 %v9577_v26, %v7280_v24 }
 0x1b6   : > { %v7882_v59 = vld [vmem:[#allocation6 + $0xab0] sm:$0xf0]  ;;  %v6736_v53 = vld [vmem:[#allocation6 + $0x198] sm:$0xf] }
 0x1b7   : > { %v9524_v58 = vld [vmem:[#allocation6 + $0x454] sm:$0xf]  ;;  %v7885_v4 = vor.u32 %v9724_v54, %v7882_v59  ;;  %3435 = vmatpush.bf16.msrb.mxu0 %v7629_v8  ;;  %v9441_v27 = vld [vmem:[#allocation6 + $0x1b4] sm:$0xf0]  ;;  %v7025_v8 = vor.u32 %v9513_v41, %v7024_v37 }
 0x1b8   : > { %v7082_v60 = vld [vmem:[#allocation6 + $0x470] sm:$0xf0]  ;;  %v7248_v59 = vld [vmem:[#allocation6 + $0x598] sm:$0xf] }
 0x1b9   : > { %v9588_v63 = vld [vmem:[#allocation6 + $0x654] sm:$0xf]  ;;  %v7085_v10 = vor.u32 %v9524_v58, %v7082_v60  ;;  %3449 = vmatpush.bf16.msra.mxu2 %v7885_v4  ;;  %v9569_v58 = vld [vmem:[#allocation6 + $0x5b4] sm:$0xf0]  ;;  %v7537_v60 = vor.u32 %v9641_v48, %v7536_v45 }
 0x1ba   : > { %v7338_v0 = vld [vmem:[#allocation6 + $0x670] sm:$0xf0]  ;;  %v9633_v4 = vld [vmem:[#allocation6 + $0x7b4] sm:$0xf0] }
 0x1bb   : > { %v9652_v2 = vld [vmem:[#allocation6 + $0x854] sm:$0xf]  ;;  %v7341_v11 = vor.u32 %v9588_v63, %v7338_v0  ;;  %3408 = vmatpush.bf16.msrb.mxu3 %v7085_v10  ;;  %v6992_v63 = vld [vmem:[#allocation6 + $0x398] sm:$0xf]  ;;  %v6737_v0 = vor.u32 %v9441_v27, %v6736_v53 }
 0x1bc   : > { %v7594_v3 = vld [vmem:[#allocation6 + $0x870] sm:$0xf0]  ;;  %v9433_v10 = vld [vmem:[#allocation6 + $0x174] sm:$0xf0] }
 0x1bd   : > { %v9716_v5 = vld [vmem:[#allocation6 + $0xa54] sm:$0xf]  ;;  %v7597_v18 = vor.u32 %v9652_v2, %v7594_v3  ;;  %3422 = vmatpush.bf16.msrb.mxu1 %v7341_v11  ;;  %v9505_v2 = vld [vmem:[#allocation6 + $0x3b4] sm:$0xf0] }
 0x1be   : > { %v7850_v7 = vld [vmem:[#allocation6 + $0xa70] sm:$0xf0]  ;;  %v7504_v3 = vld [vmem:[#allocation6 + $0x798] sm:$0xf] }
 0x1bf   : > { %v9516_v12 = vld [vmem:[#allocation6 + $0x414] sm:$0xf]  ;;  %v7853_v25 = vor.u32 %v9716_v5, %v7850_v7  ;;  %3436 = vmatpush.bf16.msrb.mxu0 %v7597_v18  ;;  %v7249_v5 = vor.u32 %v9569_v58, %v7248_v59  ;;  %v6704_v7 = vld [vmem:[#allocation6 + $0x158] sm:$0xf] }
 0x1c0   : > { %v7050_v13 = vld [vmem:[#allocation6 + $0x430] sm:$0xf0]  ;;  %v7216_v11 = vld [vmem:[#allocation6 + $0x558] sm:$0xf] }
 0x1c1   : > { %v9580_v16 = vld [vmem:[#allocation6 + $0x614] sm:$0xf]  ;;  %v7053_v32 = vor.u32 %v9516_v12, %v7050_v13  ;;  %3450 = vmatpush.bf16.msra.mxu2 %v7853_v25  ;;  %v9561_v12 = vld [vmem:[#allocation6 + $0x574] sm:$0xf0]  ;;  %v6993_v13 = vor.u32 %v9505_v2, %v6992_v63 }
 0x1c2   : > { %v7306_v19 = vld [vmem:[#allocation6 + $0x630] sm:$0xf0]  ;;  %v6960_v18 = vld [vmem:[#allocation6 + $0x358] sm:$0xf]  ;;  %v7217_v23 = vor.u32 %v9561_v12, %v7216_v11 }
 0x1c3   : > { %v9644_v20 = vld [vmem:[#allocation6 + $0x814] sm:$0xf]  ;;  %v7309_v33 = vor.u32 %v9580_v16, %v7306_v19  ;;  %3409 = vmatpush.bf16.msrb.mxu3 %v7053_v32  ;;  %v7505_v16 = vor.u32 %v9633_v4, %v7504_v3  ;;  %v6705_v19 = vor.u32 %v9433_v10, %v6704_v7  ;;  %v6672_v24 = vld [vmem:[#allocation6 + $0x118] sm:$0xf] }
 0x1c4   : > { %v7562_v21 = vld [vmem:[#allocation6 + $0x830] sm:$0xf0]  ;;  %v9425_v25 = vld [vmem:[#allocation6 + $0x134] sm:$0xf0] }
 0x1c5   : > { %v9772_v30 = vld [vmem:[#allocation6 + $0xc14] sm:$0xf]  ;;  %v7565_v39 = vor.u32 %v9644_v20, %v7562_v21  ;;  %3423 = vmatpush.bf16.msrb.mxu1 %v7309_v33  ;;  %v9497_v20 = vld [vmem:[#allocation6 + $0x374] sm:$0xf0] }
 0x1c6   : > { %v8074_v31 = vld [vmem:[#allocation6 + $0xc30] sm:$0xf0]  ;;  %3410 = vmatmul.bf16.vlgmr.msrb.gmra.mxu3 %v10806_v55  ;;  %v7472_v21 = vld [vmem:[#allocation6 + $0x758] sm:$0xf] }
 0x1c7   : > { %v9708_v35 = vld [vmem:[#allocation6 + $0xa14] sm:$0xf]  ;;  %v8077_v52 = vor.u32 %v9772_v30, %v8074_v31  ;;  %3437 = vmatpush.bf16.msrb.mxu0 %v7565_v39  ;;  %v7184_v26 = vld [vmem:[#allocation6 + $0x518] sm:$0xf]  ;;  %v6961_v31 = vor.u32 %v9497_v20, %v6960_v18  ;;  %v7473_v32 = vor.u32 %v9625_v22, %v7472_v21 }
 0x1c8   : > { %v7818_v36 = vld [vmem:[#allocation6 + $0xa30] sm:$0xf0]  ;;  %3424 = vmatmul.bf16.vlgmr.msrb.gmra.mxu1 %v10810_v61  ;;  %v9553_v30 = vld [vmem:[#allocation6 + $0x534] sm:$0xf0] }
 0x1c9   : > { %v7821_v54 = vor.u32 %v9708_v35, %v7818_v36  ;;  %3472 = vmatpush.bf16.msra.mxu1 %v6769_v40  ;;  %3465 = vmatpush.bf16.msra.mxu3 %v8077_v52  ;;  %v6928_v33 = vld [vmem:[#allocation6 + $0x318] sm:$0xf]  ;;  %v6673_v35 = vor.u32 %v9425_v25, %v6672_v24  ;;  %v7185_v40 = vor.u32 %v9553_v30, %v7184_v26 }
 0x1ca   : > { %3438 = vmatmul.bf16.vlgmr.msrb.gmra.mxu0 %v10830_v38  ;;  %v9489_v36 = vld [vmem:[#allocation6 + $0x334] sm:$0xf0] }
 0x1cb   : > { %3500 = vmatpush.bf16.msra.mxu0 %v7281_v50  ;;  %3451 = vmatpush.bf16.msra.mxu2 %v7821_v54  ;;  %v7440_v37 = vld [vmem:[#allocation6 + $0x718] sm:$0xf]  ;;  %v6929_v52 = vor.u32 %v9489_v36, %v6928_v33 }
 0x1cc   : > { %v9617_v39 = vld [vmem:[#allocation6 + $0x734] sm:$0xf0] }
 0x1cd   : > { %3486 = vmatpush.bf16.msrb.mxu3 %v7025_v8  ;;  %3473 = vmatpush.bf16.msra.mxu1 %v6737_v0  ;;  %v6640_v41 = vld [vmem:[#allocation6 + $0xd8] sm:$0xf]  ;;  %v7441_v53 = vor.u32 %v9617_v39, %v7440_v37 }
 0x1ce   : > { %3452 = vmatmul.bf16.vlgmr.msra.gmra.mxu2 %v10832_v43  ;;  %v9417_v45 = vld [vmem:[#allocation6 + $0xf4] sm:$0xf0] }
 0x1cf   : > { %3514 = vmatpush.bf16.msrb.mxu2 %v7537_v60  ;;  %3501 = vmatpush.bf16.msra.mxu0 %v7249_v5  ;;  %v7152_v48 = vld [vmem:[#allocation6 + $0x4d8] sm:$0xf]  ;;  %v6641_v54 = vor.u32 %v9417_v45, %v6640_v41 }
 0x1d0   : > { %v9545_v50 = vld [vmem:[#allocation6 + $0x4f4] sm:$0xf0] }
 0x1d1   : > { %3487 = vmatpush.bf16.msrb.mxu3 %v6993_v13  ;;  %3474 = vmatpush.bf16.msra.mxu1 %v6705_v19  ;;  %v6896_v27 = vld [vmem:[#allocation6 + $0x2d8] sm:$0xf]  ;;  %v7153_v60 = vor.u32 %v9545_v50, %v7152_v48  ;;  %v10921_v48 = vpop.f32.mrf.mxu2 }
 0x1d2   : > { %v9481_v59 = vld [vmem:[#allocation6 + $0x2f4] sm:$0xf0] }
 0x1d3   : > { %3515 = vmatpush.bf16.msrb.mxu2 %v7505_v16  ;;  %3502 = vmatpush.bf16.msra.mxu0 %v7217_v23  ;;  %v7408_v58 = vld [vmem:[#allocation6 + $0x6d8] sm:$0xf]  ;;  %v6897_v4 = vor.u32 %v9481_v59, %v6896_v27  ;;  %v10915_v16 = vpop.f32.mrf.mxu1  ;;  %v10919_v23 = vpop.f32.mrf.mxu0 }
 0x1d4   : > { %v9609_v8 = vld [vmem:[#allocation6 + $0x6f4] sm:$0xf0] }
 0x1d5   : > { %3488 = vmatpush.bf16.msrb.mxu3 %v6961_v31  ;;  %3475 = vmatpush.bf16.msra.mxu1 %v6673_v35  ;;  %v6608_v63 = vld [vmem:[#allocation6 + $0x98] sm:$0xf]  ;;  %v7409_v5 = vor.u32 %v9609_v8, %v7408_v58 }
 0x1d6   : > { %v9409_v0 = vld [vmem:[#allocation6 + $0xb4] sm:$0xf0]  ;;  %8091 = vmatmul.msk.bf16.vlgmr.msra.gmra.mxu3 %vm2880_vm0, %v10822_v51 }
 0x1d7   : > { %3516 = vmatpush.bf16.msrb.mxu2 %v7473_v32  ;;  %3503 = vmatpush.bf16.msra.mxu0 %v7185_v40  ;;  %v7120_v2 = vld [vmem:[#allocation6 + $0x498] sm:$0xf]  ;;  %v6609_v10 = vor.u32 %v9409_v0, %v6608_v63 }
 0x1d8   : > { %v9537_v3 = vld [vmem:[#allocation6 + $0x4b4] sm:$0xf0] }
 0x1d9   : > { %3489 = vmatpush.bf16.msrb.mxu3 %v6929_v52  ;;  %v6864_v7 = vld [vmem:[#allocation6 + $0x298] sm:$0xf]  ;;  %3476 = vmatpush.bf16.msra.mxu1 %v6641_v54  ;;  %v7121_v18 = vor.u32 %v9537_v3, %v7120_v2 }
 0x1da   : > { %v9473_v11 = vld [vmem:[#allocation6 + $0x2b4] sm:$0xf0] }
 0x1db   : > { %3517 = vmatpush.bf16.msrb.mxu2 %v7441_v53  ;;  %v7376_v12 = vld [vmem:[#allocation6 + $0x698] sm:$0xf]  ;;  %3504 = vmatpush.bf16.msra.mxu0 %v7153_v60  ;;  %v6865_v24 = vor.u32 %v9473_v11, %v6864_v7  ;;  %v10923_v63 = vpop.f32.mrf.mxu1  ;;  %v9509_v11 = vld [vmem:[#allocation6 + $0x3dc] sm:$0xf] }
 0x1dc   : > { %v9601_v13 = vld [vmem:[#allocation6 + $0x6b4] sm:$0xf0] }
 0x1dd   : > { %v6576_v19 = vld [vmem:[#allocation6 + $0x58] sm:$0xf]  ;;  %3490 = vmatpush.bf16.msrb.mxu3 %v6897_v4  ;;  %v7377_v25 = vor.u32 %v9601_v13, %v7376_v12  ;;  %3477 = vmatpush.bf16.msra.mxu1 %v6609_v10  ;;  %v6770_v10 = vld [vmem:[#allocation6 + $0x1f8] sm:$0xf0]  ;;  %v10925_v13 = vpop.f32.mrf.mxu0 }
 0x1de   : > { %v9401_v20 = vld [vmem:[#allocation6 + $0x74] sm:$0xf0]  ;;  %v7026_v12 = vld [vmem:[#allocation6 + $0x3f8] sm:$0xf0] }
 0x1df   : > { %v7088_v21 = vld [vmem:[#allocation6 + $0x458] sm:$0xf]  ;;  %3518 = vmatpush.bf16.msrb.mxu2 %v7409_v5  ;;  %v6577_v30 = vor.u32 %v9401_v20, %v6576_v19  ;;  %3505 = vmatpush.bf16.msra.mxu0 %v7121_v18  ;;  %v9445_v5 = vld [vmem:[#allocation6 + $0x1dc] sm:$0xf] }
 0x1e0   : > { %v9529_v22 = vld [vmem:[#allocation6 + $0x474] sm:$0xf0] }
 0x1e1   : > { %v6832_v26 = vld [vmem:[#allocation6 + $0x258] sm:$0xf]  ;;  %v7089_v35 = vor.u32 %v9529_v22, %v7088_v21  ;;  %3491 = vmatpush.bf16.msrb.mxu3 %v6865_v24  ;;  %3478 = vmatpush.bf16.msra.mxu1 %v6577_v30  ;;  %v6773_v24 = vor.u32 %v9445_v5, %v6770_v10 }
 0x1e2   : > { %v9465_v31 = vld [vmem:[#allocation6 + $0x274] sm:$0xf0] }
 0x1e3   : > { %v7344_v32 = vld [vmem:[#allocation6 + $0x658] sm:$0xf]  ;;  %3519 = vmatpush.bf16.msrb.mxu2 %v7377_v25  ;;  %v6833_v50 = vor.u32 %v9465_v31, %v6832_v26  ;;  %3506 = vmatpush.bf16.msra.mxu0 %v7089_v35  ;;  %v7029_v25 = vor.u32 %v9509_v11, %v7026_v12  ;;  %v9437_v31 = vld [vmem:[#allocation6 + $0x19c] sm:$0xf] }
 0x1e4   : > { %v9593_v33 = vld [vmem:[#allocation6 + $0x674] sm:$0xf0]  ;;  %v9501_v35 = vld [vmem:[#allocation6 + $0x39c] sm:$0xf] }
 0x1e5   : > { %v6544_v36 = vld [vmem:[#allocation6 + $0x18] sm:$0xf]  ;;  %v7345_v52 = vor.u32 %v9593_v33, %v7344_v32  ;;  %3492 = vmatpush.bf16.msrb.mxu3 %v6833_v50  ;;  %v6738_v33 = vld [vmem:[#allocation6 + $0x1b8] sm:$0xf0]  ;;  %v10937_v5 = vpop.f32.mrf.mxu0 }
 0x1e6   : > { %v9393_v37 = vld [vmem:[#allocation6 + $0x34] sm:$0xf0]  ;;  %v6741_v50 = vor.u32 %v9437_v31, %v6738_v33 }
 0x1e7   : > { %v7056_v39 = vld [vmem:[#allocation6 + $0x418] sm:$0xf]  ;;  %v6545_v59 = vor.u32 %v9393_v37, %v6544_v36  ;;  %3520 = vmatpush.bf16.msrb.mxu2 %v7345_v52  ;;  %v6994_v36 = vld [vmem:[#allocation6 + $0x3b8] sm:$0xf0]  ;;  %v10927_v37 = vpop.f32.mrf.mxu2 }
 0x1e8   : > { %v9521_v40 = vld [vmem:[#allocation6 + $0x434] sm:$0xf0]  ;;  %11283 = vst [vmem:[#allocation26_spill] sm:$0xff] %v10927_v37  ;;  %v6997_v52 = vor.u32 %v9501_v35, %v6994_v36  ;;  %v9413_v36 = vld [vmem:[#allocation6 + $0xdc] sm:$0xf] }
 0x1e9   : > { %v7792_v41 = vld [vmem:[#allocation6 + $0x9d8] sm:$0xf]  ;;  %v7057_v0 = vor.u32 %v9521_v40, %v7056_v39  ;;  %3479 = vmatpush.bf16.msra.mxu1 %v6545_v59 }
 0x1ea   : > { %v9705_v45 = vld [vmem:[#allocation6 + $0x9f4] sm:$0xf0] }
 0x1eb   : > { %v6800_v53 = vld [vmem:[#allocation6 + $0x218] sm:$0xf]  ;;  %v7793_v2 = vor.u32 %v9705_v45, %v7792_v41  ;;  %3507 = vmatpush.bf16.msra.mxu0 %v7057_v0  ;;  %v10930_v45 = vpop.f32.mrf.mxu3  ;;  %v10933_v0 = vpop.f32.mrf.mxu1 }
 0x1ec   : > { %v8080_v27 = vld [vmem:[#allocation6 + $0xc18] sm:$0xf]  ;;  %11284 = vst [vmem:[#allocation27_spill] sm:$0xff] %v10930_v45  ;;  %3480 = vmatmul.bf16.vlgmr.msra.gmra.mxu1 %v10808_v56  ;;  %v8336_v45 = vld [vmem:[#allocation9 + $0x1e0] sm:$0xf] }
 0x1ed   : > { %v9777_v54 = vld [vmem:[#allocation6 + $0xc34] sm:$0xf0]  ;;  %3528 = vmatpush.bf16.msrb.mxu1 %v7793_v2 }
 0x1ee   : > { %v9457_v58 = vld [vmem:[#allocation6 + $0x234] sm:$0xf0]  ;;  %v8081_v7 = vor.u32 %v9777_v54, %v8080_v27  ;;  %3508 = vmatmul.bf16.vlgmr.msra.gmra.mxu0 %v10806_v55  ;;  %v9429_v54 = vld [vmem:[#allocation6 + $0x15c] sm:$0xf] }
 0x1ef   : > { %v7312_v8 = vld [vmem:[#allocation6 + $0x618] sm:$0xf]  ;;  %v6801_v18 = vor.u32 %v9457_v58, %v6800_v53  ;;  %v6706_v58 = vld [vmem:[#allocation6 + $0x178] sm:$0xf0] }
 0x1f0   : > { %v9585_v60 = vld [vmem:[#allocation6 + $0x634] sm:$0xf0]  ;;  %3563 = vmatpush.bf16.msrb.mxu0 %v8081_v7  ;;  %v6709_v7 = vor.u32 %v9429_v54, %v6706_v58  ;;  %v10945_v58 = vpop.f32.mrf.mxu0 }
 0x1f1   : > { %v8048_v3 = vld [vmem:[#allocation6 + $0xbd8] sm:$0xf]  ;;  %v7313_v19 = vor.u32 %v9585_v60, %v7312_v8  ;;  %3493 = vmatpush.bf16.msrb.mxu3 %v6801_v18  ;;  %v9493_v8 = vld [vmem:[#allocation6 + $0x35c] sm:$0xf]  ;;  %11286 = vst [vmem:[#allocation29_spill] sm:$0xff] %v10945_v58 }
 0x1f2   : > { %v9769_v4 = vld [vmem:[#allocation6 + $0xbf4] sm:$0xf0]  ;;  %v6962_v60 = vld [vmem:[#allocation6 + $0x378] sm:$0xf0] }
 0x1f3   : > { %v7760_v20 = vld [vmem:[#allocation6 + $0x998] sm:$0xf]  ;;  %v8049_v22 = vor.u32 %v9769_v4, %v8048_v3  ;;  %3521 = vmatpush.bf16.msrb.mxu2 %v7313_v19  ;;  %v6965_v10 = vor.u32 %v9493_v8, %v6962_v60  ;;  %v9421_v18 = vld [vmem:[#allocation6 + $0x11c] sm:$0xf] }
 0x1f4   : > { %v9697_v21 = vld [vmem:[#allocation6 + $0x9b4] sm:$0xf0]  ;;  %3584 = vmatpush.bf16.msra.mxu0 %v7029_v25  ;;  %3494 = vmatmul.bf16.vlgmr.msrb.gmra.mxu3 %v10816_v9  ;;  %v7506_v58 = vld [vmem:[#allocation6 + $0x7b8] sm:$0xf0] }
 0x1f5   : > { %v8016_v26 = vld [vmem:[#allocation6 + $0xb98] sm:$0xf]  ;;  %v7761_v32 = vor.u32 %v9697_v21, %v7760_v20  ;;  %3542 = vmatpush.bf16.msra.mxu3 %v8049_v22  ;;  %v6674_v20 = vld [vmem:[#allocation6 + $0x138] sm:$0xf0] }
 0x1f6   : > { %v9761_v30 = vld [vmem:[#allocation6 + $0xbb4] sm:$0xf0]  ;;  %3522 = vmatmul.bf16.vlgmr.msrb.gmra.mxu2 %v10810_v61  ;;  %v9485_v21 = vld [vmem:[#allocation6 + $0x31c] sm:$0xf]  ;;  %v6677_v31 = vor.u32 %v9421_v18, %v6674_v20 }
 0x1f7   : > { %v7728_v39 = vld [vmem:[#allocation6 + $0x958] sm:$0xf]  ;;  %v8017_v41 = vor.u32 %v9761_v30, %v8016_v26  ;;  %3570 = vmatpush.bf16.msra.mxu2 %v6773_v24  ;;  %3529 = vmatpush.bf16.msrb.mxu1 %v7761_v32  ;;  %v6930_v22 = vld [vmem:[#allocation6 + $0x338] sm:$0xf0]  ;;  %v10939_v30 = vpop.f32.mrf.mxu2 }
 0x1f8   : > { %v9689_v40 = vld [vmem:[#allocation6 + $0x974] sm:$0xf0]  ;;  %3585 = vmatpush.bf16.msra.mxu0 %v6997_v52  ;;  %v6933_v32 = vor.u32 %v9485_v21, %v6930_v22  ;;  %v10941_v52 = vpop.f32.mrf.mxu3 }
 0x1f9   : > { %v7984_v53 = vld [vmem:[#allocation6 + $0xb58] sm:$0xf]  ;;  %v7729_v59 = vor.u32 %v9689_v40, %v7728_v39  ;;  %3543 = vmatpush.bf16.msra.mxu3 %v8017_v41  ;;  %v6642_v40 = vld [vmem:[#allocation6 + $0xf8] sm:$0xf0] }
 0x1fa   : > { %v9753_v27 = vld [vmem:[#allocation6 + $0xb74] sm:$0xf0]  ;;  %v9477_v41 = vld [vmem:[#allocation6 + $0x2dc] sm:$0xf]  ;;  %v6645_v8 = vor.u32 %v9413_v36, %v6642_v40 }
 0x1fb   : > { %v7696_v2 = vld [vmem:[#allocation6 + $0x918] sm:$0xf]  ;;  %v7985_v4 = vor.u32 %v9753_v27, %v7984_v53  ;;  %3571 = vmatpush.bf16.msra.mxu2 %v6741_v50  ;;  %3530 = vmatpush.bf16.msrb.mxu1 %v7729_v59  ;;  %v6898_v50 = vld [vmem:[#allocation6 + $0x2f8] sm:$0xf0]  ;;  %v10943_v53 = vpop.f32.mrf.mxu1 }
 0x1fc   : > { %v9681_v3 = vld [vmem:[#allocation6 + $0x934] sm:$0xf0]  ;;  %3586 = vmatpush.bf16.msra.mxu0 %v6965_v10  ;;  %11285 = vst [vmem:[#allocation28_spill] sm:$0xff] %v10943_v53  ;;  %v6901_v60 = vor.u32 %v9477_v41, %v6898_v50  ;;  %v6610_v10 = vld [vmem:[#allocation6 + $0xb8] sm:$0xf0] }
 0x1fd   : > { %v7952_v11 = vld [vmem:[#allocation6 + $0xb18] sm:$0xf]  ;;  %v7697_v19 = vor.u32 %v9681_v3, %v7696_v2  ;;  %3544 = vmatpush.bf16.msra.mxu3 %v7985_v4  ;;  %v9405_v4 = vld [vmem:[#allocation6 + $0x9c] sm:$0xf] }
 0x1fe   : > { %v9745_v12 = vld [vmem:[#allocation6 + $0xb34] sm:$0xf0]  ;;  %8092 = vmatmul.msk.bf16.vlgmr.msrb.gmra.mxu0 %vm2880_vm0, %v10822_v51  ;;  %v6613_v22 = vor.u32 %v9405_v4, %v6610_v10  ;;  %v6834_v36 = vld [vmem:[#allocation6 + $0x278] sm:$0xf0] }
 0x1ff   : > { %v7664_v24 = vld [vmem:[#allocation6 + $0x8d8] sm:$0xf]  ;;  %v7953_v26 = vor.u32 %v9745_v12, %v7952_v11  ;;  %3572 = vmatpush.bf16.msra.mxu2 %v6709_v7  ;;  %3531 = vmatpush.bf16.msrb.mxu1 %v7697_v19  ;;  %v9469_v11 = vld [vmem:[#allocation6 + $0x29c] sm:$0xf]  ;;  %v10949_v21 = vpop.f32.mrf.mxu2 }
 0x200   : > { %v9673_v25 = vld [vmem:[#allocation6 + $0x8f4] sm:$0xf0]  ;;  %3587 = vmatpush.bf16.msra.mxu0 %v6933_v32  ;;  %v6866_v12 = vld [vmem:[#allocation6 + $0x2b8] sm:$0xf0] }
 0x201   : > { %v7920_v33 = vld [vmem:[#allocation6 + $0xad8] sm:$0xf]  ;;  %v7665_v39 = vor.u32 %v9673_v25, %v7664_v24  ;;  %3545 = vmatpush.bf16.msra.mxu3 %v7953_v26  ;;  %v6869_v24 = vor.u32 %v9469_v11, %v6866_v12  ;;  %v9573_v50 = vld [vmem:[#allocation6 + $0x5dc] sm:$0xf] }
 0x202   : > { %v9737_v35 = vld [vmem:[#allocation6 + $0xaf4] sm:$0xf0]  ;;  %v9389_v4 = vld [vmem:[#allocation6 + $0x1c] sm:$0xf] }
 0x203   : > { %v7632_v27 = vld [vmem:[#allocation6 + $0x898] sm:$0xf]  ;;  %v7921_v59 = vor.u32 %v9737_v35, %v7920_v33  ;;  %3573 = vmatpush.bf16.msra.mxu2 %v6677_v31  ;;  %3532 = vmatpush.bf16.msrb.mxu1 %v7665_v39  ;;  %v9397_v31 = vld [vmem:[#allocation6 + $0x5c] sm:$0xf] }
 0x204   : > { %v9665_v54 = vld [vmem:[#allocation6 + $0x8b4] sm:$0xf0]  ;;  %3588 = vmatpush.bf16.msra.mxu0 %v6901_v60  ;;  %v6578_v33 = vld [vmem:[#allocation6 + $0x78] sm:$0xf0] }
 0x205   : > { %v7888_v2 = vld [vmem:[#allocation6 + $0xa98] sm:$0xf]  ;;  %v7633_v7 = vor.u32 %v9665_v54, %v7632_v27  ;;  %3546 = vmatpush.bf16.msra.mxu3 %v7921_v59  ;;  %v9461_v35 = vld [vmem:[#allocation6 + $0x25c] sm:$0xf]  ;;  %v10951_v54 = vpop.f32.mrf.mxu3  ;;  %v10953_v59 = vpop.f32.mrf.mxu1 }
 0x206   : > { %v9729_v3 = vld [vmem:[#allocation6 + $0xab4] sm:$0xf0]  ;;  %v7282_v27 = vld [vmem:[#allocation6 + $0x5f8] sm:$0xf0]  ;;  %v6837_v60 = vor.u32 %v9461_v35, %v6834_v36 }
 0x207   : > { %v7600_v18 = vld [vmem:[#allocation6 + $0x858] sm:$0xf]  ;;  %v7889_v20 = vor.u32 %v9729_v3, %v7888_v2  ;;  %3574 = vmatpush.bf16.msra.mxu2 %v6645_v8  ;;  %3533 = vmatpush.bf16.msrb.mxu1 %v7633_v7  ;;  %v6581_v8 = vor.u32 %v9397_v31, %v6578_v33  ;;  %v6546_v10 = vld [vmem:[#allocation6 + $0x38] sm:$0xf0] }
 0x208   : > { %v9657_v19 = vld [vmem:[#allocation6 + $0x874] sm:$0xf0]  ;;  %3589 = vmatpush.bf16.msra.mxu0 %v6869_v24  ;;  %v9453_v11 = vld [vmem:[#allocation6 + $0x21c] sm:$0xf]  ;;  %v6549_v33 = vor.u32 %v9389_v4, %v6546_v10 }
 0x209   : > { %v7856_v25 = vld [vmem:[#allocation6 + $0xa58] sm:$0xf]  ;;  %v7601_v32 = vor.u32 %v9657_v19, %v7600_v18  ;;  %3547 = vmatpush.bf16.msra.mxu3 %v7889_v20  ;;  %v6802_v12 = vld [vmem:[#allocation6 + $0x238] sm:$0xf0]  ;;  %v10955_v18 = vpop.f32.mrf.mxu0  ;;  %v7285_v19 = vor.u32 %v9573_v50, %v7282_v27 }
 0x20a   : > { %v9721_v26 = vld [vmem:[#allocation6 + $0xa74] sm:$0xf0]  ;;  %11287 = vst [vmem:[#allocation30_spill] sm:$0xff] %v10955_v18  ;;  %v9637_v20 = vld [vmem:[#allocation6 + $0x7dc] sm:$0xf]  ;;  %v6805_v36 = vor.u32 %v9453_v11, %v6802_v12  ;;  %v7509_v11 = vor.u32 %v9629_v15, %v7506_v58 }
 0x20b   : > { %v7568_v39 = vld [vmem:[#allocation6 + $0x818] sm:$0xf]  ;;  %v7857_v41 = vor.u32 %v9721_v26, %v7856_v25  ;;  %3575 = vmatpush.bf16.msra.mxu2 %v6613_v22  ;;  %3534 = vmatpush.bf16.msrb.mxu1 %v7601_v32  ;;  %v7538_v25 = vld [vmem:[#allocation6 + $0x7f8] sm:$0xf0] }
 0x20c   : > { %v9649_v40 = vld [vmem:[#allocation6 + $0x834] sm:$0xf0]  ;;  %v9701_v26 = vld [vmem:[#allocation6 + $0x9dc] sm:$0xf]  ;;  %3590 = vmatpush.bf16.msra.mxu0 %v6837_v60 }
 0x20d   : > { %v7824_v2 = vld [vmem:[#allocation6 + $0xa18] sm:$0xf]  ;;  %v7569_v7 = vor.u32 %v9649_v40, %v7568_v39  ;;  %3548 = vmatpush.bf16.msra.mxu3 %v7857_v41  ;;  %v7794_v22 = vld [vmem:[#allocation6 + $0x9f8] sm:$0xf0]  ;;  %v7541_v39 = vor.u32 %v9637_v20, %v7538_v25  ;;  %v10957_v40 = vpop.f32.mrf.mxu2  ;;  %v10959_v60 = vpop.f32.mrf.mxu3 }
 0x20e   : > { %v9713_v3 = vld [vmem:[#allocation6 + $0xa34] sm:$0xf0]  ;;  %v9765_v24 = vld [vmem:[#allocation6 + $0xbdc] sm:$0xf]  ;;  %v7797_v50 = vor.u32 %v9701_v26, %v7794_v22  ;;  %11288 = vst [vmem:[#allocation31_spill] sm:$0xff] %v10959_v60  ;;  %v10961_v4 = vpop.f32.mrf.mxu1 }
 0x20f   : > { %v7825_v46 = vor.u32 %v9713_v3, %v7824_v2  ;;  %v8050_v31 = vld [vmem:[#allocation6 + $0xbf8] sm:$0xf0]  ;;  %3576 = vmatpush.bf16.msra.mxu2 %v6581_v8  ;;  %3535 = vmatpush.bf16.msrb.mxu1 %v7569_v7 }
 0x210   : > { %v9565_v35 = vld [vmem:[#allocation6 + $0x59c] sm:$0xf]  ;;  %v8053_v27 = vor.u32 %v9765_v24, %v8050_v31  ;;  %3591 = vmatpush.bf16.msra.mxu0 %v6805_v36 }
 0x211   : > { %v7250_v32 = vld [vmem:[#allocation6 + $0x5b8] sm:$0xf0]  ;;  %3549 = vmatpush.bf16.msra.mxu3 %v7825_v46  ;;  %v10964_v12 = vpop.f32.mrf.mxu0 }
 0x212   : > { %v9693_v41 = vld [vmem:[#allocation6 + $0x99c] sm:$0xf]  ;;  %v7253_v2 = vor.u32 %v9565_v35, %v7250_v32  ;;  %3536 = vmatmul.bf16.vlgmr.msrb.gmra.mxu1 %v10830_v38 }
 0x213   : > { %3598 = vmatpush.bf16.msra.mxu1 %v7285_v19  ;;  %v7762_v3 = vld [vmem:[#allocation6 + $0x9b8] sm:$0xf0]  ;;  %3577 = vmatpush.bf16.msra.mxu2 %v6549_v33 }
 0x214   : > { %v9757_v51 = vld [vmem:[#allocation6 + $0xb9c] sm:$0xf]  ;;  %3640 = vmatpush.bf16.msrb.mxu0 %v8053_v27  ;;  %v7765_v46 = vor.u32 %v9693_v41, %v7762_v3  ;;  %3550 = vmatmul.bf16.vlgmr.msra.gmra.mxu3 %v10832_v43 }
 0x215   : > { %v8018_v8 = vld [vmem:[#allocation6 + $0xbb8] sm:$0xf0]  ;;  %3612 = vmatpush.bf16.msrb.mxu3 %v7541_v39  ;;  %3592 = vmatmul.bf16.vlgmr.msra.gmra.mxu0 %v10816_v9 }
 0x216   : > { %v9557_v7 = vld [vmem:[#allocation6 + $0x55c] sm:$0xf]  ;;  %v8021_v19 = vor.u32 %v9757_v51, %v8018_v8  ;;  %3578 = vmatmul.bf16.vlgmr.msra.gmra.mxu2 %v10808_v56  ;;  %v10969_v8 = vpop.f32.mrf.mxu2 }
 0x217   : > { %v7218_v10 = vld [vmem:[#allocation6 + $0x578] sm:$0xf0]  ;;  %3626 = vmatpush.bf16.msrb.mxu2 %v7797_v50  ;;  %3599 = vmatpush.bf16.msra.mxu1 %v7253_v2  ;;  %11289 = vst [vmem:[#allocation32_spill] sm:$0xff] %v10969_v8 }
 0x218   : > { %v9621_v20 = vld [vmem:[#allocation6 + $0x75c] sm:$0xf]  ;;  %v7221_v22 = vor.u32 %v9557_v7, %v7218_v10  ;;  %3641 = vmatpush.bf16.msrb.mxu0 %v8021_v19  ;;  %v10971_v10 = vpop.f32.mrf.mxu3 }
 0x219   : > { %v7474_v25 = vld [vmem:[#allocation6 + $0x778] sm:$0xf0]  ;;  %3613 = vmatpush.bf16.msrb.mxu3 %v7509_v11  ;;  %v10973_v11 = vpop.f32.mrf.mxu1 }
 0x21a   : > { %v9685_v26 = vld [vmem:[#allocation6 + $0x95c] sm:$0xf]  ;;  %v7477_v15 = vor.u32 %v9621_v20, %v7474_v25 }
 0x21b   : > { %v7730_v24 = vld [vmem:[#allocation6 + $0x978] sm:$0xf0]  ;;  %3627 = vmatpush.bf16.msrb.mxu2 %v7765_v46  ;;  %3600 = vmatpush.bf16.msra.mxu1 %v7221_v22 }
 0x21c   : > { %v9749_v31 = vld [vmem:[#allocation6 + $0xb5c] sm:$0xf]  ;;  %v7733_v51 = vor.u32 %v9685_v26, %v7730_v24 }
 0x21d   : > { %v7986_v33 = vld [vmem:[#allocation6 + $0xb78] sm:$0xf0]  ;;  %3614 = vmatpush.bf16.msrb.mxu3 %v7477_v15 }
 0x21e   : > { %v9549_v35 = vld [vmem:[#allocation6 + $0x51c] sm:$0xf]  ;;  %v7989_v58 = vor.u32 %v9749_v31, %v7986_v33 }
 0x21f   : > { %v7186_v32 = vld [vmem:[#allocation6 + $0x538] sm:$0xf0]  ;;  %3628 = vmatpush.bf16.msrb.mxu2 %v7733_v51 }
 0x220   : > { %v9613_v36 = vld [vmem:[#allocation6 + $0x71c] sm:$0xf]  ;;  %v7189_v27 = vor.u32 %v9549_v35, %v7186_v32  ;;  %3642 = vmatpush.bf16.msrb.mxu0 %v7989_v58  ;;  %v10975_v35 = vpop.f32.mrf.mxu0 }
 0x221   : > { %v7442_v39 = vld [vmem:[#allocation6 + $0x738] sm:$0xf0] }
 0x222   : > { %v9677_v50 = vld [vmem:[#allocation6 + $0x91c] sm:$0xf]  ;;  %v7445_v9 = vor.u32 %v9613_v36, %v7442_v39  ;;  %3601 = vmatpush.bf16.msra.mxu1 %v7189_v27 }
 0x223   : > { %v7698_v41 = vld [vmem:[#allocation6 + $0x938] sm:$0xf0] }
 0x224   : > { %v9741_v2 = vld [vmem:[#allocation6 + $0xb1c] sm:$0xf]  ;;  %v7701_v46 = vor.u32 %v9677_v50, %v7698_v41  ;;  %3615 = vmatpush.bf16.msrb.mxu3 %v7445_v9 }
 0x225   : > { %v7954_v3 = vld [vmem:[#allocation6 + $0xb38] sm:$0xf0] }
 0x226   : > { %v9541_v7 = vld [vmem:[#allocation6 + $0x4dc] sm:$0xf]  ;;  %v7957_v19 = vor.u32 %v9741_v2, %v7954_v3  ;;  %3629 = vmatpush.bf16.msrb.mxu2 %v7701_v46  ;;  %v10980_v46 = vpop.f32.mrf.mxu3 }
 0x227   : > { %v7154_v56 = vld [vmem:[#allocation6 + $0x4f8] sm:$0xf0] }
 0x228   : > { %v9605_v20 = vld [vmem:[#allocation6 + $0x6dc] sm:$0xf]  ;;  %v7157_v22 = vor.u32 %v9541_v7, %v7154_v56  ;;  %3643 = vmatpush.bf16.msrb.mxu0 %v7957_v19  ;;  %v11290_v56 = vperm.slane %v10851_v1, 0  ;;  %v10982_v19 = vpop.f32.mrf.mxu2 }
 0x229   : > { %v7410_v25 = vld [vmem:[#allocation6 + $0x6f8] sm:$0xf0] }
 0x22a   : > { %v9669_v26 = vld [vmem:[#allocation6 + $0x8dc] sm:$0xf]  ;;  %v7413_v36 = vor.u32 %v9605_v20, %v7410_v25  ;;  %3602 = vmatpush.bf16.msra.mxu1 %v7157_v22  ;;  %v2896_v60 = vadd.f32 %v10863_v44, %v11290_v56  ;;  %v10987_v56 = vld [vmem:[#allocation8] sm:$0xff] }
 0x22b   : > { %v7666_v24 = vld [vmem:[#allocation6 + $0x8f8] sm:$0xf0] }
 0x22c   : > { %v9733_v31 = vld [vmem:[#allocation6 + $0xadc] sm:$0xf]  ;;  %v7669_v51 = vor.u32 %v9669_v26, %v7666_v24  ;;  %3616 = vmatpush.bf16.msrb.mxu3 %v7413_v36  ;;  %v10985_v36 = vpop.f32.mrf.mxu1 }
 0x22d   : > { %v7922_v33 = vld [vmem:[#allocation6 + $0xaf8] sm:$0xf0]  ;;  %11291 = vst [vmem:[#allocation33_spill] sm:$0xff] %v10985_v36 }
 0x22e   : > { %v9533_v32 = vld [vmem:[#allocation6 + $0x49c] sm:$0xf]  ;;  %v7925_v58 = vor.u32 %v9733_v31, %v7922_v33  ;;  %3630 = vmatpush.bf16.msrb.mxu2 %v7669_v51 }
 0x22f   : > { %v7122_v15 = vld [vmem:[#allocation6 + $0x4b8] sm:$0xf0] }
 0x230   : > { %v9597_v39 = vld [vmem:[#allocation6 + $0x69c] sm:$0xf]  ;;  %v7125_v2 = vor.u32 %v9533_v32, %v7122_v15  ;;  %3644 = vmatpush.bf16.msrb.mxu0 %v7925_v58  ;;  %v2910_v15 = vadd.f32 %v10865_v49, %v2896_v60  ;;  %v872_v58 = vperm.slane %v10987_v56, 3 }
 0x231   : > { %v7378_v50 = vld [vmem:[#allocation6 + $0x6b8] sm:$0xf0] }
 0x232   : > { %v9661_v41 = vld [vmem:[#allocation6 + $0x89c] sm:$0xf]  ;;  %v7381_v9 = vor.u32 %v9597_v39, %v7378_v50  ;;  %3603 = vmatpush.bf16.msra.mxu1 %v7125_v2  ;;  %v2924_v37 = vadd.f32 %v10861_v17, %v2910_v15  ;;  %v11001_v17 = vpop.f32.mrf.mxu2 }
 0x233   : > { %v7634_v27 = vld [vmem:[#allocation6 + $0x8b8] sm:$0xf0] }
 0x234   : > { %v9725_v3 = vld [vmem:[#allocation6 + $0xa9c] sm:$0xf]  ;;  %v7637_v20 = vor.u32 %v9661_v41, %v7634_v27  ;;  %3617 = vmatpush.bf16.msrb.mxu3 %v7381_v9 }
 0x235   : > { %v7890_v7 = vld [vmem:[#allocation6 + $0xab8] sm:$0xf0] }
 0x236   : > { %v9525_v18 = vld [vmem:[#allocation6 + $0x45c] sm:$0xf]  ;;  %v7893_v25 = vor.u32 %v9725_v3, %v7890_v7  ;;  %3631 = vmatpush.bf16.msrb.mxu2 %v7637_v20 }
 0x237   : > { %v9589_v26 = vld [vmem:[#allocation6 + $0x65c] sm:$0xf]  ;;  %v7093_v31 = vor.u32 %v9525_v18, %v7090_v34  ;;  %v10991_v34 = vpop.f32.mrf.mxu0 }
 0x238   : > { %v7346_v22 = vld [vmem:[#allocation6 + $0x678] sm:$0xf0]  ;;  %11292 = vst [vmem:[#allocation34_spill] sm:$0xff] %v10991_v34  ;;  %3645 = vmatpush.bf16.msrb.mxu0 %v7893_v25  ;;  %v11293_v34 = vperm.slane %v10851_v1, 1  ;;  %v11294_v25 = vperm.slane %v10987_v56, 2 }
 0x239   : > { %v9653_v24 = vld [vmem:[#allocation6 + $0x85c] sm:$0xf]  ;;  %v7349_v41 = vor.u32 %v9589_v26, %v7346_v22  ;;  %3604 = vmatpush.bf16.msra.mxu1 %v7093_v31  ;;  %v8208_v26 = vld [vmem:[#allocation9 + $0xe0] sm:$0xf]  ;;  %v9808_v22 = vld [vmem:[#allocation9 + $0xec] sm:$0xf0]  ;;  %v3190_v31 = vadd.f32 %v10957_v40, %v872_v58 }
 0x23a   : > { %v7602_v33 = vld [vmem:[#allocation6 + $0x878] sm:$0xf0]  ;;  %v2994_v20 = vadd.f32 %v10892_v28, %v11293_v34  ;;  %v9904_v1 = vld [vmem:[#allocation9 + $0x3ec] sm:$0xf0]  ;;  %v8192_v34 = vld [vmem:[#allocation9 + $0xc0] sm:$0xf] }
 0x23b   : > { %v9717_v32 = vld [vmem:[#allocation6 + $0xa5c] sm:$0xf]  ;;  %v7605_v18 = vor.u32 %v9653_v24, %v7602_v33  ;;  %v3092_v24 = vadd.f32 %v10933_v0, %v11294_v25  ;;  %3618 = vmatpush.bf16.msrb.mxu3 %v7349_v41  ;;  %v3231_v0 = vpop.f32.mrf.mxu3 }
 0x23c   : > { %v7858_v44 = vld [vmem:[#allocation6 + $0xa78] sm:$0xf0]  ;;  %v3008_v25 = vadd.f32 %v10896_v42, %v2994_v20  ;;  %v9900_v42 = vld [vmem:[#allocation9 + $0x3cc] sm:$0xf0]  ;;  %v8304_v20 = vld [vmem:[#allocation9 + $0x1a0] sm:$0xf] }
 0x23d   : > { %v9517_v39 = vld [vmem:[#allocation6 + $0x41c] sm:$0xf]  ;;  %v7861_v49 = vor.u32 %v9717_v32, %v7858_v44  ;;  %v9840_v32 = vld [vmem:[#allocation9 + $0x1ec] sm:$0xf0]  ;;  %v8464_v44 = vld [vmem:[#allocation9 + $0x2e0] sm:$0xf]  ;;  %3632 = vmatpush.bf16.msrb.mxu2 %v7605_v18  ;;  %v3106_v18 = vadd.f32 %v10951_v54, %v3092_v24 }
 0x23e   : > { %v7058_v50 = vld [vmem:[#allocation6 + $0x438] sm:$0xf0]  ;;  %v8337_v40 = vor.u32 %v9840_v32, %v8336_v45  ;;  %v11009_v45 = vpop.f32.mrf.mxu1  ;;  %v3022_v54 = vadd.f32 %v10919_v23, %v3008_v25  ;;  %v9864_v32 = vld [vmem:[#allocation9 + $0x2ac] sm:$0xf0] }
 0x23f   : > { %v9773_v27 = vld [vmem:[#allocation6 + $0xc1c] sm:$0xf]  ;;  %v7061_v36 = vor.u32 %v9517_v39, %v7058_v50  ;;  %v9872_v39 = vld [vmem:[#allocation9 + $0x2ec] sm:$0xf0]  ;;  %3646 = vmatpush.bf16.msrb.mxu0 %v7861_v49  ;;  %v8592_v50 = vld [vmem:[#allocation9 + $0x3e0] sm:$0xf]  ;;  %v3120_v24 = vadd.f32 %v10937_v5, %v3106_v18 }
 0x240   : > { %v8082_v2 = vld [vmem:[#allocation6 + $0xc38] sm:$0xf0]  ;;  %v8465_v41 = vor.u32 %v9872_v39, %v8464_v44  ;;  %v8593_v49 = vor.u32 %v9904_v1, %v8592_v50  ;;  %v9896_v50 = vld [vmem:[#allocation9 + $0x3ac] sm:$0xf0]  ;;  %v3036_v5 = vadd.f32 %v10915_v16, %v3022_v54 }
 0x241   : > { %v9581_v60 = vld [vmem:[#allocation6 + $0x61c] sm:$0xf]  ;;  %v8085_v9 = vor.u32 %v9773_v27, %v8082_v2  ;;  %3605 = vmatpush.bf16.msra.mxu1 %v7061_v36  ;;  %v8209_v27 = vor.u32 %v9808_v22, %v8208_v26  ;;  %v2938_v2 = vadd.f32 %v10871_v14, %v2924_v37  ;;  %v9836_v36 = vld [vmem:[#allocation9 + $0x1cc] sm:$0xf0]  ;;  %v3188_v37 = vadd.f32 %v10949_v21, %v872_v58  ;;  %v11016_v22 = vpop.f32.mrf.mxu0  ;;  %v8176_v58 = vld [vmem:[#allocation9 + $0xa0] sm:$0xf] }
 0x242   : > { %v7314_v3 = vld [vmem:[#allocation6 + $0x638] sm:$0xf0]  ;;  %v3134_v16 = vadd.f32 %v10939_v30, %v3120_v24 }
 0x243   : > { %v9645_v7 = vld [vmem:[#allocation6 + $0x81c] sm:$0xf]  ;;  %v7317_v33 = vor.u32 %v9581_v60, %v7314_v3  ;;  %v9804_v60 = vld [vmem:[#allocation9 + $0xcc] sm:$0xf0]  ;;  %v8320_v3 = vld [vmem:[#allocation9 + $0x1c0] sm:$0xf]  ;;  %v2952_v14 = vadd.f32 %v10885_v57, %v2938_v2  ;;  %v3202_v39 = vadd.f32 %v10964_v12, %v3188_v37 }
 0x244   : > { %v7570_v53 = vld [vmem:[#allocation6 + $0x838] sm:$0xf0]  ;;  %3606 = vmatmul.bf16.vlgmr.msra.gmra.mxu1 %v10806_v55  ;;  %v8193_v26 = vor.u32 %v9804_v60, %v8192_v34  ;;  %v8321_v57 = vor.u32 %v9836_v36, %v8320_v3  ;;  %v9800_v55 = vld [vmem:[#allocation9 + $0xac] sm:$0xf0]  ;;  %v11034_v60 = vmul.f32 0.2, %v10876_v62  ;;  %v3148_v30 = vadd.f32 %v10953_v59, %v3134_v16 }
 0x245   : > { %v9709_v8 = vld [vmem:[#allocation6 + $0xa1c] sm:$0xf]  ;;  %v7573_v15 = vor.u32 %v9645_v7, %v7570_v53  ;;  %3661 = vmatpush.bf16.msrb.mxu1 %v8085_v9  ;;  %v3204_v53 = vadd.f32 %v10975_v35, %v3190_v31  ;;  %3619 = vmatpush.bf16.msrb.mxu3 %v7317_v33  ;;  %v8576_v7 = vld [vmem:[#allocation9 + $0x3c0] sm:$0xf]  ;;  %v11295_v35 = vperm.slane %v10987_v56, 2  ;;  %v2966_v44 = vadd.f32 %v10887_v6, %v2952_v14 }
 0x246   : > { %v7826_v51 = vld [vmem:[#allocation6 + $0xa38] sm:$0xf0]  ;;  %v9832_v31 = vld [vmem:[#allocation9 + $0x1ac] sm:$0xf0]  ;;  %v8432_v33 = vld [vmem:[#allocation9 + $0x2a0] sm:$0xf]  ;;  %v3216_v25 = vadd.f32 %v10961_v4, %v3202_v39  ;;  %v11040_v18 = vpop.f32.mrf.mxu1 }
 0x247   : > { %v7829_v28 = vor.u32 %v9709_v8, %v7826_v51  ;;  %v8448_v8 = vld [vmem:[#allocation9 + $0x2c0] sm:$0xf]  ;;  %v9868_v51 = vld [vmem:[#allocation9 + $0x2cc] sm:$0xf0]  ;;  %3633 = vmatpush.bf16.msrb.mxu2 %v7573_v15  ;;  %v3090_v9 = vadd.f32 %v10923_v63, %v11295_v35  ;;  %v3218_v23 = vadd.f32 %v10973_v11, %v3204_v53  ;;  %v8577_v63 = vor.u32 %v9900_v42, %v8576_v7 }
 0x248   : > { %v8449_v21 = vor.u32 %v9868_v51, %v8448_v8  ;;  %3620 = vmatmul.bf16.vlgmr.msrb.gmra.mxu3 %v10810_v61  ;;  %v8560_v15 = vld [vmem:[#allocation9 + $0x3a0] sm:$0xf]  ;;  %v8177_v61 = vor.u32 %v9800_v55, %v8176_v58  ;;  %v8305_v6 = vor.u32 %v9832_v31, %v8304_v20  ;;  %v8433_v12 = vor.u32 %v9864_v32, %v8432_v33  ;;  %v9796_v2 = vld [vmem:[#allocation9 + $0x8c] sm:$0xf0]  ;;  %v11297_v55 = vld [vmem:[#allocation26_spill] sm:$0xff] }
 0x249   : > { %3647 = vmatpush.bf16.msrb.mxu0 %v7829_v28  ;;  %5254 = vmatpush.bf16.msra.mxu3 %v8209_v27  ;;  %v3104_v11 = vadd.f32 %v10941_v52, %v3090_v9  ;;  %v3232_v1 = vadd.f32 %v3231_v0, %v3218_v23  ;;  %v11027_v28 = vpop.f32.mrf.mxu3  ;;  %v11029_v27 = vpop.f32.mrf.mxu2  ;;  %v8561_v52 = vor.u32 %v9896_v50, %v8560_v15  ;;  %v9828_v0 = vld [vmem:[#allocation9 + $0x18c] sm:$0xf0]  ;;  %v8544_v53 = vld [vmem:[#allocation9 + $0x380] sm:$0xf]  ;;  %v11298_v23 = vld [vmem:[#allocation32_spill] sm:$0xff] }
 0x24a   : > { %5268 = vmatpush.bf16.msra.mxu1 %v8337_v40  ;;  %3634 = vmatmul.bf16.vlgmr.msrb.gmra.mxu2 %v10830_v38  ;;  %v8160_v38 = vld [vmem:[#allocation9 + $0x80] sm:$0xf]  ;;  %v3050_v40 = vadd.f32 %v10902_v47, %v3036_v5  ;;  %v9860_v34 = vld [vmem:[#allocation9 + $0x28c] sm:$0xf0]  ;;  %v11037_v3 = vadd.f32 %v10874_v29, %v2966_v44  ;;  %v3230_v51 = vadd.f32 %v10980_v46, %v3216_v25  ;;  %v11046_v14 = vpop.f32.mrf.mxu0  ;;  %v11299_v15 = vld [vmem:[#allocation28_spill] sm:$0xff] }
 0x24b   : > { %5282 = vmatpush.bf16.msra.mxu2 %v8465_v41  ;;  %v8416_v41 = vld [vmem:[#allocation9 + $0x280] sm:$0xf]  ;;  %v3118_v47 = vadd.f32 %v10925_v13, %v3104_v11  ;;  %v3246_v36 = vadd.f32 %v10982_v19, %v3232_v1  ;;  %v8161_v8 = vor.u32 %v9796_v2, %v8160_v38  ;;  %v9792_v7 = vld [vmem:[#allocation9 + $0x6c] sm:$0xf0]  ;;  %v3162_v46 = vadd.f32 %v10971_v10, %v3148_v30 }
 0x24c   : > { %3648 = vmatmul.bf16.vlgmr.msrb.gmra.mxu0 %v10832_v43  ;;  %v8288_v43 = vld [vmem:[#allocation9 + $0x180] sm:$0xf]  ;;  %v8417_v4 = vor.u32 %v9860_v34, %v8416_v41  ;;  %v3064_v54 = vadd.f32 %v10921_v48, %v3050_v40  ;;  %v9824_v59 = vld [vmem:[#allocation9 + $0x16c] sm:$0xf0]  ;;  %v11050_v9 = vmul.f32 0.2, %v11037_v3 }
 0x24d   : > { %5296 = vmatpush.bf16.msra.mxu0 %v8593_v49  ;;  %5255 = vmatpush.bf16.msra.mxu3 %v8193_v26  ;;  %v9892_v49 = vld [vmem:[#allocation9 + $0x38c] sm:$0xf0]  ;;  %v8289_v29 = vor.u32 %v9828_v0, %v8288_v43  ;;  %v8144_v37 = vld [vmem:[#allocation9 + $0x60] sm:$0xf]  ;;  %v3132_v20 = vadd.f32 %v11297_v55, %v3118_v47  ;;  %v3260_v24 = vadd.f32 %v11016_v22, %v3246_v36  ;;  %v11302_v43 = vld [vmem:[#allocation24_spill] sm:$0xff] }
 0x24e   : > { %5269 = vmatpush.bf16.msra.mxu1 %v8321_v57  ;;  %v8272_v42 = vld [vmem:[#allocation9 + $0x160] sm:$0xf]  ;;  %v8545_v13 = vor.u32 %v9892_v49, %v8544_v53  ;;  %v9856_v19 = vld [vmem:[#allocation9 + $0x26c] sm:$0xf0]  ;;  %v8145_v48 = vor.u32 %v9792_v7, %v8144_v37  ;;  %v11304_v53 = vld [vmem:[#allocation34_spill] sm:$0xff]  ;;  %v11078_v47 = vpop.f32.mrf.mxu1 }
 0x24f   : > { %5283 = vmatpush.bf16.msra.mxu2 %v8449_v21  ;;  %v8400_v35 = vld [vmem:[#allocation9 + $0x260] sm:$0xf]  ;;  %v9888_v57 = vld [vmem:[#allocation9 + $0x36c] sm:$0xf0]  ;;  %v8273_v33 = vor.u32 %v9824_v59, %v8272_v42  ;;  %v3146_v50 = vadd.f32 %v11299_v15, %v3132_v20  ;;  %v11075_v34 = vadd.f32 %v11009_v45, %v3260_v24 }
 0x250   : > { %v8528_v26 = vld [vmem:[#allocation9 + $0x360] sm:$0xf]  ;;  %v11296_v21 = vld [vmem:[#allocation27_spill] sm:$0xff]  ;;  %v8401_v32 = vor.u32 %v9856_v19, %v8400_v35 }
 0x251   : > { %5297 = vmatpush.bf16.msra.mxu0 %v8577_v63  ;;  %5256 = vmatpush.bf16.msra.mxu3 %v8177_v61  ;;  %v11054_v58 = vadd.f32 %v11296_v21, %v3064_v54  ;;  %v3244_v63 = vadd.f32 %v11298_v23, %v3230_v51  ;;  %v11059_v31 = vpop.f32.mrf.mxu2  ;;  %v8128_v10 = vld [vmem:[#allocation9 + $0x40] sm:$0xf]  ;;  %v9788_v44 = vld [vmem:[#allocation9 + $0x4c] sm:$0xf0]  ;;  %v8529_v5 = vor.u32 %v9888_v57, %v8528_v26  ;;  %v3287_v2 = vpop.f32.mrf.mxu3  ;;  %v873_v26 = vperm.slane %v10987_v56, 4 }
 0x252   : > { %5270 = vmatpush.bf16.msra.mxu1 %v8305_v6  ;;  %v8256_v39 = vld [vmem:[#allocation9 + $0x140] sm:$0xf]  ;;  %v9820_v11 = vld [vmem:[#allocation9 + $0x14c] sm:$0xf0]  ;;  %v8129_v25 = vor.u32 %v9788_v44, %v8128_v10  ;;  %v11083_v54 = vpop.f32.mrf.mxu0 }
 0x253   : > { %5284 = vmatpush.bf16.msra.mxu2 %v8433_v12  ;;  %v8384_v1 = vld [vmem:[#allocation9 + $0x240] sm:$0xf]  ;;  %v9852_v22 = vld [vmem:[#allocation9 + $0x24c] sm:$0xf0]  ;;  %v11301_v12 = vld [vmem:[#allocation30_spill] sm:$0xff]  ;;  %v3258_v49 = vadd.f32 %v11304_v53, %v3244_v63  ;;  %v8257_v30 = vor.u32 %v9820_v11, %v8256_v39 }
 0x254   : > { %v11300_v61 = vld [vmem:[#allocation25_spill] sm:$0xff]  ;;  %v11066_v38 = vadd.f32 %v11301_v12, %v3162_v46  ;;  %8093 = vmatmul.msk.bf16.vlgmr.msrb.gmra.mxu1 %vm2880_vm0, %v11302_v43  ;;  %v9884_v16 = vld [vmem:[#allocation9 + $0x34c] sm:$0xf0]  ;;  %v8385_v36 = vor.u32 %v9852_v22, %v8384_v1  ;;  %v11087_v46 = vmul.f32 0.2, %v11075_v34  ;;  %v3692_v22 = vmax.f32 %v11037_v3, %v11050_v9 }
 0x255   : > { %5298 = vmatpush.bf16.msra.mxu0 %v8561_v52  ;;  %5257 = vmatpush.bf16.msra.mxu3 %v8161_v8  ;;  %v11063_v6 = vmul.f32 0.2, %v11300_v61  ;;  %v8512_v40 = vld [vmem:[#allocation9 + $0x340] sm:$0xf]  ;;  %v11071_v52 = vmul.f32 0.2, %v11054_v58 }
 0x256   : > { %5271 = vmatpush.bf16.msra.mxu1 %v8289_v29  ;;  %v11303_v0 = vld [vmem:[#allocation31_spill] sm:$0xff]  ;;  %v8112_v8 = vld [vmem:[#allocation9 + $0x20] sm:$0xf]  ;;  %v11081_v45 = vmul.f32 0.2, %v11066_v38 }
 0x257   : > { %5285 = vmatpush.bf16.msra.mxu2 %v8417_v4  ;;  %v3160_v41 = vadd.f32 %v11303_v0, %v3146_v50  ;;  %v9784_v51 = vld [vmem:[#allocation9 + $0x2c] sm:$0xf0]  ;;  %v8240_v29 = vld [vmem:[#allocation9 + $0x120] sm:$0xf]  ;;  %v8513_v4 = vor.u32 %v9884_v16, %v8512_v40 }
 0x258   : > { %v9816_v37 = vld [vmem:[#allocation9 + $0x12c] sm:$0xf0]  ;;  %v8368_v7 = vld [vmem:[#allocation9 + $0x220] sm:$0xf]  ;;  %v8113_v57 = vor.u32 %v9784_v51, %v8112_v8  ;;  %v3684_v8 = vmax.f32 %v10876_v62, %v11034_v60  ;;  %v3286_v51 = vadd.f32 %v11027_v28, %v873_v26 }
 0x259   : > { %5299 = vmatpush.bf16.msra.mxu0 %v8545_v13  ;;  %5258 = vmatpush.bf16.msra.mxu3 %v8145_v48  ;;  %v9848_v42 = vld [vmem:[#allocation9 + $0x22c] sm:$0xf0]  ;;  %v8496_v13 = vld [vmem:[#allocation9 + $0x320] sm:$0xf]  ;;  %v8241_v24 = vor.u32 %v9816_v37, %v8240_v29  ;;  %v11091_v15 = vpop.f32.mrf.mxu3  ;;  %v11093_v50 = vpop.f32.mrf.mxu2 }
 0x25a   : > { %5272 = vmatpush.bf16.msra.mxu1 %v8273_v33  ;;  %v9880_v59 = vld [vmem:[#allocation9 + $0x32c] sm:$0xf0]  ;;  %v11305_v35 = vld [vmem:[#allocation29_spill] sm:$0xff]  ;;  %v8369_v48 = vor.u32 %v9848_v42, %v8368_v7 }
 0x25b   : > { %5286 = vmatpush.bf16.msra.mxu2 %v8401_v32  ;;  %v3174_v19 = vadd.f32 %v11305_v35, %v3160_v41  ;;  %v8096_v21 = vld [vmem:[#allocation9] sm:$0xf]  ;;  %v9780_v23 = vld [vmem:[#allocation9 + $0xc] sm:$0xf0]  ;;  %v8497_v32 = vor.u32 %v9880_v59, %v8496_v13  ;;  %v3288_v41 = vadd.f32 %v3287_v2, %v873_v26  ;;  %v3695_v2 = vmax.f32 %v11075_v34, %v11087_v46 }
 0x25c   : > { %v11306_v55 = vld [vmem:[#allocation33_spill] sm:$0xff]  ;;  %v9812_v33 = vld [vmem:[#allocation9 + $0x10c] sm:$0xf0]  ;;  %v8097_v43 = vor.u32 %v9780_v23, %v8096_v21 }
 0x25d   : > { %5300 = vmatpush.bf16.msra.mxu0 %v8529_v5  ;;  %5259 = vmatpush.bf16.msra.mxu3 %v8129_v25  ;;  %v3272_v20 = vadd.f32 %v11306_v55, %v3258_v49  ;;  %v8224_v63 = vld [vmem:[#allocation9 + $0x100] sm:$0xf]  ;;  %v9844_v44 = vld [vmem:[#allocation9 + $0x20c] sm:$0xf0]  ;;  %v3670_v12 = vmul.f32 0.2, %v3174_v19  ;;  %v11097_v25 = vpop.f32.mrf.mxu1  ;;  %v3302_v60 = vadd.f32 %v11078_v47, %v3288_v41 }
 0x25e   : > { %5273 = vmatpush.bf16.msra.mxu1 %v8257_v30  ;;  %v8352_v10 = vld [vmem:[#allocation9 + $0x200] sm:$0xf]  ;;  %v9876_v5 = vld [vmem:[#allocation9 + $0x30c] sm:$0xf0]  ;;  %v8225_v53 = vor.u32 %v9812_v33, %v8224_v63  ;;  %v3693_v30 = vmax.f32 %v11054_v58, %v11071_v52  ;;  %v3685_v58 = vmax.f32 %v11300_v61, %v11063_v6  ;;  %v3300_v61 = vadd.f32 %v11040_v18, %v3286_v51 }
 0x25f   : > { %5287 = vmatpush.bf16.msra.mxu2 %v8385_v36  ;;  %v8480_v39 = vld [vmem:[#allocation9 + $0x300] sm:$0xf]  ;;  %v9936_v1 = vld [vmem:[#allocation9 + $0x4ec] sm:$0xf0]  ;;  %v3671_v0 = vmul.f32 0.2, %v3272_v20  ;;  %v8353_v49 = vor.u32 %v9844_v44, %v8352_v10  ;;  %v3694_v36 = vmax.f32 %v11066_v38, %v11081_v45  ;;  %v3686_v38 = vmax.f32 %v3174_v19, %v3670_v12 }
 0x260   : > { %v8720_v11 = vld [vmem:[#allocation9 + $0x4e0] sm:$0xf]  ;;  %v9968_v16 = vld [vmem:[#allocation9 + $0x5ec] sm:$0xf0]  ;;  %v8481_v3 = vor.u32 %v9876_v5, %v8480_v39  ;;  %v11112_v45 = vpack.c.bf16 %v3692_v22, %v3684_v8  ;;  %v11115_v28 = vpack.c.bf16 %v3693_v30, %v3685_v58  ;;  %v3316_v55 = vadd.f32 %v11029_v27, %v3302_v60 }
 0x261   : > { %5301 = vmatpush.bf16.msra.mxu0 %v8513_v4  ;;  %5260 = vmatpush.bf16.msra.mxu3 %v8113_v57  ;;  %v8848_v40 = vld [vmem:[#allocation9 + $0x5e0] sm:$0xf]  ;;  %v8721_v9 = vor.u32 %v9936_v1, %v8720_v11  ;;  %v11108_v4 = vpop.f32.mrf.mxu0  ;;  %v9932_v7 = vld [vmem:[#allocation9 + $0x4cc] sm:$0xf0]  ;;  %v3687_v62 = vmax.f32 %v3272_v20, %v3671_v0  ;;  %v11117_v34 = vpack.c.bf16 %v3694_v36, %v3686_v38  ;;  %v3397_v6 = vpop.f32.mrf.mxu2 }
 0x262   : > { %5274 = vmatpush.bf16.msra.mxu1 %v8241_v24  ;;  %v8849_v29 = vor.u32 %v9968_v16, %v8848_v40  ;;  %v8704_v37 = vld [vmem:[#allocation9 + $0x4c0] sm:$0xf]  ;;  %v9964_v42 = vld [vmem:[#allocation9 + $0x5cc] sm:$0xf0]  ;;  %v3343_v20 = vpop.f32.mrf.mxu3  ;;  %v874_v24 = vperm.slane %v10987_v56, 5  ;;  %v3314_v23 = vadd.f32 %v11001_v17, %v3300_v61  ;;  %v3330_v11 = vadd.f32 %v11083_v54, %v3316_v55 }
 0x263   : > { %5288 = vmatpush.bf16.msra.mxu2 %v8369_v48  ;;  %v8832_v52 = vld [vmem:[#allocation9 + $0x5c0] sm:$0xf]  ;;  %v8705_v13 = vor.u32 %v9932_v7, %v8704_v37  ;;  %v11119_v59 = vpack.c.bf16 %v3695_v2, %v3687_v62  ;;  %v9928_v47 = vld [vmem:[#allocation9 + $0x4ac] sm:$0xf0] }
 0x264   : > { %v8833_v35 = vor.u32 %v9964_v42, %v8832_v52  ;;  %v8688_v19 = vld [vmem:[#allocation9 + $0x4a0] sm:$0xf]  ;;  %v9960_v26 = vld [vmem:[#allocation9 + $0x5ac] sm:$0xf0]  ;;  %v3344_v40 = vadd.f32 %v3343_v20, %v3330_v11  ;;  %v8210_v11 = vld [vmem:[#allocation9 + $0xf0] sm:$0xf0] }
 0x265   : > { %5302 = vmatpush.bf16.msra.mxu0 %v8497_v32  ;;  %5261 = vmatpush.bf16.msra.mxu3 %v8097_v43  ;;  %v8816_v46 = vld [vmem:[#allocation9 + $0x5a0] sm:$0xf]  ;;  %v10000_v21 = vld [vmem:[#allocation9 + $0x6ec] sm:$0xf0]  ;;  %v8689_v48 = vor.u32 %v9928_v47, %v8688_v19  ;;  %v3357_v63 = vpop.f32.mrf.mxu1  ;;  %v3328_v43 = vadd.f32 %v11046_v14, %v3314_v23 }
 0x266   : > { %5275 = vmatpush.bf16.msra.mxu1 %v8225_v53  ;;  %v8976_v57 = vld [vmem:[#allocation9 + $0x6e0] sm:$0xf]  ;;  %v8817_v33 = vor.u32 %v9960_v26, %v8816_v46  ;;  %v9924_v10 = vld [vmem:[#allocation9 + $0x48c] sm:$0xf0]  ;;  %v3384_v53 = vadd.f32 %v11108_v4, %v874_v24  ;;  %v3358_v14 = vadd.f32 %v3357_v63, %v3344_v40  ;;  %v8338_v40 = vld [vmem:[#allocation9 + $0x1f0] sm:$0xf0] }
 0x267   : > { %5289 = vmatpush.bf16.msra.mxu2 %v8353_v49  ;;  %v8977_v18 = vor.u32 %v10000_v21, %v8976_v57  ;;  %v8672_v32 = vld [vmem:[#allocation9 + $0x480] sm:$0xf]  ;;  %v9956_v39 = vld [vmem:[#allocation9 + $0x58c] sm:$0xf0]  ;;  %v3342_v54 = vadd.f32 %v11091_v15, %v3328_v43  ;;  %v9838_v43 = vld [vmem:[#allocation9 + $0x1e4] sm:$0xf] }
 0x268   : > { %5262 = vmatmul.bf16.vlgmr.msra.gmra.mxu3 %v11112_v45  ;;  %v8800_v44 = vld [vmem:[#allocation9 + $0x580] sm:$0xf]  ;;  %v9996_v27 = vld [vmem:[#allocation9 + $0x6cc] sm:$0xf0]  ;;  %v8673_v12 = vor.u32 %v9924_v10, %v8672_v32  ;;  %v3398_v38 = vadd.f32 %v3397_v6, %v3384_v53  ;;  %v3372_v61 = vadd.f32 %v11093_v50, %v3358_v14 }
 0x269   : > { %5303 = vmatpush.bf16.msra.mxu0 %v8481_v3  ;;  %5310 = vmatpush.bf16.msrb.mxu3 %v8721_v9  ;;  %v8960_v5 = vld [vmem:[#allocation9 + $0x6c0] sm:$0xf]  ;;  %v3385_v1 = vpop.f32.mrf.mxu0  ;;  %v8801_v17 = vor.u32 %v9956_v39, %v8800_v44  ;;  %v9920_v0 = vld [vmem:[#allocation9 + $0x46c] sm:$0xf0]  ;;  %v3399_v3 = vpop.f32.mrf.mxu2  ;;  %v3356_v62 = vadd.f32 %v11097_v25, %v3342_v54  ;;  %v9806_v39 = vld [vmem:[#allocation9 + $0xe4] sm:$0xf]  ;;  %v8341_v54 = vor.u32 %v9838_v43, %v8338_v40 }
 0x26a   : > { %5324 = vmatpush.bf16.msrb.mxu1 %v8849_v29  ;;  %5290 = vmatmul.bf16.vlgmr.msra.gmra.mxu2 %v11117_v34  ;;  %v8961_v22 = vor.u32 %v9996_v27, %v8960_v5  ;;  %v8656_v16 = vld [vmem:[#allocation9 + $0x460] sm:$0xf]  ;;  %v9952_v49 = vld [vmem:[#allocation9 + $0x56c] sm:$0xf0]  ;;  %v3411_v9 = vpop.f32.mrf.mxu3  ;;  %v3386_v60 = vadd.f32 %v3385_v1, %v874_v24  ;;  %v8213_v53 = vor.u32 %v9806_v39, %v8210_v11  ;;  %v8274_v43 = vld [vmem:[#allocation9 + $0x170] sm:$0xf0] }
 0x26b   : > { %5276 = vmatmul.bf16.vlgmr.msra.gmra.mxu1 %v11115_v28  ;;  %5338 = vmatpush.bf16.msrb.mxu2 %v8977_v18  ;;  %v8784_v41 = vld [vmem:[#allocation9 + $0x560] sm:$0xf]  ;;  %v9992_v36 = vld [vmem:[#allocation9 + $0x6ac] sm:$0xf0]  ;;  %v8657_v2 = vor.u32 %v9920_v0, %v8656_v16  ;;  %v3412_v57 = vadd.f32 %v3411_v9, %v3398_v38  ;;  %v3370_v20 = vadd.f32 %v11059_v31, %v3356_v62  ;;  %v9862_v40 = vld [vmem:[#allocation9 + $0x2a4] sm:$0xf] }
 0x26c   : > { %5304 = vmatmul.bf16.vlgmr.msra.gmra.mxu0 %v11119_v59  ;;  %v8944_v30 = vld [vmem:[#allocation9 + $0x6a0] sm:$0xf]  ;;  %v8785_v29 = vor.u32 %v9952_v49, %v8784_v41  ;;  %v9916_v7 = vld [vmem:[#allocation9 + $0x44c] sm:$0xf0]  ;;  %v3400_v24 = vadd.f32 %v3399_v3, %v3386_v60  ;;  %v9802_v49 = vld [vmem:[#allocation9 + $0xc4] sm:$0xf] }
 0x26d   : > { %5311 = vmatpush.bf16.msrb.mxu3 %v8705_v13  ;;  %v8945_v8 = vor.u32 %v9992_v36, %v8944_v30  ;;  %v3425_v51 = vpop.f32.mrf.mxu1  ;;  %v8640_v37 = vld [vmem:[#allocation9 + $0x440] sm:$0xf]  ;;  %v9948_v4 = vld [vmem:[#allocation9 + $0x54c] sm:$0xf0]  ;;  %v8194_v3 = vld [vmem:[#allocation9 + $0xd0] sm:$0xf0] }
 0x26e   : > { %5325 = vmatpush.bf16.msrb.mxu1 %v8833_v35  ;;  %v8768_v58 = vld [vmem:[#allocation9 + $0x540] sm:$0xf]  ;;  %v9988_v42 = vld [vmem:[#allocation9 + $0x68c] sm:$0xf0]  ;;  %v8641_v13 = vor.u32 %v9916_v7, %v8640_v37  ;;  %v3426_v5 = vadd.f32 %v3425_v51, %v3412_v57  ;;  %v8322_v37 = vld [vmem:[#allocation9 + $0x1d0] sm:$0xf0]  ;;  %v8197_v38 = vor.u32 %v9802_v49, %v8194_v3 }
 0x26f   : > { %5339 = vmatpush.bf16.msrb.mxu2 %v8961_v22  ;;  %v8928_v52 = vld [vmem:[#allocation9 + $0x680] sm:$0xf]  ;;  %v8769_v19 = vor.u32 %v9948_v4, %v8768_v58  ;;  %v9912_v46 = vld [vmem:[#allocation9 + $0x42c] sm:$0xf0]  ;;  %v3672_v22 = vmul.f32 0.2, %v3370_v20 }
 0x270   : > { %v8929_v15 = vor.u32 %v9988_v42, %v8928_v52  ;;  %v8624_v47 = vld [vmem:[#allocation9 + $0x420] sm:$0xf]  ;;  %v9944_v6 = vld [vmem:[#allocation9 + $0x52c] sm:$0xf0]  ;;  %v9798_v4 = vld [vmem:[#allocation9 + $0xa4] sm:$0xf] }
 0x271   : > { %5312 = vmatpush.bf16.msrb.mxu3 %v8689_v48  ;;  %v3439_v35 = vpop.f32.mrf.mxu0  ;;  %v8752_v26 = vld [vmem:[#allocation9 + $0x520] sm:$0xf]  ;;  %v9984_v55 = vld [vmem:[#allocation9 + $0x66c] sm:$0xf0]  ;;  %v8625_v48 = vor.u32 %v9912_v46, %v8624_v47  ;;  %v3453_v32 = vpop.f32.mrf.mxu2  ;;  %v8178_v52 = vld [vmem:[#allocation9 + $0xb0] sm:$0xf0] }
 0x272   : > { %5326 = vmatpush.bf16.msrb.mxu1 %v8817_v33  ;;  %v8912_v21 = vld [vmem:[#allocation9 + $0x660] sm:$0xf]  ;;  %v3413_v25 = vpop.f32.mrf.mxu3  ;;  %v9908_v50 = vld [vmem:[#allocation9 + $0x40c] sm:$0xf0]  ;;  %v3680_v33 = vmul.f32 0.2, %v3372_v61  ;;  %v8753_v10 = vor.u32 %v9944_v6, %v8752_v26  ;;  %v3440_v30 = vadd.f32 %v3439_v35, %v3426_v5 }
 0x273   : > { %5340 = vmatpush.bf16.msrb.mxu2 %v8945_v8  ;;  %v8913_v18 = vor.u32 %v9984_v55, %v8912_v21  ;;  %v8608_v23 = vld [vmem:[#allocation9 + $0x400] sm:$0xf]  ;;  %v9940_v44 = vld [vmem:[#allocation9 + $0x50c] sm:$0xf0]  ;;  %v3414_v27 = vadd.f32 %v3413_v25, %v3400_v24  ;;  %v9830_v60 = vld [vmem:[#allocation9 + $0x1a4] sm:$0xf]  ;;  %v8181_v21 = vor.u32 %v9798_v4, %v8178_v52 }
 0x274   : > { %v8736_v63 = vld [vmem:[#allocation9 + $0x500] sm:$0xf]  ;;  %v9980_v31 = vld [vmem:[#allocation9 + $0x64c] sm:$0xf0]  ;;  %v8609_v16 = vor.u32 %v9908_v50, %v8608_v23  ;;  %v3696_v0 = vmax.f32 %v3372_v61, %v3680_v33  ;;  %v3454_v42 = vadd.f32 %v3453_v32, %v3440_v30  ;;  %v9870_v46 = vld [vmem:[#allocation9 + $0x2e4] sm:$0xf] }
 0x275   : > { %5313 = vmatpush.bf16.msrb.mxu3 %v8673_v12  ;;  %v8896_v1 = vld [vmem:[#allocation9 + $0x640] sm:$0xf]  ;;  %v3427_v12 = vpop.f32.mrf.mxu1  ;;  %v8737_v41 = vor.u32 %v9940_v44, %v8736_v63  ;;  %v9976_v8 = vld [vmem:[#allocation9 + $0x62c] sm:$0xf0]  ;;  %v8466_v26 = vld [vmem:[#allocation9 + $0x2f0] sm:$0xf0] }
 0x276   : > { %5327 = vmatpush.bf16.msrb.mxu1 %v8801_v17  ;;  %v8897_v17 = vor.u32 %v9980_v31, %v8896_v1  ;;  %v3428_v36 = vadd.f32 %v3427_v12, %v3414_v27  ;;  %v8880_v9 = vld [vmem:[#allocation9 + $0x620] sm:$0xf]  ;;  %v9972_v61 = vld [vmem:[#allocation9 + $0x60c] sm:$0xf0]  ;;  %v8469_v6 = vor.u32 %v9870_v46, %v8466_v26  ;;  %v9794_v55 = vld [vmem:[#allocation9 + $0x84] sm:$0xf] }
 0x277   : > { %5341 = vmatpush.bf16.msrb.mxu2 %v8929_v15  ;;  %v8881_v7 = vor.u32 %v9976_v8, %v8880_v9  ;;  %v9826_v24 = vld [vmem:[#allocation9 + $0x184] sm:$0xf]  ;;  %v8450_v63 = vld [vmem:[#allocation9 + $0x2d0] sm:$0xf0]  ;;  %v9104_v33 = vld [vmem:[#allocation9 + $0x7e0] sm:$0xf] }
 0x278   : > { %v9866_v50 = vld [vmem:[#allocation9 + $0x2c4] sm:$0xf]  ;;  %v10032_v39 = vld [vmem:[#allocation9 + $0x7ec] sm:$0xf0]  ;;  %v8130_v8 = vld [vmem:[#allocation9 + $0x50] sm:$0xf0] }
 0x279   : > { %5314 = vmatpush.bf16.msrb.mxu3 %v8657_v2  ;;  %v3688_v2 = vmax.f32 %v3370_v20, %v3672_v22  ;;  %v3441_v14 = vpop.f32.mrf.mxu0  ;;  %v3455_v35 = vpop.f32.mrf.mxu2  ;;  %v8453_v44 = vor.u32 %v9866_v50, %v8450_v63  ;;  %v9790_v27 = vld [vmem:[#allocation9 + $0x64] sm:$0xf]  ;;  %v9105_v11 = vor.u32 %v10032_v39, %v9104_v33  ;;  %v8146_v22 = vld [vmem:[#allocation9 + $0x70] sm:$0xf0]  ;;  %v10028_v49 = vld [vmem:[#allocation9 + $0x7cc] sm:$0xf0] }
 0x27a   : > { %5328 = vmatpush.bf16.msrb.mxu1 %v8785_v29  ;;  %v3467_v51 = vpop.f32.mrf.mxu3  ;;  %v9834_v29 = vld [vmem:[#allocation9 + $0x1c4] sm:$0xf]  ;;  %v3442_v62 = vadd.f32 %v3441_v14, %v3428_v36  ;;  %v8149_v30 = vor.u32 %v9790_v27, %v8146_v22  ;;  %v8258_v14 = vld [vmem:[#allocation9 + $0x150] sm:$0xf0]  ;;  %v9056_v46 = vld [vmem:[#allocation9 + $0x780] sm:$0xf] }
 0x27b   : > { %5342 = vmatpush.bf16.msrb.mxu2 %v8913_v18  ;;  %v11136_v58 = vpack.c.bf16 %v3696_v0, %v3688_v2  ;;  %v8325_v15 = vor.u32 %v9834_v29, %v8322_v37  ;;  %v3468_v57 = vadd.f32 %v3467_v51, %v3454_v42  ;;  %v8162_v18 = vld [vmem:[#allocation9 + $0x90] sm:$0xf0]  ;;  %v9822_v12 = vld [vmem:[#allocation9 + $0x164] sm:$0xf]  ;;  %5352 = vmatpush.bf16.msrb.mxu0 %v9105_v11  ;;  %v10020_v26 = vld [vmem:[#allocation9 + $0x78c] sm:$0xf0] }
 0x27c   : > { %v3456_v20 = vadd.f32 %v3455_v35, %v3442_v62  ;;  %v8165_v5 = vor.u32 %v9794_v55, %v8162_v18  ;;  %v8277_v3 = vor.u32 %v9822_v12, %v8274_v43  ;;  %v9786_v9 = vld [vmem:[#allocation9 + $0x44] sm:$0xf]  ;;  %v8418_v29 = vld [vmem:[#allocation9 + $0x290] sm:$0xf0]  ;;  %v10016_v39 = vld [vmem:[#allocation9 + $0x76c] sm:$0xf0] }
 0x27d   : > { %5315 = vmatpush.bf16.msrb.mxu3 %v8641_v13  ;;  %v8864_v13 = vld [vmem:[#allocation9 + $0x600] sm:$0xf]  ;;  %v3673_v32 = vmul.f32 0.2, %v3468_v57  ;;  %v9818_v2 = vld [vmem:[#allocation9 + $0x144] sm:$0xf]  ;;  %v8133_v4 = vor.u32 %v9786_v9, %v8130_v8 }
 0x27e   : > { %5329 = vmatpush.bf16.msrb.mxu1 %v8769_v19  ;;  %v8306_v19 = vld [vmem:[#allocation9 + $0x1b0] sm:$0xf0]  ;;  %v8865_v47 = vor.u32 %v9972_v61, %v8864_v13  ;;  %v9858_v51 = vld [vmem:[#allocation9 + $0x284] sm:$0xf]  ;;  %v8261_v42 = vor.u32 %v9818_v2, %v8258_v14  ;;  %v875_v11 = vperm.slane %v10987_v56, 6 }
 0x27f   : > { %5343 = vmatpush.bf16.msrb.mxu2 %v8897_v17  ;;  %v8309_v25 = vor.u32 %v9830_v60, %v8306_v19  ;;  %v8434_v17 = vld [vmem:[#allocation9 + $0x2b0] sm:$0xf0]  ;;  %v8421_v37 = vor.u32 %v9858_v51, %v8418_v29  ;;  %v9782_v62 = vld [vmem:[#allocation9 + $0x24] sm:$0xf] }
 0x280   : > { %v9814_v60 = vld [vmem:[#allocation9 + $0x124] sm:$0xf]  ;;  %v8242_v61 = vld [vmem:[#allocation9 + $0x130] sm:$0xf0] }
 0x281   : > { %5316 = vmatpush.bf16.msrb.mxu3 %v8625_v48  ;;  %v8290_v48 = vld [vmem:[#allocation9 + $0x190] sm:$0xf0]  ;;  %v11142_v13 = vpop.f32.mrf.mxu0  ;;  %v9854_v35 = vld [vmem:[#allocation9 + $0x264] sm:$0xf]  ;;  %v8245_v18 = vor.u32 %v9814_v60, %v8242_v61 }
 0x282   : > { %5330 = vmatpush.bf16.msrb.mxu1 %v8753_v10  ;;  %v3469_v23 = vpop.f32.mrf.mxu3  ;;  %v8293_v31 = vor.u32 %v9826_v24, %v8290_v48  ;;  %v8402_v19 = vld [vmem:[#allocation9 + $0x270] sm:$0xf0]  ;;  %v9934_v48 = vld [vmem:[#allocation9 + $0x4e4] sm:$0xf] }
 0x283   : > { %5344 = vmatpush.bf16.msrb.mxu2 %v8881_v7  ;;  %v3470_v10 = vadd.f32 %v3469_v23, %v3456_v20  ;;  %v9072_v7 = vld [vmem:[#allocation9 + $0x7a0] sm:$0xf]  ;;  %v8098_v55 = vld [vmem:[#allocation9 + $0x10] sm:$0xf0]  ;;  %v9810_v20 = vld [vmem:[#allocation9 + $0x104] sm:$0xf] }
 0x284   : > { %v8226_v24 = vld [vmem:[#allocation9 + $0x110] sm:$0xf0]  ;;  %v9966_v50 = vld [vmem:[#allocation9 + $0x5e4] sm:$0xf] }
 0x285   : > { %5317 = vmatpush.bf16.msrb.mxu3 %v8609_v16  ;;  %v3681_v1 = vmul.f32 0.2, %v3470_v10  ;;  %v3689_v16 = vmax.f32 %v3468_v57, %v3673_v32  ;;  %v3481_v57 = vpop.f32.mrf.mxu1  ;;  %v8722_v23 = vld [vmem:[#allocation9 + $0x4f0] sm:$0xf0]  ;;  %v9850_v63 = vld [vmem:[#allocation9 + $0x244] sm:$0xf] }
 0x286   : > { %5331 = vmatpush.bf16.msrb.mxu1 %v8737_v41  ;;  %v8437_v41 = vor.u32 %v9862_v40, %v8434_v17  ;;  %v8386_v33 = vld [vmem:[#allocation9 + $0x250] sm:$0xf0]  ;;  %v9930_v22 = vld [vmem:[#allocation9 + $0x4c4] sm:$0xf] }
 0x287   : > { %5345 = vmatpush.bf16.msrb.mxu2 %v8865_v47  ;;  %v3697_v0 = vmax.f32 %v3470_v10, %v3681_v1  ;;  %v8405_v47 = vor.u32 %v9854_v35, %v8402_v19  ;;  %v8850_v32 = vld [vmem:[#allocation9 + $0x5f0] sm:$0xf0]  ;;  %v8389_v10 = vor.u32 %v9850_v63, %v8386_v33  ;;  %v8229_v1 = vor.u32 %v9810_v20, %v8226_v24  ;;  %v9962_v17 = vld [vmem:[#allocation9 + $0x5c4] sm:$0xf] }
 0x288   : > { %5318 = vmatmul.bf16.vlgmr.msrb.gmra.mxu3 %v11136_v58  ;;  %v8706_v12 = vld [vmem:[#allocation9 + $0x4d0] sm:$0xf0]  ;;  %v8853_v40 = vor.u32 %v9966_v50, %v8850_v32  ;;  %v9926_v9 = vld [vmem:[#allocation9 + $0x4a4] sm:$0xf] }
 0x289   : > { %5366 = vmatpush.bf16.msra.mxu3 %v8213_v53  ;;  %v9088_v53 = vld [vmem:[#allocation9 + $0x7c0] sm:$0xf]  ;;  %v8690_v8 = vld [vmem:[#allocation9 + $0x4b0] sm:$0xf0]  ;;  %v9958_v51 = vld [vmem:[#allocation9 + $0x5a4] sm:$0xf] }
 0x28a   : > { %5380 = vmatpush.bf16.msra.mxu1 %v8341_v54  ;;  %v9089_v36 = vor.u32 %v10028_v49, %v9088_v53  ;;  %v11139_v54 = vpack.c.bf16 %v3697_v0, %v3689_v16  ;;  %v3495_v43 = vpop.f32.mrf.mxu3  ;;  %v9846_v16 = vld [vmem:[#allocation9 + $0x224] sm:$0xf]  ;;  %v8370_v0 = vld [vmem:[#allocation9 + $0x230] sm:$0xf0]  ;;  %v9024_v49 = vld [vmem:[#allocation9 + $0x740] sm:$0xf] }
 0x28b   : > { %5394 = vmatpush.bf16.msra.mxu2 %v8469_v6  ;;  %v8373_v53 = vor.u32 %v9846_v16, %v8370_v0  ;;  %v9842_v29 = vld [vmem:[#allocation9 + $0x204] sm:$0xf]  ;;  %v8674_v35 = vld [vmem:[#allocation9 + $0x490] sm:$0xf0] }
 0x28c   : > { %5353 = vmatpush.bf16.msrb.mxu0 %v9089_v36  ;;  %5332 = vmatmul.bf16.vlgmr.msrb.gmra.mxu1 %v11139_v54  ;;  %v11145_v36 = vpop.f32.mrf.mxu0  ;;  %v9922_v61 = vld [vmem:[#allocation9 + $0x484] sm:$0xf]  ;;  %v8658_v32 = vld [vmem:[#allocation9 + $0x470] sm:$0xf0] }
 0x28d   : > { %5367 = vmatpush.bf16.msra.mxu3 %v8197_v38  ;;  %v10024_v38 = vld [vmem:[#allocation9 + $0x7ac] sm:$0xf0]  ;;  %v3483_v2 = vpop.f32.mrf.mxu1  ;;  %v9954_v19 = vld [vmem:[#allocation9 + $0x584] sm:$0xf]  ;;  %v8770_v16 = vld [vmem:[#allocation9 + $0x550] sm:$0xf0] }
 0x28e   : > { %5381 = vmatpush.bf16.msra.mxu1 %v8325_v15  ;;  %v9073_v52 = vor.u32 %v10024_v38, %v9072_v7  ;;  %v8114_v15 = vld [vmem:[#allocation9 + $0x30] sm:$0xf0]  ;;  %v3482_v7 = vadd.f32 %v3481_v57, %v875_v11  ;;  %v8992_v57 = vld [vmem:[#allocation9 + $0x700] sm:$0xf]  ;;  %v3484_v24 = vadd.f32 %v3483_v2, %v875_v11  ;;  %v9918_v33 = vld [vmem:[#allocation9 + $0x464] sm:$0xf] }
 0x28f   : > { %5395 = vmatpush.bf16.msra.mxu2 %v8453_v44  ;;  %v8117_v6 = vor.u32 %v9782_v62, %v8114_v15  ;;  %v9040_v44 = vld [vmem:[#allocation9 + $0x760] sm:$0xf]  ;;  %v8818_v38 = vld [vmem:[#allocation9 + $0x5b0] sm:$0xf0]  ;;  %v8693_v15 = vor.u32 %v9926_v9, %v8690_v8  ;;  %v9910_v2 = vld [vmem:[#allocation9 + $0x424] sm:$0xf] }
 0x290   : > { %5354 = vmatpush.bf16.msrb.mxu0 %v9073_v52  ;;  %v9041_v27 = vor.u32 %v10016_v39, %v9040_v44  ;;  %v9008_v52 = vld [vmem:[#allocation9 + $0x720] sm:$0xf]  ;;  %v8821_v60 = vor.u32 %v9958_v51, %v8818_v38  ;;  %v9950_v44 = vld [vmem:[#allocation9 + $0x564] sm:$0xf]  ;;  %v8786_v39 = vld [vmem:[#allocation9 + $0x570] sm:$0xf0] }
 0x291   : > { %5368 = vmatpush.bf16.msra.mxu3 %v8181_v21  ;;  %v9778_v21 = vld [vmem:[#allocation9 + $0x4] sm:$0xf] }
 0x292   : > { %5382 = vmatpush.bf16.msra.mxu1 %v8309_v25  ;;  %v9057_v25 = vor.u32 %v10020_v26, %v9056_v46  ;;  %v3523_v46 = vpop.f32.mrf.mxu2  ;;  %v8802_v26 = vld [vmem:[#allocation9 + $0x590] sm:$0xf0]  ;;  %v9890_v38 = vld [vmem:[#allocation9 + $0x384] sm:$0xf] }
 0x293   : > { %5396 = vmatpush.bf16.msra.mxu2 %v8437_v41  ;;  %v8834_v41 = vld [vmem:[#allocation9 + $0x5d0] sm:$0xf0]  ;;  %v8805_v63 = vor.u32 %v9954_v19, %v8802_v26  ;;  %v9809_v26 = vld [vmem:[#allocation9 + $0xf4] sm:$0xf0] }
 0x294   : > { %5355 = vmatpush.bf16.msrb.mxu0 %v9057_v25  ;;  %v8837_v14 = vor.u32 %v9962_v17, %v8834_v41  ;;  %v9902_v25 = vld [vmem:[#allocation9 + $0x3e4] sm:$0xf]  ;;  %v8562_v41 = vld [vmem:[#allocation9 + $0x3b0] sm:$0xf0] }
 0x295   : > { %5369 = vmatpush.bf16.msra.mxu3 %v8165_v5  ;;  %v8101_v5 = vor.u32 %v9778_v21, %v8098_v55  ;;  %v3497_v21 = vpop.f32.mrf.mxu3  ;;  %v11149_v55 = vpop.f32.mrf.mxu0  ;;  %v9946_v17 = vld [vmem:[#allocation9 + $0x544] sm:$0xf] }
 0x296   : > { %5383 = vmatpush.bf16.msra.mxu1 %v8293_v31  ;;  %v8725_v31 = vor.u32 %v9934_v48, %v8722_v23  ;;  %v8677_v48 = vor.u32 %v9922_v61, %v8674_v35  ;;  %v3537_v50 = vpop.f32.mrf.mxu1  ;;  %v8773_v8 = vor.u32 %v9946_v17, %v8770_v16  ;;  %v9938_v61 = vld [vmem:[#allocation9 + $0x504] sm:$0xf]  ;;  %v8738_v35 = vld [vmem:[#allocation9 + $0x510] sm:$0xf0] }
 0x297   : > { %5397 = vmatpush.bf16.msra.mxu2 %v8421_v37  ;;  %v8354_v37 = vld [vmem:[#allocation9 + $0x210] sm:$0xf0] }
 0x298   : > { %5356 = vmatpush.bf16.msrb.mxu0 %v9041_v27  ;;  %v8578_v27 = vld [vmem:[#allocation9 + $0x3d0] sm:$0xf0] }
 0x299   : > { %5370 = vmatpush.bf16.msra.mxu3 %v8149_v30  ;;  %v10012_v30 = vld [vmem:[#allocation9 + $0x74c] sm:$0xf0] }
 0x29a   : > { %5384 = vmatpush.bf16.msra.mxu1 %v8277_v3  ;;  %v9025_v56 = vor.u32 %v10012_v30, %v9024_v49  ;;  %v8709_v3 = vor.u32 %v9930_v22, %v8706_v12  ;;  %v8789_v22 = vor.u32 %v9950_v44, %v8786_v39  ;;  %v9914_v12 = vld [vmem:[#allocation9 + $0x444] sm:$0xf]  ;;  %v8328_v44 = vld [vmem:[#allocation9 + $0x1c8] sm:$0xf] }
 0x29b   : > { %5398 = vmatpush.bf16.msra.mxu2 %v8405_v47  ;;  %v3496_v47 = vadd.f32 %v3495_v43, %v3482_v7  ;;  %v8642_v43 = vld [vmem:[#allocation9 + $0x450] sm:$0xf0] }
 0x29c   : > { %5357 = vmatpush.bf16.msrb.mxu0 %v9025_v56  ;;  %v8645_v30 = vor.u32 %v9914_v12, %v8642_v43  ;;  %v8978_v12 = vld [vmem:[#allocation9 + $0x6f0] sm:$0xf0] }
 0x29d   : > { %5371 = vmatpush.bf16.msra.mxu3 %v8133_v4  ;;  %v8357_v4 = vor.u32 %v9842_v29, %v8354_v37  ;;  %v3551_v0 = vpop.f32.mrf.mxu3  ;;  %v3567_v9 = vpop.f32.mrf.mxu0  ;;  %v9942_v29 = vld [vmem:[#allocation9 + $0x524] sm:$0xf]  ;;  %v8754_v37 = vld [vmem:[#allocation9 + $0x530] sm:$0xf0] }
 0x29e   : > { %5385 = vmatpush.bf16.msra.mxu1 %v8261_v42  ;;  %v10008_v42 = vld [vmem:[#allocation9 + $0x72c] sm:$0xf0]  ;;  %v3539_v7 = vpop.f32.mrf.mxu1 }
 0x29f   : > { %5399 = vmatpush.bf16.msra.mxu2 %v8389_v10  ;;  %v9009_v62 = vor.u32 %v10008_v42, %v9008_v52  ;;  %v3510_v10 = vadd.f32 %v11142_v13, %v3496_v47  ;;  %v9894_v13 = vld [vmem:[#allocation9 + $0x3a4] sm:$0xf] }
 0x2a0   : > { %v8565_v56 = vor.u32 %v9894_v13, %v8562_v41  ;;  %v9906_v42 = vld [vmem:[#allocation9 + $0x404] sm:$0xf]  ;;  %v8184_v13 = vld [vmem:[#allocation9 + $0xa8] sm:$0xf]  ;;  %v9801_v41 = vld [vmem:[#allocation9 + $0xb4] sm:$0xf0] }
 0x2a1   : > { %5372 = vmatpush.bf16.msra.mxu3 %v8117_v6  ;;  %5358 = vmatpush.bf16.msrb.mxu0 %v9009_v62  ;;  %v10004_v6 = vld [vmem:[#allocation9 + $0x70c] sm:$0xf0] }
 0x2a2   : > { %5386 = vmatpush.bf16.msra.mxu1 %v8245_v18  ;;  %v8993_v20 = vor.u32 %v10004_v6, %v8992_v57  ;;  %v8594_v18 = vld [vmem:[#allocation9 + $0x3f0] sm:$0xf0]  ;;  %v8344_v57 = vld [vmem:[#allocation9 + $0x1e8] sm:$0xf] }
 0x2a3   : > { %5400 = vmatpush.bf16.msra.mxu2 %v8373_v53  ;;  %v8597_v23 = vor.u32 %v9902_v25, %v8594_v18  ;;  %v8530_v25 = vld [vmem:[#allocation9 + $0x370] sm:$0xf0] }
 0x2a5   : > { %5373 = vmatpush.bf16.msra.mxu3 %v8101_v5  ;;  %5359 = vmatpush.bf16.msrb.mxu0 %v8993_v20  ;;  %v9898_v5 = vld [vmem:[#allocation9 + $0x3c4] sm:$0xf]  ;;  %v3553_v6 = vpop.f32.mrf.mxu3  ;;  %v11154_v39 = vpop.f32.mrf.mxu0 }
 0x2a6   : > { %5387 = vmatpush.bf16.msra.mxu1 %v8229_v1  ;;  %v3498_v1 = vadd.f32 %v3497_v21, %v3484_v24  ;;  %v8581_v11 = vor.u32 %v9898_v5, %v8578_v27  ;;  %v9841_v21 = vld [vmem:[#allocation9 + $0x1f4] sm:$0xf0]  ;;  %v9886_v20 = vld [vmem:[#allocation9 + $0x364] sm:$0xf] }
 0x2a7   : > { %5401 = vmatpush.bf16.msra.mxu2 %v8357_v4  ;;  %v8546_v4 = vld [vmem:[#allocation9 + $0x390] sm:$0xf0]  ;;  %v9837_v5 = vld [vmem:[#allocation9 + $0x1d4] sm:$0xf0]  ;;  %v9882_v27 = vld [vmem:[#allocation9 + $0x344] sm:$0xf] }
 0x2a8   : > { %5374 = vmatmul.bf16.vlgmr.msra.gmra.mxu3 %v11112_v45  ;;  %v3512_v53 = vadd.f32 %v11145_v36, %v3498_v1  ;;  %v8549_v62 = vor.u32 %v9890_v38, %v8546_v4  ;;  %v8514_v1 = vld [vmem:[#allocation9 + $0x350] sm:$0xf0]  ;;  %v8168_v38 = vld [vmem:[#allocation9 + $0x88] sm:$0xf]  ;;  %v9797_v4 = vld [vmem:[#allocation9 + $0x94] sm:$0xf0] }
 0x2a9   : > { %5422 = vmatpush.bf16.msrb.mxu3 %v8725_v31  ;;  %5388 = vmatmul.bf16.vlgmr.msra.gmra.mxu1 %v11115_v28  ;;  %v8661_v31 = vor.u32 %v9918_v33, %v8658_v32  ;;  %v8517_v43 = vor.u32 %v9882_v27, %v8514_v1 }
 0x2aa   : > { %5436 = vmatpush.bf16.msrb.mxu1 %v8853_v40  ;;  %5408 = vmatpush.bf16.msra.mxu0 %v8597_v23  ;;  %v3524_v40 = vadd.f32 %v3523_v46, %v3510_v10  ;;  %v8216_v46 = vld [vmem:[#allocation9 + $0xe8] sm:$0xf]  ;;  %v8741_v23 = vor.u32 %v9938_v61, %v8738_v35  ;;  %v8345_v10 = vor.u32 %v9841_v21, %v8344_v57  ;;  %v9990_v35 = vld [vmem:[#allocation9 + $0x6a4] sm:$0xf] }
 0x2ab   : > { %v8152_v21 = vld [vmem:[#allocation9 + $0x68] sm:$0xf] }
 0x2ac   : > { %v3538_v49 = vadd.f32 %v3537_v50, %v3524_v40  ;;  %v8217_v50 = vor.u32 %v9809_v26, %v8216_v46  ;;  %v8169_v26 = vor.u32 %v9797_v4, %v8168_v38  ;;  %v8728_v4 = vld [vmem:[#allocation9 + $0x4e8] sm:$0xf] }
 0x2ad   : > { %5423 = vmatpush.bf16.msrb.mxu3 %v8709_v3  ;;  %v3525_v3 = vpop.f32.mrf.mxu2  ;;  %v3595_v46 = vpop.f32.mrf.mxu0 }
 0x2ae   : > { %5437 = vmatpush.bf16.msrb.mxu1 %v8837_v14  ;;  %5409 = vmatpush.bf16.msra.mxu0 %v8581_v11  ;;  %v8626_v14 = vld [vmem:[#allocation9 + $0x430] sm:$0xf0]  ;;  %v3552_v51 = vadd.f32 %v3551_v0, %v3538_v49  ;;  %v3526_v52 = vadd.f32 %v3525_v3, %v3512_v53  ;;  %v8329_v0 = vor.u32 %v9837_v5, %v8328_v44  ;;  %v8312_v53 = vld [vmem:[#allocation9 + $0x1a8] sm:$0xf]  ;;  %v9821_v5 = vld [vmem:[#allocation9 + $0x154] sm:$0xf0] }
 0x2af   : > { %v8629_v36 = vor.u32 %v9910_v2, %v8626_v14  ;;  %v8498_v3 = vld [vmem:[#allocation9 + $0x330] sm:$0xf0]  ;;  %v9994_v14 = vld [vmem:[#allocation9 + $0x6c4] sm:$0xf]  ;;  %v8264_v44 = vld [vmem:[#allocation9 + $0x148] sm:$0xf] }
 0x2b0   : > { %v3540_v19 = vadd.f32 %v3539_v7, %v3526_v52  ;;  %v3566_v47 = vadd.f32 %v11149_v55, %v3552_v51  ;;  %v9805_v55 = vld [vmem:[#allocation9 + $0xd4] sm:$0xf0]  ;;  %v8962_v51 = vld [vmem:[#allocation9 + $0x6d0] sm:$0xf0]  ;;  %v8296_v52 = vld [vmem:[#allocation9 + $0x188] sm:$0xf] }
 0x2b1   : > { %5424 = vmatpush.bf16.msrb.mxu3 %v8693_v15  ;;  %v8757_v15 = vor.u32 %v9942_v29, %v8754_v37  ;;  %v8185_v37 = vor.u32 %v9801_v41, %v8184_v13 }
 0x2b2   : > { %5438 = vmatpush.bf16.msrb.mxu1 %v8821_v60  ;;  %5410 = vmatpush.bf16.msra.mxu0 %v8565_v56  ;;  %v8610_v60 = vld [vmem:[#allocation9 + $0x410] sm:$0xf0]  ;;  %v3554_v18 = vadd.f32 %v3553_v6, %v3540_v19  ;;  %v3674_v33 = vmul.f32 0.2, %v3566_v47  ;;  %v9878_v56 = vld [vmem:[#allocation9 + $0x324] sm:$0xf] }
 0x2b3   : > { %v8613_v24 = vor.u32 %v9906_v42, %v8610_v60  ;;  %v8501_v29 = vor.u32 %v9878_v56, %v8498_v3  ;;  %v9829_v42 = vld [vmem:[#allocation9 + $0x194] sm:$0xf0]  ;;  %v8946_v19 = vld [vmem:[#allocation9 + $0x6b0] sm:$0xf0] }
 0x2b4   : > { %v3568_v32 = vadd.f32 %v3567_v9, %v3554_v18  ;;  %v3690_v17 = vmax.f32 %v3566_v47, %v3674_v33  ;;  %v8297_v6 = vor.u32 %v9829_v42, %v8296_v52  ;;  %v8280_v18 = vld [vmem:[#allocation9 + $0x168] sm:$0xf]  ;;  %v8898_v56 = vld [vmem:[#allocation9 + $0x650] sm:$0xf0]  ;;  %v9937_v52 = vld [vmem:[#allocation9 + $0x4f4] sm:$0xf0] }
 0x2b5   : > { %5425 = vmatpush.bf16.msrb.mxu3 %v8677_v48  ;;  %v8533_v48 = vor.u32 %v9886_v20, %v8530_v25  ;;  %v3579_v11 = vpop.f32.mrf.mxu2  ;;  %v9793_v20 = vld [vmem:[#allocation9 + $0x74] sm:$0xf0]  ;;  %v8949_v25 = vor.u32 %v9990_v35, %v8946_v19 }
 0x2b6   : > { %5439 = vmatpush.bf16.msrb.mxu1 %v8805_v63  ;;  %5411 = vmatpush.bf16.msra.mxu0 %v8549_v62  ;;  %v8200_v63 = vld [vmem:[#allocation9 + $0xc8] sm:$0xf]  ;;  %v9874_v62 = vld [vmem:[#allocation9 + $0x304] sm:$0xf] }
 0x2b7   : > { %v8201_v40 = vor.u32 %v9805_v55, %v8200_v63  ;;  %v8153_v63 = vor.u32 %v9793_v20, %v8152_v21 }
 0x2b9   : > { %5426 = vmatpush.bf16.msrb.mxu3 %v8661_v31  ;;  %v3682_v31 = vmul.f32 0.2, %v3568_v32 }
 0x2ba   : > { %5440 = vmatpush.bf16.msrb.mxu1 %v8789_v22  ;;  %5412 = vmatpush.bf16.msra.mxu0 %v8533_v48  ;;  %v9998_v22 = vld [vmem:[#allocation9 + $0x6e4] sm:$0xf] }
 0x2bb   : > { %v3698_v16 = vmax.f32 %v3568_v32, %v3682_v31  ;;  %v8981_v49 = vor.u32 %v9998_v22, %v8978_v12  ;;  %v8136_v32 = vld [vmem:[#allocation9 + $0x48] sm:$0xf]  ;;  %v9982_v31 = vld [vmem:[#allocation9 + $0x664] sm:$0xf] }
 0x2bd   : > { %5427 = vmatpush.bf16.msrb.mxu3 %v8645_v30  ;;  %v9833_v30 = vld [vmem:[#allocation9 + $0x1b4] sm:$0xf0]  ;;  %v11157_v9 = vpack.c.bf16 %v3698_v16, %v3690_v17  ;;  %v3581_v57 = vpop.f32.mrf.mxu2  ;;  %v8265_v17 = vor.u32 %v9821_v5, %v8264_v44  ;;  %v8120_v16 = vld [vmem:[#allocation9 + $0x28] sm:$0xf] }
 0x2be   : > { %5441 = vmatpush.bf16.msrb.mxu1 %v8773_v8  ;;  %5413 = vmatpush.bf16.msra.mxu0 %v8517_v43  ;;  %v10252_v8 = vld [vmem:[#allocation8] sm:$0xff]  ;;  %v8313_v7 = vor.u32 %v9833_v30, %v8312_v53  ;;  %v8248_v53 = vld [vmem:[#allocation9 + $0x128] sm:$0xf]  ;;  %v9978_v30 = vld [vmem:[#allocation9 + $0x644] sm:$0xf] }
 0x2bf   : > { %v876_v2 = vperm.slane %v10252_v8, 7  ;;  %5346 = vmatmul.bf16.vlgmr.msrb.gmra.mxu2 %v11157_v9  ;;  %v8901_v38 = vor.u32 %v9978_v30, %v8898_v56  ;;  %v8680_v56 = vld [vmem:[#allocation9 + $0x488] sm:$0xf] }
 0x2c0   : > { %5450 = vmatpush.bf16.msrb.mxu2 %v8981_v49  ;;  %v9817_v49 = vld [vmem:[#allocation9 + $0x134] sm:$0xf0] }
 0x2c1   : > { %5428 = vmatpush.bf16.msrb.mxu3 %v8629_v36  ;;  %v8965_v36 = vor.u32 %v9994_v14, %v8962_v51  ;;  %v3580_v60 = vadd.f32 %v3579_v11, %v876_v2  ;;  %v3607_v61 = vpop.f32.mrf.mxu1  ;;  %v8914_v11 = vld [vmem:[#allocation9 + $0x670] sm:$0xf0]  ;;  %v8104_v14 = vld [vmem:[#allocation9 + $0x8] sm:$0xf] }
 0x2c2   : > { %5442 = vmatpush.bf16.msrb.mxu1 %v8757_v15  ;;  %5414 = vmatpush.bf16.msra.mxu0 %v8501_v29  ;;  %v8482_v15 = vld [vmem:[#allocation9 + $0x310] sm:$0xf0]  ;;  %v8917_v41 = vor.u32 %v9982_v31, %v8914_v11  ;;  %v9781_v29 = vld [vmem:[#allocation9 + $0x14] sm:$0xf0]  ;;  %v8696_v31 = vld [vmem:[#allocation9 + $0x4a8] sm:$0xf] }
 0x2c3   : > { %v8485_v47 = vor.u32 %v9874_v62, %v8482_v15  ;;  %v3594_v48 = vadd.f32 %v11154_v39, %v3580_v60  ;;  %v3582_v39 = vadd.f32 %v3581_v57, %v876_v2  ;;  %v8249_v2 = vor.u32 %v9817_v49, %v8248_v53  ;;  %v9969_v15 = vld [vmem:[#allocation9 + $0x5f4] sm:$0xf0]  ;;  %v9974_v60 = vld [vmem:[#allocation9 + $0x624] sm:$0xf]  ;;  %v9106_v53 = vld [vmem:[#allocation9 + $0x7f0] sm:$0xf0] }
 0x2c4   : > { %5451 = vmatpush.bf16.msrb.mxu2 %v8965_v36  ;;  %v8856_v36 = vld [vmem:[#allocation9 + $0x5e8] sm:$0xf]  ;;  %v8729_v57 = vor.u32 %v9937_v52, %v8728_v4  ;;  %v9929_v11 = vld [vmem:[#allocation9 + $0x4b4] sm:$0xf0]  ;;  %v10026_v52 = vld [vmem:[#allocation9 + $0x7c4] sm:$0xf] }
 0x2c5   : > { %5429 = vmatpush.bf16.msrb.mxu3 %v8613_v24  ;;  %v9825_v24 = vld [vmem:[#allocation9 + $0x174] sm:$0xf0]  ;;  %v3608_v27 = vadd.f32 %v3607_v61, %v3594_v48  ;;  %v3596_v51 = vadd.f32 %v3595_v46, %v3582_v39  ;;  %v8882_v61 = vld [vmem:[#allocation9 + $0x630] sm:$0xf0]  ;;  %v8857_v21 = vor.u32 %v9969_v15, %v8856_v36  ;;  %v8824_v39 = vld [vmem:[#allocation9 + $0x5a8] sm:$0xf] }
 0x2c6   : > { %5443 = vmatpush.bf16.msrb.mxu1 %v8741_v23  ;;  %5415 = vmatpush.bf16.msra.mxu0 %v8485_v47  ;;  %v9986_v23 = vld [vmem:[#allocation9 + $0x684] sm:$0xf]  ;;  %v8281_v33 = vor.u32 %v9825_v24, %v8280_v18  ;;  %v8105_v47 = vor.u32 %v9781_v29, %v8104_v14  ;;  %v8885_v20 = vor.u32 %v9974_v60, %v8882_v61  ;;  %v9933_v18 = vld [vmem:[#allocation9 + $0x4d4] sm:$0xf0]  ;;  %v8840_v24 = vld [vmem:[#allocation9 + $0x5c8] sm:$0xf] }
 0x2c7   : > { %v8808_v14 = vld [vmem:[#allocation9 + $0x588] sm:$0xf]  ;;  %v9921_v60 = vld [vmem:[#allocation9 + $0x474] sm:$0xf0] }
 0x2c8   : > { %5430 = vmatmul.bf16.vlgmr.msrb.gmra.mxu3 %v11136_v58  ;;  %5452 = vmatpush.bf16.msrb.mxu2 %v8949_v25  ;;  %v8712_v25 = vld [vmem:[#allocation9 + $0x4c8] sm:$0xf] }
 0x2c9   : > { %5478 = vmatpush.bf16.msra.mxu3 %v8217_v50  ;;  %5444 = vmatmul.bf16.vlgmr.msrb.gmra.mxu1 %v11139_v54  ;;  %v8930_v50 = vld [vmem:[#allocation9 + $0x690] sm:$0xf0]  ;;  %v3609_v1 = vpop.f32.mrf.mxu1  ;;  %v3649_v13 = vpop.f32.mrf.mxu0  ;;  %v8713_v5 = vor.u32 %v9933_v18, %v8712_v25  ;;  %v8664_v15 = vld [vmem:[#allocation9 + $0x468] sm:$0xf]  ;;  %v9917_v18 = vld [vmem:[#allocation9 + $0x454] sm:$0xf0] }
 0x2ca   : > { %5492 = vmatpush.bf16.msra.mxu1 %v8345_v10  ;;  %v9789_v10 = vld [vmem:[#allocation9 + $0x54] sm:$0xf0]  ;;  %v8933_v55 = vor.u32 %v9986_v23, %v8930_v50  ;;  %v3610_v42 = vadd.f32 %v3609_v1, %v3596_v51  ;;  %v9970_v50 = vld [vmem:[#allocation9 + $0x604] sm:$0xf]  ;;  %v8648_v25 = vld [vmem:[#allocation9 + $0x448] sm:$0xf] }
 0x2cb   : > { %v3621_v22 = vpop.f32.mrf.mxu3  ;;  %v8137_v12 = vor.u32 %v9789_v10, %v8136_v32  ;;  %v9965_v23 = vld [vmem:[#allocation9 + $0x5d4] sm:$0xf0]  ;;  %v8472_v10 = vld [vmem:[#allocation9 + $0x2e8] sm:$0xf] }
 0x2cc   : > { %v3622_v43 = vadd.f32 %v3621_v22, %v3608_v27  ;;  %5453 = vmatpush.bf16.msrb.mxu2 %v8933_v55  ;;  %v9873_v55 = vld [vmem:[#allocation9 + $0x2f4] sm:$0xf0]  ;;  %v8841_v27 = vor.u32 %v9965_v23, %v8840_v24 }
 0x2cd   : > { %5479 = vmatpush.bf16.msra.mxu3 %v8201_v40  ;;  %v3635_v40 = vpop.f32.mrf.mxu2  ;;  %v9957_v51 = vld [vmem:[#allocation9 + $0x594] sm:$0xf0] }
 0x2ce   : > { %5493 = vmatpush.bf16.msra.mxu1 %v8329_v0  ;;  %v9785_v0 = vld [vmem:[#allocation9 + $0x34] sm:$0xf0]  ;;  %v3636_v3 = vadd.f32 %v3635_v40, %v3622_v43 }
 0x2cf   : > { %v8121_v8 = vor.u32 %v9785_v0, %v8120_v16  ;;  %5402 = vmatmul.bf16.vlgmr.msra.gmra.mxu2 %v11117_v34  ;;  %v9961_v43 = vld [vmem:[#allocation9 + $0x5b4] sm:$0xf0]  ;;  %v8456_v16 = vld [vmem:[#allocation9 + $0x2c8] sm:$0xf] }
 0x2d0   : > { %5454 = vmatpush.bf16.msrb.mxu2 %v8917_v41  ;;  %v3650_v35 = vadd.f32 %v3649_v13, %v3636_v3  ;;  %v9869_v0 = vld [vmem:[#allocation9 + $0x2d4] sm:$0xf0]  ;;  %v8697_v13 = vor.u32 %v9929_v11, %v8696_v31  ;;  %v10030_v41 = vld [vmem:[#allocation9 + $0x7e4] sm:$0xf]  ;;  %v8825_v30 = vor.u32 %v9961_v43, %v8824_v39  ;;  %v8760_v31 = vld [vmem:[#allocation9 + $0x528] sm:$0xf] }
 0x2d1   : > { %5480 = vmatpush.bf16.msra.mxu3 %v8185_v37  ;;  %v8232_v37 = vld [vmem:[#allocation9 + $0x108] sm:$0xf]  ;;  %v3663_v62 = vpop.f32.mrf.mxu1  ;;  %v9925_v3 = vld [vmem:[#allocation9 + $0x494] sm:$0xf0] }
 0x2d2   : > { %5494 = vmatpush.bf16.msra.mxu1 %v8313_v7  ;;  %v9813_v7 = vld [vmem:[#allocation9 + $0x114] sm:$0xf0]  ;;  %v3664_v32 = vadd.f32 %v3663_v62, %v3650_v35  ;;  %v8681_v4 = vor.u32 %v9925_v3, %v8680_v56  ;;  %v9090_v62 = vld [vmem:[#allocation9 + $0x7d0] sm:$0xf0]  ;;  %v8792_v35 = vld [vmem:[#allocation9 + $0x568] sm:$0xf] }
 0x2d3   : > { %v3623_v19 = vpop.f32.mrf.mxu3  ;;  %v9949_v23 = vld [vmem:[#allocation9 + $0x554] sm:$0xf0]  ;;  %v8218_v56 = vld [vmem:[#allocation9 + $0xf8] sm:$0xf0]  ;;  %v9839_v3 = vld [vmem:[#allocation9 + $0x1ec] sm:$0xf] }
 0x2d4   : > { %v3624_v46 = vadd.f32 %v3623_v19, %v3610_v42  ;;  %5455 = vmatpush.bf16.msrb.mxu2 %v8901_v38  ;;  %v3675_v40 = vmul.f32 0.2, %v3664_v32  ;;  %v9109_v38 = vor.u32 %v10030_v41, %v9106_v53  ;;  %v8809_v42 = vor.u32 %v9957_v51, %v8808_v14  ;;  %v9953_v19 = vld [vmem:[#allocation9 + $0x574] sm:$0xf0]  ;;  %v8744_v41 = vld [vmem:[#allocation9 + $0x508] sm:$0xf] }
 0x2d5   : > { %5481 = vmatpush.bf16.msra.mxu3 %v8169_v26  ;;  %v8233_v26 = vor.u32 %v9813_v7, %v8232_v37  ;;  %v8440_v37 = vld [vmem:[#allocation9 + $0x2a8] sm:$0xf]  ;;  %v9865_v7 = vld [vmem:[#allocation9 + $0x2b4] sm:$0xf0] }
 0x2d6   : > { %5495 = vmatpush.bf16.msra.mxu1 %v8297_v6  ;;  %v3637_v6 = vpop.f32.mrf.mxu2  ;;  %v8441_v61 = vor.u32 %v9865_v7, %v8440_v37  ;;  %v9945_v11 = vld [vmem:[#allocation9 + $0x534] sm:$0xf0]  ;;  %v8376_v14 = vld [vmem:[#allocation9 + $0x228] sm:$0xf] }
 0x2d7   : > { %v3638_v48 = vadd.f32 %v3637_v6, %v3624_v46  ;;  %v9861_v46 = vld [vmem:[#allocation9 + $0x294] sm:$0xf0]  ;;  %v10022_v6 = vld [vmem:[#allocation9 + $0x7a4] sm:$0xf] }
 0x2d8   : > { %5456 = vmatpush.bf16.msrb.mxu2 %v8885_v20  ;;  %v9074_v20 = vld [vmem:[#allocation9 + $0x7b0] sm:$0xf0]  ;;  %v9941_v53 = vld [vmem:[#allocation9 + $0x514] sm:$0xf0] }
 0x2d9   : > { %5482 = vmatpush.bf16.msra.mxu3 %v8153_v63  ;;  %v8866_v63 = vld [vmem:[#allocation9 + $0x610] sm:$0xf0]  ;;  %v3665_v22 = vpop.f32.mrf.mxu1  ;;  %v9849_v51 = vld [vmem:[#allocation9 + $0x234] sm:$0xf0]  ;;  %v8745_v37 = vor.u32 %v9941_v53, %v8744_v41 }
 0x2da   : > { %5496 = vmatpush.bf16.msra.mxu1 %v8281_v33  ;;  %v3651_v33 = vpop.f32.mrf.mxu0  ;;  %v8869_v1 = vor.u32 %v9970_v50, %v8866_v63  ;;  %v8408_v50 = vld [vmem:[#allocation9 + $0x268] sm:$0xf]  ;;  %v9857_v63 = vld [vmem:[#allocation9 + $0x274] sm:$0xf0] }
 0x2db   : > { %v3652_v44 = vadd.f32 %v3651_v33, %v3638_v48  ;;  %v8776_v48 = vld [vmem:[#allocation9 + $0x548] sm:$0xf]  ;;  %v9077_v33 = vor.u32 %v10022_v6, %v9074_v20  ;;  %v10006_v6 = vld [vmem:[#allocation9 + $0x724] sm:$0xf]  ;;  %v9901_v53 = vld [vmem:[#allocation9 + $0x3d4] sm:$0xf0] }
 0x2dc   : > { %5457 = vmatpush.bf16.msrb.mxu2 %v8869_v1  ;;  %v8409_v1 = vor.u32 %v9857_v63, %v8408_v50  ;;  %v8314_v50 = vld [vmem:[#allocation9 + $0x1b8] sm:$0xf0] }
 0x2dd   : > { %5483 = vmatpush.bf16.msra.mxu3 %v8137_v12  ;;  %v8473_v12 = vor.u32 %v9873_v55, %v8472_v10  ;;  %v10018_v10 = vld [vmem:[#allocation9 + $0x784] sm:$0xf]  ;;  %v8777_v55 = vor.u32 %v9949_v23, %v8776_v48  ;;  %v9831_v23 = vld [vmem:[#allocation9 + $0x1ac] sm:$0xf] }
 0x2de   : > { %5497 = vmatpush.bf16.msra.mxu1 %v8265_v17  ;;  %v3666_v17 = vadd.f32 %v3665_v22, %v3652_v44  ;;  %v9058_v44 = vld [vmem:[#allocation9 + $0x790] sm:$0xf0]  ;;  %v8392_v22 = vld [vmem:[#allocation9 + $0x248] sm:$0xf] }
 0x2df   : > { %5458 = vmatmul.bf16.vlgmr.msrb.gmra.mxu2 %v11157_v9  ;;  %v9061_v39 = vor.u32 %v10018_v10, %v9058_v44  ;;  %v8994_v44 = vld [vmem:[#allocation9 + $0x710] sm:$0xf0] }
 0x2e0   : > { %v3683_v49 = vmul.f32 0.2, %v3666_v17  ;;  %5506 = vmatpush.bf16.msra.mxu2 %v8473_v12  ;;  %v9853_v12 = vld [vmem:[#allocation9 + $0x254] sm:$0xf0] }
 0x2e1   : > { %5484 = vmatpush.bf16.msra.mxu3 %v8121_v8  ;;  %v8457_v8 = vor.u32 %v9869_v0, %v8456_v16  ;;  %v8616_v16 = vld [vmem:[#allocation9 + $0x408] sm:$0xf]  ;;  %v8761_v0 = vor.u32 %v9945_v11, %v8760_v31  ;;  %v9795_v31 = vld [vmem:[#allocation9 + $0x8c] sm:$0xf]  ;;  %v8170_v11 = vld [vmem:[#allocation9 + $0x98] sm:$0xf0] }
 0x2e2   : > { %5498 = vmatpush.bf16.msra.mxu1 %v8249_v2  ;;  %v3691_v2 = vmax.f32 %v3664_v32, %v3675_v40  ;;  %v3699_v29 = vmax.f32 %v3666_v17, %v3683_v49  ;;  %v8649_v32 = vor.u32 %v9917_v18, %v8648_v25  ;;  %v10014_v40 = vld [vmem:[#allocation9 + $0x764] sm:$0xf]  ;;  %v9042_v17 = vld [vmem:[#allocation9 + $0x770] sm:$0xf0]  ;;  %v8393_v49 = vor.u32 %v9853_v12, %v8392_v22  ;;  %v9799_v18 = vld [vmem:[#allocation9 + $0xac] sm:$0xf] }
 0x2e3   : > { %v9827_v12 = vld [vmem:[#allocation9 + $0x18c] sm:$0xf] }
 0x2e4   : > { %v11166_v36 = vpack.c.bf16 %v3699_v29, %v3691_v2  ;;  %5507 = vmatpush.bf16.msra.mxu2 %v8457_v8  ;;  %v8346_v8 = vld [vmem:[#allocation9 + $0x1f8] sm:$0xf0]  ;;  %v9045_v2 = vor.u32 %v10014_v40, %v9042_v17  ;;  %v8952_v40 = vld [vmem:[#allocation9 + $0x6a8] sm:$0xf]  ;;  %v9993_v17 = vld [vmem:[#allocation9 + $0x6b4] sm:$0xf0] }
 0x2e5   : > { %5485 = vmatpush.bf16.msra.mxu3 %v8105_v47  ;;  %v8424_v47 = vld [vmem:[#allocation9 + $0x288] sm:$0xf] }
 0x2e6   : > { %5499 = vmatpush.bf16.msra.mxu1 %v8233_v26  ;;  %5360 = vmatmul.bf16.vlgmr.msrb.gmra.mxu0 %v11166_v36  ;;  %v9093_v26 = vor.u32 %v10026_v52, %v9090_v62  ;;  %v8425_v24 = vor.u32 %v9861_v46, %v8424_v47  ;;  %v8349_v52 = vor.u32 %v9839_v3, %v8346_v8  ;;  %v9803_v62 = vld [vmem:[#allocation9 + $0xcc] sm:$0xf]  ;;  %v8984_v46 = vld [vmem:[#allocation9 + $0x6e8] sm:$0xf]  ;;  %v8282_v8 = vld [vmem:[#allocation9 + $0x178] sm:$0xf0] }
 0x2e7   : > { %5464 = vmatpush.bf16.msrb.mxu0 %v9109_v38  ;;  %v10010_v38 = vld [vmem:[#allocation9 + $0x744] sm:$0xf]  ;;  %v9823_v3 = vld [vmem:[#allocation9 + $0x16c] sm:$0xf] }
 0x2e8   : > { %5486 = vmatmul.bf16.vlgmr.msra.gmra.mxu3 %v11112_v45  ;;  %5508 = vmatpush.bf16.msra.mxu2 %v8441_v61  ;;  %v8330_v61 = vld [vmem:[#allocation9 + $0x1d8] sm:$0xf0] }
 0x2e9   : > { %5534 = vmatpush.bf16.msrb.mxu3 %v8729_v57  ;;  %5500 = vmatmul.bf16.vlgmr.msra.gmra.mxu1 %v11115_v28  ;;  %v8665_v57 = vor.u32 %v9921_v60, %v8664_v15  ;;  %v8202_v15 = vld [vmem:[#allocation9 + $0xd8] sm:$0xf0]  ;;  %v9835_v60 = vld [vmem:[#allocation9 + $0x1cc] sm:$0xf] }
 0x2ea   : > { %5548 = vmatpush.bf16.msrb.mxu1 %v8857_v21  ;;  %v8793_v21 = vor.u32 %v9953_v19, %v8792_v35  ;;  %v8360_v35 = vld [vmem:[#allocation9 + $0x208] sm:$0xf]  ;;  %v9845_v19 = vld [vmem:[#allocation9 + $0x214] sm:$0xf0]  ;;  %v8333_v20 = vor.u32 %v9835_v60, %v8330_v61 }
 0x2eb   : > { %5465 = vmatpush.bf16.msrb.mxu0 %v9093_v26  ;;  %v10001_v26 = vld [vmem:[#allocation9 + $0x6f4] sm:$0xf0]  ;;  %v8361_v25 = vor.u32 %v9845_v19, %v8360_v35  ;;  %v8920_v60 = vld [vmem:[#allocation9 + $0x668] sm:$0xf] }
 0x2ec   : > { %5509 = vmatpush.bf16.msra.mxu2 %v8425_v24  ;;  %v8186_v24 = vld [vmem:[#allocation9 + $0xb8] sm:$0xf0]  ;;  %v8985_v48 = vor.u32 %v10001_v26, %v8984_v46  ;;  %v9985_v61 = vld [vmem:[#allocation9 + $0x674] sm:$0xf0] }
 0x2ed   : > { %5535 = vmatpush.bf16.msrb.mxu3 %v8713_v5  ;;  %v8632_v5 = vld [vmem:[#allocation9 + $0x428] sm:$0xf]  ;;  %v8189_v10 = vor.u32 %v9799_v18, %v8186_v24  ;;  %v9893_v26 = vld [vmem:[#allocation9 + $0x394] sm:$0xf0] }
 0x2ee   : > { %5549 = vmatpush.bf16.msrb.mxu1 %v8841_v27  ;;  %v9913_v27 = vld [vmem:[#allocation9 + $0x434] sm:$0xf0]  ;;  %v8904_v18 = vld [vmem:[#allocation9 + $0x648] sm:$0xf] }
 0x2ef   : > { %5466 = vmatpush.bf16.msrb.mxu0 %v9077_v33  ;;  %v8633_v43 = vor.u32 %v9913_v27, %v8632_v5  ;;  %v8968_v33 = vld [vmem:[#allocation9 + $0x6c8] sm:$0xf]  ;;  %v8317_v27 = vor.u32 %v9831_v23, %v8314_v50  ;;  %v9981_v24 = vld [vmem:[#allocation9 + $0x654] sm:$0xf0] }
 0x2f0   : > { %5510 = vmatpush.bf16.msra.mxu2 %v8409_v1  ;;  %v8600_v5 = vld [vmem:[#allocation9 + $0x3e8] sm:$0xf]  ;;  %v9905_v1 = vld [vmem:[#allocation9 + $0x3f4] sm:$0xf0] }
 0x2f1   : > { %5536 = vmatpush.bf16.msrb.mxu3 %v8697_v13  ;;  %v9909_v13 = vld [vmem:[#allocation9 + $0x414] sm:$0xf0]  ;;  %v8536_v50 = vld [vmem:[#allocation9 + $0x368] sm:$0xf] }
 0x2f2   : > { %5550 = vmatpush.bf16.msrb.mxu1 %v8825_v30  ;;  %v9807_v30 = vld [vmem:[#allocation9 + $0xec] sm:$0xf]  ;;  %v8617_v29 = vor.u32 %v9909_v13, %v8616_v16  ;;  %v8601_v16 = vor.u32 %v9905_v1, %v8600_v5  ;;  %v8584_v13 = vld [vmem:[#allocation9 + $0x3c8] sm:$0xf]  ;;  %v8905_v5 = vor.u32 %v9981_v24, %v8904_v18  ;;  %v8730_v1 = vld [vmem:[#allocation9 + $0x4f8] sm:$0xf0] }
 0x2f3   : > { %5467 = vmatpush.bf16.msrb.mxu0 %v9061_v39  ;;  %v8221_v7 = vor.u32 %v9807_v30, %v8218_v56  ;;  %v8298_v39 = vld [vmem:[#allocation9 + $0x198] sm:$0xf0]  ;;  %v8953_v56 = vor.u32 %v9993_v17, %v8952_v40  ;;  %v9955_v18 = vld [vmem:[#allocation9 + $0x58c] sm:$0xf] }
 0x2f4   : > { %5511 = vmatpush.bf16.msra.mxu2 %v8393_v49  ;;  %v8301_v41 = vor.u32 %v9827_v12, %v8298_v39  ;;  %v9791_v49 = vld [vmem:[#allocation9 + $0x6c] sm:$0xf]  ;;  %v8154_v30 = vld [vmem:[#allocation9 + $0x78] sm:$0xf0]  ;;  %v9977_v12 = vld [vmem:[#allocation9 + $0x634] sm:$0xf0] }
 0x2f5   : > { %5537 = vmatpush.bf16.msrb.mxu3 %v8681_v4  ;;  %v9026_v4 = vld [vmem:[#allocation9 + $0x750] sm:$0xf0]  ;;  %v8810_v24 = vld [vmem:[#allocation9 + $0x598] sm:$0xf0] }
 0x2f6   : > { %5551 = vmatpush.bf16.msrb.mxu1 %v8809_v42  ;;  %v8377_v42 = vor.u32 %v9849_v51, %v8376_v14  ;;  %5416 = vmatmul.bf16.vlgmr.msra.gmra.mxu0 %v11119_v59  ;;  %v9029_v47 = vor.u32 %v10010_v38, %v9026_v4  ;;  %v8936_v14 = vld [vmem:[#allocation9 + $0x688] sm:$0xf]  ;;  %v9989_v51 = vld [vmem:[#allocation9 + $0x694] sm:$0xf0]  ;;  %v9787_v4 = vld [vmem:[#allocation9 + $0x4c] sm:$0xf] }
 0x2f7   : > { %5468 = vmatpush.bf16.msrb.mxu0 %v9045_v2  ;;  %v8585_v2 = vor.u32 %v9901_v53, %v8584_v13  ;;  %v9897_v38 = vld [vmem:[#allocation9 + $0x3b4] sm:$0xf0]  ;;  %v9931_v53 = vld [vmem:[#allocation9 + $0x4cc] sm:$0xf] }
 0x2f8   : > { %5512 = vmatpush.bf16.msra.mxu2 %v8377_v42  ;;  %v8937_v42 = vor.u32 %v9989_v51, %v8936_v14  ;;  %v9871_v51 = vld [vmem:[#allocation9 + $0x2ec] sm:$0xf] }
 0x2f9   : > { %5538 = vmatpush.bf16.msrb.mxu3 %v8665_v57  ;;  %v8205_v57 = vor.u32 %v9803_v62, %v8202_v15  ;;  %v9819_v62 = vld [vmem:[#allocation9 + $0x14c] sm:$0xf]  ;;  %v8266_v15 = vld [vmem:[#allocation9 + $0x158] sm:$0xf0] }
 0x2fa   : > { %5552 = vmatpush.bf16.msrb.mxu1 %v8793_v21  ;;  %v9010_v21 = vld [vmem:[#allocation9 + $0x730] sm:$0xf0]  ;;  %v8269_v46 = vor.u32 %v9819_v62, %v8266_v15  ;;  %v9959_v15 = vld [vmem:[#allocation9 + $0x5ac] sm:$0xf] }
 0x2fb   : > { %5469 = vmatpush.bf16.msrb.mxu0 %v9029_v47  ;;  %v9013_v63 = vor.u32 %v10006_v6, %v9010_v21  ;;  %v8552_v47 = vld [vmem:[#allocation9 + $0x388] sm:$0xf]  ;;  %v8122_v6 = vld [vmem:[#allocation9 + $0x38] sm:$0xf0]  ;;  %v8921_v21 = vor.u32 %v9985_v61, %v8920_v60 }
 0x2fc   : > { %5513 = vmatpush.bf16.msra.mxu2 %v8361_v25  ;;  %v8250_v25 = vld [vmem:[#allocation9 + $0x138] sm:$0xf0] }
 0x2fd   : > { %5539 = vmatpush.bf16.msrb.mxu3 %v8649_v32  ;;  %v9997_v32 = vld [vmem:[#allocation9 + $0x6d4] sm:$0xf0]  ;;  %v8826_v60 = vld [vmem:[#allocation9 + $0x5b8] sm:$0xf0] }
 0x2fe   : > { %5553 = vmatpush.bf16.msrb.mxu1 %v8777_v55  ;;  %v10002_v55 = vld [vmem:[#allocation9 + $0x704] sm:$0xf]  ;;  %v8969_v22 = vor.u32 %v9997_v32, %v8968_v33  ;;  %v9779_v33 = vld [vmem:[#allocation9 + $0xc] sm:$0xf] }
 0x2ff   : > { %5470 = vmatpush.bf16.msrb.mxu0 %v9013_v63  ;;  %5514 = vmatmul.bf16.vlgmr.msra.gmra.mxu2 %v11117_v34  ;;  %v9889_v63 = vld [vmem:[#allocation9 + $0x374] sm:$0xf0] }
 0x300   : > { %5562 = vmatpush.bf16.msrb.mxu2 %v8985_v48  ;;  %v8553_v48 = vor.u32 %v9893_v26, %v8552_v47  ;;  %v8537_v39 = vor.u32 %v9889_v63, %v8536_v50  ;;  %v9877_v26 = vld [vmem:[#allocation9 + $0x314] sm:$0xf0] }
 0x301   : > { %5540 = vmatpush.bf16.msrb.mxu3 %v8633_v43  ;;  %v8997_v43 = vor.u32 %v10002_v55, %v8994_v44  ;;  %v9811_v55 = vld [vmem:[#allocation9 + $0x10c] sm:$0xf]  ;;  %v8234_v44 = vld [vmem:[#allocation9 + $0x118] sm:$0xf0] }
 0x302   : > { %5554 = vmatpush.bf16.msrb.mxu1 %v8761_v0  ;;  %v8173_v0 = vor.u32 %v9795_v31, %v8170_v11  ;;  %v9967_v31 = vld [vmem:[#allocation9 + $0x5ec] sm:$0xf]  ;;  %v8858_v11 = vld [vmem:[#allocation9 + $0x5f8] sm:$0xf0]  ;;  %v8237_v40 = vor.u32 %v9811_v55, %v8234_v44 }
 0x303   : > { %5471 = vmatpush.bf16.msrb.mxu0 %v8997_v43  ;;  %v8861_v13 = vor.u32 %v9967_v31, %v8858_v11  ;;  %v9919_v55 = vld [vmem:[#allocation9 + $0x46c] sm:$0xf]  ;;  %v8666_v44 = vld [vmem:[#allocation9 + $0x478] sm:$0xf0] }
 0x304   : > { %5563 = vmatpush.bf16.msrb.mxu2 %v8969_v22  ;;  %v8888_v22 = vld [vmem:[#allocation9 + $0x628] sm:$0xf]  ;;  %v9859_v31 = vld [vmem:[#allocation9 + $0x28c] sm:$0xf]  ;;  %v8426_v11 = vld [vmem:[#allocation9 + $0x298] sm:$0xf0] }
 0x305   : > { %5541 = vmatpush.bf16.msrb.mxu3 %v8617_v29  ;;  %v8157_v29 = vor.u32 %v9791_v49, %v8154_v30  ;;  %v8714_v49 = vld [vmem:[#allocation9 + $0x4d8] sm:$0xf0]  ;;  %v9963_v30 = vld [vmem:[#allocation9 + $0x5cc] sm:$0xf] }
 0x306   : > { %5555 = vmatpush.bf16.msrb.mxu1 %v8745_v37  ;;  %v8568_v37 = vld [vmem:[#allocation9 + $0x3a8] sm:$0xf]  ;;  %5472 = vmatmul.bf16.vlgmr.msrb.gmra.mxu0 %v11166_v36 }
 0x307   : > { %5520 = vmatpush.bf16.msra.mxu0 %v8601_v16  ;;  %v8569_v35 = vor.u32 %v9897_v38, %v8568_v37  ;;  %v8520_v16 = vld [vmem:[#allocation9 + $0x348] sm:$0xf] }
 0x308   : > { %5542 = vmatmul.bf16.vlgmr.msrb.gmra.mxu3 %v11136_v58  ;;  %5564 = vmatpush.bf16.msrb.mxu2 %v8953_v56  ;;  %v8842_v56 = vld [vmem:[#allocation9 + $0x5d8] sm:$0xf0]  ;;  %v8504_v37 = vld [vmem:[#allocation9 + $0x328] sm:$0xf] }
 0x309   : > { %5590 = vmatpush.bf16.msra.mxu3 %v8221_v7  ;;  %5556 = vmatmul.bf16.vlgmr.msrb.gmra.mxu1 %v11139_v54  ;;  %v8285_v7 = vor.u32 %v9823_v3, %v8282_v8  ;;  %v8872_v3 = vld [vmem:[#allocation9 + $0x608] sm:$0xf]  ;;  %v9973_v8 = vld [vmem:[#allocation9 + $0x614] sm:$0xf0]  ;;  %v8845_v38 = vor.u32 %v9963_v30, %v8842_v56 }
 0x30a   : > { %5604 = vmatpush.bf16.msra.mxu1 %v8349_v52  ;;  %v8138_v52 = vld [vmem:[#allocation9 + $0x58] sm:$0xf0] }
 0x30b   : > { %5521 = vmatpush.bf16.msra.mxu0 %v8585_v2  ;;  %v8141_v19 = vor.u32 %v9787_v4, %v8138_v52  ;;  %v8474_v2 = vld [vmem:[#allocation9 + $0x2f8] sm:$0xf0]  ;;  %v8873_v4 = vor.u32 %v9973_v8, %v8872_v3  ;;  %v9927_v52 = vld [vmem:[#allocation9 + $0x4ac] sm:$0xf]  ;;  %v9064_v3 = vld [vmem:[#allocation9 + $0x788] sm:$0xf] }
 0x30c   : > { %5565 = vmatpush.bf16.msrb.mxu2 %v8937_v42  ;;  %v8698_v42 = vld [vmem:[#allocation9 + $0x4b8] sm:$0xf0]  ;;  %v8477_v62 = vor.u32 %v9871_v51, %v8474_v2  ;;  %v9911_v51 = vld [vmem:[#allocation9 + $0x42c] sm:$0xf] }
 0x30d   : > { %5591 = vmatpush.bf16.msra.mxu3 %v8205_v57  ;;  %v9783_v57 = vld [vmem:[#allocation9 + $0x2c] sm:$0xf]  ;;  %v8701_v47 = vor.u32 %v9927_v52, %v8698_v42  ;;  %v8634_v2 = vld [vmem:[#allocation9 + $0x438] sm:$0xf0] }
 0x30e   : > { %5605 = vmatpush.bf16.msra.mxu1 %v8333_v20  ;;  %v9815_v20 = vld [vmem:[#allocation9 + $0x12c] sm:$0xf]  ;;  %v8125_v23 = vor.u32 %v9783_v57, %v8122_v6  ;;  %v9112_v57 = vld [vmem:[#allocation9 + $0x7e8] sm:$0xf]  ;;  %v8829_v6 = vor.u32 %v9959_v15, %v8826_v60  ;;  %v8637_v42 = vor.u32 %v9911_v51, %v8634_v2  ;;  %v10017_v15 = vld [vmem:[#allocation9 + $0x774] sm:$0xf0] }
 0x30f   : > { %5522 = vmatpush.bf16.msra.mxu0 %v8569_v35  ;;  %v8253_v32 = vor.u32 %v9815_v20, %v8250_v25  ;;  %v9867_v35 = vld [vmem:[#allocation9 + $0x2cc] sm:$0xf]  ;;  %v9144_v51 = vld [vmem:[#allocation12 + $0x30] sm:$0xf]  ;;  %v10041_v2 = vld [vmem:[#allocation12 + $0x34] sm:$0xf0] }
 0x310   : > { %5566 = vmatpush.bf16.msrb.mxu2 %v8921_v21  ;;  %v10033_v21 = vld [vmem:[#allocation9 + $0x7f4] sm:$0xf0]  ;;  %v9923_v20 = vld [vmem:[#allocation9 + $0x48c] sm:$0xf] }
 0x311   : > { %5592 = vmatpush.bf16.msra.mxu3 %v8189_v10  ;;  %v8106_v10 = vld [vmem:[#allocation9 + $0x18] sm:$0xf0]  ;;  %v9113_v50 = vor.u32 %v10033_v21, %v9112_v57 }
 0x312   : > { %5606 = vmatpush.bf16.msra.mxu1 %v8317_v27  ;;  %v9935_v27 = vld [vmem:[#allocation9 + $0x4ec] sm:$0xf]  ;;  %v8109_v43 = vor.u32 %v9779_v33, %v8106_v10  ;;  %v9096_v33 = vld [vmem:[#allocation9 + $0x7c8] sm:$0xf]  ;;  %v10029_v10 = vld [vmem:[#allocation9 + $0x7d4] sm:$0xf0] }
 0x313   : > { %5523 = vmatpush.bf16.msra.mxu0 %v8553_v48  ;;  %v8733_v17 = vor.u32 %v9935_v27, %v8730_v1  ;;  %v9863_v48 = vld [vmem:[#allocation9 + $0x2ac] sm:$0xf]  ;;  %v8794_v1 = vld [vmem:[#allocation9 + $0x578] sm:$0xf0] }
 0x314   : > { %5567 = vmatpush.bf16.msrb.mxu2 %v8905_v5  ;;  %v9951_v27 = vld [vmem:[#allocation9 + $0x56c] sm:$0xf]  ;;  %v10049_v57 = vld [vmem:[#allocation12 + $0x74] sm:$0xf0] }
 0x315   : > { %5593 = vmatpush.bf16.msra.mxu3 %v8173_v0  ;;  %v9885_v0 = vld [vmem:[#allocation9 + $0x354] sm:$0xf0]  ;;  %v8378_v21 = vld [vmem:[#allocation9 + $0x238] sm:$0xf0] }
 0x316   : > { %5607 = vmatpush.bf16.msra.mxu1 %v8301_v41  ;;  %v8889_v41 = vor.u32 %v9977_v12, %v8888_v22  ;;  %v8521_v14 = vor.u32 %v9885_v0, %v8520_v16  ;;  %v9097_v22 = vor.u32 %v10029_v10, %v9096_v33  ;;  %v8669_v12 = vor.u32 %v9919_v55, %v8666_v44  ;;  %v8650_v16 = vld [vmem:[#allocation9 + $0x458] sm:$0xf0]  ;;  %v9999_v10 = vld [vmem:[#allocation9 + $0x6ec] sm:$0xf]  ;;  %v9016_v44 = vld [vmem:[#allocation9 + $0x728] sm:$0xf] }
 0x317   : > { %5524 = vmatpush.bf16.msra.mxu0 %v8537_v39  ;;  %v9080_v39 = vld [vmem:[#allocation9 + $0x7a8] sm:$0xf]  ;;  %v8429_v0 = vor.u32 %v9859_v31, %v8426_v11  ;;  %v8362_v33 = vld [vmem:[#allocation9 + $0x218] sm:$0xf0]  ;;  %v9160_v31 = vld [vmem:[#allocation12 + $0x50] sm:$0xf] }
 0x318   : > { %5568 = vmatpush.bf16.msrb.mxu2 %v8889_v41  ;;  %v8778_v41 = vld [vmem:[#allocation9 + $0x558] sm:$0xf0] }
 0x319   : > { %5594 = vmatpush.bf16.msra.mxu3 %v8157_v29  ;;  %v8717_v29 = vor.u32 %v9931_v53, %v8714_v49  ;;  %v9855_v53 = vld [vmem:[#allocation9 + $0x26c] sm:$0xf]  ;;  %v8410_v49 = vld [vmem:[#allocation9 + $0x278] sm:$0xf0] }
 0x31a   : > { %5608 = vmatpush.bf16.msra.mxu1 %v8285_v7  ;;  %v9881_v7 = vld [vmem:[#allocation9 + $0x334] sm:$0xf0]  ;;  %v8986_v55 = vld [vmem:[#allocation9 + $0x6f8] sm:$0xf0] }
 0x31b   : > { %5525 = vmatpush.bf16.msra.mxu0 %v8521_v14  ;;  %v8505_v61 = vor.u32 %v9881_v7, %v8504_v37  ;;  %v10021_v14 = vld [vmem:[#allocation9 + $0x794] sm:$0xf0]  ;;  %v9943_v37 = vld [vmem:[#allocation9 + $0x52c] sm:$0xf]  ;;  %v8762_v7 = vld [vmem:[#allocation9 + $0x538] sm:$0xf0] }
 0x31c   : > { %5569 = vmatpush.bf16.msrb.mxu2 %v8873_v4  ;;  %v8394_v4 = vld [vmem:[#allocation9 + $0x258] sm:$0xf0]  ;;  %v9065_v52 = vor.u32 %v10021_v14, %v9064_v3  ;;  %v8765_v60 = vor.u32 %v9943_v37, %v8762_v7  ;;  %v9899_v3 = vld [vmem:[#allocation9 + $0x3cc] sm:$0xf] }
 0x31d   : > { %5595 = vmatpush.bf16.msra.mxu3 %v8141_v19  ;;  %v8458_v19 = vld [vmem:[#allocation9 + $0x2d8] sm:$0xf0]  ;;  %v9987_v37 = vld [vmem:[#allocation9 + $0x68c] sm:$0xf] }
 0x31e   : > { %5609 = vmatpush.bf16.msra.mxu1 %v8269_v46  ;;  %v8488_v46 = vld [vmem:[#allocation9 + $0x308] sm:$0xf]  ;;  %v8461_v25 = vor.u32 %v9867_v35, %v8458_v19  ;;  %v8618_v35 = vld [vmem:[#allocation9 + $0x418] sm:$0xf0]  ;;  %v9939_v19 = vld [vmem:[#allocation9 + $0x50c] sm:$0xf] }
 0x31f   : > { %5526 = vmatpush.bf16.msra.mxu0 %v8505_v61  ;;  %5570 = vmatmul.bf16.vlgmr.msrb.gmra.mxu2 %v11157_v9  ;;  %v9907_v61 = vld [vmem:[#allocation9 + $0x40c] sm:$0xf]  ;;  %v10045_v11 = vld [vmem:[#allocation12 + $0x54] sm:$0xf0] }
 0x320   : > { %5618 = vmatpush.bf16.msra.mxu2 %v8477_v62  ;;  %v9048_v62 = vld [vmem:[#allocation9 + $0x768] sm:$0xf]  ;;  %v8586_v14 = vld [vmem:[#allocation9 + $0x3d8] sm:$0xf0] }
 0x321   : > { %5596 = vmatpush.bf16.msra.mxu3 %v8125_v23  ;;  %v8442_v23 = vld [vmem:[#allocation9 + $0x2b8] sm:$0xf0] }
 0x322   : > { %5610 = vmatpush.bf16.msra.mxu1 %v8253_v32  ;;  %v8813_v32 = vor.u32 %v9955_v18, %v8810_v24  ;;  %v8445_v5 = vor.u32 %v9863_v48, %v8442_v23  ;;  %v9032_v18 = vld [vmem:[#allocation9 + $0x748] sm:$0xf]  ;;  %v10013_v24 = vld [vmem:[#allocation9 + $0x754] sm:$0xf0]  ;;  %v9168_v23 = vld [vmem:[#allocation12 + $0x60] sm:$0xf] }
 0x323   : > { %v8938_v7 = vld [vmem:[#allocation9 + $0x698] sm:$0xf0] }
 0x324   : > { %5619 = vmatpush.bf16.msra.mxu2 %v8461_v25 }
 0x325   : > { %5597 = vmatpush.bf16.msra.mxu3 %v8109_v43  ;;  %v8797_v43 = vor.u32 %v9951_v27, %v8794_v1 }
 0x326   : > { %5611 = vmatpush.bf16.msra.mxu1 %v8237_v40  ;;  %v10025_v40 = vld [vmem:[#allocation9 + $0x7b4] sm:$0xf0] }
 0x327   : > { %v9081_v30 = vor.u32 %v10025_v40, %v9080_v39  ;;  %v9995_v39 = vld [vmem:[#allocation9 + $0x6cc] sm:$0xf]  ;;  %v9000_v40 = vld [vmem:[#allocation9 + $0x708] sm:$0xf] }
 0x328   : > { %5598 = vmatmul.bf16.vlgmr.msra.gmra.mxu3 %v11112_v45  ;;  %v8682_v45 = vld [vmem:[#allocation9 + $0x498] sm:$0xf0]  ;;  %5620 = vmatpush.bf16.msra.mxu2 %v8445_v5  ;;  %v10009_v5 = vld [vmem:[#allocation9 + $0x734] sm:$0xf0] }
 0x329   : > { %5646 = vmatpush.bf16.msrb.mxu3 %v8733_v17  ;;  %5612 = vmatmul.bf16.vlgmr.msra.gmra.mxu1 %v11115_v28  ;;  %v8489_v28 = vor.u32 %v9877_v26, %v8488_v46  ;;  %v8685_v63 = vor.u32 %v9923_v20, %v8682_v45  ;;  %v9915_v17 = vld [vmem:[#allocation9 + $0x44c] sm:$0xf]  ;;  %v8746_v46 = vld [vmem:[#allocation9 + $0x518] sm:$0xf0]  ;;  %v9176_v26 = vld [vmem:[#allocation12 + $0x70] sm:$0xf]  ;;  %v9049_v20 = vor.u32 %v10017_v15, %v9048_v62 }
 0x32a   : > { %5660 = vmatpush.bf16.msrb.mxu1 %v8861_v13  ;;  %v9947_v13 = vld [vmem:[#allocation9 + $0x54c] sm:$0xf]  ;;  %v8653_v56 = vor.u32 %v9915_v17, %v8650_v16  ;;  %v8621_v45 = vor.u32 %v9907_v61, %v8618_v35  ;;  %v8749_v25 = vor.u32 %v9939_v19, %v8746_v46  ;;  %v10005_v17 = vld [vmem:[#allocation9 + $0x714] sm:$0xf0]  ;;  %v9136_v62 = vld [vmem:[#allocation12 + $0x20] sm:$0xf]  ;;  %v8941_v15 = vor.u32 %v9987_v37, %v8938_v7 }
 0x32b   : > { %5527 = vmatpush.bf16.msra.mxu0 %v8489_v28  ;;  %v8781_v8 = vor.u32 %v9947_v13, %v8778_v41  ;;  %v9177_v28 = vor.u32 %v10049_v57, %v9176_v26  ;;  %v9903_v16 = vld [vmem:[#allocation9 + $0x3ec] sm:$0xf]  ;;  %v8602_v13 = vld [vmem:[#allocation9 + $0x3f8] sm:$0xf0]  ;;  %v9152_v41 = vld [vmem:[#allocation12 + $0x40] sm:$0xf]  ;;  %v11184_v26 = vpop.f32.mrf.mxu1 }
 0x32c   : > { %5621 = vmatpush.bf16.msra.mxu2 %v8429_v0  ;;  %v9161_v0 = vor.u32 %v10045_v11, %v9160_v31  ;;  %v9983_v61 = vld [vmem:[#allocation9 + $0x66c] sm:$0xf]  ;;  %v8922_v35 = vld [vmem:[#allocation9 + $0x678] sm:$0xf0]  ;;  %v10044_v7 = vld [vmem:[#allocation12 + $0x54] sm:$0xf] }
 0x32d   : > { %5647 = vmatpush.bf16.msrb.mxu3 %v8717_v29  ;;  %v8413_v29 = vor.u32 %v9855_v53, %v8410_v49  ;;  %v10043_v53 = vld [vmem:[#allocation12 + $0x44] sm:$0xf0]  ;;  %v8554_v57 = vld [vmem:[#allocation9 + $0x398] sm:$0xf0] }
 0x32e   : > { %5661 = vmatpush.bf16.msrb.mxu1 %v8845_v38  ;;  %5528 = vmatmul.bf16.vlgmr.msra.gmra.mxu0 %v11119_v59  ;;  %v9851_v38 = vld [vmem:[#allocation9 + $0x24c] sm:$0xf] }
 0x32f   : > { %5576 = vmatpush.bf16.msrb.mxu0 %v9113_v50  ;;  %v10047_v50 = vld [vmem:[#allocation12 + $0x64] sm:$0xf0] }
 0x330   : > { %5622 = vmatpush.bf16.msra.mxu2 %v8413_v29  ;;  %v9169_v27 = vor.u32 %v10047_v50, %v9168_v23  ;;  %v9120_v50 = vld [vmem:[#allocation12] sm:$0xf]  ;;  %v9883_v11 = vld [vmem:[#allocation9 + $0x34c] sm:$0xf] }
 0x331   : > { %5648 = vmatpush.bf16.msrb.mxu3 %v8701_v47  ;;  %v8397_v47 = vor.u32 %v9851_v38, %v8394_v4  ;;  %v8589_v38 = vor.u32 %v9899_v3, %v8586_v14  ;;  %v9895_v4 = vld [vmem:[#allocation9 + $0x3ac] sm:$0xf] }
 0x332   : > { %5662 = vmatpush.bf16.msrb.mxu1 %v8829_v6  ;;  %v9847_v6 = vld [vmem:[#allocation9 + $0x22c] sm:$0xf] }
 0x333   : > { %5577 = vmatpush.bf16.msrb.mxu0 %v9097_v22  ;;  %v8381_v48 = vor.u32 %v9847_v6, %v8378_v21  ;;  %v8989_v22 = vor.u32 %v9999_v10, %v8986_v55  ;;  %v9128_v6 = vld [vmem:[#allocation12 + $0x10] sm:$0xf]  ;;  %v10037_v21 = vld [vmem:[#allocation12 + $0x14] sm:$0xf0]  ;;  %v10048_v55 = vld [vmem:[#allocation12 + $0x74] sm:$0xf] }
 0x334   : > { %5623 = vmatpush.bf16.msra.mxu2 %v8397_v47  ;;  %v9891_v47 = vld [vmem:[#allocation9 + $0x38c] sm:$0xf]  ;;  %v9129_v23 = vor.u32 %v10037_v21, %v9128_v6  ;;  %v10042_v6 = vld [vmem:[#allocation12 + $0x44] sm:$0xf]  ;;  %v9154_v21 = vld [vmem:[#allocation12 + $0x48] sm:$0xf0] }
 0x335   : > { %5649 = vmatpush.bf16.msrb.mxu3 %v8685_v63  ;;  %v9843_v63 = vld [vmem:[#allocation9 + $0x20c] sm:$0xf] }
 0x336   : > { %5663 = vmatpush.bf16.msrb.mxu1 %v8813_v32  ;;  %v9033_v32 = vor.u32 %v10013_v24, %v9032_v18  ;;  %v8365_v1 = vor.u32 %v9843_v63, %v8362_v33  ;;  %v8906_v18 = vld [vmem:[#allocation9 + $0x658] sm:$0xf0]  ;;  %v8557_v24 = vor.u32 %v9891_v47, %v8554_v57  ;;  %v10035_v63 = vld [vmem:[#allocation12 + $0x4] sm:$0xf0]  ;;  %v9240_v33 = vld [vmem:[#allocation12 + $0xf0] sm:$0xf] }
 0x337   : > { %5578 = vmatpush.bf16.msrb.mxu0 %v9081_v30  ;;  %v9991_v30 = vld [vmem:[#allocation9 + $0x6ac] sm:$0xf]  ;;  %v9114_v57 = vld [vmem:[#allocation9 + $0x7f8] sm:$0xf0] }
 0x338   : > { %5624 = vmatpush.bf16.msra.mxu2 %v8381_v48  ;;  %v8538_v48 = vld [vmem:[#allocation9 + $0x378] sm:$0xf0]  ;;  %v10059_v47 = vld [vmem:[#allocation12 + $0xc4] sm:$0xf0] }
 0x339   : > { %5650 = vmatpush.bf16.msrb.mxu3 %v8669_v12  ;;  %v9017_v12 = vor.u32 %v10009_v5, %v9016_v44  ;;  %v9178_v44 = vld [vmem:[#allocation12 + $0x78] sm:$0xf0] }
 0x33a   : > { %5664 = vmatpush.bf16.msrb.mxu1 %v8797_v43  ;;  %v8970_v43 = vld [vmem:[#allocation9 + $0x6d8] sm:$0xf0] }
 0x33b   : > { %5579 = vmatpush.bf16.msrb.mxu0 %v9065_v52  ;;  %v8973_v49 = vor.u32 %v9995_v39, %v8970_v43  ;;  %v9145_v52 = vor.u32 %v10041_v2, %v9144_v51  ;;  %v8522_v39 = vld [vmem:[#allocation9 + $0x358] sm:$0xf0]  ;;  %v9181_v43 = vor.u32 %v10048_v55, %v9178_v44  ;;  %v9224_v51 = vld [vmem:[#allocation12 + $0xd0] sm:$0xf]  ;;  %v9146_v55 = vld [vmem:[#allocation12 + $0x38] sm:$0xf0] }
 0x33c   : > { %5625 = vmatpush.bf16.msra.mxu2 %v8365_v1  ;;  %v8890_v1 = vld [vmem:[#allocation9 + $0x638] sm:$0xf0] }
 0x33d   : > { %5651 = vmatpush.bf16.msrb.mxu3 %v8653_v56  ;;  %v8954_v56 = vld [vmem:[#allocation9 + $0x6b8] sm:$0xf0] }
 0x33e   : > { %5665 = vmatpush.bf16.msrb.mxu1 %v8781_v8  ;;  %v9153_v8 = vor.u32 %v10043_v53, %v9152_v41  ;;  %v8957_v29 = vor.u32 %v9991_v30, %v8954_v56  ;;  %v11188_v53 = vld [vmem:[#allocation11] sm:$0xf]  ;;  %v8874_v30 = vld [vmem:[#allocation9 + $0x618] sm:$0xf0]  ;;  %v8525_v56 = vor.u32 %v9883_v11, %v8522_v39  ;;  %v10055_v11 = vld [vmem:[#allocation12 + $0xa4] sm:$0xf0] }
 0x33f   : > { %5580 = vmatpush.bf16.msrb.mxu0 %v9049_v20  ;;  %5626 = vmatmul.bf16.vlgmr.msra.gmra.mxu2 %v11117_v34  ;;  %v10039_v34 = vld [vmem:[#allocation12 + $0x24] sm:$0xf0]  ;;  %v8925_v20 = vor.u32 %v9983_v61, %v8922_v35  ;;  %v10061_v2 = vld [vmem:[#allocation12 + $0xd4] sm:$0xf0] }
 0x340   : > { %5674 = vmatpush.bf16.msrb.mxu2 %v8989_v22  ;;  %v9137_v46 = vor.u32 %v10039_v34, %v9136_v62  ;;  %v9121_v22 = vor.u32 %v10035_v63, %v9120_v50  ;;  %v9875_v62 = vld [vmem:[#allocation9 + $0x30c] sm:$0xf]  ;;  %v8490_v34 = vld [vmem:[#allocation9 + $0x318] sm:$0xf0]  ;;  %v9208_v50 = vld [vmem:[#allocation12 + $0xb0] sm:$0xf] }
 0x341   : > { %5652 = vmatpush.bf16.msrb.mxu3 %v8637_v42  ;;  %v8570_v42 = vld [vmem:[#allocation9 + $0x3b8] sm:$0xf0]  ;;  %v10031_v61 = vld [vmem:[#allocation9 + $0x7ec] sm:$0xf] }
 0x342   : > { %5666 = vmatpush.bf16.msrb.mxu1 %v8765_v60  ;;  %v11182_v60 = vpop.f32.mrf.mxu3  ;;  %v8573_v19 = vor.u32 %v9895_v4, %v8570_v42  ;;  %v9225_v4 = vor.u32 %v10061_v2, %v9224_v51  ;;  %v10057_v63 = vld [vmem:[#allocation12 + $0xb4] sm:$0xf0]  ;;  %v10015_v2 = vld [vmem:[#allocation9 + $0x76c] sm:$0xf] }
 0x343   : > { %5581 = vmatpush.bf16.msrb.mxu0 %v9033_v32  ;;  %v10065_v32 = vld [vmem:[#allocation12 + $0xf4] sm:$0xf0]  ;;  %v9209_v44 = vor.u32 %v10057_v63, %v9208_v50 }
 0x344   : > { %5675 = vmatpush.bf16.msrb.mxu2 %v8973_v49  ;;  %v9241_v5 = vor.u32 %v10065_v32, %v9240_v33  ;;  %v11190_v49 = vpop.f32.mrf.mxu1  ;;  %v9098_v32 = vld [vmem:[#allocation9 + $0x7d8] sm:$0xf0] }
 0x345   : > { %5653 = vmatpush.bf16.msrb.mxu3 %v8621_v45  ;;  %v11186_v45 = vpop.f32.mrf.mxu2 }
 0x346   : > { %5667 = vmatpush.bf16.msrb.mxu1 %v8749_v25  ;;  %v9979_v25 = vld [vmem:[#allocation9 + $0x64c] sm:$0xf] }
 0x347   : > { %5582 = vmatpush.bf16.msrb.mxu0 %v9017_v12  ;;  %v8909_v10 = vor.u32 %v9979_v25, %v8906_v18  ;;  %v8493_v18 = vor.u32 %v9875_v62, %v8490_v34  ;;  %v9122_v34 = vld [vmem:[#allocation12 + $0x8] sm:$0xf0] }
 0x348   : > { %5654 = vmatmul.bf16.vlgmr.msrb.gmra.mxu3 %v11136_v58  ;;  %v9001_v58 = vor.u32 %v10005_v17, %v9000_v40  ;;  %5676 = vmatpush.bf16.msrb.mxu2 %v8957_v29  ;;  %v9232_v40 = vld [vmem:[#allocation12 + $0xe0] sm:$0xf]  ;;  %v10063_v17 = vld [vmem:[#allocation12 + $0xe4] sm:$0xf0]  ;;  %v3966_v29 = vperm.slane %v11188_v53, 0 }
 0x349   : > { %6112 = vmatpush.bf16.msra.mxu3 %v9177_v28  ;;  %5668 = vmatmul.bf16.vlgmr.msrb.gmra.mxu1 %v11139_v54  ;;  %v8605_v54 = vor.u32 %v9903_v16, %v8602_v13  ;;  %v9887_v28 = vld [vmem:[#allocation9 + $0x36c] sm:$0xf]  ;;  %v9170_v13 = vld [vmem:[#allocation12 + $0x68] sm:$0xf0]  ;;  %v9233_v41 = vor.u32 %v10063_v17, %v9232_v40 }
 0x34a   : > { %v8541_v31 = vor.u32 %v9887_v28, %v8538_v48  ;;  %v5265_v12 = vpop.f32.mrf.mxu3  ;;  %6126 = vmatpush.bf16.msra.mxu1 %v9241_v5  ;;  %v9117_v28 = vor.u32 %v10031_v61, %v9114_v57  ;;  %v10027_v48 = vld [vmem:[#allocation9 + $0x7cc] sm:$0xf] }
 0x34b   : > { %5583 = vmatpush.bf16.msrb.mxu0 %v9001_v58  ;;  %v9971_v58 = vld [vmem:[#allocation9 + $0x60c] sm:$0xf]  ;;  %v5266_v33 = vadd.f32 %v5265_v12, %v3966_v29  ;;  %v10038_v12 = vld [vmem:[#allocation12 + $0x24] sm:$0xf] }
 0x34c   : > { %5677 = vmatpush.bf16.msrb.mxu2 %v8941_v15  ;;  %v8877_v37 = vor.u32 %v9971_v58, %v8874_v30  ;;  %v11200_v25 = vpop.f32.mrf.mxu1  ;;  %v9192_v58 = vld [vmem:[#allocation12 + $0x90] sm:$0xf]  ;;  %v10053_v30 = vld [vmem:[#allocation12 + $0x94] sm:$0xf0] }
 0x34d   : > { %6113 = vmatpush.bf16.msra.mxu3 %v9169_v27  ;;  %v9975_v27 = vld [vmem:[#allocation9 + $0x62c] sm:$0xf]  ;;  %v11192_v3 = vpop.f32.mrf.mxu2  ;;  %v5280_v39 = vadd.f32 %v11190_v49, %v5266_v33 }
 0x34e   : > { %5584 = vmatmul.bf16.vlgmr.msrb.gmra.mxu0 %v11166_v36  ;;  %v8893_v16 = vor.u32 %v9975_v27, %v8890_v1  ;;  %6127 = vmatpush.bf16.msra.mxu1 %v9233_v41  ;;  %v9101_v27 = vor.u32 %v10027_v48, %v9098_v32  ;;  %v10023_v1 = vld [vmem:[#allocation9 + $0x7ac] sm:$0xf]  ;;  %v9034_v48 = vld [vmem:[#allocation9 + $0x758] sm:$0xf0] }
 0x34f   : > { %5632 = vmatpush.bf16.msra.mxu0 %v8605_v54  ;;  %v9879_v54 = vld [vmem:[#allocation9 + $0x32c] sm:$0xf] }
 0x350   : > { %5678 = vmatpush.bf16.msrb.mxu2 %v8925_v20 }
 0x351   : > { %6114 = vmatpush.bf16.msra.mxu3 %v9161_v0  ;;  %v10046_v0 = vld [vmem:[#allocation12 + $0x64] sm:$0xf] }
 0x352   : > { %v9173_v14 = vor.u32 %v10046_v0, %v9170_v13  ;;  %v11197_v15 = vpop.f32.mrf.mxu3  ;;  %6128 = vmatpush.bf16.msra.mxu1 %v9225_v4  ;;  %v10019_v13 = vld [vmem:[#allocation9 + $0x78c] sm:$0xf]  ;;  %v10034_v4 = vld [vmem:[#allocation12 + $0x4] sm:$0xf] }
 0x353   : > { %5633 = vmatpush.bf16.msra.mxu0 %v8589_v38  ;;  %v9162_v38 = vld [vmem:[#allocation12 + $0x58] sm:$0xf0] }
 0x354   : > { %5679 = vmatpush.bf16.msrb.mxu2 %v8909_v10  ;;  %v9165_v35 = vor.u32 %v10044_v7, %v9162_v38  ;;  %v10040_v10 = vld [vmem:[#allocation12 + $0x34] sm:$0xf] }
 0x355   : > { %6115 = vmatpush.bf16.msra.mxu3 %v9153_v8  ;;  %v8506_v8 = vld [vmem:[#allocation9 + $0x338] sm:$0xf0] }
 0x356   : > { %v8509_v42 = vor.u32 %v9879_v54, %v8506_v8  ;;  %v10036_v54 = vld [vmem:[#allocation12 + $0x14] sm:$0xf]  ;;  %v9130_v8 = vld [vmem:[#allocation12 + $0x18] sm:$0xf0] }
 0x357   : > { %5634 = vmatpush.bf16.msra.mxu0 %v8573_v19  ;;  %v9216_v19 = vld [vmem:[#allocation12 + $0xc0] sm:$0xf]  ;;  %v9133_v38 = vor.u32 %v10036_v54, %v9130_v8 }
 0x358   : > { %5680 = vmatpush.bf16.msrb.mxu2 %v8893_v16  ;;  %v9217_v20 = vor.u32 %v10059_v47, %v9216_v19  ;;  %v5335_v16 = vpop.f32.mrf.mxu1  ;;  %v9242_v19 = vld [vmem:[#allocation12 + $0xf8] sm:$0xf0] }
 0x359   : > { %6116 = vmatpush.bf16.msra.mxu3 %v9145_v52  ;;  %v11195_v52 = vpop.f32.mrf.mxu0 }
 0x35a   : > { %6129 = vmatpush.bf16.msra.mxu1 %v9217_v20  ;;  %v5321_v17 = vpop.f32.mrf.mxu3  ;;  %v9125_v20 = vor.u32 %v10034_v4, %v9122_v34  ;;  %v9194_v34 = vld [vmem:[#allocation12 + $0x98] sm:$0xf0] }
 0x35b   : > { %5635 = vmatpush.bf16.msra.mxu0 %v8557_v24  ;;  %v11202_v24 = vpop.f32.mrf.mxu2 }
 0x35c   : > { %5681 = vmatpush.bf16.msrb.mxu2 %v8877_v37 }
 0x35d   : > { %6117 = vmatpush.bf16.msra.mxu3 %v9137_v46  ;;  %v5264_v46 = vadd.f32 %v11182_v60, %v3966_v29  ;;  %v9050_v29 = vld [vmem:[#allocation9 + $0x778] sm:$0xf0] }
 0x35e   : > { %6130 = vmatpush.bf16.msra.mxu1 %v9209_v44 }
 0x35f   : > { %5636 = vmatpush.bf16.msra.mxu0 %v8541_v31  ;;  %5682 = vmatmul.bf16.vlgmr.msrb.gmra.mxu2 %v11157_v9  ;;  %v5278_v60 = vadd.f32 %v11184_v26, %v5264_v46  ;;  %v9149_v9 = vor.u32 %v10040_v10, %v9146_v55  ;;  %v9200_v31 = vld [vmem:[#allocation12 + $0xa0] sm:$0xf]  ;;  %v9082_v26 = vld [vmem:[#allocation9 + $0x7b8] sm:$0xf0] }
 0x360   : > { %v9201_v40 = vor.u32 %v10055_v11, %v9200_v31  ;;  %v9085_v0 = vor.u32 %v10023_v1, %v9082_v26  ;;  %v5389_v50 = vpop.f32.mrf.mxu1  ;;  %v9018_v55 = vld [vmem:[#allocation9 + $0x738] sm:$0xf0]  ;;  %v9226_v1 = vld [vmem:[#allocation12 + $0xd8] sm:$0xf0]  ;;  %v3967_v31 = vperm.slane %v11188_v53, 1 }
 0x361   : > { %6118 = vmatpush.bf16.msra.mxu3 %v9129_v23  ;;  %v9157_v23 = vor.u32 %v10042_v6, %v9154_v21  ;;  %v5307_v5 = vpop.f32.mrf.mxu0  ;;  %v9053_v6 = vor.u32 %v10015_v2, %v9050_v29  ;;  %v10011_v21 = vld [vmem:[#allocation9 + $0x74c] sm:$0xf]  ;;  %v10054_v29 = vld [vmem:[#allocation12 + $0xa4] sm:$0xf] }
 0x362   : > { %6131 = vmatpush.bf16.msra.mxu1 %v9201_v40  ;;  %v5375_v47 = vpop.f32.mrf.mxu3  ;;  %v9037_v10 = vor.u32 %v10011_v21, %v9034_v48  ;;  %v10003_v26 = vld [vmem:[#allocation9 + $0x70c] sm:$0xf]  ;;  %v9002_v40 = vld [vmem:[#allocation9 + $0x718] sm:$0xf0] }
 0x363   : > { %5637 = vmatpush.bf16.msra.mxu0 %v8525_v56  ;;  %v9066_v56 = vld [vmem:[#allocation9 + $0x798] sm:$0xf0]  ;;  %v5349_v51 = vpop.f32.mrf.mxu2 }
 0x364   : > { %v9069_v7 = vor.u32 %v10019_v13, %v9066_v56  ;;  %v5376_v13 = vadd.f32 %v5375_v47, %v3967_v31  ;;  %v9210_v56 = vld [vmem:[#allocation12 + $0xb8] sm:$0xf0] }
 0x365   : > { %6119 = vmatpush.bf16.msra.mxu3 %v9121_v22  ;;  %v5292_v22 = vadd.f32 %v11186_v45, %v5278_v60  ;;  %v5294_v45 = vadd.f32 %v11192_v3, %v5280_v39  ;;  %v10051_v3 = vld [vmem:[#allocation12 + $0x84] sm:$0xf0] }
 0x367   : > { %5638 = vmatpush.bf16.msra.mxu0 %v8509_v42  ;;  %v5306_v49 = vadd.f32 %v11195_v52, %v5292_v22  ;;  %v9184_v42 = vld [vmem:[#allocation12 + $0x80] sm:$0xf]  ;;  %v5308_v62 = vadd.f32 %v5307_v5, %v5294_v45  ;;  %v9005_v45 = vor.u32 %v10003_v26, %v9002_v40  ;;  %v10073_v40 = vld [vmem:[#allocation12 + $0x134] sm:$0xf0] }
 0x368   : > { %v9185_v61 = vor.u32 %v10051_v3, %v9184_v42 }
 0x369   : > { %6168 = vmatpush.bf16.msrb.mxu3 %v9181_v43  ;;  %v9138_v43 = vld [vmem:[#allocation12 + $0x28] sm:$0xf0]  ;;  %v5361_v37 = vpop.f32.mrf.mxu0  ;;  %v5322_v46 = vadd.f32 %v5321_v17, %v5308_v62  ;;  %v10058_v17 = vld [vmem:[#allocation12 + $0xc4] sm:$0xf] }
 0x36a   : > { %v9141_v41 = vor.u32 %v10038_v12, %v9138_v43  ;;  %v5377_v22 = vpop.f32.mrf.mxu3 }
 0x36b   : > { %5639 = vmatpush.bf16.msra.mxu0 %v8493_v18  ;;  %v5336_v18 = vadd.f32 %v5335_v16, %v5322_v46  ;;  %v5403_v33 = vpop.f32.mrf.mxu2  ;;  %v9218_v16 = vld [vmem:[#allocation12 + $0xc8] sm:$0xf0]  ;;  %v10081_v46 = vld [vmem:[#allocation12 + $0x174] sm:$0xf0] }
 0x36d   : > { %6169 = vmatpush.bf16.msrb.mxu3 %v9173_v14  ;;  %v9193_v14 = vor.u32 %v10053_v30, %v9192_v58  ;;  %v5350_v60 = vadd.f32 %v5349_v51, %v5336_v18  ;;  %v5391_v58 = vpop.f32.mrf.mxu1  ;;  %v5390_v51 = vadd.f32 %v5389_v50, %v5376_v13  ;;  %v10071_v13 = vld [vmem:[#allocation12 + $0x124] sm:$0xf0] }
 0x36e   : > { %5640 = vmatmul.bf16.vlgmr.msra.gmra.mxu0 %v11119_v59  ;;  %v5320_v59 = vadd.f32 %v11197_v15, %v5306_v49  ;;  %v10056_v49 = vld [vmem:[#allocation12 + $0xb4] sm:$0xf] }
 0x36f   : > { %5688 = vmatpush.bf16.msrb.mxu0 %v9117_v28  ;;  %6132 = vmatpush.bf16.msra.mxu1 %v9193_v14  ;;  %v9213_v8 = vor.u32 %v10056_v49, %v9210_v56  ;;  %v5378_v14 = vadd.f32 %v5377_v22, %v3967_v31  ;;  %v5404_v2 = vadd.f32 %v5403_v33, %v5390_v51  ;;  %v9280_v31 = vld [vmem:[#allocation12 + $0x140] sm:$0xf]  ;;  %v10067_v56 = vld [vmem:[#allocation12 + $0x104] sm:$0xf0] }
 0x370   : > { %v5334_v52 = vadd.f32 %v11200_v25, %v5320_v59  ;;  %v10062_v25 = vld [vmem:[#allocation12 + $0xe4] sm:$0xf]  ;;  %v9248_v49 = vld [vmem:[#allocation12 + $0x100] sm:$0xf] }
 0x371   : > { %6170 = vmatpush.bf16.msrb.mxu3 %v9165_v35  ;;  %v10064_v35 = vld [vmem:[#allocation12 + $0xf4] sm:$0xf]  ;;  %v5363_v32 = vpop.f32.mrf.mxu0 }
 0x372   : > { %v9245_v15 = vor.u32 %v10064_v35, %v9242_v19  ;;  %v5348_v57 = vadd.f32 %v11202_v24, %v5334_v52  ;;  %v10007_v24 = vld [vmem:[#allocation9 + $0x72c] sm:$0xf]  ;;  %v5364_v5 = vadd.f32 %v5363_v32, %v5350_v60  ;;  %v5431_v59 = vpop.f32.mrf.mxu3  ;;  %v10052_v52 = vld [vmem:[#allocation12 + $0x94] sm:$0xf] }
 0x373   : > { %5689 = vmatpush.bf16.msrb.mxu0 %v9101_v27  ;;  %6133 = vmatpush.bf16.msra.mxu1 %v9185_v61  ;;  %v10060_v27 = vld [vmem:[#allocation12 + $0xd4] sm:$0xf]  ;;  %v9021_v39 = vor.u32 %v10007_v24, %v9018_v55  ;;  %v5405_v54 = vpop.f32.mrf.mxu2  ;;  %v9197_v61 = vor.u32 %v10052_v52, %v9194_v34  ;;  %v10077_v24 = vld [vmem:[#allocation12 + $0x154] sm:$0xf0]  ;;  %v10074_v34 = vld [vmem:[#allocation12 + $0x144] sm:$0xf] }
 0x374   : > { %v5362_v28 = vadd.f32 %v5361_v37, %v5348_v57  ;;  %v5706_v11 = vmul.f32 0.2, %v5364_v5  ;;  %v9202_v37 = vld [vmem:[#allocation12 + $0xa8] sm:$0xf0]  ;;  %v10050_v57 = vld [vmem:[#allocation12 + $0x84] sm:$0xf] }
 0x375   : > { %6171 = vmatpush.bf16.msrb.mxu3 %v9157_v23  ;;  %v9234_v23 = vld [vmem:[#allocation12 + $0xe8] sm:$0xf0]  ;;  %v5445_v42 = vpop.f32.mrf.mxu1 }
 0x376   : > { %v9237_v63 = vor.u32 %v10062_v25, %v9234_v23  ;;  %v5702_v44 = vmul.f32 0.2, %v5362_v28  ;;  %v5714_v43 = vmax.f32 %v5364_v5, %v5706_v11  ;;  %v9296_v25 = vld [vmem:[#allocation12 + $0x160] sm:$0xf]  ;;  %v10079_v23 = vld [vmem:[#allocation12 + $0x164] sm:$0xf0] }
 0x377   : > { %5690 = vmatpush.bf16.msrb.mxu0 %v9085_v0  ;;  %6182 = vmatpush.bf16.msrb.mxu1 %v9245_v15  ;;  %v9221_v0 = vor.u32 %v10058_v17, %v9218_v16  ;;  %v9304_v15 = vld [vmem:[#allocation12 + $0x170] sm:$0xf]  ;;  %v10075_v11 = vld [vmem:[#allocation12 + $0x144] sm:$0xf0] }
 0x378   : > { %v5710_v12 = vmax.f32 %v5362_v28, %v5702_v44  ;;  %v9305_v21 = vor.u32 %v10081_v46, %v9304_v15  ;;  %v9281_v22 = vor.u32 %v10075_v11, %v9280_v31  ;;  %v10072_v46 = vld [vmem:[#allocation12 + $0x134] sm:$0xf]  ;;  %v9368_v11 = vld [vmem:[#allocation12 + $0x1f0] sm:$0xf] }
 0x379   : > { %6172 = vmatpush.bf16.msrb.mxu3 %v9149_v9  ;;  %v9229_v9 = vor.u32 %v10060_v27, %v9226_v1  ;;  %v5417_v30 = vpop.f32.mrf.mxu0 }
 0x37a   : > { %v5418_v4 = vadd.f32 %v5417_v30, %v5404_v2  ;;  %6140 = vmatpush.bf16.msra.mxu2 %v9305_v21  ;;  %v10069_v30 = vld [vmem:[#allocation12 + $0x114] sm:$0xf0]  ;;  %v10078_v2 = vld [vmem:[#allocation12 + $0x164] sm:$0xf] }
 0x37b   : > { %5691 = vmatpush.bf16.msrb.mxu0 %v9069_v7  ;;  %6183 = vmatpush.bf16.msrb.mxu1 %v9237_v63  ;;  %v9205_v7 = vor.u32 %v10054_v29, %v9202_v37  ;;  %v5459_v47 = vpop.f32.mrf.mxu2  ;;  %v9297_v63 = vor.u32 %v10079_v23, %v9296_v25  ;;  %v9298_v29 = vld [vmem:[#allocation12 + $0x168] sm:$0xf0]  ;;  %v10070_v21 = vld [vmem:[#allocation12 + $0x124] sm:$0xf]  ;;  %v10068_v23 = vld [vmem:[#allocation12 + $0x114] sm:$0xf] }
 0x37c   : > { %v5432_v35 = vadd.f32 %v5431_v59, %v5418_v4  ;;  %v9301_v37 = vor.u32 %v10078_v2, %v9298_v29  ;;  %v9290_v4 = vld [vmem:[#allocation12 + $0x158] sm:$0xf0]  ;;  %v9344_v2 = vld [vmem:[#allocation12 + $0x1c0] sm:$0xf]  ;;  %v10091_v29 = vld [vmem:[#allocation12 + $0x1c4] sm:$0xf0] }
 0x37d   : > { %6173 = vmatpush.bf16.msrb.mxu3 %v9141_v41  ;;  %v5718_v41 = vpack.c.bf16 %v5714_v43, %v5710_v12  ;;  %v5447_v50 = vpop.f32.mrf.mxu1  ;;  %v9272_v43 = vld [vmem:[#allocation12 + $0x130] sm:$0xf] }
 0x37e   : > { %v5446_v28 = vadd.f32 %v5445_v42, %v5432_v35  ;;  %6141 = vmatpush.bf16.msra.mxu2 %v9297_v63  ;;  %v9273_v17 = vor.u32 %v10073_v40, %v9272_v43 }
 0x37f   : > { %5692 = vmatpush.bf16.msrb.mxu0 %v9053_v6  ;;  %6184 = vmatpush.bf16.msrb.mxu1 %v9229_v9  ;;  %v5433_v6 = vpop.f32.mrf.mxu3 }
 0x380   : > { %6120 = vmatmul.bf16.vlgmr.msra.gmra.mxu3 %v5718_v41  ;;  %v5460_v60 = vadd.f32 %v5459_v47, %v5446_v28 }
 0x381   : > { %6174 = vmatpush.bf16.msrb.mxu3 %v9133_v38  ;;  %v5392_v38 = vadd.f32 %v5391_v58, %v5378_v14  ;;  %v5419_v3 = vpop.f32.mrf.mxu0  ;;  %v9256_v58 = vld [vmem:[#allocation12 + $0x110] sm:$0xf]  ;;  %v9306_v14 = vld [vmem:[#allocation12 + $0x178] sm:$0xf0] }
 0x383   : > { %5693 = vmatpush.bf16.msrb.mxu0 %v9037_v10  ;;  %6185 = vmatpush.bf16.msrb.mxu1 %v9221_v0  ;;  %v5406_v62 = vadd.f32 %v5405_v54, %v5392_v38  ;;  %v9288_v10 = vld [vmem:[#allocation12 + $0x150] sm:$0xf]  ;;  %v5461_v55 = vpop.f32.mrf.mxu2  ;;  %v9264_v0 = vld [vmem:[#allocation12 + $0x120] sm:$0xf]  ;;  %v9249_v54 = vor.u32 %v10067_v56, %v9248_v49  ;;  %v10076_v38 = vld [vmem:[#allocation12 + $0x154] sm:$0xf] }
 0x384   : > { %v9289_v44 = vor.u32 %v10077_v24, %v9288_v10  ;;  %v9293_v42 = vor.u32 %v10076_v38, %v9290_v4  ;;  %v10093_v49 = vld [vmem:[#allocation12 + $0x1d4] sm:$0xf0]  ;;  %v9336_v38 = vld [vmem:[#allocation12 + $0x1b0] sm:$0xf] }
 0x385   : > { %6175 = vmatpush.bf16.msrb.mxu3 %v9125_v20  ;;  %v5420_v19 = vadd.f32 %v5419_v3, %v5406_v62  ;;  %v9186_v20 = vld [vmem:[#allocation12 + $0x88] sm:$0xf0]  ;;  %v3968_v62 = vperm.slane %v11188_v53, 2  ;;  %v10089_v4 = vld [vmem:[#allocation12 + $0x1b4] sm:$0xf0] }
 0x386   : > { %6142 = vmatpush.bf16.msra.mxu2 %v9289_v44 }
 0x387   : > { %5694 = vmatpush.bf16.msrb.mxu0 %v9021_v39  ;;  %6186 = vmatpush.bf16.msrb.mxu1 %v9213_v8  ;;  %v5434_v18 = vadd.f32 %v5433_v6, %v5420_v19  ;;  %v10080_v8 = vld [vmem:[#allocation12 + $0x174] sm:$0xf]  ;;  %v5487_v59 = vpop.f32.mrf.mxu3 }
 0x388   : > { %v9309_v51 = vor.u32 %v10080_v8, %v9306_v14  ;;  %v5488_v47 = vadd.f32 %v5487_v59, %v3968_v62 }
 0x389   : > { %v5473_v48 = vpop.f32.mrf.mxu0  ;;  %v5448_v33 = vadd.f32 %v5447_v50, %v5434_v18  ;;  %v9258_v50 = vld [vmem:[#allocation12 + $0x118] sm:$0xf0] }
 0x38a   : > { %v5474_v32 = vadd.f32 %v5473_v48, %v5460_v60  ;;  %6143 = vmatpush.bf16.msra.mxu2 %v9281_v22  ;;  %v10097_v22 = vld [vmem:[#allocation12 + $0x1f4] sm:$0xf0] }
 0x38b   : > { %5695 = vmatpush.bf16.msrb.mxu0 %v9005_v45  ;;  %6187 = vmatpush.bf16.msrb.mxu1 %v9205_v7  ;;  %v5462_v5 = vadd.f32 %v5461_v55, %v5448_v33  ;;  %v9257_v45 = vor.u32 %v10069_v30, %v9256_v58  ;;  %v5501_v7 = vpop.f32.mrf.mxu1  ;;  %v5515_v3 = vpop.f32.mrf.mxu2 }
 0x38c   : > { %v5703_v1 = vmul.f32 0.2, %v5474_v32  ;;  %v5502_v28 = vadd.f32 %v5501_v7, %v5488_v47  ;;  %v10085_v47 = vld [vmem:[#allocation12 + $0x194] sm:$0xf0] }
 0x38e   : > { %5696 = vmatmul.bf16.vlgmr.msrb.gmra.mxu0 %v11166_v36  ;;  %v9189_v36 = vor.u32 %v10050_v57, %v9186_v20  ;;  %v5711_v26 = vmax.f32 %v5474_v32, %v5703_v1  ;;  %6144 = vmatpush.bf16.msra.mxu2 %v9273_v17  ;;  %v9274_v57 = vld [vmem:[#allocation12 + $0x138] sm:$0xf0]  ;;  %v9266_v20 = vld [vmem:[#allocation12 + $0x128] sm:$0xf0]  ;;  %v5516_v63 = vadd.f32 %v5515_v3, %v5502_v28  ;;  %v10066_v1 = vld [vmem:[#allocation12 + $0x104] sm:$0xf] }
 0x38f   : > { %6188 = vmatpush.bf16.msrb.mxu1 %v9197_v61  ;;  %v5489_v52 = vpop.f32.mrf.mxu3  ;;  %v9282_v61 = vld [vmem:[#allocation12 + $0x148] sm:$0xf0]  ;;  %v9277_v6 = vor.u32 %v10072_v46, %v9274_v57  ;;  %v9261_v32 = vor.u32 %v10068_v23, %v9258_v50  ;;  %v9360_v17 = vld [vmem:[#allocation12 + $0x1e0] sm:$0xf]  ;;  %v10083_v57 = vld [vmem:[#allocation12 + $0x184] sm:$0xf0] }
 0x390   : > { %6176 = vmatmul.bf16.vlgmr.msrb.gmra.mxu3 %v5718_v41  ;;  %v9265_v41 = vor.u32 %v10071_v13, %v9264_v0  ;;  %v9285_v35 = vor.u32 %v10074_v34, %v9282_v61  ;;  %v5490_v18 = vadd.f32 %v5489_v52, %v3968_v62  ;;  %v9337_v62 = vor.u32 %v10089_v4, %v9336_v38  ;;  %v9328_v52 = vld [vmem:[#allocation12 + $0x1a0] sm:$0xf]  ;;  %v10087_v34 = vld [vmem:[#allocation12 + $0x1a4] sm:$0xf0]  ;;  %v10092_v50 = vld [vmem:[#allocation12 + $0x1d4] sm:$0xf] }
 0x391   : > { %v5475_v27 = vpop.f32.mrf.mxu0  ;;  %v9312_v46 = vld [vmem:[#allocation12 + $0x180] sm:$0xf] }
 0x392   : > { %v5476_v9 = vadd.f32 %v5475_v27, %v5462_v5  ;;  %6145 = vmatpush.bf16.msra.mxu2 %v9265_v41 }
 0x393   : > { %6189 = vmatpush.bf16.msrb.mxu1 %v9189_v36  ;;  %v5503_v15 = vpop.f32.mrf.mxu1  ;;  %v9269_v36 = vor.u32 %v10070_v21, %v9266_v20  ;;  %v5517_v25 = vpop.f32.mrf.mxu2  ;;  %v10096_v21 = vld [vmem:[#allocation12 + $0x1f4] sm:$0xf]  ;;  %v9370_v20 = vld [vmem:[#allocation12 + $0x1f8] sm:$0xf0] }
 0x394   : > { %v5707_v39 = vmul.f32 0.2, %v5476_v9  ;;  %v5504_v60 = vadd.f32 %v5503_v15, %v5490_v18  ;;  %v9373_v18 = vor.u32 %v10096_v21, %v9370_v20 }
 0x396   : > { %v5715_v12 = vmax.f32 %v5476_v9, %v5707_v39  ;;  %6146 = vmatpush.bf16.msra.mxu2 %v9257_v45  ;;  %v5518_v55 = vadd.f32 %v5517_v25, %v5504_v60  ;;  %v9250_v9 = vld [vmem:[#allocation12 + $0x108] sm:$0xf0]  ;;  %v9352_v45 = vld [vmem:[#allocation12 + $0x1d0] sm:$0xf] }
 0x397   : > { %v5543_v48 = vpop.f32.mrf.mxu3  ;;  %v9253_v31 = vor.u32 %v10066_v1, %v9250_v9  ;;  %v10088_v9 = vld [vmem:[#allocation12 + $0x1b4] sm:$0xf] }
 0x398   : > { %v5719_v16 = vpack.c.bf16 %v5715_v12, %v5711_v26  ;;  %v9369_v26 = vor.u32 %v10097_v22, %v9368_v11  ;;  %v10086_v22 = vld [vmem:[#allocation12 + $0x1a4] sm:$0xf] }
 0x39a   : > { %6134 = vmatmul.bf16.vlgmr.msra.gmra.mxu1 %v5719_v16  ;;  %6147 = vmatpush.bf16.msra.mxu2 %v9249_v54  ;;  %v9353_v54 = vor.u32 %v10093_v49, %v9352_v45 }
 0x39b   : > { %v5557_v10 = vpop.f32.mrf.mxu1  ;;  %6154 = vmatpush.bf16.msra.mxu0 %v9369_v26 }
 0x39e   : > { %6196 = vmatpush.bf16.msrb.mxu2 %v9309_v51 }
 0x39f   : > { %v5545_v39 = vpop.f32.mrf.mxu3 }
 0x3a2   : > { %6197 = vmatpush.bf16.msrb.mxu2 %v9301_v37  ;;  %v5571_v27 = vpop.f32.mrf.mxu2  ;;  %v9345_v37 = vor.u32 %v10091_v29, %v9344_v2 }
 0x3a3   : > { %v5559_v0 = vpop.f32.mrf.mxu1 }
 0x3a6   : > { %6198 = vmatpush.bf16.msrb.mxu2 %v9293_v42 }
 0x3aa   : > { %6190 = vmatmul.bf16.vlgmr.msrb.gmra.mxu1 %v5719_v16  ;;  %6199 = vmatpush.bf16.msrb.mxu2 %v9285_v35  ;;  %v10095_v16 = vld [vmem:[#allocation12 + $0x1e4] sm:$0xf0]  ;;  %v5573_v56 = vpop.f32.mrf.mxu2  ;;  %v9329_v35 = vor.u32 %v10087_v34, %v9328_v52 }
 0x3ab   : > { %v5529_v19 = vpop.f32.mrf.mxu0  ;;  %v9361_v13 = vor.u32 %v10095_v16, %v9360_v17  ;;  %v5599_v28 = vpop.f32.mrf.mxu3 }
 0x3ac   : > { %v5530_v33 = vadd.f32 %v5529_v19, %v5516_v63  ;;  %v9320_v19 = vld [vmem:[#allocation12 + $0x190] sm:$0xf]  ;;  %v5613_v23 = vpop.f32.mrf.mxu1  ;;  %v9354_v63 = vld [vmem:[#allocation12 + $0x1d8] sm:$0xf0] }
 0x3ad   : > { %6155 = vmatpush.bf16.msra.mxu0 %v9361_v13  ;;  %v9321_v15 = vor.u32 %v10085_v47, %v9320_v19  ;;  %v9357_v60 = vor.u32 %v10092_v50, %v9354_v63 }
 0x3ae   : > { %6200 = vmatpush.bf16.msrb.mxu2 %v9277_v6  ;;  %v5544_v44 = vadd.f32 %v5543_v48, %v5530_v33  ;;  %v9313_v6 = vor.u32 %v10083_v57, %v9312_v46  ;;  %v9362_v48 = vld [vmem:[#allocation12 + $0x1e8] sm:$0xf0] }
 0x3b0   : > { %v5558_v12 = vadd.f32 %v5557_v10, %v5544_v44 }
 0x3b1   : > { %6156 = vmatpush.bf16.msra.mxu0 %v9353_v54 }
 0x3b2   : > { %6201 = vmatpush.bf16.msrb.mxu2 %v9269_v36  ;;  %v5572_v41 = vadd.f32 %v5571_v27, %v5558_v12  ;;  %v10094_v36 = vld [vmem:[#allocation12 + $0x1e4] sm:$0xf] }
 0x3b3   : > { %v5531_v24 = vpop.f32.mrf.mxu0  ;;  %v9365_v25 = vor.u32 %v10094_v36, %v9362_v48  ;;  %v5601_v10 = vpop.f32.mrf.mxu3 }
 0x3b4   : > { %v5532_v5 = vadd.f32 %v5531_v24, %v5518_v55  ;;  %v10090_v24 = vld [vmem:[#allocation12 + $0x1c4] sm:$0xf]  ;;  %v9346_v55 = vld [vmem:[#allocation12 + $0x1c8] sm:$0xf0]  ;;  %v5615_v1 = vpop.f32.mrf.mxu1 }
 0x3b5   : > { %6157 = vmatpush.bf16.msra.mxu0 %v9345_v37  ;;  %v9349_v44 = vor.u32 %v10090_v24, %v9346_v55 }
 0x3b6   : > { %6202 = vmatpush.bf16.msrb.mxu2 %v9261_v32  ;;  %v5546_v43 = vadd.f32 %v5545_v39, %v5532_v5  ;;  %v3969_v32 = vperm.slane %v11188_v53, 3  ;;  %v9330_v39 = vld [vmem:[#allocation12 + $0x1a8] sm:$0xf0] }
 0x3b8   : > { %v5560_v58 = vadd.f32 %v5559_v0, %v5546_v43  ;;  %v5600_v27 = vadd.f32 %v5599_v28, %v3969_v32  ;;  %v5602_v26 = vadd.f32 %v5601_v10, %v3969_v32  ;;  %v9333_v43 = vor.u32 %v10086_v22, %v9330_v39  ;;  %v5786_v28 = vld [vmem:[#allocation14] sm:$0x3] }
 0x3b9   : > { %6158 = vmatpush.bf16.msra.mxu0 %v9337_v62  ;;  %v5789_v63 = vperm.slane %v5786_v28, 1 }
 0x3ba   : > { %6203 = vmatpush.bf16.msrb.mxu2 %v9253_v31  ;;  %v5574_v8 = vadd.f32 %v5573_v56, %v5560_v58  ;;  %v9338_v31 = vld [vmem:[#allocation12 + $0x1b8] sm:$0xf0]  ;;  %v5614_v12 = vadd.f32 %v5613_v23, %v5600_v27  ;;  %v5616_v16 = vadd.f32 %v5615_v1, %v5602_v26  ;;  %v10084_v58 = vld [vmem:[#allocation12 + $0x194] sm:$0xf] }
 0x3bb   : > { %v9341_v11 = vor.u32 %v10088_v9, %v9338_v31 }
 0x3bd   : > { %6159 = vmatpush.bf16.msra.mxu0 %v9329_v35 }
 0x3c1   : > { %6160 = vmatpush.bf16.msra.mxu0 %v9321_v15 }
 0x3c2   : > { %v5627_v33 = vpop.f32.mrf.mxu2 }
 0x3c3   : > { %v5628_v17 = vadd.f32 %v5627_v33, %v5614_v12 }
 0x3c5   : > { %6161 = vmatpush.bf16.msra.mxu0 %v9313_v6 }
 0x3c6   : > { %v5669_v13 = vpop.f32.mrf.mxu1 }
 0x3c9   : > { %6210 = vmatpush.bf16.msrb.mxu0 %v9373_v18 }
 0x3ca   : > { %v5629_v53 = vpop.f32.mrf.mxu2 }
 0x3cb   : > { %v5585_v40 = vpop.f32.mrf.mxu0  ;;  %v5630_v45 = vadd.f32 %v5629_v53, %v5616_v16 }
 0x3cc   : > { %v5586_v30 = vadd.f32 %v5585_v40, %v5572_v41  ;;  %v5655_v40 = vpop.f32.mrf.mxu3 }
 0x3cd   : > { %6211 = vmatpush.bf16.msrb.mxu0 %v9365_v25  ;;  %v5788_v25 = vperm.slane %v5786_v28, 0 }
 0x3ce   : > { %v5704_v51 = vmul.f32 0.2, %v5586_v30  ;;  %v5671_v38 = vpop.f32.mrf.mxu1 }
 0x3d0   : > { %v5712_v42 = vmax.f32 %v5586_v30, %v5704_v51  ;;  %v9322_v30 = vld [vmem:[#allocation12 + $0x198] sm:$0xf0] }
 0x3d1   : > { %6212 = vmatpush.bf16.msrb.mxu0 %v9357_v60  ;;  %v9325_v49 = vor.u32 %v10084_v58, %v9322_v30 }
 0x3d3   : > { %v5587_v14 = vpop.f32.mrf.mxu0 }
 0x3d4   : > { %v5588_v59 = vadd.f32 %v5587_v14, %v5574_v8  ;;  %v10082_v8 = vld [vmem:[#allocation12 + $0x184] sm:$0xf]  ;;  %v9314_v14 = vld [vmem:[#allocation12 + $0x188] sm:$0xf0]  ;;  %v5657_v2 = vpop.f32.mrf.mxu3 }
 0x3d5   : > { %6213 = vmatpush.bf16.msrb.mxu0 %v9349_v44 }
 0x3d6   : > { %v5708_v7 = vmul.f32 0.2, %v5588_v59 }
 0x3d8   : > { %v5716_v3 = vmax.f32 %v5588_v59, %v5708_v7  ;;  %v9317_v59 = vor.u32 %v10082_v8, %v9314_v14 }
 0x3d9   : > { %6214 = vmatpush.bf16.msrb.mxu0 %v9341_v11 }
 0x3da   : > { %v5720_v61 = vpack.c.bf16 %v5716_v3, %v5712_v42 }
 0x3dc   : > { %6148 = vmatmul.bf16.vlgmr.msra.gmra.mxu2 %v5720_v61 }
 0x3dd   : > { %6215 = vmatpush.bf16.msrb.mxu0 %v9333_v43 }
 0x3e1   : > { %6216 = vmatpush.bf16.msrb.mxu0 %v9325_v49 }
 0x3e2   : > { %v5683_v51 = vpop.f32.mrf.mxu2 }
 0x3e5   : > { %6217 = vmatpush.bf16.msrb.mxu0 %v9317_v59 }
 0x3ea   : > { %v5685_v62 = vpop.f32.mrf.mxu2 }
 0x3eb   : > { %v5641_v5 = vpop.f32.mrf.mxu0 }
 0x3ec   : > { %6204 = vmatmul.bf16.vlgmr.msrb.gmra.mxu2 %v5720_v61  ;;  %v5642_v0 = vadd.f32 %v5641_v5, %v5628_v17  ;;  %v6238_v17 = vld [vmem:[#allocation15] sm:$0x3] }
 0x3ed   : > { %v6241_v49 = vperm.slane %v6238_v17, 1 }
 0x3ee   : > { %v5656_v56 = vadd.f32 %v5655_v40, %v5642_v0 }
 0x3f0   : > { %v5670_v29 = vadd.f32 %v5669_v13, %v5656_v56 }
 0x3f2   : > { %v5684_v4 = vadd.f32 %v5683_v51, %v5670_v29 }
 0x3f3   : > { %v5643_v41 = vpop.f32.mrf.mxu0 }
 0x3f4   : > { %v5644_v54 = vadd.f32 %v5643_v41, %v5630_v45  ;;  %v6240_v45 = vperm.slane %v6238_v17, 0 }
 0x3f6   : > { %v5658_v37 = vadd.f32 %v5657_v2, %v5644_v54 }
 0x3f8   : > { %v5672_v42 = vadd.f32 %v5671_v38, %v5658_v37 }
 0x3fa   : > { %v5686_v52 = vadd.f32 %v5685_v62, %v5672_v42 }
 0x403   : > { %v6121_v57 = vpop.f32.mrf.mxu3 }
 0x404   : > { %v6122_v50 = vadd.f32 %v6121_v57, %v5788_v25 }
 0x40b   : > { %v5697_v7 = vpop.f32.mrf.mxu0  ;;  %v6123_v20 = vpop.f32.mrf.mxu3 }
 0x40c   : > { %v5698_v3 = vadd.f32 %v5697_v7, %v5684_v4  ;;  %v6124_v27 = vadd.f32 %v6123_v20, %v5788_v25 }
 0x40e   : > { %v5705_v61 = vmul.f32 0.2, %v5698_v3 }
 0x410   : > { %v5713_v47 = vmax.f32 %v5698_v3, %v5705_v61  ;;  %v10592_v61 = vmov 0  }
 0x411   : > { %10235 = vset.pattern.permute.xlu1 %v10592_v61  ;;  %10241 = vset.pattern.permute.xlu0 %v10592_v61 }
 0x413   : > { %v5699_v34 = vpop.f32.mrf.mxu0  ;;  %v6177_v23 = vpop.f32.mrf.mxu3 }
 0x414   : > { %v5700_v35 = vadd.f32 %v5699_v34, %v5686_v52  ;;  %v6178_v24 = vadd.f32 %v6177_v23, %v5789_v63 }
 0x416   : > { %v5709_v19 = vmul.f32 0.2, %v5700_v35 }
 0x417   : > { %v6135_v6 = vpop.f32.mrf.mxu1 }
 0x418   : > { %v5717_v15 = vmax.f32 %v5700_v35, %v5709_v19  ;;  %v6136_v32 = vadd.f32 %v6135_v6, %v6122_v50  ;;  %v10242_v35 = vld [vmem:[#allocation2] ss:$0 sm:$0xff] }
 0x41a   : > { %v5721_v46 = vpack.c.bf16 %v5717_v15, %v5713_v47 }
 0x41b   : > { %v6179_v9 = vpop.f32.mrf.mxu3 }
 0x41c   : > { %6162 = vmatmul.bf16.vlgmr.msra.gmra.mxu0 %v5721_v46  ;;  %v6180_v12 = vadd.f32 %v6179_v9, %v5789_v63 }
 0x41f   : > { %v6137_v18 = vpop.f32.mrf.mxu1 }
 0x420   : > { %v6138_v11 = vadd.f32 %v6137_v18, %v6124_v27 }
 0x427   : > { %v6191_v60 = vpop.f32.mrf.mxu1 }
 0x428   : > { %v6192_v44 = vadd.f32 %v6191_v60, %v6178_v24 }
 0x42c   : > { %6218 = vmatmul.bf16.vlgmr.msrb.gmra.mxu0 %v5721_v46 }
 0x42f   : > { %v6193_v26 = vpop.f32.mrf.mxu1 }
 0x430   : > { %v6194_v16 = vadd.f32 %v6193_v26, %v6180_v12 }
 0x45f   : > { %v6149_v21 = vpop.f32.mrf.mxu2 }
 0x460   : > { %v6150_v55 = vadd.f32 %v6149_v21, %v6136_v32 }
 0x467   : > { %v6151_v36 = vpop.f32.mrf.mxu2 }
 0x468   : > { %v6152_v43 = vadd.f32 %v6151_v36, %v6138_v11 }
 0x46f   : > { %v6205_v10 = vpop.f32.mrf.mxu2 }
 0x470   : > { %v6206_v1 = vadd.f32 %v6205_v10, %v6192_v44 }
 0x477   : > { %v6207_v53 = vpop.f32.mrf.mxu2 }
 0x478   : > { %v6208_v58 = vadd.f32 %v6207_v53, %v6194_v16 }
 0x499   : > { %v6163_v48 = vpop.f32.mrf.mxu0 }
 0x49a   : > { %v6164_v5 = vadd.f32 %v6163_v48, %v6150_v55 }
 0x49c   : > { %v6224_v22 = vmul.f32 0.2, %v6164_v5 }
 0x49e   : > { %v6228_v0 = vmax.f32 %v6164_v5, %v6224_v22 }
 0x4a1   : > { %v6165_v33 = vpop.f32.mrf.mxu0 }
 0x4a2   : > { %v6166_v13 = vadd.f32 %v6165_v33, %v6152_v43 }
 0x4a4   : > { %v6226_v54 = vmul.f32 0.2, %v6166_v13 }
 0x4a6   : > { %v6230_v37 = vmax.f32 %v6166_v13, %v6226_v54 }
 0x4a9   : > { %v6219_v31 = vpop.f32.mrf.mxu0 }
 0x4aa   : > { %v6220_v39 = vadd.f32 %v6219_v31, %v6206_v1 }
 0x4ac   : > { %v6225_v40 = vmul.f32 0.2, %v6220_v39 }
 0x4ae   : > { %v6229_v41 = vmax.f32 %v6220_v39, %v6225_v40 }
 0x4b0   : > { %v6232_v30 = vpack.c.bf16 %v6229_v41, %v6228_v0 }
 0x4b1   : > { %v6221_v56 = vpop.f32.mrf.mxu0 }
 0x4b2   : > { %v6222_v8 = vadd.f32 %v6221_v56, %v6208_v58  ;;  %v6234_v14 = vunpack.c.l.bf16 %v6232_v30  ;;  %v6235_v51 = vunpack.c.h.bf16 %v6232_v30 }
 0x4b4   : > { %v6227_v59 = vmul.f32 0.2, %v6222_v8  ;;  %v6244_v2 = vmul.f32 %v6240_v45, %v6234_v14  ;;  %v6245_v29 = vmul.f32 %v6241_v49, %v6235_v51 }
 0x4b6   : > { %v6231_v7 = vmax.f32 %v6222_v8, %v6227_v59  ;;  %v6248_v38 = vadd.f32 %v6245_v29, %v6244_v2 }
 0x4b8   : > { %v6233_v4 = vpack.c.bf16 %v6231_v7, %v6230_v37  ;;  %6249 = vadd.xlane.f32.xlu0 %v6248_v38 }
 0x4ba   : > { %v6236_v42 = vunpack.c.l.bf16 %v6233_v4  ;;  %v6237_v3 = vunpack.c.h.bf16 %v6233_v4 }
 0x4bc   : > { %v6246_v62 = vmul.f32 %v6240_v45, %v6236_v42  ;;  %v6247_v52 = vmul.f32 %v6241_v49, %v6237_v3 }
 0x4be   : > { %v6251_v34 = vadd.f32 %v6247_v52, %v6246_v62 }
 0x4c0   : > { %6252 = vadd.xlane.f32.xlu0 %v6251_v34 }
 0x52b   : > { %v6250_v19 = vpop.xlane.xlu0 %6249 }
 0x52c   : > { %v6258_v47 = vadd.f32 %v10242_v35, %v6250_v19 }
 0x52e   : > { %v6260_v15 = vsub.f32 0.0, %v6258_v47 }
 0x530   : > { %v6262_v46 = vmul.f32 1.442695, %v6260_v15 }
 0x532   : > { %10243 = vpow2.f32 %v6262_v46 }
 0x533   : > { %v6253_v57 = vpop.xlane.xlu0 %6252 }
 0x534   : > { %v6259_v6 = vadd.f32 %v10242_v35, %v6253_v57 }
 0x536   : > { %v6261_v21 = vsub.f32 0.0, %v6259_v6 }
 0x538   : > { %v10244_v20 = vpop.eup %10243  ;;  %v6264_v18 = vmul.f32 1.442695, %v6261_v21 }
 0x539   : > { %v6266_v28 = vadd.f32 1.0, %v10244_v20 }
 0x53a   : > { %10245 = vpow2.f32 %v6264_v18 }
 0x53b   : > { %10247 = vrcp.f32 %v6266_v28  ;;  %vm6273_vm2 = vweird.f32 %v6266_v28  ;;  %v6279_v24 = vand.u32 2147483648, %v6266_v28  ;;  %v6277_v44 = vand.u32 2147483647, %v6266_v28 }
 0x53d   : > { %v6280_v31 = vor.u32 1.1754944e-38, %v6279_v24  ;;  %vm6278_vm7 = vcmp.eq.f32.partialorder %v6277_v44, 8.507059e+37 }
 0x540   : > { %v10246_v36 = vpop.eup %10245 }
 0x541   : > { %v10248_v48 = vpop.eup %10247  ;;  %v6267_v25 = vadd.f32 1.0, %v10246_v36 }
 0x542   : > { %v6269_v23 = vmul.f32 %v10248_v48, %v6266_v28  ;;  %vm6274_vm1 = vweird.f32 %v10248_v48 }
 0x543   : > { %10249 = vrcp.f32 %v6267_v25  ;;  %v6294_v55 = vand.u32 2147483648, %v6267_v25  ;;  %v6292_v27 = vand.u32 2147483647, %v6267_v25  ;;  %vm6275_vm4 = vmor %vm6273_vm2, %vm6274_vm1  ;;  %vm6288_vm5 = vweird.f32 %v6267_v25 }
 0x544   : > { %v6270_v50 = vsub.f32 1.0, %v6269_v23 }
 0x545   : > { %v6295_v11 = vor.u32 1.1754944e-38, %v6294_v55  ;;  %vm6293_vm8 = vcmp.eq.f32.partialorder %v6292_v27, 8.507059e+37 }
 0x546   : > { %v6271_v63 = vmul.f32 %v10248_v48, %v6270_v50 }
 0x548   : > { %v6272_v32 = vadd.f32 %v10248_v48, %v6271_v63 }
 0x549   : > { %v10250_v60 = vpop.eup %10249 }
 0x54a   : > { %v6284_v33 = vmul.f32 %v10250_v60, %v6267_v25  ;;  %vm6289_vm3 = vweird.f32 %v10250_v60  ;;  %v6276_v1 = vsel %vm6275_vm4, %v10248_v48, %v6272_v32 }
 0x54b   : > { %vm6290_vm6 = vmor %vm6288_vm5, %vm6289_vm3  ;;  %v6281_v39 = vsel %vm6278_vm7, %v6280_v31, %v6276_v1 }
 0x54c   : > { %v6285_v10 = vsub.f32 1.0, %v6284_v33 }
 0x54e   : > { %v6286_v5 = vmul.f32 %v10250_v60, %v6285_v10 }
 0x550   : > { %v6287_v9 = vadd.f32 %v10250_v60, %v6286_v5 }
 0x552   : > { %v6291_v22 = vsel %vm6290_vm6, %v10250_v60, %v6287_v9 }
 0x553   : > { %v6296_v26 = vsel %vm6293_vm8, %v6295_v11, %v6291_v22 }
 0x554   : > { %v10236_v12 = vpack.i.bf16 %v6296_v26, %v6281_v39 }
 0x556   : > { %10237 = vperm.xlu1 %10235, %v10236_v12  }
 0x5c8   : > { %v10238_v43 = vpop.permute.xlu1 %10237 }
 0x5c9   : > { %v10240_v40 = vunpack.i.h.bf16 %v10238_v43  ;;  %v10239_v53 = vunpack.i.l.bf16 %v10238_v43 }
 0x5cb   : > { %v10102_v17 = vpack.c.bf16 %v10240_v40, %v10239_v53 }
 0x5cd   : > { %10103 = vst [vmem:[%s463_s20] sm:$0xff] %v10102_v17  }
 0x5ce   : > { %10520 = shalt.err (!%p10517_p8)
}
 0x5cf   : > { %s10593_s3 = smov 64   ;;  %s10594_s25 = smov 4  }
 0x5d0   : > { %10137 = dma.vmem_to_hbm [thread:$0]  (%p10743_p13), %s6326_s23, 128, %s6328_s26, %s6313_s28, %s10593_s3, %s10593_s3, %s10594_s25  }
 0x5d1 PF: > { %p10184_p9 = scmp.ge.s32.totalorder %s10575_s14, 2  ;;  %s6342_s2 = sand.u32 1, %s10563_s11  }
 0x5d2   : > { %s6343_s5 = scalar_lea.sflag [#allocation5], %s6342_s2 }
 0x5d3   : > { %p10166_p10 = pnand %p10184_p9, %p10749_p4 }
 0x5d5   : > { %p10167_p11 = pneg %p10166_p10 }
 0x5d7   : > { %10558 = dma.done.wait (%p10167_p11), %s6343_s5, 128  }
 0x5d8   : > { %10560 = vsyncadd (%p10167_p11), %s6343_s5, 4294967168  ;;  %p28_p0 = scmp.ge.s32.totalorder %s10723_s27, 5   ;;  %s11307_s11 = smov %s10567_s12 }
 0x5d9   : > { %s11308_s12 = smov %s10571_s13  ;;  %s11309_s13 = smov %s10735_s30 }
 0x5da   : > { %s11310_s14 = smov %s10723_s27  ;;  %30 = sbr.rel (!%p28_p0) target bundleno = 15 (0xf), region = 129 }
 0x5df   :  { %6349 = vsyncpa [#allocation4], 1 }
 0x5e0   :  { %6351 = vsyncpa [#allocation4 + $0x1], 1 }
 0x5e1   :  { %6352 = vsyncpa [#allocation7], 1 }
 0x5e2   :  { %6353 = vsyncpa [#allocation10], 1 }
 0x5e3   :  { %6354 = vsyncpa [#allocation13], 1 }
 0x5e4   :  { %6355 = vsyncpa [#allocation16], 1 }
 0x5e5   :  { %6356 = vsyncpa [#allocation5], 1 }
 0x5e6   :  { %6358 = vsyncpa [#allocation5 + $0x1], 1 }

// kernel: tpu_custom_call.1
= control target key start
LH: loop header
LB: loop body
LE: loop exit
PB: predicated region body
PF: predicated region fallthrough
CT: control target
= control target key end

     0   :  { %s11251_s0 = inlined_call_operand.hbm [shape: bf16[48,784], index: 0, kind: input, shape index: {}]   ;;  %s11252_s1 = inlined_call_operand.hbm [shape: bf16[784,1024], index: 1, kind: input, shape index: {}]   ;;  %s11253_s2 = inlined_call_operand.hbm [shape: f32[1,1024], index: 2, kind: input, shape index: {}]   ;;  %s11254_s3 = inlined_call_operand.hbm [shape: bf16[1024,512], index: 3, kind: input, shape index: {}]   ;;  %s11255_s4 = inlined_call_operand.hbm [shape: f32[1,512], index: 4, kind: input, shape index: {}]   ;;  %s11256_s5 = inlined_call_operand.hbm [shape: bf16[512,256], index: 5, kind: input, shape index: {}]   ;;  %s11257_s6 = inlined_call_operand.hbm [shape: f32[1,256], index: 6, kind: input, shape index: {}]   ;;  %s11258_s7 = inlined_call_operand.hbm [shape: f32[1,256], index: 7, kind: input, shape index: {}]   ;;  %s11259_s8 = inlined_call_operand.<no memory space> [shape: f32[1,1], index: 8, kind: input, shape index: {}]   ;;  %s11260_s9 = inlined_call_operand.hbm [shape: bf16[48,128], index: 9, kind: output, shape index: {}]  }
   0x1   :  { %11265 = sst [smem:[#allocation35_spill]] %s11252_s1  ;;  %v14_v0 = vstv %s11259_s8 }
   0x2   :  { %11266 = sst [smem:[#allocation36_spill]] %s11253_s2  ;;  %15 = vst [vmem:[#allocation2] sm:$0x1] %v14_v0 }
   0x3   :  { %11267 = sst [smem:[#allocation37_spill]] %s11254_s3 }
   0x4   :  { %11268 = sst [smem:[#allocation38_spill]] %s11255_s4 }
   0x5   :  { %11269 = sst [smem:[#allocation39_spill]] %s11256_s5 }
   0x6   :  { %16 = vsyncpa [#allocation4], 0 }
   0x7   :  { %18 = vsyncpa [#allocation4 + $0x1], 0 }
   0x8   :  { %19 = vsyncpa [#allocation7], 0 }
   0x9   :  { %20 = vsyncpa [#allocation10], 0 }
   0xa   :  { %21 = vsyncpa [#allocation13], 0 }
   0xb   :  { %22 = vsyncpa [#allocation16], 0 }
   0xc   :  { %23 = vsyncpa [#allocation5], 0 }
   0xd   :  { %25 = vsyncpa [#allocation5 + $0x1], 0  ;;  %s10648_s11 = smov 0   ;;  %s10650_s12 = smov 0  }
   0xe   :  { %s10652_s13 = smov 0   ;;  %s10654_s14 = smov 0  }
   0xf LB: > { %s11270_s1 = sld [smem:[#allocation35_spill]]  ;;  %s10672_s17 = sadd.s32 4294967295, %s10575_s14   ;;  %s10575_s14 = sphi %s10654_s14, %s11310_s14   ;;  %s10571_s13 = sphi %s10652_s13, %s11309_s13   ;;  %s10567_s12 = sphi %s10650_s12, %s11308_s12   ;;  %s10563_s11 = sphi %s10648_s11, %s11307_s11  }
  0x10   : > { %p6469_p0 = scmp.ge.s32.totalorder %s10575_s14, 1  ;;  %p52_p1 = scmp.eq.s32.totalorder %s10672_s17, 0 }
  0x11   : > { %p256_p2 = scmp.lt.s32.totalorder %s10575_s14, 4  ;;  %s10577_s19 = smov [#allocation6]  }
  0x12   : > { %s269_s20 = sshll.u32 %s10577_s19, 4  ;;  %s11272_s3 = sld [smem:[#allocation37_spill]]  ;;  %s270_s20 = int_to_ptr.vmem [resolvable:$true] %s269_s20 }
  0x13   : > { %p10677_p3 = pnand %p6469_p0, %p256_p2  ;;  %s10578_s25 = smov [#allocation9]  }
  0x14   : > { %s295_s26 = sshll.u32 %s10578_s25, 4  ;;  %s10579_s27 = smov 512   ;;  %s296_s26 = int_to_ptr.vmem [resolvable:$true] %s295_s26 }
  0x15   : > { %s267_s16 = sshll.u32 %s11270_s1, 4  ;;  %p10139_p4 = pneg %p10677_p3  ;;  %s268_s16 = int_to_ptr.hbm [resolvable:$true] %s267_s16 }
  0x16   : > { %s10580_s28 = smov 32   ;;  %s10581_s29 = smov 256  }
  0x17   : > { %p10688_p5 = pnand %p10139_p4, %p52_p1  ;;  %s10582_s30 = smov 16  }
  0x18   : > { %s293_s23 = sshll.u32 %s11272_s3, 4  ;;  %s11274_s5 = sld [smem:[#allocation39_spill]]  ;;  %s294_s23 = int_to_ptr.hbm [resolvable:$true] %s293_s23 }
  0x19   : > { %10142 = dma.hbm_to_vmem [thread:$0]  (!%p10688_p5), %s268_s16, 50176, %s270_s20, [#allocation7], %s10579_s27, %s10579_s27, %s10580_s28  }
  0x1a   : > { %10148 = dma.hbm_to_vmem [thread:$0]  (!%p10688_p5), %s294_s23, 32768, %s296_s26, [#allocation10], %s10581_s29, %s10581_s29, %s10582_s30  }
  0x1b   : > { %s10583_s19 = smov [#allocation12]   ;;  %s11275_s2 = sld [smem:[#allocation36_spill]] }
  0x1c   : > { %s321_s21 = sshll.u32 %s10583_s19, 4  ;;  %s10584_s16 = smov 128   ;;  %s322_s21 = int_to_ptr.vmem [resolvable:$true] %s321_s21 }
  0x1d   : > { %s10585_s20 = smov 8   ;;  %s10586_s23 = smov [#allocation8]  }
  0x1e   : > { %s319_s15 = sshll.u32 %s11274_s5, 4  ;;  %s284_s26 = sshll.u32 %s10586_s23, 4  ;;  %s320_s15 = int_to_ptr.hbm [resolvable:$true] %s319_s15  ;;  %s285_s26 = int_to_ptr.vmem [resolvable:$true] %s284_s26 }
  0x1f   : > { %10154 = dma.hbm_to_vmem [thread:$0]  (!%p10688_p5), %s320_s15, 8192, %s322_s21, [#allocation13], %s10584_s16, %s10584_s16, %s10585_s20  }
  0x20   : > { %s11276_s4 = sld [smem:[#allocation38_spill]]  ;;  %s334_s8 = sshll.u32 %s11257_s6, 4  ;;  %s335_s8 = int_to_ptr.hbm [resolvable:$true] %s334_s8 }
  0x21   : > { %s282_s1 = sshll.u32 %s11275_s2, 4  ;;  %s10587_s19 = smov [#allocation11]   ;;  %s283_s1 = int_to_ptr.hbm [resolvable:$true] %s282_s1 }
  0x22   : > { %10145 = dma.hbm_to_vmem [thread:$0]  (!%p10688_p5), %s283_s1, 128, %s285_s26, [#allocation7]  }
  0x23   : > { %s310_s15 = sshll.u32 %s10587_s19, 4  ;;  %s10588_s21 = smov [#allocation14]   ;;  %s311_s15 = int_to_ptr.vmem [resolvable:$true] %s310_s15 }
  0x24   : > { %s336_s1 = sshll.u32 %s10588_s21, 4  ;;  %s346_s16 = sshll.u32 %s11258_s7, 4  ;;  %s337_s1 = int_to_ptr.vmem [resolvable:$true] %s336_s1  ;;  %s347_s16 = int_to_ptr.hbm [resolvable:$true] %s346_s16 }
  0x25   : > { %10157 = dma.hbm_to_vmem [thread:$0]  (!%p10688_p5), %s335_s8, 32, %s337_s1, [#allocation13]  }
  0x26   : > { %s308_s29 = sshll.u32 %s11276_s4, 4  ;;  %s10589_s20 = smov [#allocation15]   ;;  %s309_s29 = int_to_ptr.hbm [resolvable:$true] %s308_s29 }
  0x27   : > { %10151 = dma.hbm_to_vmem [thread:$0]  (!%p10688_p5), %s309_s29, 64, %s311_s15, [#allocation10]  }
  0x28   : > { %s348_s23 = sshll.u32 %s10589_s20, 4  ;;  %s6468_s26 = sadd.s32 4294967294, %s10575_s14   ;;  %s349_s23 = int_to_ptr.vmem [resolvable:$true] %s348_s23 }
  0x29   : > { %10160 = dma.hbm_to_vmem [thread:$0]  (!%p10688_p5), %s347_s16, 32, %s349_s23, [#allocation16]  }
  0x2a   : > { %s10723_s27 = sadd.s32 1, %s10575_s14   ;;  %s38_s28 = sadd.s32 1, %s10571_s13 }
  0x2b   : > { %s35_s29 = ssub.s32 %s10575_s14, %s10723_s27  ;;  %p45_p6 = scmp.ne.s32.totalorder %s10571_s13, %s10567_s12 }
  0x2c   : > { %p36_p7 = scmp.eq.s32.totalorder %s35_s29, 0  ;;  %p46_p8 = scmp.eq.s32.totalorder %s10575_s14, 0 }
  0x2d   : > { %p51_p9 = scmp.ne.s32.totalorder %s10567_s12, %s10563_s11  ;;  %p243_p10 = scmp.eq.s32.totalorder %s10672_s17, 2 }
  0x2e   : > { %s10735_s30 = scalar_select %p36_p7, %s10571_s13, %s38_s28  }
  0x2f   : > { %p47_p11 = por %p46_p8, %p45_p6  ;;  %p10739_p12 = por %p52_p1, %p51_p9 }
  0x30   : > { %p10743_p13 = por %p243_p10, %p45_p6  ;;  %p249_p0 = scmp.eq.s32.totalorder %s6468_s26, 2 }
  0x31   : > { %p10176_p2 = scmp.lt.s32.totalorder %s10575_s14, 3  ;;  %s362_s8 = sand.u32 1, %s10571_s13  }
  0x32   : > { %p10749_p4 = por %p249_p0, %p51_p9  ;;  %s10104_s15 = smul.u32 56, %s362_s8 }
  0x33   : > { %p10753_p5 = pnand %p10176_p2, %p47_p11  ;;  %s10105_s1 = smul.u32 56, %s10575_s14 }
  0x34   : > { %s366_s20 = scalar_lea.vmem [#allocation3], %s10104_s15  ;;  %s363_s28 = scalar_lea.sflag [#allocation4], %s362_s8 }
  0x35   : > { %s372_s16 = scalar_lea.hbm %s11251_s0, %s10105_s1  ;;  %s375_s23 = sshll.u32 %s366_s20, 4  ;;  %s376_s23 = int_to_ptr.vmem [resolvable:$true] %s375_s23 }
  0x36   : > { %s373_s26 = sshll.u32 %s372_s16, 4  ;;  %p10467_p7 = pneg %p10753_p5  ;;  %s374_s26 = int_to_ptr.hbm [resolvable:$true] %s373_s26 }
  0x37   : > { %s10463_s29 = sshra.s32 %s374_s26, 4  ;;  %s10470_s5 = scalar_lea.hbm %s11251_s0, 168  ;;  %s10464_s29 = int_to_ptr.hbm [resolvable:$true] %s10463_s29 }
  0x38   : > { %s10465_s2 = scalar_lea.hbm %s10464_s29, 56  ;;  %p10471_p10 = scmp.lt.s32.totalorder %s10464_s29, %s11251_s0 }
  0x39   : > { %p10466_p6 = scmp.ne.s32.totalorder %s10464_s29, %s10465_s2  ;;  %p10472_p11 = scmp.lt.s32.totalorder %s10470_s5, %s10465_s2 }
  0x3b   : > { %p10468_p8 = pnand %p10467_p7, %p10466_p6  ;;  %p10473_p0 = por %p10472_p11, %p10471_p10 }
  0x3d   : > { %p10469_p9 = pneg %p10468_p8 }
  0x3f   : > { %p10474_p2 = pnand %p10473_p0, %p10469_p9 }
  0x41   : > { %10477 = shalt.err (!%p10474_p2)
}
  0x42   : > { %s10590_s8 = smov 448   ;;  %s10591_s15 = smov 28  }
  0x43   : > { %10164 = dma.hbm_to_vmem [thread:$0]  (!%p10753_p5), %s374_s26, 896, %s376_s23, %s363_s28, %s10590_s8, %s10590_s8, %s10591_s15  }
  0x44   : > { %387 = sbr.rel (%p10677_p3) target bundleno = 1489 (0x5d1), region = 56 }
  0x49   : > { %s10774_s3 = sand.u32 1, %s10567_s12  }
  0x4a   : > { %s10106_s4 = smul.u32 56, %s10774_s3  ;;  %s390_s25 = scalar_lea.sflag [#allocation4], %s10774_s3 }
  0x4c   : > { %s10778_s2 = scalar_lea.vmem [#allocation3], %s10106_s4 }
  0x4d   : > { %10538 = dma.done.wait (%p10739_p12), %s390_s25, 896  }
  0x4e   : > { %10540 = vsyncadd (%p10739_p12), %s390_s25, 4294966400 }
  0x4f   : > { %10542 = dma.done.wait (%p52_p1), [#allocation7], 50304  }
  0x50   : > { %10544 = vsyncadd (%p52_p1), [#allocation7], 4294916992 }
  0x51   : > { %10546 = dma.done.wait (%p52_p1), [#allocation10], 32832  }
  0x52   : > { %10548 = vsyncadd (%p52_p1), [#allocation10], 4294934464 }
  0x53   : > { %10550 = dma.done.wait (%p52_p1), [#allocation13], 8224  }
  0x54   : > { %10552 = vsyncadd (%p52_p1), [#allocation13], 4294959072 }
  0x55   : > { %10554 = dma.done.wait (%p52_p1), [#allocation16], 32  }
  0x56   : > { %10556 = vsyncadd (%p52_p1), [#allocation16], 4294967264  ;;  %v6744_v1 = vld [vmem:[#allocation6 + $0x1c0] sm:$0xf]  ;;  %vm2880_vm0 = vcmask 130048   ;;  %s6489_s5 = sshll.u32 %s10774_s3, 3 }
  0x57   : > { %v9446_v2 = vld [vmem:[#allocation6 + $0x1dc] sm:$0xf0]  ;;  %s10098_s18 = sshll.u32 %s10672_s17, 3  ;;  %s463_s20 = scalar_lea.vmem [#allocation17], %s6489_s5 }
  0x58   : > { %v7000_v3 = vld [vmem:[#allocation6 + $0x3c0] sm:$0xf]  ;;  %v6745_v4 = vor.u32 %v9446_v2, %v6744_v1  ;;  %s6324_s16 = scalar_lea.hbm %s11260_s9, %s10098_s18  ;;  %s6325_s23 = sshll.u32 %s463_s20, 4  ;;  %s6326_s23 = int_to_ptr.vmem [resolvable:$true] %s6325_s23 }
  0x59   : > { %v9510_v5 = vld [vmem:[#allocation6 + $0x3dc] sm:$0xf0]  ;;  %s6327_s26 = sshll.u32 %s6324_s16, 4  ;;  %s6313_s28 = scalar_lea.sflag [#allocation5], %s10774_s3  ;;  %s6328_s26 = int_to_ptr.hbm [resolvable:$true] %s6327_s26 }
  0x5a   : > { %v7256_v6 = vld [vmem:[#allocation6 + $0x5c0] sm:$0xf]  ;;  %v7001_v8 = vor.u32 %v9510_v5, %v7000_v3  ;;  %2884 = vmatpush.bf16.msra.mxu0 %v6745_v4  ;;  %s10507_s29 = sshra.s32 %s6328_s26, 4  ;;  %s10513_s8 = scalar_lea.hbm %s11260_s9, 24  ;;  %s10508_s29 = int_to_ptr.hbm [resolvable:$true] %s10507_s29 }
  0x5b   : > { %v9574_v7 = vld [vmem:[#allocation6 + $0x5dc] sm:$0xf0]  ;;  %s10509_s22 = scalar_lea.hbm %s10508_s29, 8  ;;  %p10514_p5 = scmp.lt.s32.totalorder %s10508_s29, %s11260_s9 }
  0x5c   : > { %v7257_v9 = vor.u32 %v9574_v7, %v7256_v6  ;;  %v7512_v10 = vld [vmem:[#allocation6 + $0x7c0] sm:$0xf]  ;;  %2898 = vmatpush.bf16.msra.mxu1 %v7001_v8  ;;  %p10510_p1 = scmp.ne.s32.totalorder %s10508_s29, %s10509_s22  ;;  %p10515_p6 = scmp.lt.s32.totalorder %s10513_s8, %s10509_s22 }
  0x5d   : > { %v9638_v11 = vld [vmem:[#allocation6 + $0x7dc] sm:$0xf0] }
  0x5e   : > { %v6712_v12 = vld [vmem:[#allocation6 + $0x180] sm:$0xf]  ;;  %v7513_v13 = vor.u32 %v9638_v11, %v7512_v10  ;;  %2912 = vmatpush.bf16.msra.mxu2 %v7257_v9  ;;  %p10511_p3 = pnand %p10510_p1, %p10743_p13  ;;  %p10516_p7 = por %p10515_p6, %p10514_p5 }
  0x5f   : > { %v9438_v14 = vld [vmem:[#allocation6 + $0x19c] sm:$0xf0] }
  0x60   : > { %v6968_v15 = vld [vmem:[#allocation6 + $0x380] sm:$0xf]  ;;  %v6713_v17 = vor.u32 %v9438_v14, %v6712_v12  ;;  %2926 = vmatpush.bf16.msra.mxu3 %v7513_v13  ;;  %p10512_p12 = pneg %p10511_p3 }
  0x61   : > { %v9502_v16 = vld [vmem:[#allocation6 + $0x39c] sm:$0xf0] }
  0x62   : > { %v6969_v18 = vor.u32 %v9502_v16, %v6968_v15  ;;  %v7224_v19 = vld [vmem:[#allocation6 + $0x580] sm:$0xf]  ;;  %2885 = vmatpush.bf16.msra.mxu0 %v6713_v17  ;;  %p10517_p8 = pnand %p10516_p7, %p10512_p12 }
  0x63   : > { %v9566_v20 = vld [vmem:[#allocation6 + $0x59c] sm:$0xf0] }
  0x64   : > { %v7480_v21 = vld [vmem:[#allocation6 + $0x780] sm:$0xf]  ;;  %v7225_v22 = vor.u32 %v9566_v20, %v7224_v19  ;;  %2899 = vmatpush.bf16.msra.mxu1 %v6969_v18 }
  0x65   : > { %v9630_v23 = vld [vmem:[#allocation6 + $0x79c] sm:$0xf0] }
  0x66   : > { %v6680_v24 = vld [vmem:[#allocation6 + $0x140] sm:$0xf]  ;;  %v7481_v26 = vor.u32 %v9630_v23, %v7480_v21  ;;  %2913 = vmatpush.bf16.msra.mxu2 %v7225_v22 }
  0x67   : > { %v9430_v25 = vld [vmem:[#allocation6 + $0x15c] sm:$0xf0] }
  0x68   : > { %v6936_v27 = vld [vmem:[#allocation6 + $0x340] sm:$0xf]  ;;  %v6681_v30 = vor.u32 %v9430_v25, %v6680_v24  ;;  %2927 = vmatpush.bf16.msra.mxu3 %v7481_v26 }
  0x69   : > { %v9494_v28 = vld [vmem:[#allocation6 + $0x35c] sm:$0xf0] }
  0x6a   : > { %v7192_v29 = vld [vmem:[#allocation6 + $0x540] sm:$0xf]  ;;  %v6937_v34 = vor.u32 %v9494_v28, %v6936_v27  ;;  %2886 = vmatpush.bf16.msra.mxu0 %v6681_v30 }
  0x6b   : > { %v9558_v31 = vld [vmem:[#allocation6 + $0x55c] sm:$0xf0] }
  0x6c   : > { %v7448_v32 = vld [vmem:[#allocation6 + $0x740] sm:$0xf]  ;;  %v7193_v35 = vor.u32 %v9558_v31, %v7192_v29  ;;  %2900 = vmatpush.bf16.msra.mxu1 %v6937_v34  ;;  %v6746_v34 = vld [vmem:[#allocation6 + $0x1e0] sm:$0xf0] }
  0x6d   : > { %v9622_v33 = vld [vmem:[#allocation6 + $0x75c] sm:$0xf0] }
  0x6e   : > { %v6648_v36 = vld [vmem:[#allocation6 + $0x100] sm:$0xf]  ;;  %v7449_v39 = vor.u32 %v9622_v33, %v7448_v32  ;;  %2914 = vmatpush.bf16.msra.mxu2 %v7193_v35  ;;  %v9442_v33 = vld [vmem:[#allocation6 + $0x1c4] sm:$0xf]  ;;  %v6500_v35 = vld [vmem:[%s10778_s2 + $0x8] sm:$0xf] }
  0x6f   : > { %v9422_v37 = vld [vmem:[#allocation6 + $0x11c] sm:$0xf0] }
  0x70   : > { %v6904_v38 = vld [vmem:[#allocation6 + $0x300] sm:$0xf]  ;;  %v6649_v45 = vor.u32 %v9422_v37, %v6648_v36  ;;  %2928 = vmatpush.bf16.msra.mxu3 %v7449_v39  ;;  %v9383_v37 = vld [vmem:[%s10778_s2 + $0x20] sm:$0xf0] }
  0x71   : > { %v9486_v40 = vld [vmem:[#allocation6 + $0x31c] sm:$0xf0] }
  0x72   : > { %v7160_v41 = vld [vmem:[#allocation6 + $0x500] sm:$0xf]  ;;  %v6905_v46 = vor.u32 %v9486_v40, %v6904_v38  ;;  %2887 = vmatpush.bf16.msra.mxu0 %v6649_v45 }
  0x73   : > { %v9550_v42 = vld [vmem:[#allocation6 + $0x51c] sm:$0xf0] }
  0x74   : > { %v7416_v43 = vld [vmem:[#allocation6 + $0x700] sm:$0xf]  ;;  %v7161_v47 = vor.u32 %v9550_v42, %v7160_v41  ;;  %2901 = vmatpush.bf16.msra.mxu1 %v6905_v46  ;;  %v9506_v42 = vld [vmem:[#allocation6 + $0x3c4] sm:$0xf] }
  0x75   : > { %v9614_v44 = vld [vmem:[#allocation6 + $0x71c] sm:$0xf0] }
  0x76   : > { %v6616_v48 = vld [vmem:[#allocation6 + $0xc0] sm:$0xf]  ;;  %v7417_v51 = vor.u32 %v9614_v44, %v7416_v43  ;;  %2915 = vmatpush.bf16.msra.mxu2 %v7161_v47  ;;  %v6492_v43 = vld [vmem:[%s10778_s2] sm:$0xf]  ;;  %v9382_v44 = vld [vmem:[%s10778_s2 + $0x18] sm:$0xf0] }
  0x77   : > { %v9414_v49 = vld [vmem:[#allocation6 + $0xdc] sm:$0xf0]  ;;  %v7002_v47 = vld [vmem:[#allocation6 + $0x3e0] sm:$0xf0] }
  0x78   : > { %v6872_v50 = vld [vmem:[#allocation6 + $0x2c0] sm:$0xf]  ;;  %v6617_v57 = vor.u32 %v9414_v49, %v6616_v48  ;;  %2929 = vmatpush.bf16.msra.mxu3 %v7417_v51  ;;  %v9380_v48 = vld [vmem:[%s10778_s2 + $0xc] sm:$0xf]  ;;  %v6502_v49 = vld [vmem:[%s10778_s2 + $0x24] sm:$0xf0]  ;;  %v6749_v51 = vor.u32 %v9442_v33, %v6746_v34 }
  0x79   : > { %v9478_v52 = vld [vmem:[#allocation6 + $0x2dc] sm:$0xf0] }
  0x7a   : > { %v7128_v53 = vld [vmem:[#allocation6 + $0x4c0] sm:$0xf]  ;;  %v6873_v58 = vor.u32 %v9478_v52, %v6872_v50  ;;  %2888 = vmatpush.bf16.msra.mxu0 %v6617_v57 }
  0x7b   : > { %v9542_v54 = vld [vmem:[#allocation6 + $0x4dc] sm:$0xf0] }
  0x7c   : > { %v7384_v55 = vld [vmem:[#allocation6 + $0x6c0] sm:$0xf]  ;;  %v7129_v59 = vor.u32 %v9542_v54, %v7128_v53  ;;  %2902 = vmatpush.bf16.msra.mxu1 %v6873_v58  ;;  %v9434_v58 = vld [vmem:[#allocation6 + $0x184] sm:$0xf] }
  0x7d   : > { %v9606_v56 = vld [vmem:[#allocation6 + $0x6dc] sm:$0xf0] }
  0x7e   : > { %v6584_v60 = vld [vmem:[#allocation6 + $0x80] sm:$0xf]  ;;  %v7385_v63 = vor.u32 %v9606_v56, %v7384_v55  ;;  %2916 = vmatpush.bf16.msra.mxu2 %v7129_v59  ;;  %v10806_v55 = vor.u32 %v9383_v37, %v6500_v35  ;;  %v10808_v56 = vor.u32 %v9382_v44, %v6492_v43  ;;  %v6714_v59 = vld [vmem:[#allocation6 + $0x1a0] sm:$0xf0] }
  0x7f   : > { %v9406_v61 = vld [vmem:[#allocation6 + $0x9c] sm:$0xf0]  ;;  %v9410_v35 = vld [vmem:[#allocation6 + $0xc4] sm:$0xf] }
  0x80   : > { %v6840_v62 = vld [vmem:[#allocation6 + $0x280] sm:$0xf]  ;;  %v6585_v5 = vor.u32 %v9406_v61, %v6584_v60  ;;  %2930 = vmatpush.bf16.msra.mxu3 %v7385_v63  ;;  %v10810_v61 = vor.u32 %v9380_v48, %v6502_v49  ;;  %v6494_v63 = vld [vmem:[%s10778_s2 + $0x1c] sm:$0xf0]  ;;  %v9402_v49 = vld [vmem:[#allocation6 + $0x84] sm:$0xf] }
  0x81   : > { %v9470_v0 = vld [vmem:[#allocation6 + $0x29c] sm:$0xf0] }
  0x82   : > { %v7096_v1 = vld [vmem:[#allocation6 + $0x480] sm:$0xf]  ;;  %v6841_v7 = vor.u32 %v9470_v0, %v6840_v62  ;;  %2889 = vmatpush.bf16.msra.mxu0 %v6585_v5  ;;  %v9379_v62 = vld [vmem:[%s10778_s2 + $0x4] sm:$0xf]  ;;  %v7005_v0 = vor.u32 %v9506_v42, %v7002_v47  ;;  %v6717_v5 = vor.u32 %v9434_v58, %v6714_v59  ;;  %v6874_v42 = vld [vmem:[#allocation6 + $0x2e0] sm:$0xf0] }
  0x83   : > { %v9534_v2 = vld [vmem:[#allocation6 + $0x49c] sm:$0xf0] }
  0x84   : > { %v7352_v3 = vld [vmem:[#allocation6 + $0x680] sm:$0xf]  ;;  %v7097_v8 = vor.u32 %v9534_v2, %v7096_v1  ;;  %2903 = vmatpush.bf16.msra.mxu1 %v6841_v7  ;;  %v9498_v2 = vld [vmem:[#allocation6 + $0x384] sm:$0xf] }
  0x85   : > { %v9598_v4 = vld [vmem:[#allocation6 + $0x69c] sm:$0xf0] }
  0x86   : > { %v6552_v6 = vld [vmem:[#allocation6 + $0x40] sm:$0xf]  ;;  %v7353_v12 = vor.u32 %v9598_v4, %v7352_v3  ;;  %2917 = vmatpush.bf16.msra.mxu2 %v7097_v8  ;;  %v6970_v3 = vld [vmem:[#allocation6 + $0x3a0] sm:$0xf0] }
  0x87   : > { %v9398_v9 = vld [vmem:[#allocation6 + $0x5c] sm:$0xf0] }
  0x88   : > { %v6808_v10 = vld [vmem:[#allocation6 + $0x240] sm:$0xf]  ;;  %v6553_v19 = vor.u32 %v9398_v9, %v6552_v6  ;;  %2931 = vmatpush.bf16.msra.mxu3 %v7353_v12  ;;  %v10816_v9 = vor.u32 %v9379_v62, %v6494_v63  ;;  %v6682_v12 = vld [vmem:[#allocation6 + $0x160] sm:$0xf0] }
  0x89   : > { %v9462_v11 = vld [vmem:[#allocation6 + $0x25c] sm:$0xf0] }
  0x8a   : > { %v7064_v13 = vld [vmem:[#allocation6 + $0x440] sm:$0xf]  ;;  %v6809_v24 = vor.u32 %v9462_v11, %v6808_v10  ;;  %2890 = vmatpush.bf16.msra.mxu0 %v6553_v19  ;;  %v9426_v11 = vld [vmem:[#allocation6 + $0x144] sm:$0xf] }
  0x8b   : > { %v9526_v14 = vld [vmem:[#allocation6 + $0x45c] sm:$0xf0] }
  0x8c   : > { %v7320_v15 = vld [vmem:[#allocation6 + $0x640] sm:$0xf]  ;;  %v7065_v25 = vor.u32 %v9526_v14, %v7064_v13  ;;  %2904 = vmatpush.bf16.msra.mxu1 %v6809_v24  ;;  %v6973_v13 = vor.u32 %v9498_v2, %v6970_v3  ;;  %v6650_v24 = vld [vmem:[#allocation6 + $0x120] sm:$0xf0] }
  0x8d   : > { %v9590_v16 = vld [vmem:[#allocation6 + $0x65c] sm:$0xf0]  ;;  %v6554_v2 = vld [vmem:[#allocation6 + $0x60] sm:$0xf0] }
  0x8e   : > { %v6520_v17 = vld [vmem:[#allocation6] sm:$0xf]  ;;  %v7321_v29 = vor.u32 %v9590_v16, %v7320_v15  ;;  %2918 = vmatpush.bf16.msra.mxu2 %v7065_v25  ;;  %v9490_v15 = vld [vmem:[#allocation6 + $0x344] sm:$0xf] }
  0x8f   : > { %v9390_v18 = vld [vmem:[#allocation6 + $0x1c] sm:$0xf0]  ;;  %v6938_v16 = vld [vmem:[#allocation6 + $0x360] sm:$0xf0] }
  0x90   : > { %v6776_v20 = vld [vmem:[#allocation6 + $0x200] sm:$0xf]  ;;  %v6521_v36 = vor.u32 %v9390_v18, %v6520_v17  ;;  %2932 = vmatpush.bf16.msra.mxu3 %v7321_v29  ;;  %v6685_v18 = vor.u32 %v9426_v11, %v6682_v12  ;;  %v6941_v25 = vor.u32 %v9490_v15, %v6938_v16  ;;  %v9458_v3 = vld [vmem:[#allocation6 + $0x244] sm:$0xf] }
  0x91   : > { %v9454_v21 = vld [vmem:[#allocation6 + $0x21c] sm:$0xf0]  ;;  %v6522_v15 = vld [vmem:[#allocation6 + $0x20] sm:$0xf0] }
  0x92   : > { %v7032_v22 = vld [vmem:[#allocation6 + $0x400] sm:$0xf]  ;;  %v6777_v40 = vor.u32 %v9454_v21, %v6776_v20  ;;  %2891 = vmatpush.bf16.msra.mxu0 %v6521_v36  ;;  %v6618_v36 = vld [vmem:[#allocation6 + $0xe0] sm:$0xf0] }
  0x93   : > { %v9518_v23 = vld [vmem:[#allocation6 + $0x41c] sm:$0xf0]  ;;  %v6621_v44 = vor.u32 %v9410_v35, %v6618_v36  ;;  %v9570_v16 = vld [vmem:[#allocation6 + $0x5c4] sm:$0xf] }
  0x94   : > { %v7288_v26 = vld [vmem:[#allocation6 + $0x600] sm:$0xf]  ;;  %v7033_v41 = vor.u32 %v9518_v23, %v7032_v22  ;;  %2905 = vmatpush.bf16.msra.mxu1 %v6777_v40  ;;  %v9418_v23 = vld [vmem:[#allocation6 + $0x104] sm:$0xf] }
  0x95   : > { %v9582_v27 = vld [vmem:[#allocation6 + $0x61c] sm:$0xf0]  ;;  %2892 = vmatmul.bf16.vlgmr.msra.gmra.mxu0 %v10808_v56  ;;  %v8026_v35 = vld [vmem:[#allocation6 + $0xbe0] sm:$0xf0] }
  0x96   : > { %v7768_v28 = vld [vmem:[#allocation6 + $0x9c0] sm:$0xf]  ;;  %v7289_v45 = vor.u32 %v9582_v27, %v7288_v26  ;;  %2919 = vmatpush.bf16.msra.mxu2 %v7033_v41  ;;  %v9482_v27 = vld [vmem:[#allocation6 + $0x304] sm:$0xf] }
  0x97   : > { %v9702_v30 = vld [vmem:[#allocation6 + $0x9dc] sm:$0xf0]  ;;  %2906 = vmatmul.bf16.vlgmr.msra.gmra.mxu1 %v10816_v9  ;;  %v9474_v41 = vld [vmem:[#allocation6 + $0x2c4] sm:$0xf] }
  0x98   : > { %v8024_v31 = vld [vmem:[#allocation6 + $0xbc0] sm:$0xf]  ;;  %v7769_v46 = vor.u32 %v9702_v30, %v7768_v28  ;;  %2933 = vmatpush.bf16.msra.mxu3 %v7289_v45  ;;  %v6906_v28 = vld [vmem:[#allocation6 + $0x320] sm:$0xf0]  ;;  %v6653_v30 = vor.u32 %v9418_v23, %v6650_v24 }
  0x99   : > { %v9766_v32 = vld [vmem:[#allocation6 + $0xbdc] sm:$0xf0]  ;;  %2920 = vmatmul.bf16.vlgmr.msra.gmra.mxu2 %v10806_v55  ;;  %v9562_v36 = vld [vmem:[#allocation6 + $0x584] sm:$0xf] }
  0x9a   : > { %v8056_v38 = vld [vmem:[#allocation6 + $0xc00] sm:$0xf]  ;;  %v8025_v50 = vor.u32 %v9766_v32, %v8024_v31  ;;  %2940 = vmatpush.bf16.msrb.mxu0 %v7769_v46 }
  0x9b   : > { %v9774_v39 = vld [vmem:[#allocation6 + $0xc1c] sm:$0xf0]  ;;  %2934 = vmatmul.bf16.vlgmr.msra.gmra.mxu3 %v10810_v61 }
  0x9c   : > { %v7736_v52 = vld [vmem:[#allocation6 + $0x980] sm:$0xf]  ;;  %v8057_v60 = vor.u32 %v9774_v39, %v8056_v38  ;;  %2954 = vmatpush.bf16.msrb.mxu1 %v8025_v50  ;;  %2982 = vmatpush.bf16.msrb.mxu3 %v6749_v51  ;;  %v9385_v38 = vld [vmem:[%s10778_s2 + $0x30] sm:$0xf0]  ;;  %v6909_v39 = vor.u32 %v9482_v27, %v6906_v28 }
  0x9d   : > { %v9694_v53 = vld [vmem:[#allocation6 + $0x99c] sm:$0xf0]  ;;  %v6586_v50 = vld [vmem:[#allocation6 + $0xa0] sm:$0xf0] }
  0x9e   : > { %v7992_v54 = vld [vmem:[#allocation6 + $0xb80] sm:$0xf]  ;;  %v7737_v1 = vor.u32 %v9694_v53, %v7736_v52  ;;  %2975 = vmatpush.bf16.msrb.mxu2 %v8057_v60  ;;  %v6877_v52 = vor.u32 %v9474_v41, %v6874_v42  ;;  %v6589_v59 = vor.u32 %v9402_v49, %v6586_v50  ;;  %v7482_v41 = vld [vmem:[#allocation6 + $0x7a0] sm:$0xf0] }
  0x9f   : > { %v9758_v57 = vld [vmem:[#allocation6 + $0xb9c] sm:$0xf0]  ;;  %v9754_v49 = vld [vmem:[#allocation6 + $0xb84] sm:$0xf] }
  0xa0   : > { %v7993_v4 = vor.u32 %v9758_v57, %v7992_v54  ;;  %v7704_v6 = vld [vmem:[#allocation6 + $0x940] sm:$0xf]  ;;  %2941 = vmatpush.bf16.msrb.mxu0 %v7737_v1  ;;  %2983 = vmatpush.bf16.msrb.mxu3 %v6717_v5  ;;  %v9466_v54 = vld [vmem:[#allocation6 + $0x284] sm:$0xf] }
  0xa1   : > { %v9686_v7 = vld [vmem:[#allocation6 + $0x95c] sm:$0xf0]  ;;  %v6842_v57 = vld [vmem:[#allocation6 + $0x2a0] sm:$0xf0] }
  0xa2   : > { %v7960_v8 = vld [vmem:[#allocation6 + $0xb40] sm:$0xf]  ;;  %2996 = vmatpush.bf16.msra.mxu2 %v7005_v0  ;;  %v7705_v14 = vor.u32 %v9686_v7, %v7704_v6  ;;  %2955 = vmatpush.bf16.msrb.mxu1 %v7993_v4  ;;  %v9394_v1 = vld [vmem:[#allocation6 + $0x44] sm:$0xf]  ;;  %v6845_v5 = vor.u32 %v9466_v54, %v6842_v57 }
  0xa3   : > { %v9750_v10 = vld [vmem:[#allocation6 + $0xb5c] sm:$0xf0]  ;;  %v6810_v4 = vld [vmem:[#allocation6 + $0x260] sm:$0xf0]  ;;  %v6557_v12 = vor.u32 %v9394_v1, %v6554_v2 }
  0xa4   : > { %v7961_v17 = vor.u32 %v9750_v10, %v7960_v8  ;;  %v7672_v19 = vld [vmem:[#allocation6 + $0x900] sm:$0xf]  ;;  %2942 = vmatpush.bf16.msrb.mxu0 %v7705_v14  ;;  %2984 = vmatpush.bf16.msrb.mxu3 %v6685_v18  ;;  %v9386_v14 = vld [vmem:[#allocation6 + $0x4] sm:$0xf] }
  0xa5   : > { %v9678_v20 = vld [vmem:[#allocation6 + $0x91c] sm:$0xf0]  ;;  %v9634_v18 = vld [vmem:[#allocation6 + $0x7c4] sm:$0xf]  ;;  %v6525_v28 = vor.u32 %v9386_v14, %v6522_v15 }
  0xa6   : > { %v7928_v21 = vld [vmem:[#allocation6 + $0xb00] sm:$0xf]  ;;  %2997 = vmatpush.bf16.msra.mxu2 %v6973_v13  ;;  %v7673_v26 = vor.u32 %v9678_v20, %v7672_v19  ;;  %2956 = vmatpush.bf16.msrb.mxu1 %v7961_v17  ;;  %v7258_v17 = vld [vmem:[#allocation6 + $0x5e0] sm:$0xf0] }
  0xa7   : > { %v9742_v22 = vld [vmem:[#allocation6 + $0xb1c] sm:$0xf0]  ;;  %v7514_v19 = vld [vmem:[#allocation6 + $0x7e0] sm:$0xf0] }
  0xa8   : > { %v7929_v29 = vor.u32 %v9742_v22, %v7928_v21  ;;  %v7640_v31 = vld [vmem:[#allocation6 + $0x8c0] sm:$0xf]  ;;  %2943 = vmatpush.bf16.msrb.mxu0 %v7673_v26  ;;  %2985 = vmatpush.bf16.msrb.mxu3 %v6653_v30  ;;  %v9698_v20 = vld [vmem:[#allocation6 + $0x9c4] sm:$0xf]  ;;  %v6813_v22 = vor.u32 %v9458_v3, %v6810_v4 }
  0xa9   : > { %v9670_v32 = vld [vmem:[#allocation6 + $0x8dc] sm:$0xf0]  ;;  %v7770_v21 = vld [vmem:[#allocation6 + $0x9e0] sm:$0xf0] }
  0xaa   : > { %v7896_v33 = vld [vmem:[#allocation6 + $0xac0] sm:$0xf]  ;;  %2998 = vmatpush.bf16.msra.mxu2 %v6941_v25  ;;  %v7641_v40 = vor.u32 %v9670_v32, %v7640_v31  ;;  %2957 = vmatpush.bf16.msrb.mxu1 %v7929_v29  ;;  %v9384_v25 = vld [vmem:[%s10778_s2 + $0x28] sm:$0xf0]  ;;  %v9450_v26 = vld [vmem:[#allocation6 + $0x204] sm:$0xf]  ;;  %v7261_v32 = vor.u32 %v9570_v16, %v7258_v17 }
  0xab   : > { %v9734_v34 = vld [vmem:[#allocation6 + $0xadc] sm:$0xf0]  ;;  %v6778_v29 = vld [vmem:[#allocation6 + $0x220] sm:$0xf0] }
  0xac   : > { %v6516_v37 = vld [vmem:[%s10778_s2 + $0x18] sm:$0xf]  ;;  %v7897_v43 = vor.u32 %v9734_v34, %v7896_v33  ;;  %2944 = vmatpush.bf16.msrb.mxu0 %v7641_v40  ;;  %2986 = vmatpush.bf16.msrb.mxu3 %v6621_v44  ;;  %v6508_v24 = vld [vmem:[%s10778_s2 + $0x10] sm:$0xf]  ;;  %v9381_v30 = vld [vmem:[%s10778_s2 + $0x14] sm:$0xf]  ;;  %v7517_v33 = vor.u32 %v9634_v18, %v7514_v19  ;;  %v6781_v42 = vor.u32 %v9450_v26, %v6778_v29 }
  0xad   : > { %v7608_v45 = vld [vmem:[#allocation6 + $0x880] sm:$0xf]  ;;  %v10822_v51 = vor.u32 %v9385_v38, %v6516_v37  ;;  %v9762_v34 = vld [vmem:[#allocation6 + $0xbc4] sm:$0xf]  ;;  %v7773_v37 = vor.u32 %v9698_v20, %v7770_v21  ;;  %v10830_v38 = vor.u32 %v9384_v25, %v6508_v24 }
  0xae   : > { %v9662_v46 = vld [vmem:[#allocation6 + $0x89c] sm:$0xf0]  ;;  %2999 = vmatpush.bf16.msra.mxu2 %v6909_v39  ;;  %2958 = vmatpush.bf16.msrb.mxu1 %v7897_v43  ;;  %v7226_v39 = vld [vmem:[#allocation6 + $0x5a0] sm:$0xf0] }
  0xaf   : > { %v7864_v47 = vld [vmem:[#allocation6 + $0xa80] sm:$0xf]  ;;  %11281 = vst [vmem:[#allocation24_spill] sm:$0xff] %v10822_v51  ;;  %v7609_v53 = vor.u32 %v9662_v46, %v7608_v45  ;;  %8086 = vmatmul.msk.bf16.vlgmr.msrb.gmra.mxu2 %vm2880_vm0, %v10822_v51  ;;  %v9626_v40 = vld [vmem:[#allocation6 + $0x784] sm:$0xf]  ;;  %v8029_v46 = vor.u32 %v9762_v34, %v8026_v35 }
  0xb0   : > { %v9726_v48 = vld [vmem:[#allocation6 + $0xa9c] sm:$0xf0]  ;;  %2987 = vmatpush.bf16.msrb.mxu3 %v6589_v59  ;;  %v9690_v44 = vld [vmem:[#allocation6 + $0x984] sm:$0xf] }
  0xb1   : > { %v7865_v58 = vor.u32 %v9726_v48, %v7864_v47  ;;  %v7576_v60 = vld [vmem:[#allocation6 + $0x840] sm:$0xf]  ;;  %2945 = vmatpush.bf16.msrb.mxu0 %v7609_v53  ;;  %v7738_v45 = vld [vmem:[#allocation6 + $0x9a0] sm:$0xf0]  ;;  %v7229_v47 = vor.u32 %v9562_v36, %v7226_v39  ;;  %v7485_v48 = vor.u32 %v9626_v40, %v7482_v41 }
  0xb2   : > { %v9654_v62 = vld [vmem:[#allocation6 + $0x85c] sm:$0xf0]  ;;  %3000 = vmatpush.bf16.msra.mxu2 %v6877_v52  ;;  %v7994_v50 = vld [vmem:[#allocation6 + $0xba0] sm:$0xf0]  ;;  %v7741_v53 = vor.u32 %v9690_v44, %v7738_v45 }
  0xb3   : > { %v7832_v63 = vld [vmem:[#allocation6 + $0xa40] sm:$0xf]  ;;  %v7577_v6 = vor.u32 %v9654_v62, %v7576_v60  ;;  %2959 = vmatpush.bf16.msrb.mxu1 %v7865_v58  ;;  %v9554_v52 = vld [vmem:[#allocation6 + $0x544] sm:$0xf]  ;;  %v7997_v62 = vor.u32 %v9754_v49, %v7994_v50 }
  0xb4   : > { %v9718_v0 = vld [vmem:[#allocation6 + $0xa5c] sm:$0xf0]  ;;  %2988 = vmatpush.bf16.msrb.mxu3 %v6557_v12  ;;  %v7194_v54 = vld [vmem:[#allocation6 + $0x560] sm:$0xf0] }
  0xb5   : > { %v7544_v7 = vld [vmem:[#allocation6 + $0x800] sm:$0xf]  ;;  %v7833_v11 = vor.u32 %v9718_v0, %v7832_v63  ;;  %2946 = vmatpush.bf16.msrb.mxu0 %v7577_v6  ;;  %v9618_v57 = vld [vmem:[#allocation6 + $0x744] sm:$0xf]  ;;  %v7197_v63 = vor.u32 %v9554_v52, %v7194_v54 }
  0xb6   : > { %v9646_v8 = vld [vmem:[#allocation6 + $0x81c] sm:$0xf0]  ;;  %3001 = vmatpush.bf16.msra.mxu2 %v6845_v5  ;;  %v7450_v58 = vld [vmem:[#allocation6 + $0x760] sm:$0xf0] }
  0xb7   : > { %v7800_v10 = vld [vmem:[#allocation6 + $0xa00] sm:$0xf]  ;;  %v7545_v23 = vor.u32 %v9646_v8, %v7544_v7  ;;  %2960 = vmatpush.bf16.msrb.mxu1 %v7833_v11  ;;  %v9682_v59 = vld [vmem:[#allocation6 + $0x944] sm:$0xf]  ;;  %v7453_v0 = vor.u32 %v9618_v57, %v7450_v58 }
  0xb8   : > { %v9710_v13 = vld [vmem:[#allocation6 + $0xa1c] sm:$0xf0]  ;;  %2989 = vmatpush.bf16.msrb.mxu3 %v6525_v28  ;;  %v7706_v60 = vld [vmem:[#allocation6 + $0x960] sm:$0xf0] }
  0xb9   : > { %v7801_v27 = vor.u32 %v9710_v13, %v7800_v10  ;;  %v6510_v31 = vld [vmem:[%s10778_s2 + $0x2c] sm:$0xf0]  ;;  %2947 = vmatpush.bf16.msrb.mxu0 %v7545_v23  ;;  %v9746_v1 = vld [vmem:[#allocation6 + $0xb44] sm:$0xf]  ;;  %v7709_v4 = vor.u32 %v9682_v59, %v7706_v60 }
  0xba   : > { %3002 = vmatpush.bf16.msra.mxu2 %v6813_v22  ;;  %v10832_v43 = vor.u32 %v9381_v30, %v6510_v31  ;;  %v7962_v2 = vld [vmem:[#allocation6 + $0xb60] sm:$0xf0] }
  0xbb   : > { %2961 = vmatpush.bf16.msrb.mxu1 %v7801_v27  ;;  %2990 = vmatmul.bf16.vlgmr.msrb.gmra.mxu3 %v10808_v56  ;;  %v9546_v3 = vld [vmem:[#allocation6 + $0x504] sm:$0xf]  ;;  %v7965_v11 = vor.u32 %v9746_v1, %v7962_v2  ;;  %v6752_v1 = vld [vmem:[#allocation6 + $0x1c8] sm:$0xf] }
  0xbc   : > { %3038 = vmatpush.bf16.msra.mxu3 %v7773_v37  ;;  %2948 = vmatmul.bf16.vlgmr.msrb.gmra.mxu0 %v10830_v38  ;;  %v7162_v5 = vld [vmem:[#allocation6 + $0x520] sm:$0xf0]  ;;  %v9447_v2 = vld [vmem:[#allocation6 + $0x1e4] sm:$0xf0] }
  0xbd   : > { %3010 = vmatpush.bf16.msra.mxu0 %v7261_v32  ;;  %v9610_v6 = vld [vmem:[#allocation6 + $0x704] sm:$0xf]  ;;  %v7165_v12 = vor.u32 %v9546_v3, %v7162_v5  ;;  %v7264_v3 = vld [vmem:[#allocation6 + $0x5c8] sm:$0xf] }
  0xbe   : > { %3003 = vmatpush.bf16.msra.mxu2 %v6781_v42  ;;  %2962 = vmatmul.bf16.vlgmr.msrb.gmra.mxu1 %v10832_v43  ;;  %v7418_v7 = vld [vmem:[#allocation6 + $0x720] sm:$0xf0]  ;;  %v9575_v5 = vld [vmem:[#allocation6 + $0x5e4] sm:$0xf0] }
  0xbf   : > { %3024 = vmatpush.bf16.msra.mxu1 %v7517_v33  ;;  %v9674_v8 = vld [vmem:[#allocation6 + $0x904] sm:$0xf]  ;;  %v7421_v13 = vor.u32 %v9610_v6, %v7418_v7 }
  0xc0   : > { %3039 = vmatpush.bf16.msra.mxu3 %v7741_v53  ;;  %v7674_v10 = vld [vmem:[#allocation6 + $0x920] sm:$0xf0] }
  0xc1   : > { %3011 = vmatpush.bf16.msra.mxu0 %v7229_v47  ;;  %3004 = vmatmul.bf16.vlgmr.msra.gmra.mxu2 %v10816_v9  ;;  %v9738_v14 = vld [vmem:[#allocation6 + $0xb04] sm:$0xf]  ;;  %v7677_v17 = vor.u32 %v9674_v8, %v7674_v10 }
  0xc2   : > { %3052 = vmatpush.bf16.msrb.mxu2 %v8029_v46  ;;  %v7930_v15 = vld [vmem:[#allocation6 + $0xb20] sm:$0xf0] }
  0xc3   : > { %3025 = vmatpush.bf16.msra.mxu1 %v7485_v48  ;;  %v9538_v16 = vld [vmem:[#allocation6 + $0x4c4] sm:$0xf]  ;;  %v7933_v23 = vor.u32 %v9738_v14, %v7930_v15  ;;  %v6753_v14 = vor.u32 %v9447_v2, %v6752_v1  ;;  %v7520_v15 = vld [vmem:[#allocation6 + $0x7c8] sm:$0xf] }
  0xc4   : > { %3040 = vmatpush.bf16.msra.mxu3 %v7709_v4  ;;  %v7130_v18 = vld [vmem:[#allocation6 + $0x4e0] sm:$0xf0]  ;;  %v9415_v1 = vld [vmem:[#allocation6 + $0xe4] sm:$0xf0] }
  0xc5   : > { %3012 = vmatpush.bf16.msra.mxu0 %v7197_v63  ;;  %v9602_v19 = vld [vmem:[#allocation6 + $0x6c4] sm:$0xf]  ;;  %v7133_v24 = vor.u32 %v9538_v16, %v7130_v18  ;;  %v9639_v16 = vld [vmem:[#allocation6 + $0x7e4] sm:$0xf0] }
  0xc6   : > { %3053 = vmatpush.bf16.msrb.mxu2 %v7997_v62  ;;  %v7386_v20 = vld [vmem:[#allocation6 + $0x6e0] sm:$0xf0]  ;;  %v7136_v2 = vld [vmem:[#allocation6 + $0x4c8] sm:$0xf] }
  0xc7   : > { %3026 = vmatpush.bf16.msra.mxu1 %v7453_v0  ;;  %v9666_v21 = vld [vmem:[#allocation6 + $0x8c4] sm:$0xf]  ;;  %v7389_v25 = vor.u32 %v9602_v19, %v7386_v20  ;;  %v7008_v19 = vld [vmem:[#allocation6 + $0x3c8] sm:$0xf] }
  0xc8   : > { %v7642_v22 = vld [vmem:[#allocation6 + $0x8e0] sm:$0xf0]  ;;  %3041 = vmatpush.bf16.msra.mxu3 %v7677_v17  ;;  %v7265_v17 = vor.u32 %v9575_v5, %v7264_v3  ;;  %v9511_v20 = vld [vmem:[#allocation6 + $0x3e4] sm:$0xf0] }
  0xc9   : > { %3013 = vmatpush.bf16.msra.mxu0 %v7165_v12  ;;  %v9730_v26 = vld [vmem:[#allocation6 + $0xac4] sm:$0xf]  ;;  %v7645_v29 = vor.u32 %v9666_v21, %v7642_v22  ;;  %v6720_v21 = vld [vmem:[#allocation6 + $0x188] sm:$0xf] }
  0xca   : > { %3054 = vmatpush.bf16.msrb.mxu2 %v7965_v11  ;;  %v7898_v27 = vld [vmem:[#allocation6 + $0xae0] sm:$0xf0]  ;;  %v9543_v3 = vld [vmem:[#allocation6 + $0x4e4] sm:$0xf0] }
  0xcb   : > { %3027 = vmatpush.bf16.msra.mxu1 %v7421_v13  ;;  %v9530_v28 = vld [vmem:[#allocation6 + $0x484] sm:$0xf]  ;;  %v7901_v35 = vor.u32 %v9730_v26, %v7898_v27  ;;  %v7521_v26 = vor.u32 %v9639_v16, %v7520_v15  ;;  %v7009_v27 = vor.u32 %v9511_v20, %v7008_v19  ;;  %v7104_v15 = vld [vmem:[#allocation6 + $0x488] sm:$0xf] }
  0xcc   : > { %v7098_v30 = vld [vmem:[#allocation6 + $0x4a0] sm:$0xf0]  ;;  %3042 = vmatpush.bf16.msra.mxu3 %v7645_v29  ;;  %v9631_v29 = vld [vmem:[#allocation6 + $0x7a4] sm:$0xf0] }
  0xcd   : > { %v9594_v31 = vld [vmem:[#allocation6 + $0x684] sm:$0xf]  ;;  %3014 = vmatpush.bf16.msra.mxu0 %v7133_v24  ;;  %v7101_v36 = vor.u32 %v9530_v28, %v7098_v30  ;;  %v7232_v24 = vld [vmem:[#allocation6 + $0x588] sm:$0xf] }
  0xce   : > { %v7354_v32 = vld [vmem:[#allocation6 + $0x6a0] sm:$0xf0]  ;;  %3055 = vmatpush.bf16.msrb.mxu2 %v7933_v23  ;;  %v9439_v23 = vld [vmem:[#allocation6 + $0x1a4] sm:$0xf0] }
  0xcf   : > { %v9658_v33 = vld [vmem:[#allocation6 + $0x884] sm:$0xf]  ;;  %3028 = vmatpush.bf16.msra.mxu1 %v7389_v25  ;;  %v7357_v37 = vor.u32 %v9594_v31, %v7354_v32  ;;  %v9567_v25 = vld [vmem:[#allocation6 + $0x5a4] sm:$0xf0]  ;;  %v6721_v30 = vor.u32 %v9439_v23, %v6720_v21 }
  0xd0   : > { %v7610_v34 = vld [vmem:[#allocation6 + $0x8a0] sm:$0xf0]  ;;  %v7488_v28 = vld [vmem:[#allocation6 + $0x788] sm:$0xf]  ;;  %v7233_v31 = vor.u32 %v9567_v25, %v7232_v24 }
  0xd1   : > { %v9722_v39 = vld [vmem:[#allocation6 + $0xa84] sm:$0xf]  ;;  %v7613_v42 = vor.u32 %v9658_v33, %v7610_v34  ;;  %3015 = vmatpush.bf16.msra.mxu0 %v7101_v36  ;;  %v6976_v32 = vld [vmem:[#allocation6 + $0x388] sm:$0xf] }
  0xd2   : > { %v7866_v40 = vld [vmem:[#allocation6 + $0xaa0] sm:$0xf0]  ;;  %3056 = vmatpush.bf16.msrb.mxu2 %v7901_v35  ;;  %v9503_v33 = vld [vmem:[#allocation6 + $0x3a4] sm:$0xf0] }
  0xd3   : > { %v9522_v41 = vld [vmem:[#allocation6 + $0x444] sm:$0xf]  ;;  %v7869_v49 = vor.u32 %v9722_v39, %v7866_v40  ;;  %3029 = vmatpush.bf16.msra.mxu1 %v7357_v37  ;;  %3043 = vmatpush.bf16.msra.mxu3 %v7613_v42  ;;  %v6688_v34 = vld [vmem:[#allocation6 + $0x148] sm:$0xf]  ;;  %v7489_v39 = vor.u32 %v9631_v29, %v7488_v28  ;;  %v6977_v40 = vor.u32 %v9503_v33, %v6976_v32 }
  0xd4   : > { %v7066_v44 = vld [vmem:[#allocation6 + $0x460] sm:$0xf0]  ;;  %v9431_v35 = vld [vmem:[#allocation6 + $0x164] sm:$0xf0] }
  0xd5   : > { %v9586_v45 = vld [vmem:[#allocation6 + $0x644] sm:$0xf]  ;;  %v7069_v53 = vor.u32 %v9522_v41, %v7066_v44  ;;  %v7200_v36 = vld [vmem:[#allocation6 + $0x548] sm:$0xf]  ;;  %v6689_v44 = vor.u32 %v9431_v35, %v6688_v34 }
  0xd6   : > { %v7322_v46 = vld [vmem:[#allocation6 + $0x660] sm:$0xf0]  ;;  %3057 = vmatpush.bf16.msrb.mxu2 %v7869_v49  ;;  %v9559_v37 = vld [vmem:[#allocation6 + $0x564] sm:$0xf0] }
  0xd7   : > { %v9650_v47 = vld [vmem:[#allocation6 + $0x844] sm:$0xf]  ;;  %v7325_v54 = vor.u32 %v9586_v45, %v7322_v46  ;;  %3016 = vmatpush.bf16.msra.mxu0 %v7069_v53  ;;  %v7456_v41 = vld [vmem:[#allocation6 + $0x748] sm:$0xf]  ;;  %v7201_v45 = vor.u32 %v9559_v37, %v7200_v36 }
  0xd8   : > { %v7578_v48 = vld [vmem:[#allocation6 + $0x860] sm:$0xf0]  ;;  %v9623_v42 = vld [vmem:[#allocation6 + $0x764] sm:$0xf0] }
  0xd9   : > { %v9714_v50 = vld [vmem:[#allocation6 + $0xa44] sm:$0xf]  ;;  %v7581_v60 = vor.u32 %v9650_v47, %v7578_v48  ;;  %3030 = vmatpush.bf16.msra.mxu1 %v7325_v54  ;;  %v6944_v46 = vld [vmem:[#allocation6 + $0x348] sm:$0xf]  ;;  %v7457_v53 = vor.u32 %v9623_v42, %v7456_v41 }
  0xda   : > { %v7834_v52 = vld [vmem:[#allocation6 + $0xa60] sm:$0xf0]  ;;  %v9495_v47 = vld [vmem:[#allocation6 + $0x364] sm:$0xf0] }
  0xdb   : > { %v9514_v57 = vld [vmem:[#allocation6 + $0x404] sm:$0xf]  ;;  %v7837_v4 = vor.u32 %v9714_v50, %v7834_v52  ;;  %3044 = vmatpush.bf16.msra.mxu3 %v7581_v60  ;;  %v6656_v48 = vld [vmem:[#allocation6 + $0x108] sm:$0xf]  ;;  %v6945_v54 = vor.u32 %v9495_v47, %v6944_v46 }
  0xdc   : > { %v7034_v58 = vld [vmem:[#allocation6 + $0x420] sm:$0xf0]  ;;  %v9423_v49 = vld [vmem:[#allocation6 + $0x124] sm:$0xf0] }
  0xdd   : > { %v9578_v59 = vld [vmem:[#allocation6 + $0x604] sm:$0xf]  ;;  %v7037_v8 = vor.u32 %v9514_v57, %v7034_v58  ;;  %3058 = vmatpush.bf16.msrb.mxu2 %v7837_v4  ;;  %v7168_v50 = vld [vmem:[#allocation6 + $0x508] sm:$0xf]  ;;  %v6657_v60 = vor.u32 %v9423_v49, %v6656_v48 }
  0xde   : > { %v7290_v62 = vld [vmem:[#allocation6 + $0x620] sm:$0xf0]  ;;  %v9551_v52 = vld [vmem:[#allocation6 + $0x524] sm:$0xf0] }
  0xdf   : > { %v9642_v63 = vld [vmem:[#allocation6 + $0x804] sm:$0xf]  ;;  %v7293_v10 = vor.u32 %v9578_v59, %v7290_v62  ;;  %3017 = vmatpush.bf16.msra.mxu0 %v7037_v8  ;;  %v6912_v57 = vld [vmem:[#allocation6 + $0x308] sm:$0xf]  ;;  %v7169_v62 = vor.u32 %v9551_v52, %v7168_v50 }
  0xe0   : > { %v7546_v0 = vld [vmem:[#allocation6 + $0x820] sm:$0xf0]  ;;  %v7424_v58 = vld [vmem:[#allocation6 + $0x708] sm:$0xf] }
  0xe1   : > { %v9770_v6 = vld [vmem:[#allocation6 + $0xc04] sm:$0xf]  ;;  %v7549_v13 = vor.u32 %v9642_v63, %v7546_v0  ;;  %3031 = vmatpush.bf16.msra.mxu1 %v7293_v10  ;;  %v9615_v59 = vld [vmem:[#allocation6 + $0x724] sm:$0xf0]  ;;  %v7137_v10 = vor.u32 %v9543_v3, %v7136_v2  ;;  %v7010_v3 = vld [vmem:[#allocation6 + $0x3e8] sm:$0xf0] }
  0xe2   : > { %v8058_v7 = vld [vmem:[#allocation6 + $0xc20] sm:$0xf0]  ;;  %3018 = vmatmul.bf16.vlgmr.msra.gmra.mxu0 %v10806_v55  ;;  %v9487_v63 = vld [vmem:[#allocation6 + $0x324] sm:$0xf0]  ;;  %v7425_v4 = vor.u32 %v9615_v59, %v7424_v58 }
  0xe3   : > { %v9706_v11 = vld [vmem:[#allocation6 + $0xa04] sm:$0xf]  ;;  %v8061_v18 = vor.u32 %v9770_v6, %v8058_v7  ;;  %3045 = vmatpush.bf16.msra.mxu3 %v7549_v13  ;;  %3108 = vmatpush.bf16.msrb.mxu0 %v7265_v17  ;;  %v6624_v0 = vld [vmem:[#allocation6 + $0xc8] sm:$0xf]  ;;  %v6913_v5 = vor.u32 %v9487_v63, %v6912_v57  ;;  %v9443_v63 = vld [vmem:[#allocation6 + $0x1cc] sm:$0xf] }
  0xe4   : > { %v7802_v12 = vld [vmem:[#allocation6 + $0xa20] sm:$0xf0]  ;;  %3032 = vmatmul.bf16.vlgmr.msra.gmra.mxu1 %v10810_v61  ;;  %v7392_v6 = vld [vmem:[#allocation6 + $0x6c8] sm:$0xf]  ;;  %v6625_v8 = vor.u32 %v9415_v1, %v6624_v0  ;;  %v6754_v0 = vld [vmem:[#allocation6 + $0x1e8] sm:$0xf0] }
  0xe5   : > { %v7805_v22 = vor.u32 %v9706_v11, %v7802_v12  ;;  %3080 = vmatpush.bf16.msrb.mxu1 %v6753_v14  ;;  %v9607_v7 = vld [vmem:[#allocation6 + $0x6e4] sm:$0xf0]  ;;  %v9507_v1 = vld [vmem:[#allocation6 + $0x3cc] sm:$0xf] }
  0xe6   : > { %3046 = vmatmul.bf16.vlgmr.msra.gmra.mxu3 %v10830_v38  ;;  %v6880_v11 = vld [vmem:[#allocation6 + $0x2c8] sm:$0xf]  ;;  %v7393_v17 = vor.u32 %v9607_v7, %v7392_v6 }
  0xe7   : > { %3073 = vmatpush.bf16.msrb.mxu3 %v8061_v18  ;;  %3059 = vmatpush.bf16.msrb.mxu2 %v7805_v22  ;;  %v9479_v12 = vld [vmem:[#allocation6 + $0x2e4] sm:$0xf0] }
  0xe8   : > { %3109 = vmatpush.bf16.msrb.mxu0 %v7233_v31  ;;  %v6592_v13 = vld [vmem:[#allocation6 + $0x88] sm:$0xf]  ;;  %v6881_v18 = vor.u32 %v9479_v12, %v6880_v11  ;;  %v7013_v12 = vor.u32 %v9507_v1, %v7010_v3 }
  0xe9   : > { %3081 = vmatpush.bf16.msrb.mxu1 %v6721_v30  ;;  %v9407_v14 = vld [vmem:[#allocation6 + $0xa4] sm:$0xf0] }
  0xea   : > { %3060 = vmatmul.bf16.vlgmr.msrb.gmra.mxu2 %v10832_v43  ;;  %v9535_v16 = vld [vmem:[#allocation6 + $0x4a4] sm:$0xf0]  ;;  %v6593_v21 = vor.u32 %v9407_v14, %v6592_v13  ;;  %v9435_v14 = vld [vmem:[#allocation6 + $0x18c] sm:$0xf] }
  0xeb   : > { %3122 = vmatpush.bf16.msra.mxu2 %v7521_v26  ;;  %3094 = vmatpush.bf16.msra.mxu3 %v7009_v27  ;;  %v7360_v19 = vld [vmem:[#allocation6 + $0x688] sm:$0xf]  ;;  %v7105_v22 = vor.u32 %v9535_v16, %v7104_v15  ;;  %v6722_v15 = vld [vmem:[#allocation6 + $0x1a8] sm:$0xf0] }
  0xec   : > { %3110 = vmatpush.bf16.msrb.mxu0 %v7201_v45  ;;  %v9599_v20 = vld [vmem:[#allocation6 + $0x6a4] sm:$0xf0]  ;;  %v9499_v16 = vld [vmem:[#allocation6 + $0x38c] sm:$0xf] }
  0xed   : > { %3082 = vmatpush.bf16.msrb.mxu1 %v6689_v44  ;;  %v6848_v23 = vld [vmem:[#allocation6 + $0x288] sm:$0xf]  ;;  %v7361_v29 = vor.u32 %v9599_v20, %v7360_v19 }
  0xee   : > { %v9471_v24 = vld [vmem:[#allocation6 + $0x2a4] sm:$0xf0] }
  0xef   : > { %3123 = vmatpush.bf16.msra.mxu2 %v7489_v39  ;;  %3095 = vmatpush.bf16.msra.mxu3 %v6977_v40  ;;  %v6560_v25 = vld [vmem:[#allocation6 + $0x48] sm:$0xf]  ;;  %v6849_v30 = vor.u32 %v9471_v24, %v6848_v23 }
  0xf0   : > { %3111 = vmatpush.bf16.msrb.mxu0 %v7169_v62  ;;  %v9399_v26 = vld [vmem:[#allocation6 + $0x64] sm:$0xf0] }
  0xf1   : > { %3083 = vmatpush.bf16.msrb.mxu1 %v6657_v60  ;;  %v7072_v27 = vld [vmem:[#allocation6 + $0x448] sm:$0xf]  ;;  %v6561_v34 = vor.u32 %v9399_v26, %v6560_v25  ;;  %v9427_v26 = vld [vmem:[#allocation6 + $0x14c] sm:$0xf] }
  0xf2   : > { %v9527_v28 = vld [vmem:[#allocation6 + $0x464] sm:$0xf0] }
  0xf3   : > { %3124 = vmatpush.bf16.msra.mxu2 %v7457_v53  ;;  %3096 = vmatpush.bf16.msra.mxu3 %v6945_v54  ;;  %v6816_v31 = vld [vmem:[#allocation6 + $0x248] sm:$0xf]  ;;  %v7073_v35 = vor.u32 %v9527_v28, %v7072_v27  ;;  %v6690_v27 = vld [vmem:[#allocation6 + $0x168] sm:$0xf0] }
  0xf4   : > { %3112 = vmatpush.bf16.msrb.mxu0 %v7137_v10  ;;  %v7328_v32 = vld [vmem:[#allocation6 + $0x648] sm:$0xf]  ;;  %v9491_v28 = vld [vmem:[#allocation6 + $0x34c] sm:$0xf] }
  0xf5   : > { %3084 = vmatpush.bf16.msrb.mxu1 %v6625_v8  ;;  %v9591_v33 = vld [vmem:[#allocation6 + $0x664] sm:$0xf0]  ;;  %v6757_v8 = vor.u32 %v9443_v63, %v6754_v0 }
  0xf6   : > { %8087 = vmatmul.msk.bf16.vlgmr.msrb.gmra.mxu3 %vm2880_vm0, %v10822_v51  ;;  %v9463_v36 = vld [vmem:[#allocation6 + $0x264] sm:$0xf0]  ;;  %v7329_v44 = vor.u32 %v9591_v33, %v7328_v32  ;;  %v6693_v33 = vor.u32 %v9427_v26, %v6690_v27 }
  0xf7   : > { %3125 = vmatpush.bf16.msra.mxu2 %v7425_v4  ;;  %3097 = vmatpush.bf16.msra.mxu3 %v6913_v5  ;;  %v6528_v37 = vld [vmem:[#allocation6 + $0x8] sm:$0xf]  ;;  %v6817_v48 = vor.u32 %v9463_v36, %v6816_v31 }
  0xf8   : > { %3113 = vmatpush.bf16.msrb.mxu0 %v7105_v22  ;;  %v9391_v39 = vld [vmem:[#allocation6 + $0x24] sm:$0xf0] }
  0xf9   : > { %3085 = vmatpush.bf16.msrb.mxu1 %v6593_v21  ;;  %v7040_v40 = vld [vmem:[#allocation6 + $0x408] sm:$0xf]  ;;  %v6529_v53 = vor.u32 %v9391_v39, %v6528_v37  ;;  %v6725_v21 = vor.u32 %v9435_v14, %v6722_v15  ;;  %v9419_v39 = vld [vmem:[#allocation6 + $0x10c] sm:$0xf] }
  0xfa   : > { %v9519_v41 = vld [vmem:[#allocation6 + $0x424] sm:$0xf0] }
  0xfb   : > { %3126 = vmatpush.bf16.msra.mxu2 %v7393_v17  ;;  %3098 = vmatpush.bf16.msra.mxu3 %v6881_v18  ;;  %v7776_v42 = vld [vmem:[#allocation6 + $0x9c8] sm:$0xf]  ;;  %v7041_v54 = vor.u32 %v9519_v41, %v7040_v40  ;;  %v6978_v17 = vld [vmem:[#allocation6 + $0x3a8] sm:$0xf0] }
  0xfc   : > { %v9703_v45 = vld [vmem:[#allocation6 + $0x9e4] sm:$0xf0]  ;;  %3114 = vmatpush.bf16.msrb.mxu0 %v7073_v35  ;;  %v6981_v24 = vor.u32 %v9499_v16, %v6978_v17  ;;  %v6658_v40 = vld [vmem:[#allocation6 + $0x128] sm:$0xf0] }
  0xfd   : > { %v8064_v46 = vld [vmem:[#allocation6 + $0xc08] sm:$0xf]  ;;  %3086 = vmatpush.bf16.msrb.mxu1 %v6561_v34  ;;  %v7777_v60 = vor.u32 %v9703_v45, %v7776_v42  ;;  %v9483_v41 = vld [vmem:[#allocation6 + $0x30c] sm:$0xf] }
  0xfe   : > { %v9775_v47 = vld [vmem:[#allocation6 + $0xc24] sm:$0xf0]  ;;  %v6914_v42 = vld [vmem:[#allocation6 + $0x328] sm:$0xf0] }
  0xff   : > { %3127 = vmatpush.bf16.msra.mxu2 %v7361_v29  ;;  %3099 = vmatpush.bf16.msra.mxu3 %v6849_v30  ;;  %v6784_v49 = vld [vmem:[#allocation6 + $0x208] sm:$0xf]  ;;  %v8065_v62 = vor.u32 %v9775_v47, %v8064_v46  ;;  %v6946_v29 = vld [vmem:[#allocation6 + $0x368] sm:$0xf0]  ;;  %v6661_v47 = vor.u32 %v9419_v39, %v6658_v40 }
 0x100   : > { %v7296_v50 = vld [vmem:[#allocation6 + $0x608] sm:$0xf]  ;;  %3115 = vmatpush.bf16.msrb.mxu0 %v7041_v54  ;;  %v6949_v36 = vor.u32 %v9491_v28, %v6946_v29  ;;  %v6626_v54 = vld [vmem:[#allocation6 + $0xe8] sm:$0xf0] }
 0x101   : > { %v9583_v52 = vld [vmem:[#allocation6 + $0x624] sm:$0xf0]  ;;  %3087 = vmatpush.bf16.msrb.mxu1 %v6529_v53  ;;  %v9411_v53 = vld [vmem:[#allocation6 + $0xcc] sm:$0xf] }
 0x102   : > { %v9455_v57 = vld [vmem:[#allocation6 + $0x224] sm:$0xf0]  ;;  %v7297_v2 = vor.u32 %v9583_v52, %v7296_v50  ;;  %v6917_v50 = vor.u32 %v9483_v41, %v6914_v42  ;;  %v6629_v63 = vor.u32 %v9411_v53, %v6626_v54  ;;  %v9395_v17 = vld [vmem:[#allocation6 + $0x4c] sm:$0xf] }
 0x103   : > { %v8032_v58 = vld [vmem:[#allocation6 + $0xbc8] sm:$0xf]  ;;  %3128 = vmatpush.bf16.msra.mxu2 %v7329_v44  ;;  %3100 = vmatpush.bf16.msra.mxu3 %v6817_v48  ;;  %v6785_v6 = vor.u32 %v9455_v57, %v6784_v49  ;;  %v9475_v57 = vld [vmem:[#allocation6 + $0x2cc] sm:$0xf] }
 0x104   : > { %v9767_v59 = vld [vmem:[#allocation6 + $0xbe4] sm:$0xf0]  ;;  %3171 = vmatpush.bf16.msra.mxu0 %v8065_v62  ;;  %3088 = vmatmul.bf16.vlgmr.msrb.gmra.mxu1 %v10808_v56  ;;  %v9699_v39 = vld [vmem:[#allocation6 + $0x9cc] sm:$0xf] }
 0x105   : > { %v7744_v4 = vld [vmem:[#allocation6 + $0x988] sm:$0xf]  ;;  %v8033_v7 = vor.u32 %v9767_v59, %v8032_v58  ;;  %3136 = vmatpush.bf16.msra.mxu1 %v7777_v60  ;;  %3116 = vmatmul.bf16.vlgmr.msrb.gmra.mxu0 %v10806_v55  ;;  %v6882_v58 = vld [vmem:[#allocation6 + $0x2e8] sm:$0xf0] }
 0x106   : > { %v9695_v5 = vld [vmem:[#allocation6 + $0x9a4] sm:$0xf0]  ;;  %v7778_v40 = vld [vmem:[#allocation6 + $0x9e8] sm:$0xf0] }
 0x107   : > { %v8000_v10 = vld [vmem:[#allocation6 + $0xb88] sm:$0xf]  ;;  %v7745_v13 = vor.u32 %v9695_v5, %v7744_v4  ;;  %3129 = vmatpush.bf16.msra.mxu2 %v7297_v2  ;;  %3101 = vmatpush.bf16.msra.mxu3 %v6785_v6  ;;  %v6885_v2 = vor.u32 %v9475_v57, %v6882_v58  ;;  %v9403_v4 = vld [vmem:[#allocation6 + $0x8c] sm:$0xf] }
 0x108   : > { %v9759_v11 = vld [vmem:[#allocation6 + $0xba4] sm:$0xf0]  ;;  %3192 = vmatpush.bf16.msrb.mxu0 %v7013_v12  ;;  %v6594_v5 = vld [vmem:[#allocation6 + $0xa8] sm:$0xf0] }
 0x109   : > { %v7712_v18 = vld [vmem:[#allocation6 + $0x948] sm:$0xf]  ;;  %v8001_v20 = vor.u32 %v9759_v11, %v8000_v10  ;;  %3137 = vmatpush.bf16.msra.mxu1 %v7745_v13  ;;  %v9467_v6 = vld [vmem:[#allocation6 + $0x28c] sm:$0xf]  ;;  %v6597_v12 = vor.u32 %v9403_v4, %v6594_v5 }
 0x10a   : > { %v9687_v19 = vld [vmem:[#allocation6 + $0x964] sm:$0xf0]  ;;  %3102 = vmatmul.bf16.vlgmr.msra.gmra.mxu3 %v10816_v9  ;;  %3130 = vmatmul.bf16.vlgmr.msra.gmra.mxu2 %v10810_v61  ;;  %v9763_v41 = vld [vmem:[#allocation6 + $0xbcc] sm:$0xf] }
 0x10b   : > { %3150 = vmatpush.bf16.msrb.mxu3 %v8033_v7  ;;  %3178 = vmatpush.bf16.msrb.mxu2 %v6757_v8  ;;  %v7968_v22 = vld [vmem:[#allocation6 + $0xb48] sm:$0xf]  ;;  %v7713_v25 = vor.u32 %v9687_v19, %v7712_v18  ;;  %v6850_v7 = vld [vmem:[#allocation6 + $0x2a8] sm:$0xf0] }
 0x10c   : > { %v9751_v23 = vld [vmem:[#allocation6 + $0xb64] sm:$0xf0]  ;;  %3193 = vmatpush.bf16.msrb.mxu0 %v6981_v24  ;;  %v6853_v15 = vor.u32 %v9467_v6, %v6850_v7  ;;  %v6562_v18 = vld [vmem:[#allocation6 + $0x68] sm:$0xf0] }
 0x10d   : > { %v7680_v30 = vld [vmem:[#allocation6 + $0x908] sm:$0xf]  ;;  %v7969_v32 = vor.u32 %v9751_v23, %v7968_v22  ;;  %3138 = vmatpush.bf16.msra.mxu1 %v7713_v25  ;;  %v9459_v19 = vld [vmem:[#allocation6 + $0x24c] sm:$0xf]  ;;  %v6565_v26 = vor.u32 %v9395_v17, %v6562_v18 }
 0x10e   : > { %v9679_v31 = vld [vmem:[#allocation6 + $0x924] sm:$0xf0]  ;;  %v9571_v23 = vld [vmem:[#allocation6 + $0x5cc] sm:$0xf] }
 0x10f   : > { %3151 = vmatpush.bf16.msrb.mxu3 %v8001_v20  ;;  %3179 = vmatpush.bf16.msrb.mxu2 %v6725_v21  ;;  %v7936_v34 = vld [vmem:[#allocation6 + $0xb08] sm:$0xf]  ;;  %v7681_v37 = vor.u32 %v9679_v31, %v7680_v30  ;;  %v6818_v20 = vld [vmem:[#allocation6 + $0x268] sm:$0xf0] }
 0x110   : > { %v9743_v35 = vld [vmem:[#allocation6 + $0xb24] sm:$0xf0]  ;;  %3194 = vmatpush.bf16.msrb.mxu0 %v6949_v36  ;;  %v7266_v24 = vld [vmem:[#allocation6 + $0x5e8] sm:$0xf0]  ;;  %v6821_v29 = vor.u32 %v9459_v19, %v6818_v20 }
 0x111   : > { %v7648_v44 = vld [vmem:[#allocation6 + $0x8c8] sm:$0xf]  ;;  %v7937_v46 = vor.u32 %v9743_v35, %v7936_v34  ;;  %3139 = vmatpush.bf16.msra.mxu1 %v7681_v37  ;;  %v9387_v31 = vld [vmem:[#allocation6 + $0xc] sm:$0xf]  ;;  %v7269_v34 = vor.u32 %v9571_v23, %v7266_v24 }
 0x112   : > { %v9671_v45 = vld [vmem:[#allocation6 + $0x8e4] sm:$0xf0]  ;;  %v6786_v35 = vld [vmem:[#allocation6 + $0x228] sm:$0xf0] }
 0x113   : > { %3152 = vmatpush.bf16.msrb.mxu3 %v7969_v32  ;;  %3180 = vmatpush.bf16.msrb.mxu2 %v6693_v33  ;;  %v7904_v48 = vld [vmem:[#allocation6 + $0xac8] sm:$0xf]  ;;  %v7649_v52 = vor.u32 %v9671_v45, %v7648_v44  ;;  %v6530_v32 = vld [vmem:[#allocation6 + $0x28] sm:$0xf0] }
 0x114   : > { %v9735_v49 = vld [vmem:[#allocation6 + $0xae4] sm:$0xf0]  ;;  %3195 = vmatpush.bf16.msrb.mxu0 %v6917_v50  ;;  %v9451_v33 = vld [vmem:[#allocation6 + $0x20c] sm:$0xf]  ;;  %v7781_v50 = vor.u32 %v9699_v39, %v7778_v40 }
 0x115   : > { %v7616_v59 = vld [vmem:[#allocation6 + $0x888] sm:$0xf]  ;;  %v7905_v62 = vor.u32 %v9735_v49, %v7904_v48  ;;  %3140 = vmatpush.bf16.msra.mxu1 %v7649_v52  ;;  %8088 = vmatmul.msk.bf16.vlgmr.msra.gmra.mxu0 %vm2880_vm0, %v10822_v51  ;;  %v9635_v36 = vld [vmem:[#allocation6 + $0x7cc] sm:$0xf]  ;;  %v6789_v48 = vor.u32 %v9451_v33, %v6786_v35 }
 0x116   : > { %v9663_v60 = vld [vmem:[#allocation6 + $0x8a4] sm:$0xf0]  ;;  %v7522_v37 = vld [vmem:[#allocation6 + $0x7e8] sm:$0xf0] }
 0x117   : > { %3153 = vmatpush.bf16.msrb.mxu3 %v7937_v46  ;;  %3181 = vmatpush.bf16.msrb.mxu2 %v6661_v47  ;;  %v7872_v0 = vld [vmem:[#allocation6 + $0xa88] sm:$0xf]  ;;  %v7617_v3 = vor.u32 %v9663_v60, %v7616_v59  ;;  %v8034_v44 = vld [vmem:[#allocation6 + $0xbe8] sm:$0xf0]  ;;  %v6533_v47 = vor.u32 %v9387_v31, %v6530_v32  ;;  %v7525_v49 = vor.u32 %v9635_v36, %v7522_v37 }
 0x118   : > { %v9727_v1 = vld [vmem:[#allocation6 + $0xaa4] sm:$0xf0]  ;;  %3196 = vmatpush.bf16.msrb.mxu0 %v6885_v2  ;;  %v9563_v45 = vld [vmem:[#allocation6 + $0x58c] sm:$0xf]  ;;  %v8037_v54 = vor.u32 %v9763_v41, %v8034_v44 }
 0x119   : > { %v7584_v8 = vld [vmem:[#allocation6 + $0x848] sm:$0xf]  ;;  %v7873_v11 = vor.u32 %v9727_v1, %v7872_v0  ;;  %3141 = vmatpush.bf16.msra.mxu1 %v7617_v3  ;;  %v7234_v46 = vld [vmem:[#allocation6 + $0x5a8] sm:$0xf0]  ;;  %v10851_v1 = vld [vmem:[#allocation8] sm:$0xff] }
 0x11a   : > { %v9655_v10 = vld [vmem:[#allocation6 + $0x864] sm:$0xf0]  ;;  %v9627_v52 = vld [vmem:[#allocation6 + $0x78c] sm:$0xf]  ;;  %v7237_v57 = vor.u32 %v9563_v45, %v7234_v46 }
 0x11b   : > { %3154 = vmatpush.bf16.msrb.mxu3 %v7905_v62  ;;  %3182 = vmatpush.bf16.msrb.mxu2 %v6629_v63  ;;  %v7840_v13 = vld [vmem:[#allocation6 + $0xa48] sm:$0xf]  ;;  %v7585_v16 = vor.u32 %v9655_v10, %v7584_v8  ;;  %v7490_v53 = vld [vmem:[#allocation6 + $0x7a8] sm:$0xf0] }
 0x11c   : > { %v9719_v14 = vld [vmem:[#allocation6 + $0xa64] sm:$0xf0]  ;;  %3197 = vmatpush.bf16.msrb.mxu0 %v6853_v15  ;;  %v9691_v58 = vld [vmem:[#allocation6 + $0x98c] sm:$0xf]  ;;  %v7493_v2 = vor.u32 %v9627_v52, %v7490_v53  ;;  %v11262_v15 = vperm.slane %v10851_v1, 0  ;;  %v2921_v46 = vpop.f32.mrf.mxu2 }
 0x11d   : > { %v7552_v21 = vld [vmem:[#allocation6 + $0x808] sm:$0xf]  ;;  %v7841_v25 = vor.u32 %v9719_v14, %v7840_v13  ;;  %3142 = vmatpush.bf16.msra.mxu1 %v7585_v16  ;;  %v7746_v59 = vld [vmem:[#allocation6 + $0x9a8] sm:$0xf0] }
 0x11e   : > { %v9647_v22 = vld [vmem:[#allocation6 + $0x824] sm:$0xf0]  ;;  %v9755_v60 = vld [vmem:[#allocation6 + $0xb8c] sm:$0xf]  ;;  %v7749_v3 = vor.u32 %v9691_v58, %v7746_v59  ;;  %v2935_v53 = vpop.f32.mrf.mxu3 }
 0x11f   : > { %3155 = vmatpush.bf16.msrb.mxu3 %v7873_v11  ;;  %3183 = vmatpush.bf16.msrb.mxu2 %v6597_v12  ;;  %v7808_v27 = vld [vmem:[#allocation6 + $0xa08] sm:$0xf]  ;;  %v7553_v30 = vor.u32 %v9647_v22, %v7552_v21  ;;  %v8002_v62 = vld [vmem:[#allocation6 + $0xba8] sm:$0xf0]  ;;  %v2893_v22 = vpop.f32.mrf.mxu0 }
 0x120   : > { %v9711_v28 = vld [vmem:[#allocation6 + $0xa24] sm:$0xf0]  ;;  %3198 = vmatpush.bf16.msrb.mxu0 %v6821_v29  ;;  %v9555_v63 = vld [vmem:[#allocation6 + $0x54c] sm:$0xf]  ;;  %v8005_v7 = vor.u32 %v9755_v60, %v8002_v62 }
 0x121   : > { %v7809_v42 = vor.u32 %v9711_v28, %v7808_v27  ;;  %3143 = vmatpush.bf16.msra.mxu1 %v7553_v30  ;;  %v7202_v0 = vld [vmem:[#allocation6 + $0x568] sm:$0xf0] }
 0x122   : > { %v9619_v4 = vld [vmem:[#allocation6 + $0x74c] sm:$0xf]  ;;  %v7205_v8 = vor.u32 %v9555_v63, %v7202_v0 }
 0x123   : > { %3156 = vmatpush.bf16.msrb.mxu3 %v7841_v25  ;;  %3184 = vmatpush.bf16.msrb.mxu2 %v6565_v26  ;;  %v7458_v5 = vld [vmem:[#allocation6 + $0x768] sm:$0xf0]  ;;  %v2894_v26 = vadd.f32 %v2893_v22, %v11262_v15  ;;  %v9629_v15 = vld [vmem:[#allocation6 + $0x79c] sm:$0xf] }
 0x124   : > { %3144 = vmatmul.bf16.vlgmr.msra.gmra.mxu1 %v10830_v38  ;;  %3199 = vmatpush.bf16.msrb.mxu0 %v6789_v48  ;;  %v9683_v6 = vld [vmem:[#allocation6 + $0x94c] sm:$0xf]  ;;  %v7461_v16 = vor.u32 %v9619_v4, %v7458_v5 }
 0x125   : > { %3206 = vmatpush.bf16.msrb.mxu1 %v7269_v34  ;;  %v7714_v10 = vld [vmem:[#allocation6 + $0x968] sm:$0xf0]  ;;  %v2907_v34 = vpop.f32.mrf.mxu1 }
 0x126   : > { %v9747_v11 = vld [vmem:[#allocation6 + $0xb4c] sm:$0xf]  ;;  %v7717_v17 = vor.u32 %v9683_v6, %v7714_v10  ;;  %v2908_v41 = vadd.f32 %v2907_v34, %v2894_v26  ;;  %v9512_v34 = vld [vmem:[#allocation6 + $0x3ec] sm:$0xf0] }
 0x127   : > { %3157 = vmatpush.bf16.msrb.mxu3 %v7809_v42  ;;  %3185 = vmatpush.bf16.msrb.mxu2 %v6533_v47  ;;  %v7970_v12 = vld [vmem:[#allocation6 + $0xb68] sm:$0xf0] }
 0x128   : > { %3248 = vmatpush.bf16.msra.mxu0 %v8037_v54  ;;  %v9547_v13 = vld [vmem:[#allocation6 + $0x50c] sm:$0xf]  ;;  %v7973_v20 = vor.u32 %v9747_v11, %v7970_v12  ;;  %v2922_v47 = vadd.f32 %v2921_v46, %v2908_v41 }
 0x129   : > { %3207 = vmatpush.bf16.msrb.mxu1 %v7237_v57  ;;  %v7170_v14 = vld [vmem:[#allocation6 + $0x528] sm:$0xf0]  ;;  %3200 = vmatmul.bf16.vlgmr.msrb.gmra.mxu0 %v10816_v9 }
 0x12a   : > { %3158 = vmatmul.bf16.vlgmr.msrb.gmra.mxu3 %v10832_v43  ;;  %3186 = vmatmul.bf16.vlgmr.msrb.gmra.mxu2 %v10808_v56  ;;  %v9611_v18 = vld [vmem:[#allocation6 + $0x70c] sm:$0xf]  ;;  %v7173_v21 = vor.u32 %v9547_v13, %v7170_v14  ;;  %v10859_v62 = vadd.f32 %v2935_v53, %v2922_v47  ;;  %v6728_v47 = vld [vmem:[#allocation6 + $0x190] sm:$0xf] }
 0x12b   : > { %3220 = vmatpush.bf16.msra.mxu3 %v7525_v49  ;;  %3234 = vmatpush.bf16.msra.mxu2 %v7781_v50  ;;  %v7426_v19 = vld [vmem:[#allocation6 + $0x728] sm:$0xf0]  ;;  %v6984_v53 = vld [vmem:[#allocation6 + $0x390] sm:$0xf] }
 0x12c   : > { %3249 = vmatpush.bf16.msra.mxu0 %v8005_v7  ;;  %v9675_v23 = vld [vmem:[#allocation6 + $0x90c] sm:$0xf]  ;;  %v7429_v30 = vor.u32 %v9611_v18, %v7426_v19 }
 0x12d   : > { %3208 = vmatpush.bf16.msrb.mxu1 %v7205_v8  ;;  %v7682_v24 = vld [vmem:[#allocation6 + $0x928] sm:$0xf0] }
 0x12e   : > { %v9739_v25 = vld [vmem:[#allocation6 + $0xb0c] sm:$0xf]  ;;  %v7685_v31 = vor.u32 %v9675_v23, %v7682_v24 }
 0x12f   : > { %3221 = vmatpush.bf16.msra.mxu3 %v7493_v2  ;;  %3235 = vmatpush.bf16.msra.mxu2 %v7749_v3  ;;  %v7938_v27 = vld [vmem:[#allocation6 + $0xb28] sm:$0xf0] }
 0x130   : > { %v9539_v28 = vld [vmem:[#allocation6 + $0x4cc] sm:$0xf]  ;;  %3250 = vmatpush.bf16.msra.mxu0 %v7973_v20  ;;  %v7941_v35 = vor.u32 %v9739_v25, %v7938_v27 }
 0x131   : > { %v7138_v29 = vld [vmem:[#allocation6 + $0x4e8] sm:$0xf0]  ;;  %3209 = vmatpush.bf16.msrb.mxu1 %v7173_v21 }
 0x132   : > { %v9603_v32 = vld [vmem:[#allocation6 + $0x6cc] sm:$0xf]  ;;  %v7141_v36 = vor.u32 %v9539_v28, %v7138_v29 }
 0x133   : > { %3222 = vmatpush.bf16.msra.mxu3 %v7461_v16  ;;  %3236 = vmatpush.bf16.msra.mxu2 %v7717_v17  ;;  %v7394_v33 = vld [vmem:[#allocation6 + $0x6e8] sm:$0xf0]  ;;  %v10861_v17 = vpop.f32.mrf.mxu2 }
 0x134   : > { %v9667_v37 = vld [vmem:[#allocation6 + $0x8cc] sm:$0xf]  ;;  %v7397_v48 = vor.u32 %v9603_v32, %v7394_v33  ;;  %3251 = vmatpush.bf16.msra.mxu0 %v7941_v35  ;;  %v9448_v32 = vld [vmem:[#allocation6 + $0x1ec] sm:$0xf0] }
 0x135   : > { %v7650_v39 = vld [vmem:[#allocation6 + $0x8e8] sm:$0xf0]  ;;  %3210 = vmatpush.bf16.msrb.mxu1 %v7141_v36  ;;  %v7016_v33 = vld [vmem:[#allocation6 + $0x3d0] sm:$0xf] }
 0x136   : > { %v9731_v40 = vld [vmem:[#allocation6 + $0xacc] sm:$0xf]  ;;  %v7653_v49 = vor.u32 %v9667_v37, %v7650_v39  ;;  %v7272_v35 = vld [vmem:[#allocation6 + $0x5d0] sm:$0xf]  ;;  %v7017_v46 = vor.u32 %v9512_v34, %v7016_v33 }
 0x137   : > { %v7906_v42 = vld [vmem:[#allocation6 + $0xae8] sm:$0xf0]  ;;  %3223 = vmatpush.bf16.msra.mxu3 %v7429_v30  ;;  %3237 = vmatpush.bf16.msra.mxu2 %v7685_v31  ;;  %v6760_v31 = vld [vmem:[#allocation6 + $0x1d0] sm:$0xf] }
 0x138   : > { %v9531_v44 = vld [vmem:[#allocation6 + $0x48c] sm:$0xf]  ;;  %v7909_v54 = vor.u32 %v9731_v40, %v7906_v42  ;;  %v9576_v37 = vld [vmem:[#allocation6 + $0x5ec] sm:$0xf0] }
 0x139   : > { %v7106_v45 = vld [vmem:[#allocation6 + $0x4a8] sm:$0xf0]  ;;  %v7528_v39 = vld [vmem:[#allocation6 + $0x7d0] sm:$0xf] }
 0x13a   : > { %v9595_v50 = vld [vmem:[#allocation6 + $0x68c] sm:$0xf]  ;;  %v7109_v57 = vor.u32 %v9531_v44, %v7106_v45  ;;  %3252 = vmatpush.bf16.msra.mxu0 %v7909_v54  ;;  %v9640_v40 = vld [vmem:[#allocation6 + $0x7ec] sm:$0xf0]  ;;  %v10863_v44 = vpop.f32.mrf.mxu0  ;;  %v6761_v45 = vor.u32 %v9448_v32, %v6760_v31 }
 0x13b   : > { %v7362_v52 = vld [vmem:[#allocation6 + $0x6a8] sm:$0xf0]  ;;  %3224 = vmatpush.bf16.msra.mxu3 %v7397_v48  ;;  %3238 = vmatpush.bf16.msra.mxu2 %v7653_v49  ;;  %v9440_v48 = vld [vmem:[#allocation6 + $0x1ac] sm:$0xf0]  ;;  %v10865_v49 = vpop.f32.mrf.mxu1 }
 0x13c   : > { %v9659_v58 = vld [vmem:[#allocation6 + $0x88c] sm:$0xf]  ;;  %v7365_v3 = vor.u32 %v9595_v50, %v7362_v52  ;;  %3211 = vmatpush.bf16.msrb.mxu1 %v7109_v57  ;;  %v7273_v50 = vor.u32 %v9576_v37, %v7272_v35  ;;  %v7529_v52 = vor.u32 %v9640_v40, %v7528_v39  ;;  %v9504_v54 = vld [vmem:[#allocation6 + $0x3ac] sm:$0xf0] }
 0x13d   : > { %v7618_v59 = vld [vmem:[#allocation6 + $0x8a8] sm:$0xf0]  ;;  %v7240_v57 = vld [vmem:[#allocation6 + $0x590] sm:$0xf] }
 0x13e   : > { %v9723_v60 = vld [vmem:[#allocation6 + $0xa8c] sm:$0xf]  ;;  %v7621_v4 = vor.u32 %v9659_v58, %v7618_v59  ;;  %v2977_v58 = vpop.f32.mrf.mxu2  ;;  %v9568_v59 = vld [vmem:[#allocation6 + $0x5ac] sm:$0xf0] }
 0x13f   : > { %v7874_v63 = vld [vmem:[#allocation6 + $0xaa8] sm:$0xf0]  ;;  %3225 = vmatpush.bf16.msra.mxu3 %v7365_v3  ;;  %v6696_v3 = vld [vmem:[#allocation6 + $0x150] sm:$0xf] }
 0x140   : > { %v9523_v0 = vld [vmem:[#allocation6 + $0x44c] sm:$0xf]  ;;  %v7877_v7 = vor.u32 %v9723_v60, %v7874_v63  ;;  %3239 = vmatpush.bf16.msra.mxu2 %v7621_v4  ;;  %v7496_v60 = vld [vmem:[#allocation6 + $0x790] sm:$0xf] }
 0x141   : > { %v7074_v2 = vld [vmem:[#allocation6 + $0x468] sm:$0xf0]  ;;  %v9632_v63 = vld [vmem:[#allocation6 + $0x7ac] sm:$0xf0] }
 0x142   : > { %v9587_v5 = vld [vmem:[#allocation6 + $0x64c] sm:$0xf]  ;;  %v7077_v8 = vor.u32 %v9523_v0, %v7074_v2  ;;  %3253 = vmatpush.bf16.msra.mxu0 %v7877_v7  ;;  %v6729_v0 = vor.u32 %v9440_v48, %v6728_v47  ;;  %v6985_v2 = vor.u32 %v9504_v54, %v6984_v53  ;;  %v9432_v4 = vld [vmem:[#allocation6 + $0x16c] sm:$0xf0] }
 0x143   : > { %v7330_v6 = vld [vmem:[#allocation6 + $0x668] sm:$0xf0]  ;;  %v6952_v7 = vld [vmem:[#allocation6 + $0x350] sm:$0xf] }
 0x144   : > { %v9651_v10 = vld [vmem:[#allocation6 + $0x84c] sm:$0xf]  ;;  %v7333_v20 = vor.u32 %v9587_v5, %v7330_v6  ;;  %3212 = vmatpush.bf16.msrb.mxu1 %v7077_v8  ;;  %v7241_v5 = vor.u32 %v9568_v59, %v7240_v57  ;;  %v7497_v6 = vor.u32 %v9632_v63, %v7496_v60  ;;  %v9496_v8 = vld [vmem:[#allocation6 + $0x36c] sm:$0xf0] }
 0x145   : > { %v7586_v11 = vld [vmem:[#allocation6 + $0x868] sm:$0xf0]  ;;  %v7432_v31 = vld [vmem:[#allocation6 + $0x710] sm:$0xf] }
 0x146   : > { %v9715_v12 = vld [vmem:[#allocation6 + $0xa4c] sm:$0xf]  ;;  %v7589_v21 = vor.u32 %v9651_v10, %v7586_v11  ;;  %3226 = vmatpush.bf16.msra.mxu3 %v7333_v20  ;;  %v7208_v10 = vld [vmem:[#allocation6 + $0x550] sm:$0xf] }
 0x147   : > { %v7842_v13 = vld [vmem:[#allocation6 + $0xa68] sm:$0xf0]  ;;  %v9560_v11 = vld [vmem:[#allocation6 + $0x56c] sm:$0xf0] }
 0x148   : > { %v9515_v14 = vld [vmem:[#allocation6 + $0x40c] sm:$0xf]  ;;  %v7845_v24 = vor.u32 %v9715_v12, %v7842_v13  ;;  %3240 = vmatpush.bf16.msra.mxu2 %v7589_v21  ;;  %v7464_v12 = vld [vmem:[#allocation6 + $0x750] sm:$0xf] }
 0x149   : > { %v7042_v16 = vld [vmem:[#allocation6 + $0x428] sm:$0xf0]  ;;  %v9624_v13 = vld [vmem:[#allocation6 + $0x76c] sm:$0xf0] }
 0x14a   : > { %v9771_v18 = vld [vmem:[#allocation6 + $0xc0c] sm:$0xf]  ;;  %v7045_v25 = vor.u32 %v9515_v14, %v7042_v16  ;;  %3254 = vmatpush.bf16.msra.mxu0 %v7845_v24  ;;  %v10871_v14 = vpop.f32.mrf.mxu3  ;;  %v2949_v16 = vpop.f32.mrf.mxu0  ;;  %v6664_v20 = vld [vmem:[#allocation6 + $0x110] sm:$0xf]  ;;  %v7465_v24 = vor.u32 %v9624_v13, %v7464_v12 }
 0x14b   : > { %v8066_v19 = vld [vmem:[#allocation6 + $0xc28] sm:$0xf0]  ;;  %v9424_v21 = vld [vmem:[#allocation6 + $0x12c] sm:$0xf0] }
 0x14c   : > { %v9579_v22 = vld [vmem:[#allocation6 + $0x60c] sm:$0xf]  ;;  %v8069_v30 = vor.u32 %v9771_v18, %v8066_v19  ;;  %3213 = vmatpush.bf16.msrb.mxu1 %v7045_v25  ;;  %v6697_v18 = vor.u32 %v9432_v4, %v6696_v3  ;;  %v6953_v19 = vor.u32 %v9496_v8, %v6952_v7  ;;  %v2963_v25 = vpop.f32.mrf.mxu1  ;;  %v9616_v32 = vld [vmem:[#allocation6 + $0x72c] sm:$0xf0]  ;;  %v6665_v34 = vor.u32 %v9424_v21, %v6664_v20 }
 0x14d   : > { %v7298_v23 = vld [vmem:[#allocation6 + $0x628] sm:$0xf0]  ;;  %v9416_v37 = vld [vmem:[#allocation6 + $0xec] sm:$0xf0] }
 0x14e   : > { %v9643_v26 = vld [vmem:[#allocation6 + $0x80c] sm:$0xf]  ;;  %v7301_v36 = vor.u32 %v9579_v22, %v7298_v23  ;;  %v2950_v22 = vadd.f32 %v2949_v16, %v10859_v62  ;;  %v7209_v23 = vor.u32 %v9560_v11, %v7208_v10  ;;  %v6888_v39 = vld [vmem:[#allocation6 + $0x2d0] sm:$0xf] }
 0x14f   : > { %v7554_v27 = vld [vmem:[#allocation6 + $0x828] sm:$0xf0]  ;;  %3214 = vmatmul.bf16.vlgmr.msrb.gmra.mxu1 %v10806_v55  ;;  %v9544_v47 = vld [vmem:[#allocation6 + $0x4ec] sm:$0xf0] }
 0x150   : > { %v9707_v28 = vld [vmem:[#allocation6 + $0xa0c] sm:$0xf]  ;;  %v7557_v41 = vor.u32 %v9643_v26, %v7554_v27  ;;  %3269 = vmatpush.bf16.msra.mxu1 %v8069_v30  ;;  %3227 = vmatpush.bf16.msra.mxu3 %v7301_v36  ;;  %v6920_v26 = vld [vmem:[#allocation6 + $0x310] sm:$0xf]  ;;  %v2964_v33 = vadd.f32 %v2963_v25, %v2950_v22 }
 0x151   : > { %v7810_v29 = vld [vmem:[#allocation6 + $0xa28] sm:$0xf0]  ;;  %v9488_v27 = vld [vmem:[#allocation6 + $0x32c] sm:$0xf0] }
 0x152   : > { %v7813_v42 = vor.u32 %v9707_v28, %v7810_v29  ;;  %3241 = vmatpush.bf16.msra.mxu2 %v7557_v41  ;;  %v7176_v28 = vld [vmem:[#allocation6 + $0x510] sm:$0xf]  ;;  %v10874_v29 = vpop.f32.mrf.mxu2  ;;  %v6921_v35 = vor.u32 %v9488_v27, %v6920_v26  ;;  %v10876_v62 = vadd.f32 %v2977_v58, %v2964_v33  ;;  %v7433_v41 = vor.u32 %v9616_v32, %v7432_v31  ;;  %v2991_v59 = vpop.f32.mrf.mxu3 }
 0x153   : > { %3228 = vmatmul.bf16.vlgmr.msra.gmra.mxu3 %v10810_v61  ;;  %v9552_v30 = vld [vmem:[#allocation6 + $0x52c] sm:$0xf0] }
 0x154   : > { %3255 = vmatpush.bf16.msra.mxu0 %v7813_v42  ;;  %3276 = vmatpush.bf16.msrb.mxu3 %v6761_v45  ;;  %v6632_v36 = vld [vmem:[#allocation6 + $0xd0] sm:$0xf]  ;;  %v7177_v40 = vor.u32 %v9552_v30, %v7176_v28 }
 0x155   : > { %3290 = vmatpush.bf16.msrb.mxu1 %v7017_v46  ;;  %3242 = vmatmul.bf16.vlgmr.msra.gmra.mxu2 %v10830_v38  ;;  %v9480_v42 = vld [vmem:[#allocation6 + $0x2ec] sm:$0xf0]  ;;  %v11261_v46 = vperm.slane %v10851_v1, 1 }
 0x156   : > { %3304 = vmatpush.bf16.msrb.mxu2 %v7273_v50  ;;  %v7144_v45 = vld [vmem:[#allocation6 + $0x4d0] sm:$0xf]  ;;  %v6889_v53 = vor.u32 %v9480_v42, %v6888_v39 }
 0x157   : > { %3256 = vmatmul.bf16.vlgmr.msra.gmra.mxu0 %v10832_v43  ;;  %v7400_v48 = vld [vmem:[#allocation6 + $0x6d0] sm:$0xf]  ;;  %v7145_v58 = vor.u32 %v9544_v47, %v7144_v45  ;;  %v2992_v3 = vadd.f32 %v2991_v59, %v11261_v46 }
 0x158   : > { %3318 = vmatpush.bf16.msrb.mxu0 %v7529_v52  ;;  %3277 = vmatpush.bf16.msrb.mxu3 %v6729_v0  ;;  %v9608_v50 = vld [vmem:[#allocation6 + $0x6ec] sm:$0xf0]  ;;  %v6633_v52 = vor.u32 %v9416_v37, %v6632_v36 }
 0x159   : > { %3291 = vmatpush.bf16.msrb.mxu1 %v6985_v2  ;;  %v6600_v54 = vld [vmem:[#allocation6 + $0x90] sm:$0xf]  ;;  %v7401_v60 = vor.u32 %v9608_v50, %v7400_v48  ;;  %v9444_v48 = vld [vmem:[#allocation6 + $0x1d4] sm:$0xf] }
 0x15a   : > { %3305 = vmatpush.bf16.msrb.mxu2 %v7241_v5  ;;  %v9408_v57 = vld [vmem:[#allocation6 + $0xac] sm:$0xf0]  ;;  %v3005_v7 = vpop.f32.mrf.mxu2  ;;  %v6762_v50 = vld [vmem:[#allocation6 + $0x1f0] sm:$0xf0] }
 0x15b   : > { %v6856_v63 = vld [vmem:[#allocation6 + $0x290] sm:$0xf]  ;;  %v10883_v8 = vadd.f32 %v3005_v7, %v2992_v3  ;;  %v6601_v10 = vor.u32 %v9408_v57, %v6600_v54  ;;  %v10885_v57 = vpop.f32.mrf.mxu0 }
 0x15c   : > { %3319 = vmatpush.bf16.msrb.mxu0 %v7497_v6  ;;  %3278 = vmatpush.bf16.msrb.mxu3 %v6697_v18  ;;  %v9472_v0 = vld [vmem:[#allocation6 + $0x2ac] sm:$0xf0] }
 0x15d   : > { %3292 = vmatpush.bf16.msrb.mxu1 %v6953_v19  ;;  %v7112_v2 = vld [vmem:[#allocation6 + $0x490] sm:$0xf]  ;;  %v6857_v11 = vor.u32 %v9472_v0, %v6856_v63  ;;  %v9508_v63 = vld [vmem:[#allocation6 + $0x3d4] sm:$0xf] }
 0x15e   : > { %3306 = vmatpush.bf16.msrb.mxu2 %v7209_v23  ;;  %v9536_v4 = vld [vmem:[#allocation6 + $0x4ac] sm:$0xf0]  ;;  %v7018_v0 = vld [vmem:[#allocation6 + $0x3f0] sm:$0xf0] }
 0x15f   : > { %8089 = vmatmul.msk.bf16.vlgmr.msra.gmra.mxu1 %vm2880_vm0, %v10822_v51  ;;  %v7368_v5 = vld [vmem:[#allocation6 + $0x690] sm:$0xf]  ;;  %v7113_v16 = vor.u32 %v9536_v4, %v7112_v2  ;;  %v6765_v2 = vor.u32 %v9444_v48, %v6762_v50  ;;  %v9420_v48 = vld [vmem:[#allocation6 + $0x114] sm:$0xf] }
 0x160   : > { %3320 = vmatpush.bf16.msrb.mxu0 %v7465_v24  ;;  %3279 = vmatpush.bf16.msrb.mxu3 %v6665_v34  ;;  %v9600_v6 = vld [vmem:[#allocation6 + $0x6ac] sm:$0xf0]  ;;  %v6666_v50 = vld [vmem:[#allocation6 + $0x130] sm:$0xf0] }
 0x161   : > { %3293 = vmatpush.bf16.msrb.mxu1 %v6921_v35  ;;  %v6568_v12 = vld [vmem:[#allocation6 + $0x50] sm:$0xf]  ;;  %v7369_v18 = vor.u32 %v9600_v6, %v7368_v5  ;;  %v10887_v6 = vpop.f32.mrf.mxu1 }
 0x162   : > { %3307 = vmatpush.bf16.msrb.mxu2 %v7177_v40  ;;  %v9400_v13 = vld [vmem:[#allocation6 + $0x6c] sm:$0xf0] }
 0x163   : > { %v6824_v19 = vld [vmem:[#allocation6 + $0x250] sm:$0xf]  ;;  %v6569_v25 = vor.u32 %v9400_v13, %v6568_v12  ;;  %v7021_v13 = vor.u32 %v9508_v63, %v7018_v0 }
 0x164   : > { %3321 = vmatpush.bf16.msrb.mxu0 %v7433_v41  ;;  %3280 = vmatpush.bf16.msrb.mxu3 %v6633_v52  ;;  %v9464_v20 = vld [vmem:[#allocation6 + $0x26c] sm:$0xf0] }
 0x165   : > { %3294 = vmatpush.bf16.msrb.mxu1 %v6889_v53  ;;  %v7080_v21 = vld [vmem:[#allocation6 + $0x450] sm:$0xf]  ;;  %v6825_v26 = vor.u32 %v9464_v20, %v6824_v19  ;;  %v6986_v19 = vld [vmem:[#allocation6 + $0x3b0] sm:$0xf0] }
 0x166   : > { %3308 = vmatpush.bf16.msrb.mxu2 %v7145_v58  ;;  %v9528_v22 = vld [vmem:[#allocation6 + $0x46c] sm:$0xf0] }
 0x167   : > { %v7336_v23 = vld [vmem:[#allocation6 + $0x650] sm:$0xf]  ;;  %v7081_v31 = vor.u32 %v9528_v22, %v7080_v21 }
 0x168   : > { %3322 = vmatpush.bf16.msrb.mxu0 %v7401_v60  ;;  %v9592_v24 = vld [vmem:[#allocation6 + $0x66c] sm:$0xf0]  ;;  %3281 = vmatpush.bf16.msrb.mxu3 %v6601_v10  ;;  %v9436_v10 = vld [vmem:[#allocation6 + $0x194] sm:$0xf] }
 0x169   : > { %3295 = vmatpush.bf16.msrb.mxu1 %v6857_v11  ;;  %v6536_v27 = vld [vmem:[#allocation6 + $0x10] sm:$0xf]  ;;  %v7337_v32 = vor.u32 %v9592_v24, %v7336_v23  ;;  %v6730_v11 = vld [vmem:[#allocation6 + $0x1b0] sm:$0xf0] }
 0x16a   : > { %v9392_v28 = vld [vmem:[#allocation6 + $0x2c] sm:$0xf0]  ;;  %3309 = vmatpush.bf16.msrb.mxu2 %v7113_v16  ;;  %v6733_v21 = vor.u32 %v9436_v10, %v6730_v11 }
 0x16b   : > { %v6792_v30 = vld [vmem:[#allocation6 + $0x210] sm:$0xf]  ;;  %v6537_v45 = vor.u32 %v9392_v28, %v6536_v27  ;;  %v6698_v27 = vld [vmem:[#allocation6 + $0x170] sm:$0xf0]  ;;  %v10892_v28 = vpop.f32.mrf.mxu3 }
 0x16c   : > { %3323 = vmatpush.bf16.msrb.mxu0 %v7369_v18  ;;  %v9456_v33 = vld [vmem:[#allocation6 + $0x22c] sm:$0xf0]  ;;  %3282 = vmatpush.bf16.msrb.mxu3 %v6569_v25  ;;  %v9500_v18 = vld [vmem:[#allocation6 + $0x394] sm:$0xf] }
 0x16d   : > { %v7048_v34 = vld [vmem:[#allocation6 + $0x410] sm:$0xf]  ;;  %3296 = vmatpush.bf16.msrb.mxu1 %v6825_v26  ;;  %v6793_v47 = vor.u32 %v9456_v33, %v6792_v30  ;;  %v9428_v26 = vld [vmem:[#allocation6 + $0x154] sm:$0xf]  ;;  %v6989_v30 = vor.u32 %v9500_v18, %v6986_v19 }
 0x16e   : > { %v9520_v35 = vld [vmem:[#allocation6 + $0x42c] sm:$0xf0]  ;;  %3310 = vmatpush.bf16.msrb.mxu2 %v7081_v31  ;;  %v3019_v31 = vpop.f32.mrf.mxu0  ;;  %v9492_v33 = vld [vmem:[#allocation6 + $0x354] sm:$0xf] }
 0x16f   : > { %v7304_v36 = vld [vmem:[#allocation6 + $0x610] sm:$0xf]  ;;  %v7049_v52 = vor.u32 %v9520_v35, %v7048_v34  ;;  %v6954_v34 = vld [vmem:[#allocation6 + $0x370] sm:$0xf0]  ;;  %v3020_v35 = vadd.f32 %v3019_v31, %v10883_v8 }
 0x170   : > { %v9584_v37 = vld [vmem:[#allocation6 + $0x62c] sm:$0xf0]  ;;  %3324 = vmatpush.bf16.msrb.mxu0 %v7337_v32  ;;  %3283 = vmatpush.bf16.msrb.mxu3 %v6537_v45  ;;  %v3033_v45 = vpop.f32.mrf.mxu1 }
 0x171   : > { %v7784_v39 = vld [vmem:[#allocation6 + $0x9d0] sm:$0xf]  ;;  %v7305_v53 = vor.u32 %v9584_v37, %v7304_v36  ;;  %3297 = vmatpush.bf16.msrb.mxu1 %v6793_v47  ;;  %v6701_v37 = vor.u32 %v9428_v26, %v6698_v27  ;;  %v6602_v26 = vld [vmem:[#allocation6 + $0xb0] sm:$0xf0] }
 0x172   : > { %v9704_v40 = vld [vmem:[#allocation6 + $0x9ec] sm:$0xf0]  ;;  %3311 = vmatpush.bf16.msrb.mxu2 %v7049_v52  ;;  %v3034_v52 = vadd.f32 %v3033_v45, %v3020_v35  ;;  %v6570_v45 = vld [vmem:[#allocation6 + $0x70] sm:$0xf0] }
 0x173   : > { %v8040_v41 = vld [vmem:[#allocation6 + $0xbd0] sm:$0xf]  ;;  %v7785_v59 = vor.u32 %v9704_v40, %v7784_v39  ;;  %3284 = vmatmul.bf16.vlgmr.msrb.gmra.mxu3 %v10808_v56 }
 0x174   : > { %v9768_v42 = vld [vmem:[#allocation6 + $0xbec] sm:$0xf0]  ;;  %3325 = vmatpush.bf16.msrb.mxu0 %v7305_v53  ;;  %3298 = vmatmul.bf16.vlgmr.msrb.gmra.mxu1 %v10816_v9  ;;  %v6957_v53 = vor.u32 %v9492_v33, %v6954_v34  ;;  %v6858_v33 = vld [vmem:[#allocation6 + $0x2b0] sm:$0xf0] }
 0x175   : > { %v8072_v54 = vld [vmem:[#allocation6 + $0xc10] sm:$0xf]  ;;  %v8041_v58 = vor.u32 %v9768_v42, %v8040_v41  ;;  %3332 = vmatpush.bf16.msra.mxu3 %v7785_v59  ;;  %3312 = vmatmul.bf16.vlgmr.msrb.gmra.mxu2 %v10806_v55  ;;  %v10896_v42 = vpop.f32.mrf.mxu2  ;;  %v9484_v59 = vld [vmem:[#allocation6 + $0x314] sm:$0xf] }
 0x176   : > { %v9776_v60 = vld [vmem:[#allocation6 + $0xc2c] sm:$0xf0] }
 0x177   : > { %v7752_v3 = vld [vmem:[#allocation6 + $0x990] sm:$0xf]  ;;  %v8073_v12 = vor.u32 %v9776_v60, %v8072_v54  ;;  %3346 = vmatpush.bf16.msra.mxu1 %v8041_v58  ;;  %3326 = vmatmul.bf16.vlgmr.msrb.gmra.mxu0 %v10810_v61  ;;  %v6922_v58 = vld [vmem:[#allocation6 + $0x330] sm:$0xf0]  ;;  %v6669_v60 = vor.u32 %v9420_v48, %v6666_v50 }
 0x178   : > { %v9696_v4 = vld [vmem:[#allocation6 + $0x9ac] sm:$0xf0]  ;;  %3374 = vmatpush.bf16.msra.mxu0 %v6765_v2  ;;  %v6925_v11 = vor.u32 %v9484_v59, %v6922_v58 }
 0x179   : > { %v8008_v5 = vld [vmem:[#allocation6 + $0xb90] sm:$0xf]  ;;  %v7753_v16 = vor.u32 %v9696_v4, %v7752_v3  ;;  %3367 = vmatpush.bf16.msra.mxu2 %v8073_v12  ;;  %v9412_v4 = vld [vmem:[#allocation6 + $0xd4] sm:$0xf] }
 0x17a   : > { %v9760_v7 = vld [vmem:[#allocation6 + $0xbac] sm:$0xf0] }
 0x17b   : > { %v8009_v20 = vor.u32 %v9760_v7, %v8008_v5  ;;  %v7720_v22 = vld [vmem:[#allocation6 + $0x950] sm:$0xf]  ;;  %3333 = vmatpush.bf16.msra.mxu3 %v7753_v16  ;;  %v6634_v5 = vld [vmem:[#allocation6 + $0xf0] sm:$0xf0]  ;;  %v3047_v7 = vpop.f32.mrf.mxu3 }
 0x17c   : > { %v9688_v23 = vld [vmem:[#allocation6 + $0x96c] sm:$0xf0]  ;;  %3375 = vmatpush.bf16.msra.mxu0 %v6733_v21  ;;  %v3048_v10 = vadd.f32 %v3047_v7, %v3034_v52  ;;  %v6890_v16 = vld [vmem:[#allocation6 + $0x2f0] sm:$0xf0]  ;;  %v6637_v19 = vor.u32 %v9412_v4, %v6634_v5 }
 0x17d   : > { %v7976_v24 = vld [vmem:[#allocation6 + $0xb50] sm:$0xf]  ;;  %3388 = vmatpush.bf16.msrb.mxu2 %v7021_v13  ;;  %v7721_v32 = vor.u32 %v9688_v23, %v7720_v22  ;;  %3347 = vmatpush.bf16.msra.mxu1 %v8009_v20  ;;  %v9476_v13 = vld [vmem:[#allocation6 + $0x2d4] sm:$0xf]  ;;  %v3061_v23 = vpop.f32.mrf.mxu2 }
 0x17e   : > { %v9752_v25 = vld [vmem:[#allocation6 + $0xb6c] sm:$0xf0]  ;;  %v10898_v27 = vadd.f32 %v3061_v23, %v3048_v10  ;;  %v9460_v52 = vld [vmem:[#allocation6 + $0x254] sm:$0xf] }
 0x17f   : > { %v7977_v36 = vor.u32 %v9752_v25, %v7976_v24  ;;  %v7688_v39 = vld [vmem:[#allocation6 + $0x910] sm:$0xf]  ;;  %3334 = vmatpush.bf16.msra.mxu3 %v7721_v32  ;;  %v9404_v25 = vld [vmem:[#allocation6 + $0x94] sm:$0xf] }
 0x180   : > { %v9680_v40 = vld [vmem:[#allocation6 + $0x92c] sm:$0xf0]  ;;  %3376 = vmatpush.bf16.msra.mxu0 %v6701_v37  ;;  %v9468_v32 = vld [vmem:[#allocation6 + $0x294] sm:$0xf]  ;;  %v6605_v35 = vor.u32 %v9404_v25, %v6602_v26 }
 0x181   : > { %v7944_v41 = vld [vmem:[#allocation6 + $0xb10] sm:$0xf]  ;;  %3389 = vmatpush.bf16.msrb.mxu2 %v6989_v30  ;;  %v7689_v54 = vor.u32 %v9680_v40, %v7688_v39  ;;  %3348 = vmatpush.bf16.msra.mxu1 %v7977_v36  ;;  %v6893_v30 = vor.u32 %v9476_v13, %v6890_v16  ;;  %v6861_v48 = vor.u32 %v9468_v32, %v6858_v33  ;;  %v7274_v4 = vld [vmem:[#allocation6 + $0x5f0] sm:$0xf0] }
 0x182   : > { %v9744_v47 = vld [vmem:[#allocation6 + $0xb2c] sm:$0xf0]  ;;  %v9636_v5 = vld [vmem:[#allocation6 + $0x7d4] sm:$0xf] }
 0x183   : > { %v7945_v8 = vor.u32 %v9744_v47, %v7944_v41  ;;  %v7656_v63 = vld [vmem:[#allocation6 + $0x8d0] sm:$0xf]  ;;  %3335 = vmatpush.bf16.msra.mxu3 %v7689_v54  ;;  %v9396_v41 = vld [vmem:[#allocation6 + $0x54] sm:$0xf]  ;;  %v10902_v47 = vpop.f32.mrf.mxu3 }
 0x184   : > { %v9672_v0 = vld [vmem:[#allocation6 + $0x8ec] sm:$0xf0]  ;;  %3377 = vmatpush.bf16.msra.mxu0 %v6669_v60  ;;  %v6573_v58 = vor.u32 %v9396_v41, %v6570_v45  ;;  %v7530_v7 = vld [vmem:[#allocation6 + $0x7f0] sm:$0xf0] }
 0x185   : > { %v7912_v2 = vld [vmem:[#allocation6 + $0xad0] sm:$0xf]  ;;  %3390 = vmatpush.bf16.msrb.mxu2 %v6957_v53  ;;  %v7657_v12 = vor.u32 %v9672_v0, %v7656_v63  ;;  %3349 = vmatpush.bf16.msra.mxu1 %v7945_v8  ;;  %v6826_v53 = vld [vmem:[#allocation6 + $0x270] sm:$0xf0] }
 0x186   : > { %v9736_v3 = vld [vmem:[#allocation6 + $0xaec] sm:$0xf0]  ;;  %8090 = vmatmul.msk.bf16.vlgmr.msra.gmra.mxu2 %vm2880_vm0, %v10822_v51  ;;  %v9388_v0 = vld [vmem:[#allocation6 + $0x14] sm:$0xf]  ;;  %v6829_v10 = vor.u32 %v9460_v52, %v6826_v53 }
 0x187   : > { %v7913_v18 = vor.u32 %v9736_v3, %v7912_v2  ;;  %v7624_v20 = vld [vmem:[#allocation6 + $0x890] sm:$0xf]  ;;  %3336 = vmatpush.bf16.msra.mxu3 %v7657_v12  ;;  %v6538_v2 = vld [vmem:[#allocation6 + $0x30] sm:$0xf0] }
 0x188   : > { %v9664_v21 = vld [vmem:[#allocation6 + $0x8ac] sm:$0xf0]  ;;  %3378 = vmatpush.bf16.msra.mxu0 %v6637_v19  ;;  %v9572_v3 = vld [vmem:[#allocation6 + $0x5d4] sm:$0xf] }
 0x189   : > { %v7880_v22 = vld [vmem:[#allocation6 + $0xa90] sm:$0xf]  ;;  %3391 = vmatpush.bf16.msrb.mxu2 %v6925_v11  ;;  %v7625_v31 = vor.u32 %v9664_v21, %v7624_v20  ;;  %3350 = vmatpush.bf16.msra.mxu1 %v7913_v18  ;;  %v9700_v12 = vld [vmem:[#allocation6 + $0x9d4] sm:$0xf]  ;;  %v6541_v18 = vor.u32 %v9388_v0, %v6538_v2  ;;  %v7277_v21 = vor.u32 %v9572_v3, %v7274_v4 }
 0x18a   : > { %v9728_v24 = vld [vmem:[#allocation6 + $0xaac] sm:$0xf0]  ;;  %v7786_v13 = vld [vmem:[#allocation6 + $0x9f0] sm:$0xf0] }
 0x18b   : > { %v7881_v34 = vor.u32 %v9728_v24, %v7880_v22  ;;  %v7592_v36 = vld [vmem:[#allocation6 + $0x850] sm:$0xf]  ;;  %3337 = vmatpush.bf16.msra.mxu3 %v7625_v31  ;;  %v9452_v19 = vld [vmem:[#allocation6 + $0x214] sm:$0xf]  ;;  %v7533_v22 = vor.u32 %v9636_v5, %v7530_v7  ;;  %v7789_v26 = vor.u32 %v9700_v12, %v7786_v13 }
 0x18c   : > { %v9656_v37 = vld [vmem:[#allocation6 + $0x86c] sm:$0xf0]  ;;  %3379 = vmatpush.bf16.msra.mxu0 %v6605_v35  ;;  %v6794_v20 = vld [vmem:[#allocation6 + $0x230] sm:$0xf0] }
 0x18d   : > { %v7848_v39 = vld [vmem:[#allocation6 + $0xa50] sm:$0xf]  ;;  %3392 = vmatpush.bf16.msrb.mxu2 %v6893_v30  ;;  %v7593_v50 = vor.u32 %v9656_v37, %v7592_v36  ;;  %3351 = vmatpush.bf16.msra.mxu1 %v7881_v34  ;;  %v9764_v23 = vld [vmem:[#allocation6 + $0xbd4] sm:$0xf]  ;;  %v3075_v30 = vpop.f32.mrf.mxu3  ;;  %v6797_v35 = vor.u32 %v9452_v19, %v6794_v20 }
 0x18e   : > { %v9720_v40 = vld [vmem:[#allocation6 + $0xa6c] sm:$0xf0]  ;;  %v8042_v24 = vld [vmem:[#allocation6 + $0xbf0] sm:$0xf0]  ;;  %v10905_v34 = vadd.f32 %v3075_v30, %v10898_v27 }
 0x18f   : > { %v7560_v54 = vld [vmem:[#allocation6 + $0x810] sm:$0xf]  ;;  %v7849_v59 = vor.u32 %v9720_v40, %v7848_v39  ;;  %3338 = vmatpush.bf16.msra.mxu3 %v7593_v50  ;;  %v9564_v25 = vld [vmem:[#allocation6 + $0x594] sm:$0xf]  ;;  %v8045_v39 = vor.u32 %v9764_v23, %v8042_v24 }
 0x190   : > { %v9648_v8 = vld [vmem:[#allocation6 + $0x82c] sm:$0xf0]  ;;  %3380 = vmatpush.bf16.msra.mxu0 %v6573_v58  ;;  %v7242_v31 = vld [vmem:[#allocation6 + $0x5b0] sm:$0xf0]  ;;  %11282 = vst [vmem:[#allocation25_spill] sm:$0xff] %v10905_v34 }
 0x191   : > { %v7816_v60 = vld [vmem:[#allocation6 + $0xa10] sm:$0xf]  ;;  %3393 = vmatpush.bf16.msrb.mxu2 %v6861_v48  ;;  %v7561_v11 = vor.u32 %v9648_v8, %v7560_v54  ;;  %3352 = vmatpush.bf16.msra.mxu1 %v7849_v59  ;;  %v9628_v32 = vld [vmem:[#allocation6 + $0x794] sm:$0xf]  ;;  %v7245_v40 = vor.u32 %v9564_v25, %v7242_v31  ;;  %v7090_v34 = vld [vmem:[#allocation6 + $0x478] sm:$0xf0] }
 0x192   : > { %v9712_v63 = vld [vmem:[#allocation6 + $0xa2c] sm:$0xf0]  ;;  %v7498_v33 = vld [vmem:[#allocation6 + $0x7b0] sm:$0xf0] }
 0x193   : > { %v7817_v16 = vor.u32 %v9712_v63, %v7816_v60  ;;  %3339 = vmatpush.bf16.msra.mxu3 %v7561_v11  ;;  %v9692_v36 = vld [vmem:[#allocation6 + $0x994] sm:$0xf]  ;;  %v7501_v41 = vor.u32 %v9628_v32, %v7498_v33 }
 0x194   : > { %v7754_v37 = vld [vmem:[#allocation6 + $0x9b0] sm:$0xf0]  ;;  %3381 = vmatpush.bf16.msra.mxu0 %v6541_v18 }
 0x195   : > { %3394 = vmatpush.bf16.msrb.mxu2 %v6829_v10  ;;  %3353 = vmatpush.bf16.msra.mxu1 %v7817_v16  ;;  %v9756_v45 = vld [vmem:[#allocation6 + $0xb94] sm:$0xf]  ;;  %v7757_v52 = vor.u32 %v9692_v36, %v7754_v37 }
 0x196   : > { %v8010_v48 = vld [vmem:[#allocation6 + $0xbb0] sm:$0xf0]  ;;  %3340 = vmatmul.bf16.vlgmr.msra.gmra.mxu3 %v10830_v38 }
 0x197   : > { %3402 = vmatpush.bf16.msrb.mxu3 %v7277_v21  ;;  %v9556_v50 = vld [vmem:[#allocation6 + $0x554] sm:$0xf]  ;;  %v8013_v8 = vor.u32 %v9756_v45, %v8010_v48  ;;  %3382 = vmatmul.bf16.vlgmr.msra.gmra.mxu0 %v10808_v56 }
 0x198   : > { %3430 = vmatpush.bf16.msrb.mxu0 %v7789_v26  ;;  %v7210_v53 = vld [vmem:[#allocation6 + $0x570] sm:$0xf0]  ;;  %3354 = vmatmul.bf16.vlgmr.msra.gmra.mxu1 %v10832_v43 }
 0x199   : > { %3416 = vmatpush.bf16.msrb.mxu1 %v7533_v22  ;;  %v9620_v27 = vld [vmem:[#allocation6 + $0x754] sm:$0xf]  ;;  %3395 = vmatpush.bf16.msrb.mxu2 %v6797_v35  ;;  %v7213_v60 = vor.u32 %v9556_v50, %v7210_v53 }
 0x19a   : > { %v7466_v54 = vld [vmem:[#allocation6 + $0x770] sm:$0xf0] }
 0x19b   : > { %v9684_v59 = vld [vmem:[#allocation6 + $0x954] sm:$0xf]  ;;  %3403 = vmatpush.bf16.msrb.mxu3 %v7245_v40  ;;  %v7469_v63 = vor.u32 %v9620_v27, %v7466_v54 }
 0x19c   : > { %v7722_v58 = vld [vmem:[#allocation6 + $0x970] sm:$0xf0]  ;;  %3431 = vmatpush.bf16.msrb.mxu0 %v7757_v52  ;;  %3396 = vmatmul.bf16.vlgmr.msrb.gmra.mxu2 %v10816_v9 }
 0x19d   : > { %3444 = vmatpush.bf16.msra.mxu2 %v8045_v39  ;;  %3417 = vmatpush.bf16.msrb.mxu1 %v7501_v41  ;;  %v9748_v0 = vld [vmem:[#allocation6 + $0xb54] sm:$0xf]  ;;  %v7725_v4 = vor.u32 %v9684_v59, %v7722_v58 }
 0x19e   : > { %v7978_v2 = vld [vmem:[#allocation6 + $0xb70] sm:$0xf0] }
 0x19f   : > { %v9548_v3 = vld [vmem:[#allocation6 + $0x514] sm:$0xf]  ;;  %v7981_v13 = vor.u32 %v9748_v0, %v7978_v2  ;;  %3404 = vmatpush.bf16.msrb.mxu3 %v7213_v60 }
 0x1a0   : > { %v7178_v5 = vld [vmem:[#allocation6 + $0x530] sm:$0xf0]  ;;  %3432 = vmatpush.bf16.msrb.mxu0 %v7725_v4 }
 0x1a1   : > { %v9612_v7 = vld [vmem:[#allocation6 + $0x714] sm:$0xf]  ;;  %3445 = vmatpush.bf16.msra.mxu2 %v8013_v8  ;;  %3418 = vmatpush.bf16.msrb.mxu1 %v7469_v63  ;;  %v7181_v16 = vor.u32 %v9548_v3, %v7178_v5 }
 0x1a2   : > { %v7434_v10 = vld [vmem:[#allocation6 + $0x730] sm:$0xf0] }
 0x1a3   : > { %v9676_v11 = vld [vmem:[#allocation6 + $0x914] sm:$0xf]  ;;  %v7437_v18 = vor.u32 %v9612_v7, %v7434_v10  ;;  %3405 = vmatpush.bf16.msrb.mxu3 %v7181_v16 }
 0x1a4   : > { %v7690_v12 = vld [vmem:[#allocation6 + $0x930] sm:$0xf0] }
 0x1a5   : > { %v9740_v19 = vld [vmem:[#allocation6 + $0xb14] sm:$0xf]  ;;  %v7693_v22 = vor.u32 %v9676_v11, %v7690_v12  ;;  %3446 = vmatpush.bf16.msra.mxu2 %v7981_v13  ;;  %3419 = vmatpush.bf16.msrb.mxu1 %v7437_v18 }
 0x1a6   : > { %v7946_v20 = vld [vmem:[#allocation6 + $0xb30] sm:$0xf0] }
 0x1a7   : > { %v9540_v21 = vld [vmem:[#allocation6 + $0x4d4] sm:$0xf]  ;;  %v7949_v31 = vor.u32 %v9740_v19, %v7946_v20  ;;  %3433 = vmatpush.bf16.msrb.mxu0 %v7693_v22  ;;  %v6768_v22 = vld [vmem:[#allocation6 + $0x1d8] sm:$0xf] }
 0x1a8   : > { %v7146_v23 = vld [vmem:[#allocation6 + $0x4f0] sm:$0xf0] }
 0x1a9   : > { %v9604_v24 = vld [vmem:[#allocation6 + $0x6d4] sm:$0xf]  ;;  %v7149_v32 = vor.u32 %v9540_v21, %v7146_v23  ;;  %3447 = vmatpush.bf16.msra.mxu2 %v7949_v31  ;;  %v9449_v23 = vld [vmem:[#allocation6 + $0x1f4] sm:$0xf0] }
 0x1aa   : > { %v7402_v25 = vld [vmem:[#allocation6 + $0x6f0] sm:$0xf0] }
 0x1ab   : > { %v9668_v26 = vld [vmem:[#allocation6 + $0x8d4] sm:$0xf]  ;;  %v7405_v33 = vor.u32 %v9604_v24, %v7402_v25  ;;  %3406 = vmatpush.bf16.msrb.mxu3 %v7149_v32  ;;  %v7280_v24 = vld [vmem:[#allocation6 + $0x5d8] sm:$0xf] }
 0x1ac   : > { %v7658_v30 = vld [vmem:[#allocation6 + $0x8f0] sm:$0xf0] }
 0x1ad   : > { %v9732_v35 = vld [vmem:[#allocation6 + $0xad4] sm:$0xf]  ;;  %v7661_v39 = vor.u32 %v9668_v26, %v7658_v30  ;;  %3420 = vmatpush.bf16.msrb.mxu1 %v7405_v33  ;;  %v9577_v26 = vld [vmem:[#allocation6 + $0x5f4] sm:$0xf0] }
 0x1ae   : > { %v7914_v36 = vld [vmem:[#allocation6 + $0xaf0] sm:$0xf0] }
 0x1af   : > { %v9532_v37 = vld [vmem:[#allocation6 + $0x494] sm:$0xf]  ;;  %v7917_v52 = vor.u32 %v9732_v35, %v7914_v36  ;;  %3434 = vmatpush.bf16.msrb.mxu0 %v7661_v39 }
 0x1b0   : > { %v7114_v40 = vld [vmem:[#allocation6 + $0x4b0] sm:$0xf0] }
 0x1b1   : > { %v9596_v41 = vld [vmem:[#allocation6 + $0x694] sm:$0xf]  ;;  %v7117_v53 = vor.u32 %v9532_v37, %v7114_v40  ;;  %3448 = vmatpush.bf16.msra.mxu2 %v7917_v52  ;;  %v7024_v37 = vld [vmem:[#allocation6 + $0x3d8] sm:$0xf]  ;;  %v6769_v40 = vor.u32 %v9449_v23, %v6768_v22 }
 0x1b2   : > { %v7370_v45 = vld [vmem:[#allocation6 + $0x6b0] sm:$0xf0]  ;;  %v9625_v22 = vld [vmem:[#allocation6 + $0x774] sm:$0xf0] }
 0x1b3   : > { %v9660_v48 = vld [vmem:[#allocation6 + $0x894] sm:$0xf]  ;;  %v7373_v27 = vor.u32 %v9596_v41, %v7370_v45  ;;  %3407 = vmatpush.bf16.msrb.mxu3 %v7117_v53  ;;  %v9513_v41 = vld [vmem:[#allocation6 + $0x3f4] sm:$0xf0] }
 0x1b4   : > { %v7626_v50 = vld [vmem:[#allocation6 + $0x8b0] sm:$0xf0]  ;;  %v7536_v45 = vld [vmem:[#allocation6 + $0x7d8] sm:$0xf] }
 0x1b5   : > { %v9724_v54 = vld [vmem:[#allocation6 + $0xa94] sm:$0xf]  ;;  %v7629_v8 = vor.u32 %v9660_v48, %v7626_v50  ;;  %3421 = vmatpush.bf16.msrb.mxu1 %v7373_v27  ;;  %v9641_v48 = vld [vmem:[#allocation6 + $0x7f4] sm:$0xf0]  ;;  %v7281_v50 = vor.u32 %v9577_v26, %v7280_v24 }
 0x1b6   : > { %v7882_v59 = vld [vmem:[#allocation6 + $0xab0] sm:$0xf0]  ;;  %v6736_v53 = vld [vmem:[#allocation6 + $0x198] sm:$0xf] }
 0x1b7   : > { %v9524_v58 = vld [vmem:[#allocation6 + $0x454] sm:$0xf]  ;;  %v7885_v4 = vor.u32 %v9724_v54, %v7882_v59  ;;  %3435 = vmatpush.bf16.msrb.mxu0 %v7629_v8  ;;  %v9441_v27 = vld [vmem:[#allocation6 + $0x1b4] sm:$0xf0]  ;;  %v7025_v8 = vor.u32 %v9513_v41, %v7024_v37 }
 0x1b8   : > { %v7082_v60 = vld [vmem:[#allocation6 + $0x470] sm:$0xf0]  ;;  %v7248_v59 = vld [vmem:[#allocation6 + $0x598] sm:$0xf] }
 0x1b9   : > { %v9588_v63 = vld [vmem:[#allocation6 + $0x654] sm:$0xf]  ;;  %v7085_v10 = vor.u32 %v9524_v58, %v7082_v60  ;;  %3449 = vmatpush.bf16.msra.mxu2 %v7885_v4  ;;  %v9569_v58 = vld [vmem:[#allocation6 + $0x5b4] sm:$0xf0]  ;;  %v7537_v60 = vor.u32 %v9641_v48, %v7536_v45 }
 0x1ba   : > { %v7338_v0 = vld [vmem:[#allocation6 + $0x670] sm:$0xf0]  ;;  %v9633_v4 = vld [vmem:[#allocation6 + $0x7b4] sm:$0xf0] }
 0x1bb   : > { %v9652_v2 = vld [vmem:[#allocation6 + $0x854] sm:$0xf]  ;;  %v7341_v11 = vor.u32 %v9588_v63, %v7338_v0  ;;  %3408 = vmatpush.bf16.msrb.mxu3 %v7085_v10  ;;  %v6992_v63 = vld [vmem:[#allocation6 + $0x398] sm:$0xf]  ;;  %v6737_v0 = vor.u32 %v9441_v27, %v6736_v53 }
 0x1bc   : > { %v7594_v3 = vld [vmem:[#allocation6 + $0x870] sm:$0xf0]  ;;  %v9433_v10 = vld [vmem:[#allocation6 + $0x174] sm:$0xf0] }
 0x1bd   : > { %v9716_v5 = vld [vmem:[#allocation6 + $0xa54] sm:$0xf]  ;;  %v7597_v18 = vor.u32 %v9652_v2, %v7594_v3  ;;  %3422 = vmatpush.bf16.msrb.mxu1 %v7341_v11  ;;  %v9505_v2 = vld [vmem:[#allocation6 + $0x3b4] sm:$0xf0] }
 0x1be   : > { %v7850_v7 = vld [vmem:[#allocation6 + $0xa70] sm:$0xf0]  ;;  %v7504_v3 = vld [vmem:[#allocation6 + $0x798] sm:$0xf] }
 0x1bf   : > { %v9516_v12 = vld [vmem:[#allocation6 + $0x414] sm:$0xf]  ;;  %v7853_v25 = vor.u32 %v9716_v5, %v7850_v7  ;;  %3436 = vmatpush.bf16.msrb.mxu0 %v7597_v18  ;;  %v7249_v5 = vor.u32 %v9569_v58, %v7248_v59  ;;  %v6704_v7 = vld [vmem:[#allocation6 + $0x158] sm:$0xf] }
 0x1c0   : > { %v7050_v13 = vld [vmem:[#allocation6 + $0x430] sm:$0xf0]  ;;  %v7216_v11 = vld [vmem:[#allocation6 + $0x558] sm:$0xf] }
 0x1c1   : > { %v9580_v16 = vld [vmem:[#allocation6 + $0x614] sm:$0xf]  ;;  %v7053_v32 = vor.u32 %v9516_v12, %v7050_v13  ;;  %3450 = vmatpush.bf16.msra.mxu2 %v7853_v25  ;;  %v9561_v12 = vld [vmem:[#allocation6 + $0x574] sm:$0xf0]  ;;  %v6993_v13 = vor.u32 %v9505_v2, %v6992_v63 }
 0x1c2   : > { %v7306_v19 = vld [vmem:[#allocation6 + $0x630] sm:$0xf0]  ;;  %v6960_v18 = vld [vmem:[#allocation6 + $0x358] sm:$0xf]  ;;  %v7217_v23 = vor.u32 %v9561_v12, %v7216_v11 }
 0x1c3   : > { %v9644_v20 = vld [vmem:[#allocation6 + $0x814] sm:$0xf]  ;;  %v7309_v33 = vor.u32 %v9580_v16, %v7306_v19  ;;  %3409 = vmatpush.bf16.msrb.mxu3 %v7053_v32  ;;  %v7505_v16 = vor.u32 %v9633_v4, %v7504_v3  ;;  %v6705_v19 = vor.u32 %v9433_v10, %v6704_v7  ;;  %v6672_v24 = vld [vmem:[#allocation6 + $0x118] sm:$0xf] }
 0x1c4   : > { %v7562_v21 = vld [vmem:[#allocation6 + $0x830] sm:$0xf0]  ;;  %v9425_v25 = vld [vmem:[#allocation6 + $0x134] sm:$0xf0] }
 0x1c5   : > { %v9772_v30 = vld [vmem:[#allocation6 + $0xc14] sm:$0xf]  ;;  %v7565_v39 = vor.u32 %v9644_v20, %v7562_v21  ;;  %3423 = vmatpush.bf16.msrb.mxu1 %v7309_v33  ;;  %v9497_v20 = vld [vmem:[#allocation6 + $0x374] sm:$0xf0] }
 0x1c6   : > { %v8074_v31 = vld [vmem:[#allocation6 + $0xc30] sm:$0xf0]  ;;  %3410 = vmatmul.bf16.vlgmr.msrb.gmra.mxu3 %v10806_v55  ;;  %v7472_v21 = vld [vmem:[#allocation6 + $0x758] sm:$0xf] }
 0x1c7   : > { %v9708_v35 = vld [vmem:[#allocation6 + $0xa14] sm:$0xf]  ;;  %v8077_v52 = vor.u32 %v9772_v30, %v8074_v31  ;;  %3437 = vmatpush.bf16.msrb.mxu0 %v7565_v39  ;;  %v7184_v26 = vld [vmem:[#allocation6 + $0x518] sm:$0xf]  ;;  %v6961_v31 = vor.u32 %v9497_v20, %v6960_v18  ;;  %v7473_v32 = vor.u32 %v9625_v22, %v7472_v21 }
 0x1c8   : > { %v7818_v36 = vld [vmem:[#allocation6 + $0xa30] sm:$0xf0]  ;;  %3424 = vmatmul.bf16.vlgmr.msrb.gmra.mxu1 %v10810_v61  ;;  %v9553_v30 = vld [vmem:[#allocation6 + $0x534] sm:$0xf0] }
 0x1c9   : > { %v7821_v54 = vor.u32 %v9708_v35, %v7818_v36  ;;  %3472 = vmatpush.bf16.msra.mxu1 %v6769_v40  ;;  %3465 = vmatpush.bf16.msra.mxu3 %v8077_v52  ;;  %v6928_v33 = vld [vmem:[#allocation6 + $0x318] sm:$0xf]  ;;  %v6673_v35 = vor.u32 %v9425_v25, %v6672_v24  ;;  %v7185_v40 = vor.u32 %v9553_v30, %v7184_v26 }
 0x1ca   : > { %3438 = vmatmul.bf16.vlgmr.msrb.gmra.mxu0 %v10830_v38  ;;  %v9489_v36 = vld [vmem:[#allocation6 + $0x334] sm:$0xf0] }
 0x1cb   : > { %3500 = vmatpush.bf16.msra.mxu0 %v7281_v50  ;;  %3451 = vmatpush.bf16.msra.mxu2 %v7821_v54  ;;  %v7440_v37 = vld [vmem:[#allocation6 + $0x718] sm:$0xf]  ;;  %v6929_v52 = vor.u32 %v9489_v36, %v6928_v33 }
 0x1cc   : > { %v9617_v39 = vld [vmem:[#allocation6 + $0x734] sm:$0xf0] }
 0x1cd   : > { %3486 = vmatpush.bf16.msrb.mxu3 %v7025_v8  ;;  %3473 = vmatpush.bf16.msra.mxu1 %v6737_v0  ;;  %v6640_v41 = vld [vmem:[#allocation6 + $0xd8] sm:$0xf]  ;;  %v7441_v53 = vor.u32 %v9617_v39, %v7440_v37 }
 0x1ce   : > { %3452 = vmatmul.bf16.vlgmr.msra.gmra.mxu2 %v10832_v43  ;;  %v9417_v45 = vld [vmem:[#allocation6 + $0xf4] sm:$0xf0] }
 0x1cf   : > { %3514 = vmatpush.bf16.msrb.mxu2 %v7537_v60  ;;  %3501 = vmatpush.bf16.msra.mxu0 %v7249_v5  ;;  %v7152_v48 = vld [vmem:[#allocation6 + $0x4d8] sm:$0xf]  ;;  %v6641_v54 = vor.u32 %v9417_v45, %v6640_v41 }
 0x1d0   : > { %v9545_v50 = vld [vmem:[#allocation6 + $0x4f4] sm:$0xf0] }
 0x1d1   : > { %3487 = vmatpush.bf16.msrb.mxu3 %v6993_v13  ;;  %3474 = vmatpush.bf16.msra.mxu1 %v6705_v19  ;;  %v6896_v27 = vld [vmem:[#allocation6 + $0x2d8] sm:$0xf]  ;;  %v7153_v60 = vor.u32 %v9545_v50, %v7152_v48  ;;  %v10921_v48 = vpop.f32.mrf.mxu2 }
 0x1d2   : > { %v9481_v59 = vld [vmem:[#allocation6 + $0x2f4] sm:$0xf0] }
 0x1d3   : > { %3515 = vmatpush.bf16.msrb.mxu2 %v7505_v16  ;;  %3502 = vmatpush.bf16.msra.mxu0 %v7217_v23  ;;  %v7408_v58 = vld [vmem:[#allocation6 + $0x6d8] sm:$0xf]  ;;  %v6897_v4 = vor.u32 %v9481_v59, %v6896_v27  ;;  %v10915_v16 = vpop.f32.mrf.mxu1  ;;  %v10919_v23 = vpop.f32.mrf.mxu0 }
 0x1d4   : > { %v9609_v8 = vld [vmem:[#allocation6 + $0x6f4] sm:$0xf0] }
 0x1d5   : > { %3488 = vmatpush.bf16.msrb.mxu3 %v6961_v31  ;;  %3475 = vmatpush.bf16.msra.mxu1 %v6673_v35  ;;  %v6608_v63 = vld [vmem:[#allocation6 + $0x98] sm:$0xf]  ;;  %v7409_v5 = vor.u32 %v9609_v8, %v7408_v58 }
 0x1d6   : > { %v9409_v0 = vld [vmem:[#allocation6 + $0xb4] sm:$0xf0]  ;;  %8091 = vmatmul.msk.bf16.vlgmr.msra.gmra.mxu3 %vm2880_vm0, %v10822_v51 }
 0x1d7   : > { %3516 = vmatpush.bf16.msrb.mxu2 %v7473_v32  ;;  %3503 = vmatpush.bf16.msra.mxu0 %v7185_v40  ;;  %v7120_v2 = vld [vmem:[#allocation6 + $0x498] sm:$0xf]  ;;  %v6609_v10 = vor.u32 %v9409_v0, %v6608_v63 }
 0x1d8   : > { %v9537_v3 = vld [vmem:[#allocation6 + $0x4b4] sm:$0xf0] }
 0x1d9   : > { %3489 = vmatpush.bf16.msrb.mxu3 %v6929_v52  ;;  %v6864_v7 = vld [vmem:[#allocation6 + $0x298] sm:$0xf]  ;;  %3476 = vmatpush.bf16.msra.mxu1 %v6641_v54  ;;  %v7121_v18 = vor.u32 %v9537_v3, %v7120_v2 }
 0x1da   : > { %v9473_v11 = vld [vmem:[#allocation6 + $0x2b4] sm:$0xf0] }
 0x1db   : > { %3517 = vmatpush.bf16.msrb.mxu2 %v7441_v53  ;;  %v7376_v12 = vld [vmem:[#allocation6 + $0x698] sm:$0xf]  ;;  %3504 = vmatpush.bf16.msra.mxu0 %v7153_v60  ;;  %v6865_v24 = vor.u32 %v9473_v11, %v6864_v7  ;;  %v10923_v63 = vpop.f32.mrf.mxu1  ;;  %v9509_v11 = vld [vmem:[#allocation6 + $0x3dc] sm:$0xf] }
 0x1dc   : > { %v9601_v13 = vld [vmem:[#allocation6 + $0x6b4] sm:$0xf0] }
 0x1dd   : > { %v6576_v19 = vld [vmem:[#allocation6 + $0x58] sm:$0xf]  ;;  %3490 = vmatpush.bf16.msrb.mxu3 %v6897_v4  ;;  %v7377_v25 = vor.u32 %v9601_v13, %v7376_v12  ;;  %3477 = vmatpush.bf16.msra.mxu1 %v6609_v10  ;;  %v6770_v10 = vld [vmem:[#allocation6 + $0x1f8] sm:$0xf0]  ;;  %v10925_v13 = vpop.f32.mrf.mxu0 }
 0x1de   : > { %v9401_v20 = vld [vmem:[#allocation6 + $0x74] sm:$0xf0]  ;;  %v7026_v12 = vld [vmem:[#allocation6 + $0x3f8] sm:$0xf0] }
 0x1df   : > { %v7088_v21 = vld [vmem:[#allocation6 + $0x458] sm:$0xf]  ;;  %3518 = vmatpush.bf16.msrb.mxu2 %v7409_v5  ;;  %v6577_v30 = vor.u32 %v9401_v20, %v6576_v19  ;;  %3505 = vmatpush.bf16.msra.mxu0 %v7121_v18  ;;  %v9445_v5 = vld [vmem:[#allocation6 + $0x1dc] sm:$0xf] }
 0x1e0   : > { %v9529_v22 = vld [vmem:[#allocation6 + $0x474] sm:$0xf0] }
 0x1e1   : > { %v6832_v26 = vld [vmem:[#allocation6 + $0x258] sm:$0xf]  ;;  %v7089_v35 = vor.u32 %v9529_v22, %v7088_v21  ;;  %3491 = vmatpush.bf16.msrb.mxu3 %v6865_v24  ;;  %3478 = vmatpush.bf16.msra.mxu1 %v6577_v30  ;;  %v6773_v24 = vor.u32 %v9445_v5, %v6770_v10 }
 0x1e2   : > { %v9465_v31 = vld [vmem:[#allocation6 + $0x274] sm:$0xf0] }
 0x1e3   : > { %v7344_v32 = vld [vmem:[#allocation6 + $0x658] sm:$0xf]  ;;  %3519 = vmatpush.bf16.msrb.mxu2 %v7377_v25  ;;  %v6833_v50 = vor.u32 %v9465_v31, %v6832_v26  ;;  %3506 = vmatpush.bf16.msra.mxu0 %v7089_v35  ;;  %v7029_v25 = vor.u32 %v9509_v11, %v7026_v12  ;;  %v9437_v31 = vld [vmem:[#allocation6 + $0x19c] sm:$0xf] }
 0x1e4   : > { %v9593_v33 = vld [vmem:[#allocation6 + $0x674] sm:$0xf0]  ;;  %v9501_v35 = vld [vmem:[#allocation6 + $0x39c] sm:$0xf] }
 0x1e5   : > { %v6544_v36 = vld [vmem:[#allocation6 + $0x18] sm:$0xf]  ;;  %v7345_v52 = vor.u32 %v9593_v33, %v7344_v32  ;;  %3492 = vmatpush.bf16.msrb.mxu3 %v6833_v50  ;;  %v6738_v33 = vld [vmem:[#allocation6 + $0x1b8] sm:$0xf0]  ;;  %v10937_v5 = vpop.f32.mrf.mxu0 }
 0x1e6   : > { %v9393_v37 = vld [vmem:[#allocation6 + $0x34] sm:$0xf0]  ;;  %v6741_v50 = vor.u32 %v9437_v31, %v6738_v33 }
 0x1e7   : > { %v7056_v39 = vld [vmem:[#allocation6 + $0x418] sm:$0xf]  ;;  %v6545_v59 = vor.u32 %v9393_v37, %v6544_v36  ;;  %3520 = vmatpush.bf16.msrb.mxu2 %v7345_v52  ;;  %v6994_v36 = vld [vmem:[#allocation6 + $0x3b8] sm:$0xf0]  ;;  %v10927_v37 = vpop.f32.mrf.mxu2 }
 0x1e8   : > { %v9521_v40 = vld [vmem:[#allocation6 + $0x434] sm:$0xf0]  ;;  %11283 = vst [vmem:[#allocation26_spill] sm:$0xff] %v10927_v37  ;;  %v6997_v52 = vor.u32 %v9501_v35, %v6994_v36  ;;  %v9413_v36 = vld [vmem:[#allocation6 + $0xdc] sm:$0xf] }
 0x1e9   : > { %v7792_v41 = vld [vmem:[#allocation6 + $0x9d8] sm:$0xf]  ;;  %v7057_v0 = vor.u32 %v9521_v40, %v7056_v39  ;;  %3479 = vmatpush.bf16.msra.mxu1 %v6545_v59 }
 0x1ea   : > { %v9705_v45 = vld [vmem:[#allocation6 + $0x9f4] sm:$0xf0] }
 0x1eb   : > { %v6800_v53 = vld [vmem:[#allocation6 + $0x218] sm:$0xf]  ;;  %v7793_v2 = vor.u32 %v9705_v45, %v7792_v41  ;;  %3507 = vmatpush.bf16.msra.mxu0 %v7057_v0  ;;  %v10930_v45 = vpop.f32.mrf.mxu3  ;;  %v10933_v0 = vpop.f32.mrf.mxu1 }
 0x1ec   : > { %v8080_v27 = vld [vmem:[#allocation6 + $0xc18] sm:$0xf]  ;;  %11284 = vst [vmem:[#allocation27_spill] sm:$0xff] %v10930_v45  ;;  %3480 = vmatmul.bf16.vlgmr.msra.gmra.mxu1 %v10808_v56  ;;  %v8336_v45 = vld [vmem:[#allocation9 + $0x1e0] sm:$0xf] }
 0x1ed   : > { %v9777_v54 = vld [vmem:[#allocation6 + $0xc34] sm:$0xf0]  ;;  %3528 = vmatpush.bf16.msrb.mxu1 %v7793_v2 }
 0x1ee   : > { %v9457_v58 = vld [vmem:[#allocation6 + $0x234] sm:$0xf0]  ;;  %v8081_v7 = vor.u32 %v9777_v54, %v8080_v27  ;;  %3508 = vmatmul.bf16.vlgmr.msra.gmra.mxu0 %v10806_v55  ;;  %v9429_v54 = vld [vmem:[#allocation6 + $0x15c] sm:$0xf] }
 0x1ef   : > { %v7312_v8 = vld [vmem:[#allocation6 + $0x618] sm:$0xf]  ;;  %v6801_v18 = vor.u32 %v9457_v58, %v6800_v53  ;;  %v6706_v58 = vld [vmem:[#allocation6 + $0x178] sm:$0xf0] }
 0x1f0   : > { %v9585_v60 = vld [vmem:[#allocation6 + $0x634] sm:$0xf0]  ;;  %3563 = vmatpush.bf16.msrb.mxu0 %v8081_v7  ;;  %v6709_v7 = vor.u32 %v9429_v54, %v6706_v58  ;;  %v10945_v58 = vpop.f32.mrf.mxu0 }
 0x1f1   : > { %v8048_v3 = vld [vmem:[#allocation6 + $0xbd8] sm:$0xf]  ;;  %v7313_v19 = vor.u32 %v9585_v60, %v7312_v8  ;;  %3493 = vmatpush.bf16.msrb.mxu3 %v6801_v18  ;;  %v9493_v8 = vld [vmem:[#allocation6 + $0x35c] sm:$0xf]  ;;  %11286 = vst [vmem:[#allocation29_spill] sm:$0xff] %v10945_v58 }
 0x1f2   : > { %v9769_v4 = vld [vmem:[#allocation6 + $0xbf4] sm:$0xf0]  ;;  %v6962_v60 = vld [vmem:[#allocation6 + $0x378] sm:$0xf0] }
 0x1f3   : > { %v7760_v20 = vld [vmem:[#allocation6 + $0x998] sm:$0xf]  ;;  %v8049_v22 = vor.u32 %v9769_v4, %v8048_v3  ;;  %3521 = vmatpush.bf16.msrb.mxu2 %v7313_v19  ;;  %v6965_v10 = vor.u32 %v9493_v8, %v6962_v60  ;;  %v9421_v18 = vld [vmem:[#allocation6 + $0x11c] sm:$0xf] }
 0x1f4   : > { %v9697_v21 = vld [vmem:[#allocation6 + $0x9b4] sm:$0xf0]  ;;  %3584 = vmatpush.bf16.msra.mxu0 %v7029_v25  ;;  %3494 = vmatmul.bf16.vlgmr.msrb.gmra.mxu3 %v10816_v9  ;;  %v7506_v58 = vld [vmem:[#allocation6 + $0x7b8] sm:$0xf0] }
 0x1f5   : > { %v8016_v26 = vld [vmem:[#allocation6 + $0xb98] sm:$0xf]  ;;  %v7761_v32 = vor.u32 %v9697_v21, %v7760_v20  ;;  %3542 = vmatpush.bf16.msra.mxu3 %v8049_v22  ;;  %v6674_v20 = vld [vmem:[#allocation6 + $0x138] sm:$0xf0] }
 0x1f6   : > { %v9761_v30 = vld [vmem:[#allocation6 + $0xbb4] sm:$0xf0]  ;;  %3522 = vmatmul.bf16.vlgmr.msrb.gmra.mxu2 %v10810_v61  ;;  %v9485_v21 = vld [vmem:[#allocation6 + $0x31c] sm:$0xf]  ;;  %v6677_v31 = vor.u32 %v9421_v18, %v6674_v20 }
 0x1f7   : > { %v7728_v39 = vld [vmem:[#allocation6 + $0x958] sm:$0xf]  ;;  %v8017_v41 = vor.u32 %v9761_v30, %v8016_v26  ;;  %3570 = vmatpush.bf16.msra.mxu2 %v6773_v24  ;;  %3529 = vmatpush.bf16.msrb.mxu1 %v7761_v32  ;;  %v6930_v22 = vld [vmem:[#allocation6 + $0x338] sm:$0xf0]  ;;  %v10939_v30 = vpop.f32.mrf.mxu2 }
 0x1f8   : > { %v9689_v40 = vld [vmem:[#allocation6 + $0x974] sm:$0xf0]  ;;  %3585 = vmatpush.bf16.msra.mxu0 %v6997_v52  ;;  %v6933_v32 = vor.u32 %v9485_v21, %v6930_v22  ;;  %v10941_v52 = vpop.f32.mrf.mxu3 }
 0x1f9   : > { %v7984_v53 = vld [vmem:[#allocation6 + $0xb58] sm:$0xf]  ;;  %v7729_v59 = vor.u32 %v9689_v40, %v7728_v39  ;;  %3543 = vmatpush.bf16.msra.mxu3 %v8017_v41  ;;  %v6642_v40 = vld [vmem:[#allocation6 + $0xf8] sm:$0xf0] }
 0x1fa   : > { %v9753_v27 = vld [vmem:[#allocation6 + $0xb74] sm:$0xf0]  ;;  %v9477_v41 = vld [vmem:[#allocation6 + $0x2dc] sm:$0xf]  ;;  %v6645_v8 = vor.u32 %v9413_v36, %v6642_v40 }
 0x1fb   : > { %v7696_v2 = vld [vmem:[#allocation6 + $0x918] sm:$0xf]  ;;  %v7985_v4 = vor.u32 %v9753_v27, %v7984_v53  ;;  %3571 = vmatpush.bf16.msra.mxu2 %v6741_v50  ;;  %3530 = vmatpush.bf16.msrb.mxu1 %v7729_v59  ;;  %v6898_v50 = vld [vmem:[#allocation6 + $0x2f8] sm:$0xf0]  ;;  %v10943_v53 = vpop.f32.mrf.mxu1 }
 0x1fc   : > { %v9681_v3 = vld [vmem:[#allocation6 + $0x934] sm:$0xf0]  ;;  %3586 = vmatpush.bf16.msra.mxu0 %v6965_v10  ;;  %11285 = vst [vmem:[#allocation28_spill] sm:$0xff] %v10943_v53  ;;  %v6901_v60 = vor.u32 %v9477_v41, %v6898_v50  ;;  %v6610_v10 = vld [vmem:[#allocation6 + $0xb8] sm:$0xf0] }
 0x1fd   : > { %v7952_v11 = vld [vmem:[#allocation6 + $0xb18] sm:$0xf]  ;;  %v7697_v19 = vor.u32 %v9681_v3, %v7696_v2  ;;  %3544 = vmatpush.bf16.msra.mxu3 %v7985_v4  ;;  %v9405_v4 = vld [vmem:[#allocation6 + $0x9c] sm:$0xf] }
 0x1fe   : > { %v9745_v12 = vld [vmem:[#allocation6 + $0xb34] sm:$0xf0]  ;;  %8092 = vmatmul.msk.bf16.vlgmr.msrb.gmra.mxu0 %vm2880_vm0, %v10822_v51  ;;  %v6613_v22 = vor.u32 %v9405_v4, %v6610_v10  ;;  %v6834_v36 = vld [vmem:[#allocation6 + $0x278] sm:$0xf0] }
 0x1ff   : > { %v7664_v24 = vld [vmem:[#allocation6 + $0x8d8] sm:$0xf]  ;;  %v7953_v26 = vor.u32 %v9745_v12, %v7952_v11  ;;  %3572 = vmatpush.bf16.msra.mxu2 %v6709_v7  ;;  %3531 = vmatpush.bf16.msrb.mxu1 %v7697_v19  ;;  %v9469_v11 = vld [vmem:[#allocation6 + $0x29c] sm:$0xf]  ;;  %v10949_v21 = vpop.f32.mrf.mxu2 }
 0x200   : > { %v9673_v25 = vld [vmem:[#allocation6 + $0x8f4] sm:$0xf0]  ;;  %3587 = vmatpush.bf16.msra.mxu0 %v6933_v32  ;;  %v6866_v12 = vld [vmem:[#allocation6 + $0x2b8] sm:$0xf0] }
 0x201   : > { %v7920_v33 = vld [vmem:[#allocation6 + $0xad8] sm:$0xf]  ;;  %v7665_v39 = vor.u32 %v9673_v25, %v7664_v24  ;;  %3545 = vmatpush.bf16.msra.mxu3 %v7953_v26  ;;  %v6869_v24 = vor.u32 %v9469_v11, %v6866_v12  ;;  %v9573_v50 = vld [vmem:[#allocation6 + $0x5dc] sm:$0xf] }
 0x202   : > { %v9737_v35 = vld [vmem:[#allocation6 + $0xaf4] sm:$0xf0]  ;;  %v9389_v4 = vld [vmem:[#allocation6 + $0x1c] sm:$0xf] }
 0x203   : > { %v7632_v27 = vld [vmem:[#allocation6 + $0x898] sm:$0xf]  ;;  %v7921_v59 = vor.u32 %v9737_v35, %v7920_v33  ;;  %3573 = vmatpush.bf16.msra.mxu2 %v6677_v31  ;;  %3532 = vmatpush.bf16.msrb.mxu1 %v7665_v39  ;;  %v9397_v31 = vld [vmem:[#allocation6 + $0x5c] sm:$0xf] }
 0x204   : > { %v9665_v54 = vld [vmem:[#allocation6 + $0x8b4] sm:$0xf0]  ;;  %3588 = vmatpush.bf16.msra.mxu0 %v6901_v60  ;;  %v6578_v33 = vld [vmem:[#allocation6 + $0x78] sm:$0xf0] }
 0x205   : > { %v7888_v2 = vld [vmem:[#allocation6 + $0xa98] sm:$0xf]  ;;  %v7633_v7 = vor.u32 %v9665_v54, %v7632_v27  ;;  %3546 = vmatpush.bf16.msra.mxu3 %v7921_v59  ;;  %v9461_v35 = vld [vmem:[#allocation6 + $0x25c] sm:$0xf]  ;;  %v10951_v54 = vpop.f32.mrf.mxu3  ;;  %v10953_v59 = vpop.f32.mrf.mxu1 }
 0x206   : > { %v9729_v3 = vld [vmem:[#allocation6 + $0xab4] sm:$0xf0]  ;;  %v7282_v27 = vld [vmem:[#allocation6 + $0x5f8] sm:$0xf0]  ;;  %v6837_v60 = vor.u32 %v9461_v35, %v6834_v36 }
 0x207   : > { %v7600_v18 = vld [vmem:[#allocation6 + $0x858] sm:$0xf]  ;;  %v7889_v20 = vor.u32 %v9729_v3, %v7888_v2  ;;  %3574 = vmatpush.bf16.msra.mxu2 %v6645_v8  ;;  %3533 = vmatpush.bf16.msrb.mxu1 %v7633_v7  ;;  %v6581_v8 = vor.u32 %v9397_v31, %v6578_v33  ;;  %v6546_v10 = vld [vmem:[#allocation6 + $0x38] sm:$0xf0] }
 0x208   : > { %v9657_v19 = vld [vmem:[#allocation6 + $0x874] sm:$0xf0]  ;;  %3589 = vmatpush.bf16.msra.mxu0 %v6869_v24  ;;  %v9453_v11 = vld [vmem:[#allocation6 + $0x21c] sm:$0xf]  ;;  %v6549_v33 = vor.u32 %v9389_v4, %v6546_v10 }
 0x209   : > { %v7856_v25 = vld [vmem:[#allocation6 + $0xa58] sm:$0xf]  ;;  %v7601_v32 = vor.u32 %v9657_v19, %v7600_v18  ;;  %3547 = vmatpush.bf16.msra.mxu3 %v7889_v20  ;;  %v6802_v12 = vld [vmem:[#allocation6 + $0x238] sm:$0xf0]  ;;  %v10955_v18 = vpop.f32.mrf.mxu0  ;;  %v7285_v19 = vor.u32 %v9573_v50, %v7282_v27 }
 0x20a   : > { %v9721_v26 = vld [vmem:[#allocation6 + $0xa74] sm:$0xf0]  ;;  %11287 = vst [vmem:[#allocation30_spill] sm:$0xff] %v10955_v18  ;;  %v9637_v20 = vld [vmem:[#allocation6 + $0x7dc] sm:$0xf]  ;;  %v6805_v36 = vor.u32 %v9453_v11, %v6802_v12  ;;  %v7509_v11 = vor.u32 %v9629_v15, %v7506_v58 }
 0x20b   : > { %v7568_v39 = vld [vmem:[#allocation6 + $0x818] sm:$0xf]  ;;  %v7857_v41 = vor.u32 %v9721_v26, %v7856_v25  ;;  %3575 = vmatpush.bf16.msra.mxu2 %v6613_v22  ;;  %3534 = vmatpush.bf16.msrb.mxu1 %v7601_v32  ;;  %v7538_v25 = vld [vmem:[#allocation6 + $0x7f8] sm:$0xf0] }
 0x20c   : > { %v9649_v40 = vld [vmem:[#allocation6 + $0x834] sm:$0xf0]  ;;  %v9701_v26 = vld [vmem:[#allocation6 + $0x9dc] sm:$0xf]  ;;  %3590 = vmatpush.bf16.msra.mxu0 %v6837_v60 }
 0x20d   : > { %v7824_v2 = vld [vmem:[#allocation6 + $0xa18] sm:$0xf]  ;;  %v7569_v7 = vor.u32 %v9649_v40, %v7568_v39  ;;  %3548 = vmatpush.bf16.msra.mxu3 %v7857_v41  ;;  %v7794_v22 = vld [vmem:[#allocation6 + $0x9f8] sm:$0xf0]  ;;  %v7541_v39 = vor.u32 %v9637_v20, %v7538_v25  ;;  %v10957_v40 = vpop.f32.mrf.mxu2  ;;  %v10959_v60 = vpop.f32.mrf.mxu3 }
 0x20e   : > { %v9713_v3 = vld [vmem:[#allocation6 + $0xa34] sm:$0xf0]  ;;  %v9765_v24 = vld [vmem:[#allocation6 + $0xbdc] sm:$0xf]  ;;  %v7797_v50 = vor.u32 %v9701_v26, %v7794_v22  ;;  %11288 = vst [vmem:[#allocation31_spill] sm:$0xff] %v10959_v60  ;;  %v10961_v4 = vpop.f32.mrf.mxu1 }
 0x20f   : > { %v7825_v46 = vor.u32 %v9713_v3, %v7824_v2  ;;  %v8050_v31 = vld [vmem:[#allocation6 + $0xbf8] sm:$0xf0]  ;;  %3576 = vmatpush.bf16.msra.mxu2 %v6581_v8  ;;  %3535 = vmatpush.bf16.msrb.mxu1 %v7569_v7 }
 0x210   : > { %v9565_v35 = vld [vmem:[#allocation6 + $0x59c] sm:$0xf]  ;;  %v8053_v27 = vor.u32 %v9765_v24, %v8050_v31  ;;  %3591 = vmatpush.bf16.msra.mxu0 %v6805_v36 }
 0x211   : > { %v7250_v32 = vld [vmem:[#allocation6 + $0x5b8] sm:$0xf0]  ;;  %3549 = vmatpush.bf16.msra.mxu3 %v7825_v46  ;;  %v10964_v12 = vpop.f32.mrf.mxu0 }
 0x212   : > { %v9693_v41 = vld [vmem:[#allocation6 + $0x99c] sm:$0xf]  ;;  %v7253_v2 = vor.u32 %v9565_v35, %v7250_v32  ;;  %3536 = vmatmul.bf16.vlgmr.msrb.gmra.mxu1 %v10830_v38 }
 0x213   : > { %3598 = vmatpush.bf16.msra.mxu1 %v7285_v19  ;;  %v7762_v3 = vld [vmem:[#allocation6 + $0x9b8] sm:$0xf0]  ;;  %3577 = vmatpush.bf16.msra.mxu2 %v6549_v33 }
 0x214   : > { %v9757_v51 = vld [vmem:[#allocation6 + $0xb9c] sm:$0xf]  ;;  %3640 = vmatpush.bf16.msrb.mxu0 %v8053_v27  ;;  %v7765_v46 = vor.u32 %v9693_v41, %v7762_v3  ;;  %3550 = vmatmul.bf16.vlgmr.msra.gmra.mxu3 %v10832_v43 }
 0x215   : > { %v8018_v8 = vld [vmem:[#allocation6 + $0xbb8] sm:$0xf0]  ;;  %3612 = vmatpush.bf16.msrb.mxu3 %v7541_v39  ;;  %3592 = vmatmul.bf16.vlgmr.msra.gmra.mxu0 %v10816_v9 }
 0x216   : > { %v9557_v7 = vld [vmem:[#allocation6 + $0x55c] sm:$0xf]  ;;  %v8021_v19 = vor.u32 %v9757_v51, %v8018_v8  ;;  %3578 = vmatmul.bf16.vlgmr.msra.gmra.mxu2 %v10808_v56  ;;  %v10969_v8 = vpop.f32.mrf.mxu2 }
 0x217   : > { %v7218_v10 = vld [vmem:[#allocation6 + $0x578] sm:$0xf0]  ;;  %3626 = vmatpush.bf16.msrb.mxu2 %v7797_v50  ;;  %3599 = vmatpush.bf16.msra.mxu1 %v7253_v2  ;;  %11289 = vst [vmem:[#allocation32_spill] sm:$0xff] %v10969_v8 }
 0x218   : > { %v9621_v20 = vld [vmem:[#allocation6 + $0x75c] sm:$0xf]  ;;  %v7221_v22 = vor.u32 %v9557_v7, %v7218_v10  ;;  %3641 = vmatpush.bf16.msrb.mxu0 %v8021_v19  ;;  %v10971_v10 = vpop.f32.mrf.mxu3 }
 0x219   : > { %v7474_v25 = vld [vmem:[#allocation6 + $0x778] sm:$0xf0]  ;;  %3613 = vmatpush.bf16.msrb.mxu3 %v7509_v11  ;;  %v10973_v11 = vpop.f32.mrf.mxu1 }
 0x21a   : > { %v9685_v26 = vld [vmem:[#allocation6 + $0x95c] sm:$0xf]  ;;  %v7477_v15 = vor.u32 %v9621_v20, %v7474_v25 }
 0x21b   : > { %v7730_v24 = vld [vmem:[#allocation6 + $0x978] sm:$0xf0]  ;;  %3627 = vmatpush.bf16.msrb.mxu2 %v7765_v46  ;;  %3600 = vmatpush.bf16.msra.mxu1 %v7221_v22 }
 0x21c   : > { %v9749_v31 = vld [vmem:[#allocation6 + $0xb5c] sm:$0xf]  ;;  %v7733_v51 = vor.u32 %v9685_v26, %v7730_v24 }
 0x21d   : > { %v7986_v33 = vld [vmem:[#allocation6 + $0xb78] sm:$0xf0]  ;;  %3614 = vmatpush.bf16.msrb.mxu3 %v7477_v15 }
 0x21e   : > { %v9549_v35 = vld [vmem:[#allocation6 + $0x51c] sm:$0xf]  ;;  %v7989_v58 = vor.u32 %v9749_v31, %v7986_v33 }
 0x21f   : > { %v7186_v32 = vld [vmem:[#allocation6 + $0x538] sm:$0xf0]  ;;  %3628 = vmatpush.bf16.msrb.mxu2 %v7733_v51 }
 0x220   : > { %v9613_v36 = vld [vmem:[#allocation6 + $0x71c] sm:$0xf]  ;;  %v7189_v27 = vor.u32 %v9549_v35, %v7186_v32  ;;  %3642 = vmatpush.bf16.msrb.mxu0 %v7989_v58  ;;  %v10975_v35 = vpop.f32.mrf.mxu0 }
 0x221   : > { %v7442_v39 = vld [vmem:[#allocation6 + $0x738] sm:$0xf0] }
 0x222   : > { %v9677_v50 = vld [vmem:[#allocation6 + $0x91c] sm:$0xf]  ;;  %v7445_v9 = vor.u32 %v9613_v36, %v7442_v39  ;;  %3601 = vmatpush.bf16.msra.mxu1 %v7189_v27 }
 0x223   : > { %v7698_v41 = vld [vmem:[#allocation6 + $0x938] sm:$0xf0] }
 0x224   : > { %v9741_v2 = vld [vmem:[#allocation6 + $0xb1c] sm:$0xf]  ;;  %v7701_v46 = vor.u32 %v9677_v50, %v7698_v41  ;;  %3615 = vmatpush.bf16.msrb.mxu3 %v7445_v9 }
 0x225   : > { %v7954_v3 = vld [vmem:[#allocation6 + $0xb38] sm:$0xf0] }
 0x226   : > { %v9541_v7 = vld [vmem:[#allocation6 + $0x4dc] sm:$0xf]  ;;  %v7957_v19 = vor.u32 %v9741_v2, %v7954_v3  ;;  %3629 = vmatpush.bf16.msrb.mxu2 %v7701_v46  ;;  %v10980_v46 = vpop.f32.mrf.mxu3 }
 0x227   : > { %v7154_v56 = vld [vmem:[#allocation6 + $0x4f8] sm:$0xf0] }
 0x228   : > { %v9605_v20 = vld [vmem:[#allocation6 + $0x6dc] sm:$0xf]  ;;  %v7157_v22 = vor.u32 %v9541_v7, %v7154_v56  ;;  %3643 = vmatpush.bf16.msrb.mxu0 %v7957_v19  ;;  %v11290_v56 = vperm.slane %v10851_v1, 0  ;;  %v10982_v19 = vpop.f32.mrf.mxu2 }
 0x229   : > { %v7410_v25 = vld [vmem:[#allocation6 + $0x6f8] sm:$0xf0] }
 0x22a   : > { %v9669_v26 = vld [vmem:[#allocation6 + $0x8dc] sm:$0xf]  ;;  %v7413_v36 = vor.u32 %v9605_v20, %v7410_v25  ;;  %3602 = vmatpush.bf16.msra.mxu1 %v7157_v22  ;;  %v2896_v60 = vadd.f32 %v10863_v44, %v11290_v56  ;;  %v10987_v56 = vld [vmem:[#allocation8] sm:$0xff] }
 0x22b   : > { %v7666_v24 = vld [vmem:[#allocation6 + $0x8f8] sm:$0xf0] }
 0x22c   : > { %v9733_v31 = vld [vmem:[#allocation6 + $0xadc] sm:$0xf]  ;;  %v7669_v51 = vor.u32 %v9669_v26, %v7666_v24  ;;  %3616 = vmatpush.bf16.msrb.mxu3 %v7413_v36  ;;  %v10985_v36 = vpop.f32.mrf.mxu1 }
 0x22d   : > { %v7922_v33 = vld [vmem:[#allocation6 + $0xaf8] sm:$0xf0]  ;;  %11291 = vst [vmem:[#allocation33_spill] sm:$0xff] %v10985_v36 }
 0x22e   : > { %v9533_v32 = vld [vmem:[#allocation6 + $0x49c] sm:$0xf]  ;;  %v7925_v58 = vor.u32 %v9733_v31, %v7922_v33  ;;  %3630 = vmatpush.bf16.msrb.mxu2 %v7669_v51 }
 0x22f   : > { %v7122_v15 = vld [vmem:[#allocation6 + $0x4b8] sm:$0xf0] }
 0x230   : > { %v9597_v39 = vld [vmem:[#allocation6 + $0x69c] sm:$0xf]  ;;  %v7125_v2 = vor.u32 %v9533_v32, %v7122_v15  ;;  %3644 = vmatpush.bf16.msrb.mxu0 %v7925_v58  ;;  %v2910_v15 = vadd.f32 %v10865_v49, %v2896_v60  ;;  %v872_v58 = vperm.slane %v10987_v56, 3 }
 0x231   : > { %v7378_v50 = vld [vmem:[#allocation6 + $0x6b8] sm:$0xf0] }
 0x232   : > { %v9661_v41 = vld [vmem:[#allocation6 + $0x89c] sm:$0xf]  ;;  %v7381_v9 = vor.u32 %v9597_v39, %v7378_v50  ;;  %3603 = vmatpush.bf16.msra.mxu1 %v7125_v2  ;;  %v2924_v37 = vadd.f32 %v10861_v17, %v2910_v15  ;;  %v11001_v17 = vpop.f32.mrf.mxu2 }
 0x233   : > { %v7634_v27 = vld [vmem:[#allocation6 + $0x8b8] sm:$0xf0] }
 0x234   : > { %v9725_v3 = vld [vmem:[#allocation6 + $0xa9c] sm:$0xf]  ;;  %v7637_v20 = vor.u32 %v9661_v41, %v7634_v27  ;;  %3617 = vmatpush.bf16.msrb.mxu3 %v7381_v9 }
 0x235   : > { %v7890_v7 = vld [vmem:[#allocation6 + $0xab8] sm:$0xf0] }
 0x236   : > { %v9525_v18 = vld [vmem:[#allocation6 + $0x45c] sm:$0xf]  ;;  %v7893_v25 = vor.u32 %v9725_v3, %v7890_v7  ;;  %3631 = vmatpush.bf16.msrb.mxu2 %v7637_v20 }
 0x237   : > { %v9589_v26 = vld [vmem:[#allocation6 + $0x65c] sm:$0xf]  ;;  %v7093_v31 = vor.u32 %v9525_v18, %v7090_v34  ;;  %v10991_v34 = vpop.f32.mrf.mxu0 }
 0x238   : > { %v7346_v22 = vld [vmem:[#allocation6 + $0x678] sm:$0xf0]  ;;  %11292 = vst [vmem:[#allocation34_spill] sm:$0xff] %v10991_v34  ;;  %3645 = vmatpush.bf16.msrb.mxu0 %v7893_v25  ;;  %v11293_v34 = vperm.slane %v10851_v1, 1  ;;  %v11294_v25 = vperm.slane %v10987_v56, 2 }
 0x239   : > { %v9653_v24 = vld [vmem:[#allocation6 + $0x85c] sm:$0xf]  ;;  %v7349_v41 = vor.u32 %v9589_v26, %v7346_v22  ;;  %3604 = vmatpush.bf16.msra.mxu1 %v7093_v31  ;;  %v8208_v26 = vld [vmem:[#allocation9 + $0xe0] sm:$0xf]  ;;  %v9808_v22 = vld [vmem:[#allocation9 + $0xec] sm:$0xf0]  ;;  %v3190_v31 = vadd.f32 %v10957_v40, %v872_v58 }
 0x23a   : > { %v7602_v33 = vld [vmem:[#allocation6 + $0x878] sm:$0xf0]  ;;  %v2994_v20 = vadd.f32 %v10892_v28, %v11293_v34  ;;  %v9904_v1 = vld [vmem:[#allocation9 + $0x3ec] sm:$0xf0]  ;;  %v8192_v34 = vld [vmem:[#allocation9 + $0xc0] sm:$0xf] }
 0x23b   : > { %v9717_v32 = vld [vmem:[#allocation6 + $0xa5c] sm:$0xf]  ;;  %v7605_v18 = vor.u32 %v9653_v24, %v7602_v33  ;;  %v3092_v24 = vadd.f32 %v10933_v0, %v11294_v25  ;;  %3618 = vmatpush.bf16.msrb.mxu3 %v7349_v41  ;;  %v3231_v0 = vpop.f32.mrf.mxu3 }
 0x23c   : > { %v7858_v44 = vld [vmem:[#allocation6 + $0xa78] sm:$0xf0]  ;;  %v3008_v25 = vadd.f32 %v10896_v42, %v2994_v20  ;;  %v9900_v42 = vld [vmem:[#allocation9 + $0x3cc] sm:$0xf0]  ;;  %v8304_v20 = vld [vmem:[#allocation9 + $0x1a0] sm:$0xf] }
 0x23d   : > { %v9517_v39 = vld [vmem:[#allocation6 + $0x41c] sm:$0xf]  ;;  %v7861_v49 = vor.u32 %v9717_v32, %v7858_v44  ;;  %v9840_v32 = vld [vmem:[#allocation9 + $0x1ec] sm:$0xf0]  ;;  %v8464_v44 = vld [vmem:[#allocation9 + $0x2e0] sm:$0xf]  ;;  %3632 = vmatpush.bf16.msrb.mxu2 %v7605_v18  ;;  %v3106_v18 = vadd.f32 %v10951_v54, %v3092_v24 }
 0x23e   : > { %v7058_v50 = vld [vmem:[#allocation6 + $0x438] sm:$0xf0]  ;;  %v8337_v40 = vor.u32 %v9840_v32, %v8336_v45  ;;  %v11009_v45 = vpop.f32.mrf.mxu1  ;;  %v3022_v54 = vadd.f32 %v10919_v23, %v3008_v25  ;;  %v9864_v32 = vld [vmem:[#allocation9 + $0x2ac] sm:$0xf0] }
 0x23f   : > { %v9773_v27 = vld [vmem:[#allocation6 + $0xc1c] sm:$0xf]  ;;  %v7061_v36 = vor.u32 %v9517_v39, %v7058_v50  ;;  %v9872_v39 = vld [vmem:[#allocation9 + $0x2ec] sm:$0xf0]  ;;  %3646 = vmatpush.bf16.msrb.mxu0 %v7861_v49  ;;  %v8592_v50 = vld [vmem:[#allocation9 + $0x3e0] sm:$0xf]  ;;  %v3120_v24 = vadd.f32 %v10937_v5, %v3106_v18 }
 0x240   : > { %v8082_v2 = vld [vmem:[#allocation6 + $0xc38] sm:$0xf0]  ;;  %v8465_v41 = vor.u32 %v9872_v39, %v8464_v44  ;;  %v8593_v49 = vor.u32 %v9904_v1, %v8592_v50  ;;  %v9896_v50 = vld [vmem:[#allocation9 + $0x3ac] sm:$0xf0]  ;;  %v3036_v5 = vadd.f32 %v10915_v16, %v3022_v54 }
 0x241   : > { %v9581_v60 = vld [vmem:[#allocation6 + $0x61c] sm:$0xf]  ;;  %v8085_v9 = vor.u32 %v9773_v27, %v8082_v2  ;;  %3605 = vmatpush.bf16.msra.mxu1 %v7061_v36  ;;  %v8209_v27 = vor.u32 %v9808_v22, %v8208_v26  ;;  %v2938_v2 = vadd.f32 %v10871_v14, %v2924_v37  ;;  %v9836_v36 = vld [vmem:[#allocation9 + $0x1cc] sm:$0xf0]  ;;  %v3188_v37 = vadd.f32 %v10949_v21, %v872_v58  ;;  %v11016_v22 = vpop.f32.mrf.mxu0  ;;  %v8176_v58 = vld [vmem:[#allocation9 + $0xa0] sm:$0xf] }
 0x242   : > { %v7314_v3 = vld [vmem:[#allocation6 + $0x638] sm:$0xf0]  ;;  %v3134_v16 = vadd.f32 %v10939_v30, %v3120_v24 }
 0x243   : > { %v9645_v7 = vld [vmem:[#allocation6 + $0x81c] sm:$0xf]  ;;  %v7317_v33 = vor.u32 %v9581_v60, %v7314_v3  ;;  %v9804_v60 = vld [vmem:[#allocation9 + $0xcc] sm:$0xf0]  ;;  %v8320_v3 = vld [vmem:[#allocation9 + $0x1c0] sm:$0xf]  ;;  %v2952_v14 = vadd.f32 %v10885_v57, %v2938_v2  ;;  %v3202_v39 = vadd.f32 %v10964_v12, %v3188_v37 }
 0x244   : > { %v7570_v53 = vld [vmem:[#allocation6 + $0x838] sm:$0xf0]  ;;  %3606 = vmatmul.bf16.vlgmr.msra.gmra.mxu1 %v10806_v55  ;;  %v8193_v26 = vor.u32 %v9804_v60, %v8192_v34  ;;  %v8321_v57 = vor.u32 %v9836_v36, %v8320_v3  ;;  %v9800_v55 = vld [vmem:[#allocation9 + $0xac] sm:$0xf0]  ;;  %v11034_v60 = vmul.f32 0.2, %v10876_v62  ;;  %v3148_v30 = vadd.f32 %v10953_v59, %v3134_v16 }
 0x245   : > { %v9709_v8 = vld [vmem:[#allocation6 + $0xa1c] sm:$0xf]  ;;  %v7573_v15 = vor.u32 %v9645_v7, %v7570_v53  ;;  %3661 = vmatpush.bf16.msrb.mxu1 %v8085_v9  ;;  %v3204_v53 = vadd.f32 %v10975_v35, %v3190_v31  ;;  %3619 = vmatpush.bf16.msrb.mxu3 %v7317_v33  ;;  %v8576_v7 = vld [vmem:[#allocation9 + $0x3c0] sm:$0xf]  ;;  %v11295_v35 = vperm.slane %v10987_v56, 2  ;;  %v2966_v44 = vadd.f32 %v10887_v6, %v2952_v14 }
 0x246   : > { %v7826_v51 = vld [vmem:[#allocation6 + $0xa38] sm:$0xf0]  ;;  %v9832_v31 = vld [vmem:[#allocation9 + $0x1ac] sm:$0xf0]  ;;  %v8432_v33 = vld [vmem:[#allocation9 + $0x2a0] sm:$0xf]  ;;  %v3216_v25 = vadd.f32 %v10961_v4, %v3202_v39  ;;  %v11040_v18 = vpop.f32.mrf.mxu1 }
 0x247   : > { %v7829_v28 = vor.u32 %v9709_v8, %v7826_v51  ;;  %v8448_v8 = vld [vmem:[#allocation9 + $0x2c0] sm:$0xf]  ;;  %v9868_v51 = vld [vmem:[#allocation9 + $0x2cc] sm:$0xf0]  ;;  %3633 = vmatpush.bf16.msrb.mxu2 %v7573_v15  ;;  %v3090_v9 = vadd.f32 %v10923_v63, %v11295_v35  ;;  %v3218_v23 = vadd.f32 %v10973_v11, %v3204_v53  ;;  %v8577_v63 = vor.u32 %v9900_v42, %v8576_v7 }
 0x248   : > { %v8449_v21 = vor.u32 %v9868_v51, %v8448_v8  ;;  %3620 = vmatmul.bf16.vlgmr.msrb.gmra.mxu3 %v10810_v61  ;;  %v8560_v15 = vld [vmem:[#allocation9 + $0x3a0] sm:$0xf]  ;;  %v8177_v61 = vor.u32 %v9800_v55, %v8176_v58  ;;  %v8305_v6 = vor.u32 %v9832_v31, %v8304_v20  ;;  %v8433_v12 = vor.u32 %v9864_v32, %v8432_v33  ;;  %v9796_v2 = vld [vmem:[#allocation9 + $0x8c] sm:$0xf0]  ;;  %v11297_v55 = vld [vmem:[#allocation26_spill] sm:$0xff] }
 0x249   : > { %3647 = vmatpush.bf16.msrb.mxu0 %v7829_v28  ;;  %5254 = vmatpush.bf16.msra.mxu3 %v8209_v27  ;;  %v3104_v11 = vadd.f32 %v10941_v52, %v3090_v9  ;;  %v3232_v1 = vadd.f32 %v3231_v0, %v3218_v23  ;;  %v11027_v28 = vpop.f32.mrf.mxu3  ;;  %v11029_v27 = vpop.f32.mrf.mxu2  ;;  %v8561_v52 = vor.u32 %v9896_v50, %v8560_v15  ;;  %v9828_v0 = vld [vmem:[#allocation9 + $0x18c] sm:$0xf0]  ;;  %v8544_v53 = vld [vmem:[#allocation9 + $0x380] sm:$0xf]  ;;  %v11298_v23 = vld [vmem:[#allocation32_spill] sm:$0xff] }
 0x24a   : > { %5268 = vmatpush.bf16.msra.mxu1 %v8337_v40  ;;  %3634 = vmatmul.bf16.vlgmr.msrb.gmra.mxu2 %v10830_v38  ;;  %v8160_v38 = vld [vmem:[#allocation9 + $0x80] sm:$0xf]  ;;  %v3050_v40 = vadd.f32 %v10902_v47, %v3036_v5  ;;  %v9860_v34 = vld [vmem:[#allocation9 + $0x28c] sm:$0xf0]  ;;  %v11037_v3 = vadd.f32 %v10874_v29, %v2966_v44  ;;  %v3230_v51 = vadd.f32 %v10980_v46, %v3216_v25  ;;  %v11046_v14 = vpop.f32.mrf.mxu0  ;;  %v11299_v15 = vld [vmem:[#allocation28_spill] sm:$0xff] }
 0x24b   : > { %5282 = vmatpush.bf16.msra.mxu2 %v8465_v41  ;;  %v8416_v41 = vld [vmem:[#allocation9 + $0x280] sm:$0xf]  ;;  %v3118_v47 = vadd.f32 %v10925_v13, %v3104_v11  ;;  %v3246_v36 = vadd.f32 %v10982_v19, %v3232_v1  ;;  %v8161_v8 = vor.u32 %v9796_v2, %v8160_v38  ;;  %v9792_v7 = vld [vmem:[#allocation9 + $0x6c] sm:$0xf0]  ;;  %v3162_v46 = vadd.f32 %v10971_v10, %v3148_v30 }
 0x24c   : > { %3648 = vmatmul.bf16.vlgmr.msrb.gmra.mxu0 %v10832_v43  ;;  %v8288_v43 = vld [vmem:[#allocation9 + $0x180] sm:$0xf]  ;;  %v8417_v4 = vor.u32 %v9860_v34, %v8416_v41  ;;  %v3064_v54 = vadd.f32 %v10921_v48, %v3050_v40  ;;  %v9824_v59 = vld [vmem:[#allocation9 + $0x16c] sm:$0xf0]  ;;  %v11050_v9 = vmul.f32 0.2, %v11037_v3 }
 0x24d   : > { %5296 = vmatpush.bf16.msra.mxu0 %v8593_v49  ;;  %5255 = vmatpush.bf16.msra.mxu3 %v8193_v26  ;;  %v9892_v49 = vld [vmem:[#allocation9 + $0x38c] sm:$0xf0]  ;;  %v8289_v29 = vor.u32 %v9828_v0, %v8288_v43  ;;  %v8144_v37 = vld [vmem:[#allocation9 + $0x60] sm:$0xf]  ;;  %v3132_v20 = vadd.f32 %v11297_v55, %v3118_v47  ;;  %v3260_v24 = vadd.f32 %v11016_v22, %v3246_v36  ;;  %v11302_v43 = vld [vmem:[#allocation24_spill] sm:$0xff] }
 0x24e   : > { %5269 = vmatpush.bf16.msra.mxu1 %v8321_v57  ;;  %v8272_v42 = vld [vmem:[#allocation9 + $0x160] sm:$0xf]  ;;  %v8545_v13 = vor.u32 %v9892_v49, %v8544_v53  ;;  %v9856_v19 = vld [vmem:[#allocation9 + $0x26c] sm:$0xf0]  ;;  %v8145_v48 = vor.u32 %v9792_v7, %v8144_v37  ;;  %v11304_v53 = vld [vmem:[#allocation34_spill] sm:$0xff]  ;;  %v11078_v47 = vpop.f32.mrf.mxu1 }
 0x24f   : > { %5283 = vmatpush.bf16.msra.mxu2 %v8449_v21  ;;  %v8400_v35 = vld [vmem:[#allocation9 + $0x260] sm:$0xf]  ;;  %v9888_v57 = vld [vmem:[#allocation9 + $0x36c] sm:$0xf0]  ;;  %v8273_v33 = vor.u32 %v9824_v59, %v8272_v42  ;;  %v3146_v50 = vadd.f32 %v11299_v15, %v3132_v20  ;;  %v11075_v34 = vadd.f32 %v11009_v45, %v3260_v24 }
 0x250   : > { %v8528_v26 = vld [vmem:[#allocation9 + $0x360] sm:$0xf]  ;;  %v11296_v21 = vld [vmem:[#allocation27_spill] sm:$0xff]  ;;  %v8401_v32 = vor.u32 %v9856_v19, %v8400_v35 }
 0x251   : > { %5297 = vmatpush.bf16.msra.mxu0 %v8577_v63  ;;  %5256 = vmatpush.bf16.msra.mxu3 %v8177_v61  ;;  %v11054_v58 = vadd.f32 %v11296_v21, %v3064_v54  ;;  %v3244_v63 = vadd.f32 %v11298_v23, %v3230_v51  ;;  %v11059_v31 = vpop.f32.mrf.mxu2  ;;  %v8128_v10 = vld [vmem:[#allocation9 + $0x40] sm:$0xf]  ;;  %v9788_v44 = vld [vmem:[#allocation9 + $0x4c] sm:$0xf0]  ;;  %v8529_v5 = vor.u32 %v9888_v57, %v8528_v26  ;;  %v3287_v2 = vpop.f32.mrf.mxu3  ;;  %v873_v26 = vperm.slane %v10987_v56, 4 }
 0x252   : > { %5270 = vmatpush.bf16.msra.mxu1 %v8305_v6  ;;  %v8256_v39 = vld [vmem:[#allocation9 + $0x140] sm:$0xf]  ;;  %v9820_v11 = vld [vmem:[#allocation9 + $0x14c] sm:$0xf0]  ;;  %v8129_v25 = vor.u32 %v9788_v44, %v8128_v10  ;;  %v11083_v54 = vpop.f32.mrf.mxu0 }
 0x253   : > { %5284 = vmatpush.bf16.msra.mxu2 %v8433_v12  ;;  %v8384_v1 = vld [vmem:[#allocation9 + $0x240] sm:$0xf]  ;;  %v9852_v22 = vld [vmem:[#allocation9 + $0x24c] sm:$0xf0]  ;;  %v11301_v12 = vld [vmem:[#allocation30_spill] sm:$0xff]  ;;  %v3258_v49 = vadd.f32 %v11304_v53, %v3244_v63  ;;  %v8257_v30 = vor.u32 %v9820_v11, %v8256_v39 }
 0x254   : > { %v11300_v61 = vld [vmem:[#allocation25_spill] sm:$0xff]  ;;  %v11066_v38 = vadd.f32 %v11301_v12, %v3162_v46  ;;  %8093 = vmatmul.msk.bf16.vlgmr.msrb.gmra.mxu1 %vm2880_vm0, %v11302_v43  ;;  %v9884_v16 = vld [vmem:[#allocation9 + $0x34c] sm:$0xf0]  ;;  %v8385_v36 = vor.u32 %v9852_v22, %v8384_v1  ;;  %v11087_v46 = vmul.f32 0.2, %v11075_v34  ;;  %v3692_v22 = vmax.f32 %v11037_v3, %v11050_v9 }
 0x255   : > { %5298 = vmatpush.bf16.msra.mxu0 %v8561_v52  ;;  %5257 = vmatpush.bf16.msra.mxu3 %v8161_v8  ;;  %v11063_v6 = vmul.f32 0.2, %v11300_v61  ;;  %v8512_v40 = vld [vmem:[#allocation9 + $0x340] sm:$0xf]  ;;  %v11071_v52 = vmul.f32 0.2, %v11054_v58 }
 0x256   : > { %5271 = vmatpush.bf16.msra.mxu1 %v8289_v29  ;;  %v11303_v0 = vld [vmem:[#allocation31_spill] sm:$0xff]  ;;  %v8112_v8 = vld [vmem:[#allocation9 + $0x20] sm:$0xf]  ;;  %v11081_v45 = vmul.f32 0.2, %v11066_v38 }
 0x257   : > { %5285 = vmatpush.bf16.msra.mxu2 %v8417_v4  ;;  %v3160_v41 = vadd.f32 %v11303_v0, %v3146_v50  ;;  %v9784_v51 = vld [vmem:[#allocation9 + $0x2c] sm:$0xf0]  ;;  %v8240_v29 = vld [vmem:[#allocation9 + $0x120] sm:$0xf]  ;;  %v8513_v4 = vor.u32 %v9884_v16, %v8512_v40 }
 0x258   : > { %v9816_v37 = vld [vmem:[#allocation9 + $0x12c] sm:$0xf0]  ;;  %v8368_v7 = vld [vmem:[#allocation9 + $0x220] sm:$0xf]  ;;  %v8113_v57 = vor.u32 %v9784_v51, %v8112_v8  ;;  %v3684_v8 = vmax.f32 %v10876_v62, %v11034_v60  ;;  %v3286_v51 = vadd.f32 %v11027_v28, %v873_v26 }
 0x259   : > { %5299 = vmatpush.bf16.msra.mxu0 %v8545_v13  ;;  %5258 = vmatpush.bf16.msra.mxu3 %v8145_v48  ;;  %v9848_v42 = vld [vmem:[#allocation9 + $0x22c] sm:$0xf0]  ;;  %v8496_v13 = vld [vmem:[#allocation9 + $0x320] sm:$0xf]  ;;  %v8241_v24 = vor.u32 %v9816_v37, %v8240_v29  ;;  %v11091_v15 = vpop.f32.mrf.mxu3  ;;  %v11093_v50 = vpop.f32.mrf.mxu2 }
 0x25a   : > { %5272 = vmatpush.bf16.msra.mxu1 %v8273_v33  ;;  %v9880_v59 = vld [vmem:[#allocation9 + $0x32c] sm:$0xf0]  ;;  %v11305_v35 = vld [vmem:[#allocation29_spill] sm:$0xff]  ;;  %v8369_v48 = vor.u32 %v9848_v42, %v8368_v7 }
 0x25b   : > { %5286 = vmatpush.bf16.msra.mxu2 %v8401_v32  ;;  %v3174_v19 = vadd.f32 %v11305_v35, %v3160_v41  ;;  %v8096_v21 = vld [vmem:[#allocation9] sm:$0xf]  ;;  %v9780_v23 = vld [vmem:[#allocation9 + $0xc] sm:$0xf0]  ;;  %v8497_v32 = vor.u32 %v9880_v59, %v8496_v13  ;;  %v3288_v41 = vadd.f32 %v3287_v2, %v873_v26  ;;  %v3695_v2 = vmax.f32 %v11075_v34, %v11087_v46 }
 0x25c   : > { %v11306_v55 = vld [vmem:[#allocation33_spill] sm:$0xff]  ;;  %v9812_v33 = vld [vmem:[#allocation9 + $0x10c] sm:$0xf0]  ;;  %v8097_v43 = vor.u32 %v9780_v23, %v8096_v21 }
 0x25d   : > { %5300 = vmatpush.bf16.msra.mxu0 %v8529_v5  ;;  %5259 = vmatpush.bf16.msra.mxu3 %v8129_v25  ;;  %v3272_v20 = vadd.f32 %v11306_v55, %v3258_v49  ;;  %v8224_v63 = vld [vmem:[#allocation9 + $0x100] sm:$0xf]  ;;  %v9844_v44 = vld [vmem:[#allocation9 + $0x20c] sm:$0xf0]  ;;  %v3670_v12 = vmul.f32 0.2, %v3174_v19  ;;  %v11097_v25 = vpop.f32.mrf.mxu1  ;;  %v3302_v60 = vadd.f32 %v11078_v47, %v3288_v41 }
 0x25e   : > { %5273 = vmatpush.bf16.msra.mxu1 %v8257_v30  ;;  %v8352_v10 = vld [vmem:[#allocation9 + $0x200] sm:$0xf]  ;;  %v9876_v5 = vld [vmem:[#allocation9 + $0x30c] sm:$0xf0]  ;;  %v8225_v53 = vor.u32 %v9812_v33, %v8224_v63  ;;  %v3693_v30 = vmax.f32 %v11054_v58, %v11071_v52  ;;  %v3685_v58 = vmax.f32 %v11300_v61, %v11063_v6  ;;  %v3300_v61 = vadd.f32 %v11040_v18, %v3286_v51 }
 0x25f   : > { %5287 = vmatpush.bf16.msra.mxu2 %v8385_v36  ;;  %v8480_v39 = vld [vmem:[#allocation9 + $0x300] sm:$0xf]  ;;  %v9936_v1 = vld [vmem:[#allocation9 + $0x4ec] sm:$0xf0]  ;;  %v3671_v0 = vmul.f32 0.2, %v3272_v20  ;;  %v8353_v49 = vor.u32 %v9844_v44, %v8352_v10  ;;  %v3694_v36 = vmax.f32 %v11066_v38, %v11081_v45  ;;  %v3686_v38 = vmax.f32 %v3174_v19, %v3670_v12 }
 0x260   : > { %v8720_v11 = vld [vmem:[#allocation9 + $0x4e0] sm:$0xf]  ;;  %v9968_v16 = vld [vmem:[#allocation9 + $0x5ec] sm:$0xf0]  ;;  %v8481_v3 = vor.u32 %v9876_v5, %v8480_v39  ;;  %v11112_v45 = vpack.c.bf16 %v3692_v22, %v3684_v8  ;;  %v11115_v28 = vpack.c.bf16 %v3693_v30, %v3685_v58  ;;  %v3316_v55 = vadd.f32 %v11029_v27, %v3302_v60 }
 0x261   : > { %5301 = vmatpush.bf16.msra.mxu0 %v8513_v4  ;;  %5260 = vmatpush.bf16.msra.mxu3 %v8113_v57  ;;  %v8848_v40 = vld [vmem:[#allocation9 + $0x5e0] sm:$0xf]  ;;  %v8721_v9 = vor.u32 %v9936_v1, %v8720_v11  ;;  %v11108_v4 = vpop.f32.mrf.mxu0  ;;  %v9932_v7 = vld [vmem:[#allocation9 + $0x4cc] sm:$0xf0]  ;;  %v3687_v62 = vmax.f32 %v3272_v20, %v3671_v0  ;;  %v11117_v34 = vpack.c.bf16 %v3694_v36, %v3686_v38  ;;  %v3397_v6 = vpop.f32.mrf.mxu2 }
 0x262   : > { %5274 = vmatpush.bf16.msra.mxu1 %v8241_v24  ;;  %v8849_v29 = vor.u32 %v9968_v16, %v8848_v40  ;;  %v8704_v37 = vld [vmem:[#allocation9 + $0x4c0] sm:$0xf]  ;;  %v9964_v42 = vld [vmem:[#allocation9 + $0x5cc] sm:$0xf0]  ;;  %v3343_v20 = vpop.f32.mrf.mxu3  ;;  %v874_v24 = vperm.slane %v10987_v56, 5  ;;  %v3314_v23 = vadd.f32 %v11001_v17, %v3300_v61  ;;  %v3330_v11 = vadd.f32 %v11083_v54, %v3316_v55 }
 0x263   : > { %5288 = vmatpush.bf16.msra.mxu2 %v8369_v48  ;;  %v8832_v52 = vld [vmem:[#allocation9 + $0x5c0] sm:$0xf]  ;;  %v8705_v13 = vor.u32 %v9932_v7, %v8704_v37  ;;  %v11119_v59 = vpack.c.bf16 %v3695_v2, %v3687_v62  ;;  %v9928_v47 = vld [vmem:[#allocation9 + $0x4ac] sm:$0xf0] }
 0x264   : > { %v8833_v35 = vor.u32 %v9964_v42, %v8832_v52  ;;  %v8688_v19 = vld [vmem:[#allocation9 + $0x4a0] sm:$0xf]  ;;  %v9960_v26 = vld [vmem:[#allocation9 + $0x5ac] sm:$0xf0]  ;;  %v3344_v40 = vadd.f32 %v3343_v20, %v3330_v11  ;;  %v8210_v11 = vld [vmem:[#allocation9 + $0xf0] sm:$0xf0] }
 0x265   : > { %5302 = vmatpush.bf16.msra.mxu0 %v8497_v32  ;;  %5261 = vmatpush.bf16.msra.mxu3 %v8097_v43  ;;  %v8816_v46 = vld [vmem:[#allocation9 + $0x5a0] sm:$0xf]  ;;  %v10000_v21 = vld [vmem:[#allocation9 + $0x6ec] sm:$0xf0]  ;;  %v8689_v48 = vor.u32 %v9928_v47, %v8688_v19  ;;  %v3357_v63 = vpop.f32.mrf.mxu1  ;;  %v3328_v43 = vadd.f32 %v11046_v14, %v3314_v23 }
 0x266   : > { %5275 = vmatpush.bf16.msra.mxu1 %v8225_v53  ;;  %v8976_v57 = vld [vmem:[#allocation9 + $0x6e0] sm:$0xf]  ;;  %v8817_v33 = vor.u32 %v9960_v26, %v8816_v46  ;;  %v9924_v10 = vld [vmem:[#allocation9 + $0x48c] sm:$0xf0]  ;;  %v3384_v53 = vadd.f32 %v11108_v4, %v874_v24  ;;  %v3358_v14 = vadd.f32 %v3357_v63, %v3344_v40  ;;  %v8338_v40 = vld [vmem:[#allocation9 + $0x1f0] sm:$0xf0] }
 0x267   : > { %5289 = vmatpush.bf16.msra.mxu2 %v8353_v49  ;;  %v8977_v18 = vor.u32 %v10000_v21, %v8976_v57  ;;  %v8672_v32 = vld [vmem:[#allocation9 + $0x480] sm:$0xf]  ;;  %v9956_v39 = vld [vmem:[#allocation9 + $0x58c] sm:$0xf0]  ;;  %v3342_v54 = vadd.f32 %v11091_v15, %v3328_v43  ;;  %v9838_v43 = vld [vmem:[#allocation9 + $0x1e4] sm:$0xf] }
 0x268   : > { %5262 = vmatmul.bf16.vlgmr.msra.gmra.mxu3 %v11112_v45  ;;  %v8800_v44 = vld [vmem:[#allocation9 + $0x580] sm:$0xf]  ;;  %v9996_v27 = vld [vmem:[#allocation9 + $0x6cc] sm:$0xf0]  ;;  %v8673_v12 = vor.u32 %v9924_v10, %v8672_v32  ;;  %v3398_v38 = vadd.f32 %v3397_v6, %v3384_v53  ;;  %v3372_v61 = vadd.f32 %v11093_v50, %v3358_v14 }
 0x269   : > { %5303 = vmatpush.bf16.msra.mxu0 %v8481_v3  ;;  %5310 = vmatpush.bf16.msrb.mxu3 %v8721_v9  ;;  %v8960_v5 = vld [vmem:[#allocation9 + $0x6c0] sm:$0xf]  ;;  %v3385_v1 = vpop.f32.mrf.mxu0  ;;  %v8801_v17 = vor.u32 %v9956_v39, %v8800_v44  ;;  %v9920_v0 = vld [vmem:[#allocation9 + $0x46c] sm:$0xf0]  ;;  %v3399_v3 = vpop.f32.mrf.mxu2  ;;  %v3356_v62 = vadd.f32 %v11097_v25, %v3342_v54  ;;  %v9806_v39 = vld [vmem:[#allocation9 + $0xe4] sm:$0xf]  ;;  %v8341_v54 = vor.u32 %v9838_v43, %v8338_v40 }
 0x26a   : > { %5324 = vmatpush.bf16.msrb.mxu1 %v8849_v29  ;;  %5290 = vmatmul.bf16.vlgmr.msra.gmra.mxu2 %v11117_v34  ;;  %v8961_v22 = vor.u32 %v9996_v27, %v8960_v5  ;;  %v8656_v16 = vld [vmem:[#allocation9 + $0x460] sm:$0xf]  ;;  %v9952_v49 = vld [vmem:[#allocation9 + $0x56c] sm:$0xf0]  ;;  %v3411_v9 = vpop.f32.mrf.mxu3  ;;  %v3386_v60 = vadd.f32 %v3385_v1, %v874_v24  ;;  %v8213_v53 = vor.u32 %v9806_v39, %v8210_v11  ;;  %v8274_v43 = vld [vmem:[#allocation9 + $0x170] sm:$0xf0] }
 0x26b   : > { %5276 = vmatmul.bf16.vlgmr.msra.gmra.mxu1 %v11115_v28  ;;  %5338 = vmatpush.bf16.msrb.mxu2 %v8977_v18  ;;  %v8784_v41 = vld [vmem:[#allocation9 + $0x560] sm:$0xf]  ;;  %v9992_v36 = vld [vmem:[#allocation9 + $0x6ac] sm:$0xf0]  ;;  %v8657_v2 = vor.u32 %v9920_v0, %v8656_v16  ;;  %v3412_v57 = vadd.f32 %v3411_v9, %v3398_v38  ;;  %v3370_v20 = vadd.f32 %v11059_v31, %v3356_v62  ;;  %v9862_v40 = vld [vmem:[#allocation9 + $0x2a4] sm:$0xf] }
 0x26c   : > { %5304 = vmatmul.bf16.vlgmr.msra.gmra.mxu0 %v11119_v59  ;;  %v8944_v30 = vld [vmem:[#allocation9 + $0x6a0] sm:$0xf]  ;;  %v8785_v29 = vor.u32 %v9952_v49, %v8784_v41  ;;  %v9916_v7 = vld [vmem:[#allocation9 + $0x44c] sm:$0xf0]  ;;  %v3400_v24 = vadd.f32 %v3399_v3, %v3386_v60  ;;  %v9802_v49 = vld [vmem:[#allocation9 + $0xc4] sm:$0xf] }
 0x26d   : > { %5311 = vmatpush.bf16.msrb.mxu3 %v8705_v13  ;;  %v8945_v8 = vor.u32 %v9992_v36, %v8944_v30  ;;  %v3425_v51 = vpop.f32.mrf.mxu1  ;;  %v8640_v37 = vld [vmem:[#allocation9 + $0x440] sm:$0xf]  ;;  %v9948_v4 = vld [vmem:[#allocation9 + $0x54c] sm:$0xf0]  ;;  %v8194_v3 = vld [vmem:[#allocation9 + $0xd0] sm:$0xf0] }
 0x26e   : > { %5325 = vmatpush.bf16.msrb.mxu1 %v8833_v35  ;;  %v8768_v58 = vld [vmem:[#allocation9 + $0x540] sm:$0xf]  ;;  %v9988_v42 = vld [vmem:[#allocation9 + $0x68c] sm:$0xf0]  ;;  %v8641_v13 = vor.u32 %v9916_v7, %v8640_v37  ;;  %v3426_v5 = vadd.f32 %v3425_v51, %v3412_v57  ;;  %v8322_v37 = vld [vmem:[#allocation9 + $0x1d0] sm:$0xf0]  ;;  %v8197_v38 = vor.u32 %v9802_v49, %v8194_v3 }
 0x26f   : > { %5339 = vmatpush.bf16.msrb.mxu2 %v8961_v22  ;;  %v8928_v52 = vld [vmem:[#allocation9 + $0x680] sm:$0xf]  ;;  %v8769_v19 = vor.u32 %v9948_v4, %v8768_v58  ;;  %v9912_v46 = vld [vmem:[#allocation9 + $0x42c] sm:$0xf0]  ;;  %v3672_v22 = vmul.f32 0.2, %v3370_v20 }
 0x270   : > { %v8929_v15 = vor.u32 %v9988_v42, %v8928_v52  ;;  %v8624_v47 = vld [vmem:[#allocation9 + $0x420] sm:$0xf]  ;;  %v9944_v6 = vld [vmem:[#allocation9 + $0x52c] sm:$0xf0]  ;;  %v9798_v4 = vld [vmem:[#allocation9 + $0xa4] sm:$0xf] }
 0x271   : > { %5312 = vmatpush.bf16.msrb.mxu3 %v8689_v48  ;;  %v3439_v35 = vpop.f32.mrf.mxu0  ;;  %v8752_v26 = vld [vmem:[#allocation9 + $0x520] sm:$0xf]  ;;  %v9984_v55 = vld [vmem:[#allocation9 + $0x66c] sm:$0xf0]  ;;  %v8625_v48 = vor.u32 %v9912_v46, %v8624_v47  ;;  %v3453_v32 = vpop.f32.mrf.mxu2  ;;  %v8178_v52 = vld [vmem:[#allocation9 + $0xb0] sm:$0xf0] }
 0x272   : > { %5326 = vmatpush.bf16.msrb.mxu1 %v8817_v33  ;;  %v8912_v21 = vld [vmem:[#allocation9 + $0x660] sm:$0xf]  ;;  %v3413_v25 = vpop.f32.mrf.mxu3  ;;  %v9908_v50 = vld [vmem:[#allocation9 + $0x40c] sm:$0xf0]  ;;  %v3680_v33 = vmul.f32 0.2, %v3372_v61  ;;  %v8753_v10 = vor.u32 %v9944_v6, %v8752_v26  ;;  %v3440_v30 = vadd.f32 %v3439_v35, %v3426_v5 }
 0x273   : > { %5340 = vmatpush.bf16.msrb.mxu2 %v8945_v8  ;;  %v8913_v18 = vor.u32 %v9984_v55, %v8912_v21  ;;  %v8608_v23 = vld [vmem:[#allocation9 + $0x400] sm:$0xf]  ;;  %v9940_v44 = vld [vmem:[#allocation9 + $0x50c] sm:$0xf0]  ;;  %v3414_v27 = vadd.f32 %v3413_v25, %v3400_v24  ;;  %v9830_v60 = vld [vmem:[#allocation9 + $0x1a4] sm:$0xf]  ;;  %v8181_v21 = vor.u32 %v9798_v4, %v8178_v52 }
 0x274   : > { %v8736_v63 = vld [vmem:[#allocation9 + $0x500] sm:$0xf]  ;;  %v9980_v31 = vld [vmem:[#allocation9 + $0x64c] sm:$0xf0]  ;;  %v8609_v16 = vor.u32 %v9908_v50, %v8608_v23  ;;  %v3696_v0 = vmax.f32 %v3372_v61, %v3680_v33  ;;  %v3454_v42 = vadd.f32 %v3453_v32, %v3440_v30  ;;  %v9870_v46 = vld [vmem:[#allocation9 + $0x2e4] sm:$0xf] }
 0x275   : > { %5313 = vmatpush.bf16.msrb.mxu3 %v8673_v12  ;;  %v8896_v1 = vld [vmem:[#allocation9 + $0x640] sm:$0xf]  ;;  %v3427_v12 = vpop.f32.mrf.mxu1  ;;  %v8737_v41 = vor.u32 %v9940_v44, %v8736_v63  ;;  %v9976_v8 = vld [vmem:[#allocation9 + $0x62c] sm:$0xf0]  ;;  %v8466_v26 = vld [vmem:[#allocation9 + $0x2f0] sm:$0xf0] }
 0x276   : > { %5327 = vmatpush.bf16.msrb.mxu1 %v8801_v17  ;;  %v8897_v17 = vor.u32 %v9980_v31, %v8896_v1  ;;  %v3428_v36 = vadd.f32 %v3427_v12, %v3414_v27  ;;  %v8880_v9 = vld [vmem:[#allocation9 + $0x620] sm:$0xf]  ;;  %v9972_v61 = vld [vmem:[#allocation9 + $0x60c] sm:$0xf0]  ;;  %v8469_v6 = vor.u32 %v9870_v46, %v8466_v26  ;;  %v9794_v55 = vld [vmem:[#allocation9 + $0x84] sm:$0xf] }
 0x277   : > { %5341 = vmatpush.bf16.msrb.mxu2 %v8929_v15  ;;  %v8881_v7 = vor.u32 %v9976_v8, %v8880_v9  ;;  %v9826_v24 = vld [vmem:[#allocation9 + $0x184] sm:$0xf]  ;;  %v8450_v63 = vld [vmem:[#allocation9 + $0x2d0] sm:$0xf0]  ;;  %v9104_v33 = vld [vmem:[#allocation9 + $0x7e0] sm:$0xf] }
 0x278   : > { %v9866_v50 = vld [vmem:[#allocation9 + $0x2c4] sm:$0xf]  ;;  %v10032_v39 = vld [vmem:[#allocation9 + $0x7ec] sm:$0xf0]  ;;  %v8130_v8 = vld [vmem:[#allocation9 + $0x50] sm:$0xf0] }
 0x279   : > { %5314 = vmatpush.bf16.msrb.mxu3 %v8657_v2  ;;  %v3688_v2 = vmax.f32 %v3370_v20, %v3672_v22  ;;  %v3441_v14 = vpop.f32.mrf.mxu0  ;;  %v3455_v35 = vpop.f32.mrf.mxu2  ;;  %v8453_v44 = vor.u32 %v9866_v50, %v8450_v63  ;;  %v9790_v27 = vld [vmem:[#allocation9 + $0x64] sm:$0xf]  ;;  %v9105_v11 = vor.u32 %v10032_v39, %v9104_v33  ;;  %v8146_v22 = vld [vmem:[#allocation9 + $0x70] sm:$0xf0]  ;;  %v10028_v49 = vld [vmem:[#allocation9 + $0x7cc] sm:$0xf0] }
 0x27a   : > { %5328 = vmatpush.bf16.msrb.mxu1 %v8785_v29  ;;  %v3467_v51 = vpop.f32.mrf.mxu3  ;;  %v9834_v29 = vld [vmem:[#allocation9 + $0x1c4] sm:$0xf]  ;;  %v3442_v62 = vadd.f32 %v3441_v14, %v3428_v36  ;;  %v8149_v30 = vor.u32 %v9790_v27, %v8146_v22  ;;  %v8258_v14 = vld [vmem:[#allocation9 + $0x150] sm:$0xf0]  ;;  %v9056_v46 = vld [vmem:[#allocation9 + $0x780] sm:$0xf] }
 0x27b   : > { %5342 = vmatpush.bf16.msrb.mxu2 %v8913_v18  ;;  %v11136_v58 = vpack.c.bf16 %v3696_v0, %v3688_v2  ;;  %v8325_v15 = vor.u32 %v9834_v29, %v8322_v37  ;;  %v3468_v57 = vadd.f32 %v3467_v51, %v3454_v42  ;;  %v8162_v18 = vld [vmem:[#allocation9 + $0x90] sm:$0xf0]  ;;  %v9822_v12 = vld [vmem:[#allocation9 + $0x164] sm:$0xf]  ;;  %5352 = vmatpush.bf16.msrb.mxu0 %v9105_v11  ;;  %v10020_v26 = vld [vmem:[#allocation9 + $0x78c] sm:$0xf0] }
 0x27c   : > { %v3456_v20 = vadd.f32 %v3455_v35, %v3442_v62  ;;  %v8165_v5 = vor.u32 %v9794_v55, %v8162_v18  ;;  %v8277_v3 = vor.u32 %v9822_v12, %v8274_v43  ;;  %v9786_v9 = vld [vmem:[#allocation9 + $0x44] sm:$0xf]  ;;  %v8418_v29 = vld [vmem:[#allocation9 + $0x290] sm:$0xf0]  ;;  %v10016_v39 = vld [vmem:[#allocation9 + $0x76c] sm:$0xf0] }
 0x27d   : > { %5315 = vmatpush.bf16.msrb.mxu3 %v8641_v13  ;;  %v8864_v13 = vld [vmem:[#allocation9 + $0x600] sm:$0xf]  ;;  %v3673_v32 = vmul.f32 0.2, %v3468_v57  ;;  %v9818_v2 = vld [vmem:[#allocation9 + $0x144] sm:$0xf]  ;;  %v8133_v4 = vor.u32 %v9786_v9, %v8130_v8 }
 0x27e   : > { %5329 = vmatpush.bf16.msrb.mxu1 %v8769_v19  ;;  %v8306_v19 = vld [vmem:[#allocation9 + $0x1b0] sm:$0xf0]  ;;  %v8865_v47 = vor.u32 %v9972_v61, %v8864_v13  ;;  %v9858_v51 = vld [vmem:[#allocation9 + $0x284] sm:$0xf]  ;;  %v8261_v42 = vor.u32 %v9818_v2, %v8258_v14  ;;  %v875_v11 = vperm.slane %v10987_v56, 6 }
 0x27f   : > { %5343 = vmatpush.bf16.msrb.mxu2 %v8897_v17  ;;  %v8309_v25 = vor.u32 %v9830_v60, %v8306_v19  ;;  %v8434_v17 = vld [vmem:[#allocation9 + $0x2b0] sm:$0xf0]  ;;  %v8421_v37 = vor.u32 %v9858_v51, %v8418_v29  ;;  %v9782_v62 = vld [vmem:[#allocation9 + $0x24] sm:$0xf] }
 0x280   : > { %v9814_v60 = vld [vmem:[#allocation9 + $0x124] sm:$0xf]  ;;  %v8242_v61 = vld [vmem:[#allocation9 + $0x130] sm:$0xf0] }
 0x281   : > { %5316 = vmatpush.bf16.msrb.mxu3 %v8625_v48  ;;  %v8290_v48 = vld [vmem:[#allocation9 + $0x190] sm:$0xf0]  ;;  %v11142_v13 = vpop.f32.mrf.mxu0  ;;  %v9854_v35 = vld [vmem:[#allocation9 + $0x264] sm:$0xf]  ;;  %v8245_v18 = vor.u32 %v9814_v60, %v8242_v61 }
 0x282   : > { %5330 = vmatpush.bf16.msrb.mxu1 %v8753_v10  ;;  %v3469_v23 = vpop.f32.mrf.mxu3  ;;  %v8293_v31 = vor.u32 %v9826_v24, %v8290_v48  ;;  %v8402_v19 = vld [vmem:[#allocation9 + $0x270] sm:$0xf0]  ;;  %v9934_v48 = vld [vmem:[#allocation9 + $0x4e4] sm:$0xf] }
 0x283   : > { %5344 = vmatpush.bf16.msrb.mxu2 %v8881_v7  ;;  %v3470_v10 = vadd.f32 %v3469_v23, %v3456_v20  ;;  %v9072_v7 = vld [vmem:[#allocation9 + $0x7a0] sm:$0xf]  ;;  %v8098_v55 = vld [vmem:[#allocation9 + $0x10] sm:$0xf0]  ;;  %v9810_v20 = vld [vmem:[#allocation9 + $0x104] sm:$0xf] }
 0x284   : > { %v8226_v24 = vld [vmem:[#allocation9 + $0x110] sm:$0xf0]  ;;  %v9966_v50 = vld [vmem:[#allocation9 + $0x5e4] sm:$0xf] }
 0x285   : > { %5317 = vmatpush.bf16.msrb.mxu3 %v8609_v16  ;;  %v3681_v1 = vmul.f32 0.2, %v3470_v10  ;;  %v3689_v16 = vmax.f32 %v3468_v57, %v3673_v32  ;;  %v3481_v57 = vpop.f32.mrf.mxu1  ;;  %v8722_v23 = vld [vmem:[#allocation9 + $0x4f0] sm:$0xf0]  ;;  %v9850_v63 = vld [vmem:[#allocation9 + $0x244] sm:$0xf] }
 0x286   : > { %5331 = vmatpush.bf16.msrb.mxu1 %v8737_v41  ;;  %v8437_v41 = vor.u32 %v9862_v40, %v8434_v17  ;;  %v8386_v33 = vld [vmem:[#allocation9 + $0x250] sm:$0xf0]  ;;  %v9930_v22 = vld [vmem:[#allocation9 + $0x4c4] sm:$0xf] }
 0x287   : > { %5345 = vmatpush.bf16.msrb.mxu2 %v8865_v47  ;;  %v3697_v0 = vmax.f32 %v3470_v10, %v3681_v1  ;;  %v8405_v47 = vor.u32 %v9854_v35, %v8402_v19  ;;  %v8850_v32 = vld [vmem:[#allocation9 + $0x5f0] sm:$0xf0]  ;;  %v8389_v10 = vor.u32 %v9850_v63, %v8386_v33  ;;  %v8229_v1 = vor.u32 %v9810_v20, %v8226_v24  ;;  %v9962_v17 = vld [vmem:[#allocation9 + $0x5c4] sm:$0xf] }
 0x288   : > { %5318 = vmatmul.bf16.vlgmr.msrb.gmra.mxu3 %v11136_v58  ;;  %v8706_v12 = vld [vmem:[#allocation9 + $0x4d0] sm:$0xf0]  ;;  %v8853_v40 = vor.u32 %v9966_v50, %v8850_v32  ;;  %v9926_v9 = vld [vmem:[#allocation9 + $0x4a4] sm:$0xf] }
 0x289   : > { %5366 = vmatpush.bf16.msra.mxu3 %v8213_v53  ;;  %v9088_v53 = vld [vmem:[#allocation9 + $0x7c0] sm:$0xf]  ;;  %v8690_v8 = vld [vmem:[#allocation9 + $0x4b0] sm:$0xf0]  ;;  %v9958_v51 = vld [vmem:[#allocation9 + $0x5a4] sm:$0xf] }
 0x28a   : > { %5380 = vmatpush.bf16.msra.mxu1 %v8341_v54  ;;  %v9089_v36 = vor.u32 %v10028_v49, %v9088_v53  ;;  %v11139_v54 = vpack.c.bf16 %v3697_v0, %v3689_v16  ;;  %v3495_v43 = vpop.f32.mrf.mxu3  ;;  %v9846_v16 = vld [vmem:[#allocation9 + $0x224] sm:$0xf]  ;;  %v8370_v0 = vld [vmem:[#allocation9 + $0x230] sm:$0xf0]  ;;  %v9024_v49 = vld [vmem:[#allocation9 + $0x740] sm:$0xf] }
 0x28b   : > { %5394 = vmatpush.bf16.msra.mxu2 %v8469_v6  ;;  %v8373_v53 = vor.u32 %v9846_v16, %v8370_v0  ;;  %v9842_v29 = vld [vmem:[#allocation9 + $0x204] sm:$0xf]  ;;  %v8674_v35 = vld [vmem:[#allocation9 + $0x490] sm:$0xf0] }
 0x28c   : > { %5353 = vmatpush.bf16.msrb.mxu0 %v9089_v36  ;;  %5332 = vmatmul.bf16.vlgmr.msrb.gmra.mxu1 %v11139_v54  ;;  %v11145_v36 = vpop.f32.mrf.mxu0  ;;  %v9922_v61 = vld [vmem:[#allocation9 + $0x484] sm:$0xf]  ;;  %v8658_v32 = vld [vmem:[#allocation9 + $0x470] sm:$0xf0] }
 0x28d   : > { %5367 = vmatpush.bf16.msra.mxu3 %v8197_v38  ;;  %v10024_v38 = vld [vmem:[#allocation9 + $0x7ac] sm:$0xf0]  ;;  %v3483_v2 = vpop.f32.mrf.mxu1  ;;  %v9954_v19 = vld [vmem:[#allocation9 + $0x584] sm:$0xf]  ;;  %v8770_v16 = vld [vmem:[#allocation9 + $0x550] sm:$0xf0] }
 0x28e   : > { %5381 = vmatpush.bf16.msra.mxu1 %v8325_v15  ;;  %v9073_v52 = vor.u32 %v10024_v38, %v9072_v7  ;;  %v8114_v15 = vld [vmem:[#allocation9 + $0x30] sm:$0xf0]  ;;  %v3482_v7 = vadd.f32 %v3481_v57, %v875_v11  ;;  %v8992_v57 = vld [vmem:[#allocation9 + $0x700] sm:$0xf]  ;;  %v3484_v24 = vadd.f32 %v3483_v2, %v875_v11  ;;  %v9918_v33 = vld [vmem:[#allocation9 + $0x464] sm:$0xf] }
 0x28f   : > { %5395 = vmatpush.bf16.msra.mxu2 %v8453_v44  ;;  %v8117_v6 = vor.u32 %v9782_v62, %v8114_v15  ;;  %v9040_v44 = vld [vmem:[#allocation9 + $0x760] sm:$0xf]  ;;  %v8818_v38 = vld [vmem:[#allocation9 + $0x5b0] sm:$0xf0]  ;;  %v8693_v15 = vor.u32 %v9926_v9, %v8690_v8  ;;  %v9910_v2 = vld [vmem:[#allocation9 + $0x424] sm:$0xf] }
 0x290   : > { %5354 = vmatpush.bf16.msrb.mxu0 %v9073_v52  ;;  %v9041_v27 = vor.u32 %v10016_v39, %v9040_v44  ;;  %v9008_v52 = vld [vmem:[#allocation9 + $0x720] sm:$0xf]  ;;  %v8821_v60 = vor.u32 %v9958_v51, %v8818_v38  ;;  %v9950_v44 = vld [vmem:[#allocation9 + $0x564] sm:$0xf]  ;;  %v8786_v39 = vld [vmem:[#allocation9 + $0x570] sm:$0xf0] }
 0x291   : > { %5368 = vmatpush.bf16.msra.mxu3 %v8181_v21  ;;  %v9778_v21 = vld [vmem:[#allocation9 + $0x4] sm:$0xf] }
 0x292   : > { %5382 = vmatpush.bf16.msra.mxu1 %v8309_v25  ;;  %v9057_v25 = vor.u32 %v10020_v26, %v9056_v46  ;;  %v3523_v46 = vpop.f32.mrf.mxu2  ;;  %v8802_v26 = vld [vmem:[#allocation9 + $0x590] sm:$0xf0]  ;;  %v9890_v38 = vld [vmem:[#allocation9 + $0x384] sm:$0xf] }
 0x293   : > { %5396 = vmatpush.bf16.msra.mxu2 %v8437_v41  ;;  %v8834_v41 = vld [vmem:[#allocation9 + $0x5d0] sm:$0xf0]  ;;  %v8805_v63 = vor.u32 %v9954_v19, %v8802_v26  ;;  %v9809_v26 = vld [vmem:[#allocation9 + $0xf4] sm:$0xf0] }
 0x294   : > { %5355 = vmatpush.bf16.msrb.mxu0 %v9057_v25  ;;  %v8837_v14 = vor.u32 %v9962_v17, %v8834_v41  ;;  %v9902_v25 = vld [vmem:[#allocation9 + $0x3e4] sm:$0xf]  ;;  %v8562_v41 = vld [vmem:[#allocation9 + $0x3b0] sm:$0xf0] }
 0x295   : > { %5369 = vmatpush.bf16.msra.mxu3 %v8165_v5  ;;  %v8101_v5 = vor.u32 %v9778_v21, %v8098_v55  ;;  %v3497_v21 = vpop.f32.mrf.mxu3  ;;  %v11149_v55 = vpop.f32.mrf.mxu0  ;;  %v9946_v17 = vld [vmem:[#allocation9 + $0x544] sm:$0xf] }
 0x296   : > { %5383 = vmatpush.bf16.msra.mxu1 %v8293_v31  ;;  %v8725_v31 = vor.u32 %v9934_v48, %v8722_v23  ;;  %v8677_v48 = vor.u32 %v9922_v61, %v8674_v35  ;;  %v3537_v50 = vpop.f32.mrf.mxu1  ;;  %v8773_v8 = vor.u32 %v9946_v17, %v8770_v16  ;;  %v9938_v61 = vld [vmem:[#allocation9 + $0x504] sm:$0xf]  ;;  %v8738_v35 = vld [vmem:[#allocation9 + $0x510] sm:$0xf0] }
 0x297   : > { %5397 = vmatpush.bf16.msra.mxu2 %v8421_v37  ;;  %v8354_v37 = vld [vmem:[#allocation9 + $0x210] sm:$0xf0] }
 0x298   : > { %5356 = vmatpush.bf16.msrb.mxu0 %v9041_v27  ;;  %v8578_v27 = vld [vmem:[#allocation9 + $0x3d0] sm:$0xf0] }
 0x299   : > { %5370 = vmatpush.bf16.msra.mxu3 %v8149_v30  ;;  %v10012_v30 = vld [vmem:[#allocation9 + $0x74c] sm:$0xf0] }
 0x29a   : > { %5384 = vmatpush.bf16.msra.mxu1 %v8277_v3  ;;  %v9025_v56 = vor.u32 %v10012_v30, %v9024_v49  ;;  %v8709_v3 = vor.u32 %v9930_v22, %v8706_v12  ;;  %v8789_v22 = vor.u32 %v9950_v44, %v8786_v39  ;;  %v9914_v12 = vld [vmem:[#allocation9 + $0x444] sm:$0xf]  ;;  %v8328_v44 = vld [vmem:[#allocation9 + $0x1c8] sm:$0xf] }
 0x29b   : > { %5398 = vmatpush.bf16.msra.mxu2 %v8405_v47  ;;  %v3496_v47 = vadd.f32 %v3495_v43, %v3482_v7  ;;  %v8642_v43 = vld [vmem:[#allocation9 + $0x450] sm:$0xf0] }
 0x29c   : > { %5357 = vmatpush.bf16.msrb.mxu0 %v9025_v56  ;;  %v8645_v30 = vor.u32 %v9914_v12, %v8642_v43  ;;  %v8978_v12 = vld [vmem:[#allocation9 + $0x6f0] sm:$0xf0] }
 0x29d   : > { %5371 = vmatpush.bf16.msra.mxu3 %v8133_v4  ;;  %v8357_v4 = vor.u32 %v9842_v29, %v8354_v37  ;;  %v3551_v0 = vpop.f32.mrf.mxu3  ;;  %v3567_v9 = vpop.f32.mrf.mxu0  ;;  %v9942_v29 = vld [vmem:[#allocation9 + $0x524] sm:$0xf]  ;;  %v8754_v37 = vld [vmem:[#allocation9 + $0x530] sm:$0xf0] }
 0x29e   : > { %5385 = vmatpush.bf16.msra.mxu1 %v8261_v42  ;;  %v10008_v42 = vld [vmem:[#allocation9 + $0x72c] sm:$0xf0]  ;;  %v3539_v7 = vpop.f32.mrf.mxu1 }
 0x29f   : > { %5399 = vmatpush.bf16.msra.mxu2 %v8389_v10  ;;  %v9009_v62 = vor.u32 %v10008_v42, %v9008_v52  ;;  %v3510_v10 = vadd.f32 %v11142_v13, %v3496_v47  ;;  %v9894_v13 = vld [vmem:[#allocation9 + $0x3a4] sm:$0xf] }
 0x2a0   : > { %v8565_v56 = vor.u32 %v9894_v13, %v8562_v41  ;;  %v9906_v42 = vld [vmem:[#allocation9 + $0x404] sm:$0xf]  ;;  %v8184_v13 = vld [vmem:[#allocation9 + $0xa8] sm:$0xf]  ;;  %v9801_v41 = vld [vmem:[#allocation9 + $0xb4] sm:$0xf0] }
 0x2a1   : > { %5372 = vmatpush.bf16.msra.mxu3 %v8117_v6  ;;  %5358 = vmatpush.bf16.msrb.mxu0 %v9009_v62  ;;  %v10004_v6 = vld [vmem:[#allocation9 + $0x70c] sm:$0xf0] }
 0x2a2   : > { %5386 = vmatpush.bf16.msra.mxu1 %v8245_v18  ;;  %v8993_v20 = vor.u32 %v10004_v6, %v8992_v57  ;;  %v8594_v18 = vld [vmem:[#allocation9 + $0x3f0] sm:$0xf0]  ;;  %v8344_v57 = vld [vmem:[#allocation9 + $0x1e8] sm:$0xf] }
 0x2a3   : > { %5400 = vmatpush.bf16.msra.mxu2 %v8373_v53  ;;  %v8597_v23 = vor.u32 %v9902_v25, %v8594_v18  ;;  %v8530_v25 = vld [vmem:[#allocation9 + $0x370] sm:$0xf0] }
 0x2a5   : > { %5373 = vmatpush.bf16.msra.mxu3 %v8101_v5  ;;  %5359 = vmatpush.bf16.msrb.mxu0 %v8993_v20  ;;  %v9898_v5 = vld [vmem:[#allocation9 + $0x3c4] sm:$0xf]  ;;  %v3553_v6 = vpop.f32.mrf.mxu3  ;;  %v11154_v39 = vpop.f32.mrf.mxu0 }
 0x2a6   : > { %5387 = vmatpush.bf16.msra.mxu1 %v8229_v1  ;;  %v3498_v1 = vadd.f32 %v3497_v21, %v3484_v24  ;;  %v8581_v11 = vor.u32 %v9898_v5, %v8578_v27  ;;  %v9841_v21 = vld [vmem:[#allocation9 + $0x1f4] sm:$0xf0]  ;;  %v9886_v20 = vld [vmem:[#allocation9 + $0x364] sm:$0xf] }
 0x2a7   : > { %5401 = vmatpush.bf16.msra.mxu2 %v8357_v4  ;;  %v8546_v4 = vld [vmem:[#allocation9 + $0x390] sm:$0xf0]  ;;  %v9837_v5 = vld [vmem:[#allocation9 + $0x1d4] sm:$0xf0]  ;;  %v9882_v27 = vld [vmem:[#allocation9 + $0x344] sm:$0xf] }
 0x2a8   : > { %5374 = vmatmul.bf16.vlgmr.msra.gmra.mxu3 %v11112_v45  ;;  %v3512_v53 = vadd.f32 %v11145_v36, %v3498_v1  ;;  %v8549_v62 = vor.u32 %v9890_v38, %v8546_v4  ;;  %v8514_v1 = vld [vmem:[#allocation9 + $0x350] sm:$0xf0]  ;;  %v8168_v38 = vld [vmem:[#allocation9 + $0x88] sm:$0xf]  ;;  %v9797_v4 = vld [vmem:[#allocation9 + $0x94] sm:$0xf0] }
 0x2a9   : > { %5422 = vmatpush.bf16.msrb.mxu3 %v8725_v31  ;;  %5388 = vmatmul.bf16.vlgmr.msra.gmra.mxu1 %v11115_v28  ;;  %v8661_v31 = vor.u32 %v9918_v33, %v8658_v32  ;;  %v8517_v43 = vor.u32 %v9882_v27, %v8514_v1 }
 0x2aa   : > { %5436 = vmatpush.bf16.msrb.mxu1 %v8853_v40  ;;  %5408 = vmatpush.bf16.msra.mxu0 %v8597_v23  ;;  %v3524_v40 = vadd.f32 %v3523_v46, %v3510_v10  ;;  %v8216_v46 = vld [vmem:[#allocation9 + $0xe8] sm:$0xf]  ;;  %v8741_v23 = vor.u32 %v9938_v61, %v8738_v35  ;;  %v8345_v10 = vor.u32 %v9841_v21, %v8344_v57  ;;  %v9990_v35 = vld [vmem:[#allocation9 + $0x6a4] sm:$0xf] }
 0x2ab   : > { %v8152_v21 = vld [vmem:[#allocation9 + $0x68] sm:$0xf] }
 0x2ac   : > { %v3538_v49 = vadd.f32 %v3537_v50, %v3524_v40  ;;  %v8217_v50 = vor.u32 %v9809_v26, %v8216_v46  ;;  %v8169_v26 = vor.u32 %v9797_v4, %v8168_v38  ;;  %v8728_v4 = vld [vmem:[#allocation9 + $0x4e8] sm:$0xf] }
 0x2ad   : > { %5423 = vmatpush.bf16.msrb.mxu3 %v8709_v3  ;;  %v3525_v3 = vpop.f32.mrf.mxu2  ;;  %v3595_v46 = vpop.f32.mrf.mxu0 }
 0x2ae   : > { %5437 = vmatpush.bf16.msrb.mxu1 %v8837_v14  ;;  %5409 = vmatpush.bf16.msra.mxu0 %v8581_v11  ;;  %v8626_v14 = vld [vmem:[#allocation9 + $0x430] sm:$0xf0]  ;;  %v3552_v51 = vadd.f32 %v3551_v0, %v3538_v49  ;;  %v3526_v52 = vadd.f32 %v3525_v3, %v3512_v53  ;;  %v8329_v0 = vor.u32 %v9837_v5, %v8328_v44  ;;  %v8312_v53 = vld [vmem:[#allocation9 + $0x1a8] sm:$0xf]  ;;  %v9821_v5 = vld [vmem:[#allocation9 + $0x154] sm:$0xf0] }
 0x2af   : > { %v8629_v36 = vor.u32 %v9910_v2, %v8626_v14  ;;  %v8498_v3 = vld [vmem:[#allocation9 + $0x330] sm:$0xf0]  ;;  %v9994_v14 = vld [vmem:[#allocation9 + $0x6c4] sm:$0xf]  ;;  %v8264_v44 = vld [vmem:[#allocation9 + $0x148] sm:$0xf] }
 0x2b0   : > { %v3540_v19 = vadd.f32 %v3539_v7, %v3526_v52  ;;  %v3566_v47 = vadd.f32 %v11149_v55, %v3552_v51  ;;  %v9805_v55 = vld [vmem:[#allocation9 + $0xd4] sm:$0xf0]  ;;  %v8962_v51 = vld [vmem:[#allocation9 + $0x6d0] sm:$0xf0]  ;;  %v8296_v52 = vld [vmem:[#allocation9 + $0x188] sm:$0xf] }
 0x2b1   : > { %5424 = vmatpush.bf16.msrb.mxu3 %v8693_v15  ;;  %v8757_v15 = vor.u32 %v9942_v29, %v8754_v37  ;;  %v8185_v37 = vor.u32 %v9801_v41, %v8184_v13 }
 0x2b2   : > { %5438 = vmatpush.bf16.msrb.mxu1 %v8821_v60  ;;  %5410 = vmatpush.bf16.msra.mxu0 %v8565_v56  ;;  %v8610_v60 = vld [vmem:[#allocation9 + $0x410] sm:$0xf0]  ;;  %v3554_v18 = vadd.f32 %v3553_v6, %v3540_v19  ;;  %v3674_v33 = vmul.f32 0.2, %v3566_v47  ;;  %v9878_v56 = vld [vmem:[#allocation9 + $0x324] sm:$0xf] }
 0x2b3   : > { %v8613_v24 = vor.u32 %v9906_v42, %v8610_v60  ;;  %v8501_v29 = vor.u32 %v9878_v56, %v8498_v3  ;;  %v9829_v42 = vld [vmem:[#allocation9 + $0x194] sm:$0xf0]  ;;  %v8946_v19 = vld [vmem:[#allocation9 + $0x6b0] sm:$0xf0] }
 0x2b4   : > { %v3568_v32 = vadd.f32 %v3567_v9, %v3554_v18  ;;  %v3690_v17 = vmax.f32 %v3566_v47, %v3674_v33  ;;  %v8297_v6 = vor.u32 %v9829_v42, %v8296_v52  ;;  %v8280_v18 = vld [vmem:[#allocation9 + $0x168] sm:$0xf]  ;;  %v8898_v56 = vld [vmem:[#allocation9 + $0x650] sm:$0xf0]  ;;  %v9937_v52 = vld [vmem:[#allocation9 + $0x4f4] sm:$0xf0] }
 0x2b5   : > { %5425 = vmatpush.bf16.msrb.mxu3 %v8677_v48  ;;  %v8533_v48 = vor.u32 %v9886_v20, %v8530_v25  ;;  %v3579_v11 = vpop.f32.mrf.mxu2  ;;  %v9793_v20 = vld [vmem:[#allocation9 + $0x74] sm:$0xf0]  ;;  %v8949_v25 = vor.u32 %v9990_v35, %v8946_v19 }
 0x2b6   : > { %5439 = vmatpush.bf16.msrb.mxu1 %v8805_v63  ;;  %5411 = vmatpush.bf16.msra.mxu0 %v8549_v62  ;;  %v8200_v63 = vld [vmem:[#allocation9 + $0xc8] sm:$0xf]  ;;  %v9874_v62 = vld [vmem:[#allocation9 + $0x304] sm:$0xf] }
 0x2b7   : > { %v8201_v40 = vor.u32 %v9805_v55, %v8200_v63  ;;  %v8153_v63 = vor.u32 %v9793_v20, %v8152_v21 }
 0x2b9   : > { %5426 = vmatpush.bf16.msrb.mxu3 %v8661_v31  ;;  %v3682_v31 = vmul.f32 0.2, %v3568_v32 }
 0x2ba   : > { %5440 = vmatpush.bf16.msrb.mxu1 %v8789_v22  ;;  %5412 = vmatpush.bf16.msra.mxu0 %v8533_v48  ;;  %v9998_v22 = vld [vmem:[#allocation9 + $0x6e4] sm:$0xf] }
 0x2bb   : > { %v3698_v16 = vmax.f32 %v3568_v32, %v3682_v31  ;;  %v8981_v49 = vor.u32 %v9998_v22, %v8978_v12  ;;  %v8136_v32 = vld [vmem:[#allocation9 + $0x48] sm:$0xf]  ;;  %v9982_v31 = vld [vmem:[#allocation9 + $0x664] sm:$0xf] }
 0x2bd   : > { %5427 = vmatpush.bf16.msrb.mxu3 %v8645_v30  ;;  %v9833_v30 = vld [vmem:[#allocation9 + $0x1b4] sm:$0xf0]  ;;  %v11157_v9 = vpack.c.bf16 %v3698_v16, %v3690_v17  ;;  %v3581_v57 = vpop.f32.mrf.mxu2  ;;  %v8265_v17 = vor.u32 %v9821_v5, %v8264_v44  ;;  %v8120_v16 = vld [vmem:[#allocation9 + $0x28] sm:$0xf] }
 0x2be   : > { %5441 = vmatpush.bf16.msrb.mxu1 %v8773_v8  ;;  %5413 = vmatpush.bf16.msra.mxu0 %v8517_v43  ;;  %v10252_v8 = vld [vmem:[#allocation8] sm:$0xff]  ;;  %v8313_v7 = vor.u32 %v9833_v30, %v8312_v53  ;;  %v8248_v53 = vld [vmem:[#allocation9 + $0x128] sm:$0xf]  ;;  %v9978_v30 = vld [vmem:[#allocation9 + $0x644] sm:$0xf] }
 0x2bf   : > { %v876_v2 = vperm.slane %v10252_v8, 7  ;;  %5346 = vmatmul.bf16.vlgmr.msrb.gmra.mxu2 %v11157_v9  ;;  %v8901_v38 = vor.u32 %v9978_v30, %v8898_v56  ;;  %v8680_v56 = vld [vmem:[#allocation9 + $0x488] sm:$0xf] }
 0x2c0   : > { %5450 = vmatpush.bf16.msrb.mxu2 %v8981_v49  ;;  %v9817_v49 = vld [vmem:[#allocation9 + $0x134] sm:$0xf0] }
 0x2c1   : > { %5428 = vmatpush.bf16.msrb.mxu3 %v8629_v36  ;;  %v8965_v36 = vor.u32 %v9994_v14, %v8962_v51  ;;  %v3580_v60 = vadd.f32 %v3579_v11, %v876_v2  ;;  %v3607_v61 = vpop.f32.mrf.mxu1  ;;  %v8914_v11 = vld [vmem:[#allocation9 + $0x670] sm:$0xf0]  ;;  %v8104_v14 = vld [vmem:[#allocation9 + $0x8] sm:$0xf] }
 0x2c2   : > { %5442 = vmatpush.bf16.msrb.mxu1 %v8757_v15  ;;  %5414 = vmatpush.bf16.msra.mxu0 %v8501_v29  ;;  %v8482_v15 = vld [vmem:[#allocation9 + $0x310] sm:$0xf0]  ;;  %v8917_v41 = vor.u32 %v9982_v31, %v8914_v11  ;;  %v9781_v29 = vld [vmem:[#allocation9 + $0x14] sm:$0xf0]  ;;  %v8696_v31 = vld [vmem:[#allocation9 + $0x4a8] sm:$0xf] }
 0x2c3   : > { %v8485_v47 = vor.u32 %v9874_v62, %v8482_v15  ;;  %v3594_v48 = vadd.f32 %v11154_v39, %v3580_v60  ;;  %v3582_v39 = vadd.f32 %v3581_v57, %v876_v2  ;;  %v8249_v2 = vor.u32 %v9817_v49, %v8248_v53  ;;  %v9969_v15 = vld [vmem:[#allocation9 + $0x5f4] sm:$0xf0]  ;;  %v9974_v60 = vld [vmem:[#allocation9 + $0x624] sm:$0xf]  ;;  %v9106_v53 = vld [vmem:[#allocation9 + $0x7f0] sm:$0xf0] }
 0x2c4   : > { %5451 = vmatpush.bf16.msrb.mxu2 %v8965_v36  ;;  %v8856_v36 = vld [vmem:[#allocation9 + $0x5e8] sm:$0xf]  ;;  %v8729_v57 = vor.u32 %v9937_v52, %v8728_v4  ;;  %v9929_v11 = vld [vmem:[#allocation9 + $0x4b4] sm:$0xf0]  ;;  %v10026_v52 = vld [vmem:[#allocation9 + $0x7c4] sm:$0xf] }
 0x2c5   : > { %5429 = vmatpush.bf16.msrb.mxu3 %v8613_v24  ;;  %v9825_v24 = vld [vmem:[#allocation9 + $0x174] sm:$0xf0]  ;;  %v3608_v27 = vadd.f32 %v3607_v61, %v3594_v48  ;;  %v3596_v51 = vadd.f32 %v3595_v46, %v3582_v39  ;;  %v8882_v61 = vld [vmem:[#allocation9 + $0x630] sm:$0xf0]  ;;  %v8857_v21 = vor.u32 %v9969_v15, %v8856_v36  ;;  %v8824_v39 = vld [vmem:[#allocation9 + $0x5a8] sm:$0xf] }
 0x2c6   : > { %5443 = vmatpush.bf16.msrb.mxu1 %v8741_v23  ;;  %5415 = vmatpush.bf16.msra.mxu0 %v8485_v47  ;;  %v9986_v23 = vld [vmem:[#allocation9 + $0x684] sm:$0xf]  ;;  %v8281_v33 = vor.u32 %v9825_v24, %v8280_v18  ;;  %v8105_v47 = vor.u32 %v9781_v29, %v8104_v14  ;;  %v8885_v20 = vor.u32 %v9974_v60, %v8882_v61  ;;  %v9933_v18 = vld [vmem:[#allocation9 + $0x4d4] sm:$0xf0]  ;;  %v8840_v24 = vld [vmem:[#allocation9 + $0x5c8] sm:$0xf] }
 0x2c7   : > { %v8808_v14 = vld [vmem:[#allocation9 + $0x588] sm:$0xf]  ;;  %v9921_v60 = vld [vmem:[#allocation9 + $0x474] sm:$0xf0] }
 0x2c8   : > { %5430 = vmatmul.bf16.vlgmr.msrb.gmra.mxu3 %v11136_v58  ;;  %5452 = vmatpush.bf16.msrb.mxu2 %v8949_v25  ;;  %v8712_v25 = vld [vmem:[#allocation9 + $0x4c8] sm:$0xf] }
 0x2c9   : > { %5478 = vmatpush.bf16.msra.mxu3 %v8217_v50  ;;  %5444 = vmatmul.bf16.vlgmr.msrb.gmra.mxu1 %v11139_v54  ;;  %v8930_v50 = vld [vmem:[#allocation9 + $0x690] sm:$0xf0]  ;;  %v3609_v1 = vpop.f32.mrf.mxu1  ;;  %v3649_v13 = vpop.f32.mrf.mxu0  ;;  %v8713_v5 = vor.u32 %v9933_v18, %v8712_v25  ;;  %v8664_v15 = vld [vmem:[#allocation9 + $0x468] sm:$0xf]  ;;  %v9917_v18 = vld [vmem:[#allocation9 + $0x454] sm:$0xf0] }
 0x2ca   : > { %5492 = vmatpush.bf16.msra.mxu1 %v8345_v10  ;;  %v9789_v10 = vld [vmem:[#allocation9 + $0x54] sm:$0xf0]  ;;  %v8933_v55 = vor.u32 %v9986_v23, %v8930_v50  ;;  %v3610_v42 = vadd.f32 %v3609_v1, %v3596_v51  ;;  %v9970_v50 = vld [vmem:[#allocation9 + $0x604] sm:$0xf]  ;;  %v8648_v25 = vld [vmem:[#allocation9 + $0x448] sm:$0xf] }
 0x2cb   : > { %v3621_v22 = vpop.f32.mrf.mxu3  ;;  %v8137_v12 = vor.u32 %v9789_v10, %v8136_v32  ;;  %v9965_v23 = vld [vmem:[#allocation9 + $0x5d4] sm:$0xf0]  ;;  %v8472_v10 = vld [vmem:[#allocation9 + $0x2e8] sm:$0xf] }
 0x2cc   : > { %v3622_v43 = vadd.f32 %v3621_v22, %v3608_v27  ;;  %5453 = vmatpush.bf16.msrb.mxu2 %v8933_v55  ;;  %v9873_v55 = vld [vmem:[#allocation9 + $0x2f4] sm:$0xf0]  ;;  %v8841_v27 = vor.u32 %v9965_v23, %v8840_v24 }
 0x2cd   : > { %5479 = vmatpush.bf16.msra.mxu3 %v8201_v40  ;;  %v3635_v40 = vpop.f32.mrf.mxu2  ;;  %v9957_v51 = vld [vmem:[#allocation9 + $0x594] sm:$0xf0] }
 0x2ce   : > { %5493 = vmatpush.bf16.msra.mxu1 %v8329_v0  ;;  %v9785_v0 = vld [vmem:[#allocation9 + $0x34] sm:$0xf0]  ;;  %v3636_v3 = vadd.f32 %v3635_v40, %v3622_v43 }
 0x2cf   : > { %v8121_v8 = vor.u32 %v9785_v0, %v8120_v16  ;;  %5402 = vmatmul.bf16.vlgmr.msra.gmra.mxu2 %v11117_v34  ;;  %v9961_v43 = vld [vmem:[#allocation9 + $0x5b4] sm:$0xf0]  ;;  %v8456_v16 = vld [vmem:[#allocation9 + $0x2c8] sm:$0xf] }
 0x2d0   : > { %5454 = vmatpush.bf16.msrb.mxu2 %v8917_v41  ;;  %v3650_v35 = vadd.f32 %v3649_v13, %v3636_v3  ;;  %v9869_v0 = vld [vmem:[#allocation9 + $0x2d4] sm:$0xf0]  ;;  %v8697_v13 = vor.u32 %v9929_v11, %v8696_v31  ;;  %v10030_v41 = vld [vmem:[#allocation9 + $0x7e4] sm:$0xf]  ;;  %v8825_v30 = vor.u32 %v9961_v43, %v8824_v39  ;;  %v8760_v31 = vld [vmem:[#allocation9 + $0x528] sm:$0xf] }
 0x2d1   : > { %5480 = vmatpush.bf16.msra.mxu3 %v8185_v37  ;;  %v8232_v37 = vld [vmem:[#allocation9 + $0x108] sm:$0xf]  ;;  %v3663_v62 = vpop.f32.mrf.mxu1  ;;  %v9925_v3 = vld [vmem:[#allocation9 + $0x494] sm:$0xf0] }
 0x2d2   : > { %5494 = vmatpush.bf16.msra.mxu1 %v8313_v7  ;;  %v9813_v7 = vld [vmem:[#allocation9 + $0x114] sm:$0xf0]  ;;  %v3664_v32 = vadd.f32 %v3663_v62, %v3650_v35  ;;  %v8681_v4 = vor.u32 %v9925_v3, %v8680_v56  ;;  %v9090_v62 = vld [vmem:[#allocation9 + $0x7d0] sm:$0xf0]  ;;  %v8792_v35 = vld [vmem:[#allocation9 + $0x568] sm:$0xf] }
 0x2d3   : > { %v3623_v19 = vpop.f32.mrf.mxu3  ;;  %v9949_v23 = vld [vmem:[#allocation9 + $0x554] sm:$0xf0]  ;;  %v8218_v56 = vld [vmem:[#allocation9 + $0xf8] sm:$0xf0]  ;;  %v9839_v3 = vld [vmem:[#allocation9 + $0x1ec] sm:$0xf] }
 0x2d4   : > { %v3624_v46 = vadd.f32 %v3623_v19, %v3610_v42  ;;  %5455 = vmatpush.bf16.msrb.mxu2 %v8901_v38  ;;  %v3675_v40 = vmul.f32 0.2, %v3664_v32  ;;  %v9109_v38 = vor.u32 %v10030_v41, %v9106_v53  ;;  %v8809_v42 = vor.u32 %v9957_v51, %v8808_v14  ;;  %v9953_v19 = vld [vmem:[#allocation9 + $0x574] sm:$0xf0]  ;;  %v8744_v41 = vld [vmem:[#allocation9 + $0x508] sm:$0xf] }
 0x2d5   : > { %5481 = vmatpush.bf16.msra.mxu3 %v8169_v26  ;;  %v8233_v26 = vor.u32 %v9813_v7, %v8232_v37  ;;  %v8440_v37 = vld [vmem:[#allocation9 + $0x2a8] sm:$0xf]  ;;  %v9865_v7 = vld [vmem:[#allocation9 + $0x2b4] sm:$0xf0] }
 0x2d6   : > { %5495 = vmatpush.bf16.msra.mxu1 %v8297_v6  ;;  %v3637_v6 = vpop.f32.mrf.mxu2  ;;  %v8441_v61 = vor.u32 %v9865_v7, %v8440_v37  ;;  %v9945_v11 = vld [vmem:[#allocation9 + $0x534] sm:$0xf0]  ;;  %v8376_v14 = vld [vmem:[#allocation9 + $0x228] sm:$0xf] }
 0x2d7   : > { %v3638_v48 = vadd.f32 %v3637_v6, %v3624_v46  ;;  %v9861_v46 = vld [vmem:[#allocation9 + $0x294] sm:$0xf0]  ;;  %v10022_v6 = vld [vmem:[#allocation9 + $0x7a4] sm:$0xf] }
 0x2d8   : > { %5456 = vmatpush.bf16.msrb.mxu2 %v8885_v20  ;;  %v9074_v20 = vld [vmem:[#allocation9 + $0x7b0] sm:$0xf0]  ;;  %v9941_v53 = vld [vmem:[#allocation9 + $0x514] sm:$0xf0] }
 0x2d9   : > { %5482 = vmatpush.bf16.msra.mxu3 %v8153_v63  ;;  %v8866_v63 = vld [vmem:[#allocation9 + $0x610] sm:$0xf0]  ;;  %v3665_v22 = vpop.f32.mrf.mxu1  ;;  %v9849_v51 = vld [vmem:[#allocation9 + $0x234] sm:$0xf0]  ;;  %v8745_v37 = vor.u32 %v9941_v53, %v8744_v41 }
 0x2da   : > { %5496 = vmatpush.bf16.msra.mxu1 %v8281_v33  ;;  %v3651_v33 = vpop.f32.mrf.mxu0  ;;  %v8869_v1 = vor.u32 %v9970_v50, %v8866_v63  ;;  %v8408_v50 = vld [vmem:[#allocation9 + $0x268] sm:$0xf]  ;;  %v9857_v63 = vld [vmem:[#allocation9 + $0x274] sm:$0xf0] }
 0x2db   : > { %v3652_v44 = vadd.f32 %v3651_v33, %v3638_v48  ;;  %v8776_v48 = vld [vmem:[#allocation9 + $0x548] sm:$0xf]  ;;  %v9077_v33 = vor.u32 %v10022_v6, %v9074_v20  ;;  %v10006_v6 = vld [vmem:[#allocation9 + $0x724] sm:$0xf]  ;;  %v9901_v53 = vld [vmem:[#allocation9 + $0x3d4] sm:$0xf0] }
 0x2dc   : > { %5457 = vmatpush.bf16.msrb.mxu2 %v8869_v1  ;;  %v8409_v1 = vor.u32 %v9857_v63, %v8408_v50  ;;  %v8314_v50 = vld [vmem:[#allocation9 + $0x1b8] sm:$0xf0] }
 0x2dd   : > { %5483 = vmatpush.bf16.msra.mxu3 %v8137_v12  ;;  %v8473_v12 = vor.u32 %v9873_v55, %v8472_v10  ;;  %v10018_v10 = vld [vmem:[#allocation9 + $0x784] sm:$0xf]  ;;  %v8777_v55 = vor.u32 %v9949_v23, %v8776_v48  ;;  %v9831_v23 = vld [vmem:[#allocation9 + $0x1ac] sm:$0xf] }
 0x2de   : > { %5497 = vmatpush.bf16.msra.mxu1 %v8265_v17  ;;  %v3666_v17 = vadd.f32 %v3665_v22, %v3652_v44  ;;  %v9058_v44 = vld [vmem:[#allocation9 + $0x790] sm:$0xf0]  ;;  %v8392_v22 = vld [vmem:[#allocation9 + $0x248] sm:$0xf] }
 0x2df   : > { %5458 = vmatmul.bf16.vlgmr.msrb.gmra.mxu2 %v11157_v9  ;;  %v9061_v39 = vor.u32 %v10018_v10, %v9058_v44  ;;  %v8994_v44 = vld [vmem:[#allocation9 + $0x710] sm:$0xf0] }
 0x2e0   : > { %v3683_v49 = vmul.f32 0.2, %v3666_v17  ;;  %5506 = vmatpush.bf16.msra.mxu2 %v8473_v12  ;;  %v9853_v12 = vld [vmem:[#allocation9 + $0x254] sm:$0xf0] }
 0x2e1   : > { %5484 = vmatpush.bf16.msra.mxu3 %v8121_v8  ;;  %v8457_v8 = vor.u32 %v9869_v0, %v8456_v16  ;;  %v8616_v16 = vld [vmem:[#allocation9 + $0x408] sm:$0xf]  ;;  %v8761_v0 = vor.u32 %v9945_v11, %v8760_v31  ;;  %v9795_v31 = vld [vmem:[#allocation9 + $0x8c] sm:$0xf]  ;;  %v8170_v11 = vld [vmem:[#allocation9 + $0x98] sm:$0xf0] }
 0x2e2   : > { %5498 = vmatpush.bf16.msra.mxu1 %v8249_v2  ;;  %v3691_v2 = vmax.f32 %v3664_v32, %v3675_v40  ;;  %v3699_v29 = vmax.f32 %v3666_v17, %v3683_v49  ;;  %v8649_v32 = vor.u32 %v9917_v18, %v8648_v25  ;;  %v10014_v40 = vld [vmem:[#allocation9 + $0x764] sm:$0xf]  ;;  %v9042_v17 = vld [vmem:[#allocation9 + $0x770] sm:$0xf0]  ;;  %v8393_v49 = vor.u32 %v9853_v12, %v8392_v22  ;;  %v9799_v18 = vld [vmem:[#allocation9 + $0xac] sm:$0xf] }
 0x2e3   : > { %v9827_v12 = vld [vmem:[#allocation9 + $0x18c] sm:$0xf] }
 0x2e4   : > { %v11166_v36 = vpack.c.bf16 %v3699_v29, %v3691_v2  ;;  %5507 = vmatpush.bf16.msra.mxu2 %v8457_v8  ;;  %v8346_v8 = vld [vmem:[#allocation9 + $0x1f8] sm:$0xf0]  ;;  %v9045_v2 = vor.u32 %v10014_v40, %v9042_v17  ;;  %v8952_v40 = vld [vmem:[#allocation9 + $0x6a8] sm:$0xf]  ;;  %v9993_v17 = vld [vmem:[#allocation9 + $0x6b4] sm:$0xf0] }
 0x2e5   : > { %5485 = vmatpush.bf16.msra.mxu3 %v8105_v47  ;;  %v8424_v47 = vld [vmem:[#allocation9 + $0x288] sm:$0xf] }
 0x2e6   : > { %5499 = vmatpush.bf16.msra.mxu1 %v8233_v26  ;;  %5360 = vmatmul.bf16.vlgmr.msrb.gmra.mxu0 %v11166_v36  ;;  %v9093_v26 = vor.u32 %v10026_v52, %v9090_v62  ;;  %v8425_v24 = vor.u32 %v9861_v46, %v8424_v47  ;;  %v8349_v52 = vor.u32 %v9839_v3, %v8346_v8  ;;  %v9803_v62 = vld [vmem:[#allocation9 + $0xcc] sm:$0xf]  ;;  %v8984_v46 = vld [vmem:[#allocation9 + $0x6e8] sm:$0xf]  ;;  %v8282_v8 = vld [vmem:[#allocation9 + $0x178] sm:$0xf0] }
 0x2e7   : > { %5464 = vmatpush.bf16.msrb.mxu0 %v9109_v38  ;;  %v10010_v38 = vld [vmem:[#allocation9 + $0x744] sm:$0xf]  ;;  %v9823_v3 = vld [vmem:[#allocation9 + $0x16c] sm:$0xf] }
 0x2e8   : > { %5486 = vmatmul.bf16.vlgmr.msra.gmra.mxu3 %v11112_v45  ;;  %5508 = vmatpush.bf16.msra.mxu2 %v8441_v61  ;;  %v8330_v61 = vld [vmem:[#allocation9 + $0x1d8] sm:$0xf0] }
 0x2e9   : > { %5534 = vmatpush.bf16.msrb.mxu3 %v8729_v57  ;;  %5500 = vmatmul.bf16.vlgmr.msra.gmra.mxu1 %v11115_v28  ;;  %v8665_v57 = vor.u32 %v9921_v60, %v8664_v15  ;;  %v8202_v15 = vld [vmem:[#allocation9 + $0xd8] sm:$0xf0]  ;;  %v9835_v60 = vld [vmem:[#allocation9 + $0x1cc] sm:$0xf] }
 0x2ea   : > { %5548 = vmatpush.bf16.msrb.mxu1 %v8857_v21  ;;  %v8793_v21 = vor.u32 %v9953_v19, %v8792_v35  ;;  %v8360_v35 = vld [vmem:[#allocation9 + $0x208] sm:$0xf]  ;;  %v9845_v19 = vld [vmem:[#allocation9 + $0x214] sm:$0xf0]  ;;  %v8333_v20 = vor.u32 %v9835_v60, %v8330_v61 }
 0x2eb   : > { %5465 = vmatpush.bf16.msrb.mxu0 %v9093_v26  ;;  %v10001_v26 = vld [vmem:[#allocation9 + $0x6f4] sm:$0xf0]  ;;  %v8361_v25 = vor.u32 %v9845_v19, %v8360_v35  ;;  %v8920_v60 = vld [vmem:[#allocation9 + $0x668] sm:$0xf] }
 0x2ec   : > { %5509 = vmatpush.bf16.msra.mxu2 %v8425_v24  ;;  %v8186_v24 = vld [vmem:[#allocation9 + $0xb8] sm:$0xf0]  ;;  %v8985_v48 = vor.u32 %v10001_v26, %v8984_v46  ;;  %v9985_v61 = vld [vmem:[#allocation9 + $0x674] sm:$0xf0] }
 0x2ed   : > { %5535 = vmatpush.bf16.msrb.mxu3 %v8713_v5  ;;  %v8632_v5 = vld [vmem:[#allocation9 + $0x428] sm:$0xf]  ;;  %v8189_v10 = vor.u32 %v9799_v18, %v8186_v24  ;;  %v9893_v26 = vld [vmem:[#allocation9 + $0x394] sm:$0xf0] }
 0x2ee   : > { %5549 = vmatpush.bf16.msrb.mxu1 %v8841_v27  ;;  %v9913_v27 = vld [vmem:[#allocation9 + $0x434] sm:$0xf0]  ;;  %v8904_v18 = vld [vmem:[#allocation9 + $0x648] sm:$0xf] }
 0x2ef   : > { %5466 = vmatpush.bf16.msrb.mxu0 %v9077_v33  ;;  %v8633_v43 = vor.u32 %v9913_v27, %v8632_v5  ;;  %v8968_v33 = vld [vmem:[#allocation9 + $0x6c8] sm:$0xf]  ;;  %v8317_v27 = vor.u32 %v9831_v23, %v8314_v50  ;;  %v9981_v24 = vld [vmem:[#allocation9 + $0x654] sm:$0xf0] }
 0x2f0   : > { %5510 = vmatpush.bf16.msra.mxu2 %v8409_v1  ;;  %v8600_v5 = vld [vmem:[#allocation9 + $0x3e8] sm:$0xf]  ;;  %v9905_v1 = vld [vmem:[#allocation9 + $0x3f4] sm:$0xf0] }
 0x2f1   : > { %5536 = vmatpush.bf16.msrb.mxu3 %v8697_v13  ;;  %v9909_v13 = vld [vmem:[#allocation9 + $0x414] sm:$0xf0]  ;;  %v8536_v50 = vld [vmem:[#allocation9 + $0x368] sm:$0xf] }
 0x2f2   : > { %5550 = vmatpush.bf16.msrb.mxu1 %v8825_v30  ;;  %v9807_v30 = vld [vmem:[#allocation9 + $0xec] sm:$0xf]  ;;  %v8617_v29 = vor.u32 %v9909_v13, %v8616_v16  ;;  %v8601_v16 = vor.u32 %v9905_v1, %v8600_v5  ;;  %v8584_v13 = vld [vmem:[#allocation9 + $0x3c8] sm:$0xf]  ;;  %v8905_v5 = vor.u32 %v9981_v24, %v8904_v18  ;;  %v8730_v1 = vld [vmem:[#allocation9 + $0x4f8] sm:$0xf0] }
 0x2f3   : > { %5467 = vmatpush.bf16.msrb.mxu0 %v9061_v39  ;;  %v8221_v7 = vor.u32 %v9807_v30, %v8218_v56  ;;  %v8298_v39 = vld [vmem:[#allocation9 + $0x198] sm:$0xf0]  ;;  %v8953_v56 = vor.u32 %v9993_v17, %v8952_v40  ;;  %v9955_v18 = vld [vmem:[#allocation9 + $0x58c] sm:$0xf] }
 0x2f4   : > { %5511 = vmatpush.bf16.msra.mxu2 %v8393_v49  ;;  %v8301_v41 = vor.u32 %v9827_v12, %v8298_v39  ;;  %v9791_v49 = vld [vmem:[#allocation9 + $0x6c] sm:$0xf]  ;;  %v8154_v30 = vld [vmem:[#allocation9 + $0x78] sm:$0xf0]  ;;  %v9977_v12 = vld [vmem:[#allocation9 + $0x634] sm:$0xf0] }
 0x2f5   : > { %5537 = vmatpush.bf16.msrb.mxu3 %v8681_v4  ;;  %v9026_v4 = vld [vmem:[#allocation9 + $0x750] sm:$0xf0]  ;;  %v8810_v24 = vld [vmem:[#allocation9 + $0x598] sm:$0xf0] }
 0x2f6   : > { %5551 = vmatpush.bf16.msrb.mxu1 %v8809_v42  ;;  %v8377_v42 = vor.u32 %v9849_v51, %v8376_v14  ;;  %5416 = vmatmul.bf16.vlgmr.msra.gmra.mxu0 %v11119_v59  ;;  %v9029_v47 = vor.u32 %v10010_v38, %v9026_v4  ;;  %v8936_v14 = vld [vmem:[#allocation9 + $0x688] sm:$0xf]  ;;  %v9989_v51 = vld [vmem:[#allocation9 + $0x694] sm:$0xf0]  ;;  %v9787_v4 = vld [vmem:[#allocation9 + $0x4c] sm:$0xf] }
 0x2f7   : > { %5468 = vmatpush.bf16.msrb.mxu0 %v9045_v2  ;;  %v8585_v2 = vor.u32 %v9901_v53, %v8584_v13  ;;  %v9897_v38 = vld [vmem:[#allocation9 + $0x3b4] sm:$0xf0]  ;;  %v9931_v53 = vld [vmem:[#allocation9 + $0x4cc] sm:$0xf] }
 0x2f8   : > { %5512 = vmatpush.bf16.msra.mxu2 %v8377_v42  ;;  %v8937_v42 = vor.u32 %v9989_v51, %v8936_v14  ;;  %v9871_v51 = vld [vmem:[#allocation9 + $0x2ec] sm:$0xf] }
 0x2f9   : > { %5538 = vmatpush.bf16.msrb.mxu3 %v8665_v57  ;;  %v8205_v57 = vor.u32 %v9803_v62, %v8202_v15  ;;  %v9819_v62 = vld [vmem:[#allocation9 + $0x14c] sm:$0xf]  ;;  %v8266_v15 = vld [vmem:[#allocation9 + $0x158] sm:$0xf0] }
 0x2fa   : > { %5552 = vmatpush.bf16.msrb.mxu1 %v8793_v21  ;;  %v9010_v21 = vld [vmem:[#allocation9 + $0x730] sm:$0xf0]  ;;  %v8269_v46 = vor.u32 %v9819_v62, %v8266_v15  ;;  %v9959_v15 = vld [vmem:[#allocation9 + $0x5ac] sm:$0xf] }
 0x2fb   : > { %5469 = vmatpush.bf16.msrb.mxu0 %v9029_v47  ;;  %v9013_v63 = vor.u32 %v10006_v6, %v9010_v21  ;;  %v8552_v47 = vld [vmem:[#allocation9 + $0x388] sm:$0xf]  ;;  %v8122_v6 = vld [vmem:[#allocation9 + $0x38] sm:$0xf0]  ;;  %v8921_v21 = vor.u32 %v9985_v61, %v8920_v60 }
 0x2fc   : > { %5513 = vmatpush.bf16.msra.mxu2 %v8361_v25  ;;  %v8250_v25 = vld [vmem:[#allocation9 + $0x138] sm:$0xf0] }
 0x2fd   : > { %5539 = vmatpush.bf16.msrb.mxu3 %v8649_v32  ;;  %v9997_v32 = vld [vmem:[#allocation9 + $0x6d4] sm:$0xf0]  ;;  %v8826_v60 = vld [vmem:[#allocation9 + $0x5b8] sm:$0xf0] }
 0x2fe   : > { %5553 = vmatpush.bf16.msrb.mxu1 %v8777_v55  ;;  %v10002_v55 = vld [vmem:[#allocation9 + $0x704] sm:$0xf]  ;;  %v8969_v22 = vor.u32 %v9997_v32, %v8968_v33  ;;  %v9779_v33 = vld [vmem:[#allocation9 + $0xc] sm:$0xf] }
 0x2ff   : > { %5470 = vmatpush.bf16.msrb.mxu0 %v9013_v63  ;;  %5514 = vmatmul.bf16.vlgmr.msra.gmra.mxu2 %v11117_v34  ;;  %v9889_v63 = vld [vmem:[#allocation9 + $0x374] sm:$0xf0] }
 0x300   : > { %5562 = vmatpush.bf16.msrb.mxu2 %v8985_v48  ;;  %v8553_v48 = vor.u32 %v9893_v26, %v8552_v47  ;;  %v8537_v39 = vor.u32 %v9889_v63, %v8536_v50  ;;  %v9877_v26 = vld [vmem:[#allocation9 + $0x314] sm:$0xf0] }
 0x301   : > { %5540 = vmatpush.bf16.msrb.mxu3 %v8633_v43  ;;  %v8997_v43 = vor.u32 %v10002_v55, %v8994_v44  ;;  %v9811_v55 = vld [vmem:[#allocation9 + $0x10c] sm:$0xf]  ;;  %v8234_v44 = vld [vmem:[#allocation9 + $0x118] sm:$0xf0] }
 0x302   : > { %5554 = vmatpush.bf16.msrb.mxu1 %v8761_v0  ;;  %v8173_v0 = vor.u32 %v9795_v31, %v8170_v11  ;;  %v9967_v31 = vld [vmem:[#allocation9 + $0x5ec] sm:$0xf]  ;;  %v8858_v11 = vld [vmem:[#allocation9 + $0x5f8] sm:$0xf0]  ;;  %v8237_v40 = vor.u32 %v9811_v55, %v8234_v44 }
 0x303   : > { %5471 = vmatpush.bf16.msrb.mxu0 %v8997_v43  ;;  %v8861_v13 = vor.u32 %v9967_v31, %v8858_v11  ;;  %v9919_v55 = vld [vmem:[#allocation9 + $0x46c] sm:$0xf]  ;;  %v8666_v44 = vld [vmem:[#allocation9 + $0x478] sm:$0xf0] }
 0x304   : > { %5563 = vmatpush.bf16.msrb.mxu2 %v8969_v22  ;;  %v8888_v22 = vld [vmem:[#allocation9 + $0x628] sm:$0xf]  ;;  %v9859_v31 = vld [vmem:[#allocation9 + $0x28c] sm:$0xf]  ;;  %v8426_v11 = vld [vmem:[#allocation9 + $0x298] sm:$0xf0] }
 0x305   : > { %5541 = vmatpush.bf16.msrb.mxu3 %v8617_v29  ;;  %v8157_v29 = vor.u32 %v9791_v49, %v8154_v30  ;;  %v8714_v49 = vld [vmem:[#allocation9 + $0x4d8] sm:$0xf0]  ;;  %v9963_v30 = vld [vmem:[#allocation9 + $0x5cc] sm:$0xf] }
 0x306   : > { %5555 = vmatpush.bf16.msrb.mxu1 %v8745_v37  ;;  %v8568_v37 = vld [vmem:[#allocation9 + $0x3a8] sm:$0xf]  ;;  %5472 = vmatmul.bf16.vlgmr.msrb.gmra.mxu0 %v11166_v36 }
 0x307   : > { %5520 = vmatpush.bf16.msra.mxu0 %v8601_v16  ;;  %v8569_v35 = vor.u32 %v9897_v38, %v8568_v37  ;;  %v8520_v16 = vld [vmem:[#allocation9 + $0x348] sm:$0xf] }
 0x308   : > { %5542 = vmatmul.bf16.vlgmr.msrb.gmra.mxu3 %v11136_v58  ;;  %5564 = vmatpush.bf16.msrb.mxu2 %v8953_v56  ;;  %v8842_v56 = vld [vmem:[#allocation9 + $0x5d8] sm:$0xf0]  ;;  %v8504_v37 = vld [vmem:[#allocation9 + $0x328] sm:$0xf] }
 0x309   : > { %5590 = vmatpush.bf16.msra.mxu3 %v8221_v7  ;;  %5556 = vmatmul.bf16.vlgmr.msrb.gmra.mxu1 %v11139_v54  ;;  %v8285_v7 = vor.u32 %v9823_v3, %v8282_v8  ;;  %v8872_v3 = vld [vmem:[#allocation9 + $0x608] sm:$0xf]  ;;  %v9973_v8 = vld [vmem:[#allocation9 + $0x614] sm:$0xf0]  ;;  %v8845_v38 = vor.u32 %v9963_v30, %v8842_v56 }
 0x30a   : > { %5604 = vmatpush.bf16.msra.mxu1 %v8349_v52  ;;  %v8138_v52 = vld [vmem:[#allocation9 + $0x58] sm:$0xf0] }
 0x30b   : > { %5521 = vmatpush.bf16.msra.mxu0 %v8585_v2  ;;  %v8141_v19 = vor.u32 %v9787_v4, %v8138_v52  ;;  %v8474_v2 = vld [vmem:[#allocation9 + $0x2f8] sm:$0xf0]  ;;  %v8873_v4 = vor.u32 %v9973_v8, %v8872_v3  ;;  %v9927_v52 = vld [vmem:[#allocation9 + $0x4ac] sm:$0xf]  ;;  %v9064_v3 = vld [vmem:[#allocation9 + $0x788] sm:$0xf] }
 0x30c   : > { %5565 = vmatpush.bf16.msrb.mxu2 %v8937_v42  ;;  %v8698_v42 = vld [vmem:[#allocation9 + $0x4b8] sm:$0xf0]  ;;  %v8477_v62 = vor.u32 %v9871_v51, %v8474_v2  ;;  %v9911_v51 = vld [vmem:[#allocation9 + $0x42c] sm:$0xf] }
 0x30d   : > { %5591 = vmatpush.bf16.msra.mxu3 %v8205_v57  ;;  %v9783_v57 = vld [vmem:[#allocation9 + $0x2c] sm:$0xf]  ;;  %v8701_v47 = vor.u32 %v9927_v52, %v8698_v42  ;;  %v8634_v2 = vld [vmem:[#allocation9 + $0x438] sm:$0xf0] }
 0x30e   : > { %5605 = vmatpush.bf16.msra.mxu1 %v8333_v20  ;;  %v9815_v20 = vld [vmem:[#allocation9 + $0x12c] sm:$0xf]  ;;  %v8125_v23 = vor.u32 %v9783_v57, %v8122_v6  ;;  %v9112_v57 = vld [vmem:[#allocation9 + $0x7e8] sm:$0xf]  ;;  %v8829_v6 = vor.u32 %v9959_v15, %v8826_v60  ;;  %v8637_v42 = vor.u32 %v9911_v51, %v8634_v2  ;;  %v10017_v15 = vld [vmem:[#allocation9 + $0x774] sm:$0xf0] }
 0x30f   : > { %5522 = vmatpush.bf16.msra.mxu0 %v8569_v35  ;;  %v8253_v32 = vor.u32 %v9815_v20, %v8250_v25  ;;  %v9867_v35 = vld [vmem:[#allocation9 + $0x2cc] sm:$0xf]  ;;  %v9144_v51 = vld [vmem:[#allocation12 + $0x30] sm:$0xf]  ;;  %v10041_v2 = vld [vmem:[#allocation12 + $0x34] sm:$0xf0] }
 0x310   : > { %5566 = vmatpush.bf16.msrb.mxu2 %v8921_v21  ;;  %v10033_v21 = vld [vmem:[#allocation9 + $0x7f4] sm:$0xf0]  ;;  %v9923_v20 = vld [vmem:[#allocation9 + $0x48c] sm:$0xf] }
 0x311   : > { %5592 = vmatpush.bf16.msra.mxu3 %v8189_v10  ;;  %v8106_v10 = vld [vmem:[#allocation9 + $0x18] sm:$0xf0]  ;;  %v9113_v50 = vor.u32 %v10033_v21, %v9112_v57 }
 0x312   : > { %5606 = vmatpush.bf16.msra.mxu1 %v8317_v27  ;;  %v9935_v27 = vld [vmem:[#allocation9 + $0x4ec] sm:$0xf]  ;;  %v8109_v43 = vor.u32 %v9779_v33, %v8106_v10  ;;  %v9096_v33 = vld [vmem:[#allocation9 + $0x7c8] sm:$0xf]  ;;  %v10029_v10 = vld [vmem:[#allocation9 + $0x7d4] sm:$0xf0] }
 0x313   : > { %5523 = vmatpush.bf16.msra.mxu0 %v8553_v48  ;;  %v8733_v17 = vor.u32 %v9935_v27, %v8730_v1  ;;  %v9863_v48 = vld [vmem:[#allocation9 + $0x2ac] sm:$0xf]  ;;  %v8794_v1 = vld [vmem:[#allocation9 + $0x578] sm:$0xf0] }
 0x314   : > { %5567 = vmatpush.bf16.msrb.mxu2 %v8905_v5  ;;  %v9951_v27 = vld [vmem:[#allocation9 + $0x56c] sm:$0xf]  ;;  %v10049_v57 = vld [vmem:[#allocation12 + $0x74] sm:$0xf0] }
 0x315   : > { %5593 = vmatpush.bf16.msra.mxu3 %v8173_v0  ;;  %v9885_v0 = vld [vmem:[#allocation9 + $0x354] sm:$0xf0]  ;;  %v8378_v21 = vld [vmem:[#allocation9 + $0x238] sm:$0xf0] }
 0x316   : > { %5607 = vmatpush.bf16.msra.mxu1 %v8301_v41  ;;  %v8889_v41 = vor.u32 %v9977_v12, %v8888_v22  ;;  %v8521_v14 = vor.u32 %v9885_v0, %v8520_v16  ;;  %v9097_v22 = vor.u32 %v10029_v10, %v9096_v33  ;;  %v8669_v12 = vor.u32 %v9919_v55, %v8666_v44  ;;  %v8650_v16 = vld [vmem:[#allocation9 + $0x458] sm:$0xf0]  ;;  %v9999_v10 = vld [vmem:[#allocation9 + $0x6ec] sm:$0xf]  ;;  %v9016_v44 = vld [vmem:[#allocation9 + $0x728] sm:$0xf] }
 0x317   : > { %5524 = vmatpush.bf16.msra.mxu0 %v8537_v39  ;;  %v9080_v39 = vld [vmem:[#allocation9 + $0x7a8] sm:$0xf]  ;;  %v8429_v0 = vor.u32 %v9859_v31, %v8426_v11  ;;  %v8362_v33 = vld [vmem:[#allocation9 + $0x218] sm:$0xf0]  ;;  %v9160_v31 = vld [vmem:[#allocation12 + $0x50] sm:$0xf] }
 0x318   : > { %5568 = vmatpush.bf16.msrb.mxu2 %v8889_v41  ;;  %v8778_v41 = vld [vmem:[#allocation9 + $0x558] sm:$0xf0] }
 0x319   : > { %5594 = vmatpush.bf16.msra.mxu3 %v8157_v29  ;;  %v8717_v29 = vor.u32 %v9931_v53, %v8714_v49  ;;  %v9855_v53 = vld [vmem:[#allocation9 + $0x26c] sm:$0xf]  ;;  %v8410_v49 = vld [vmem:[#allocation9 + $0x278] sm:$0xf0] }
 0x31a   : > { %5608 = vmatpush.bf16.msra.mxu1 %v8285_v7  ;;  %v9881_v7 = vld [vmem:[#allocation9 + $0x334] sm:$0xf0]  ;;  %v8986_v55 = vld [vmem:[#allocation9 + $0x6f8] sm:$0xf0] }
 0x31b   : > { %5525 = vmatpush.bf16.msra.mxu0 %v8521_v14  ;;  %v8505_v61 = vor.u32 %v9881_v7, %v8504_v37  ;;  %v10021_v14 = vld [vmem:[#allocation9 + $0x794] sm:$0xf0]  ;;  %v9943_v37 = vld [vmem:[#allocation9 + $0x52c] sm:$0xf]  ;;  %v8762_v7 = vld [vmem:[#allocation9 + $0x538] sm:$0xf0] }
 0x31c   : > { %5569 = vmatpush.bf16.msrb.mxu2 %v8873_v4  ;;  %v8394_v4 = vld [vmem:[#allocation9 + $0x258] sm:$0xf0]  ;;  %v9065_v52 = vor.u32 %v10021_v14, %v9064_v3  ;;  %v8765_v60 = vor.u32 %v9943_v37, %v8762_v7  ;;  %v9899_v3 = vld [vmem:[#allocation9 + $0x3cc] sm:$0xf] }
 0x31d   : > { %5595 = vmatpush.bf16.msra.mxu3 %v8141_v19  ;;  %v8458_v19 = vld [vmem:[#allocation9 + $0x2d8] sm:$0xf0]  ;;  %v9987_v37 = vld [vmem:[#allocation9 + $0x68c] sm:$0xf] }
 0x31e   : > { %5609 = vmatpush.bf16.msra.mxu1 %v8269_v46  ;;  %v8488_v46 = vld [vmem:[#allocation9 + $0x308] sm:$0xf]  ;;  %v8461_v25 = vor.u32 %v9867_v35, %v8458_v19  ;;  %v8618_v35 = vld [vmem:[#allocation9 + $0x418] sm:$0xf0]  ;;  %v9939_v19 = vld [vmem:[#allocation9 + $0x50c] sm:$0xf] }
 0x31f   : > { %5526 = vmatpush.bf16.msra.mxu0 %v8505_v61  ;;  %5570 = vmatmul.bf16.vlgmr.msrb.gmra.mxu2 %v11157_v9  ;;  %v9907_v61 = vld [vmem:[#allocation9 + $0x40c] sm:$0xf]  ;;  %v10045_v11 = vld [vmem:[#allocation12 + $0x54] sm:$0xf0] }
 0x320   : > { %5618 = vmatpush.bf16.msra.mxu2 %v8477_v62  ;;  %v9048_v62 = vld [vmem:[#allocation9 + $0x768] sm:$0xf]  ;;  %v8586_v14 = vld [vmem:[#allocation9 + $0x3d8] sm:$0xf0] }
 0x321   : > { %5596 = vmatpush.bf16.msra.mxu3 %v8125_v23  ;;  %v8442_v23 = vld [vmem:[#allocation9 + $0x2b8] sm:$0xf0] }
 0x322   : > { %5610 = vmatpush.bf16.msra.mxu1 %v8253_v32  ;;  %v8813_v32 = vor.u32 %v9955_v18, %v8810_v24  ;;  %v8445_v5 = vor.u32 %v9863_v48, %v8442_v23  ;;  %v9032_v18 = vld [vmem:[#allocation9 + $0x748] sm:$0xf]  ;;  %v10013_v24 = vld [vmem:[#allocation9 + $0x754] sm:$0xf0]  ;;  %v9168_v23 = vld [vmem:[#allocation12 + $0x60] sm:$0xf] }
 0x323   : > { %v8938_v7 = vld [vmem:[#allocation9 + $0x698] sm:$0xf0] }
 0x324   : > { %5619 = vmatpush.bf16.msra.mxu2 %v8461_v25 }
 0x325   : > { %5597 = vmatpush.bf16.msra.mxu3 %v8109_v43  ;;  %v8797_v43 = vor.u32 %v9951_v27, %v8794_v1 }
 0x326   : > { %5611 = vmatpush.bf16.msra.mxu1 %v8237_v40  ;;  %v10025_v40 = vld [vmem:[#allocation9 + $0x7b4] sm:$0xf0] }
 0x327   : > { %v9081_v30 = vor.u32 %v10025_v40, %v9080_v39  ;;  %v9995_v39 = vld [vmem:[#allocation9 + $0x6cc] sm:$0xf]  ;;  %v9000_v40 = vld [vmem:[#allocation9 + $0x708] sm:$0xf] }
 0x328   : > { %5598 = vmatmul.bf16.vlgmr.msra.gmra.mxu3 %v11112_v45  ;;  %v8682_v45 = vld [vmem:[#allocation9 + $0x498] sm:$0xf0]  ;;  %5620 = vmatpush.bf16.msra.mxu2 %v8445_v5  ;;  %v10009_v5 = vld [vmem:[#allocation9 + $0x734] sm:$0xf0] }
 0x329   : > { %5646 = vmatpush.bf16.msrb.mxu3 %v8733_v17  ;;  %5612 = vmatmul.bf16.vlgmr.msra.gmra.mxu1 %v11115_v28  ;;  %v8489_v28 = vor.u32 %v9877_v26, %v8488_v46  ;;  %v8685_v63 = vor.u32 %v9923_v20, %v8682_v45  ;;  %v9915_v17 = vld [vmem:[#allocation9 + $0x44c] sm:$0xf]  ;;  %v8746_v46 = vld [vmem:[#allocation9 + $0x518] sm:$0xf0]  ;;  %v9176_v26 = vld [vmem:[#allocation12 + $0x70] sm:$0xf]  ;;  %v9049_v20 = vor.u32 %v10017_v15, %v9048_v62 }
 0x32a   : > { %5660 = vmatpush.bf16.msrb.mxu1 %v8861_v13  ;;  %v9947_v13 = vld [vmem:[#allocation9 + $0x54c] sm:$0xf]  ;;  %v8653_v56 = vor.u32 %v9915_v17, %v8650_v16  ;;  %v8621_v45 = vor.u32 %v9907_v61, %v8618_v35  ;;  %v8749_v25 = vor.u32 %v9939_v19, %v8746_v46  ;;  %v10005_v17 = vld [vmem:[#allocation9 + $0x714] sm:$0xf0]  ;;  %v9136_v62 = vld [vmem:[#allocation12 + $0x20] sm:$0xf]  ;;  %v8941_v15 = vor.u32 %v9987_v37, %v8938_v7 }
 0x32b   : > { %5527 = vmatpush.bf16.msra.mxu0 %v8489_v28  ;;  %v8781_v8 = vor.u32 %v9947_v13, %v8778_v41  ;;  %v9177_v28 = vor.u32 %v10049_v57, %v9176_v26  ;;  %v9903_v16 = vld [vmem:[#allocation9 + $0x3ec] sm:$0xf]  ;;  %v8602_v13 = vld [vmem:[#allocation9 + $0x3f8] sm:$0xf0]  ;;  %v9152_v41 = vld [vmem:[#allocation12 + $0x40] sm:$0xf]  ;;  %v11184_v26 = vpop.f32.mrf.mxu1 }
 0x32c   : > { %5621 = vmatpush.bf16.msra.mxu2 %v8429_v0  ;;  %v9161_v0 = vor.u32 %v10045_v11, %v9160_v31  ;;  %v9983_v61 = vld [vmem:[#allocation9 + $0x66c] sm:$0xf]  ;;  %v8922_v35 = vld [vmem:[#allocation9 + $0x678] sm:$0xf0]  ;;  %v10044_v7 = vld [vmem:[#allocation12 + $0x54] sm:$0xf] }
 0x32d   : > { %5647 = vmatpush.bf16.msrb.mxu3 %v8717_v29  ;;  %v8413_v29 = vor.u32 %v9855_v53, %v8410_v49  ;;  %v10043_v53 = vld [vmem:[#allocation12 + $0x44] sm:$0xf0]  ;;  %v8554_v57 = vld [vmem:[#allocation9 + $0x398] sm:$0xf0] }
 0x32e   : > { %5661 = vmatpush.bf16.msrb.mxu1 %v8845_v38  ;;  %5528 = vmatmul.bf16.vlgmr.msra.gmra.mxu0 %v11119_v59  ;;  %v9851_v38 = vld [vmem:[#allocation9 + $0x24c] sm:$0xf] }
 0x32f   : > { %5576 = vmatpush.bf16.msrb.mxu0 %v9113_v50  ;;  %v10047_v50 = vld [vmem:[#allocation12 + $0x64] sm:$0xf0] }
 0x330   : > { %5622 = vmatpush.bf16.msra.mxu2 %v8413_v29  ;;  %v9169_v27 = vor.u32 %v10047_v50, %v9168_v23  ;;  %v9120_v50 = vld [vmem:[#allocation12] sm:$0xf]  ;;  %v9883_v11 = vld [vmem:[#allocation9 + $0x34c] sm:$0xf] }
 0x331   : > { %5648 = vmatpush.bf16.msrb.mxu3 %v8701_v47  ;;  %v8397_v47 = vor.u32 %v9851_v38, %v8394_v4  ;;  %v8589_v38 = vor.u32 %v9899_v3, %v8586_v14  ;;  %v9895_v4 = vld [vmem:[#allocation9 + $0x3ac] sm:$0xf] }
 0x332   : > { %5662 = vmatpush.bf16.msrb.mxu1 %v8829_v6  ;;  %v9847_v6 = vld [vmem:[#allocation9 + $0x22c] sm:$0xf] }
 0x333   : > { %5577 = vmatpush.bf16.msrb.mxu0 %v9097_v22  ;;  %v8381_v48 = vor.u32 %v9847_v6, %v8378_v21  ;;  %v8989_v22 = vor.u32 %v9999_v10, %v8986_v55  ;;  %v9128_v6 = vld [vmem:[#allocation12 + $0x10] sm:$0xf]  ;;  %v10037_v21 = vld [vmem:[#allocation12 + $0x14] sm:$0xf0]  ;;  %v10048_v55 = vld [vmem:[#allocation12 + $0x74] sm:$0xf] }
 0x334   : > { %5623 = vmatpush.bf16.msra.mxu2 %v8397_v47  ;;  %v9891_v47 = vld [vmem:[#allocation9 + $0x38c] sm:$0xf]  ;;  %v9129_v23 = vor.u32 %v10037_v21, %v9128_v6  ;;  %v10042_v6 = vld [vmem:[#allocation12 + $0x44] sm:$0xf]  ;;  %v9154_v21 = vld [vmem:[#allocation12 + $0x48] sm:$0xf0] }
 0x335   : > { %5649 = vmatpush.bf16.msrb.mxu3 %v8685_v63  ;;  %v9843_v63 = vld [vmem:[#allocation9 + $0x20c] sm:$0xf] }
 0x336   : > { %5663 = vmatpush.bf16.msrb.mxu1 %v8813_v32  ;;  %v9033_v32 = vor.u32 %v10013_v24, %v9032_v18  ;;  %v8365_v1 = vor.u32 %v9843_v63, %v8362_v33  ;;  %v8906_v18 = vld [vmem:[#allocation9 + $0x658] sm:$0xf0]  ;;  %v8557_v24 = vor.u32 %v9891_v47, %v8554_v57  ;;  %v10035_v63 = vld [vmem:[#allocation12 + $0x4] sm:$0xf0]  ;;  %v9240_v33 = vld [vmem:[#allocation12 + $0xf0] sm:$0xf] }
 0x337   : > { %5578 = vmatpush.bf16.msrb.mxu0 %v9081_v30  ;;  %v9991_v30 = vld [vmem:[#allocation9 + $0x6ac] sm:$0xf]  ;;  %v9114_v57 = vld [vmem:[#allocation9 + $0x7f8] sm:$0xf0] }
 0x338   : > { %5624 = vmatpush.bf16.msra.mxu2 %v8381_v48  ;;  %v8538_v48 = vld [vmem:[#allocation9 + $0x378] sm:$0xf0]  ;;  %v10059_v47 = vld [vmem:[#allocation12 + $0xc4] sm:$0xf0] }
 0x339   : > { %5650 = vmatpush.bf16.msrb.mxu3 %v8669_v12  ;;  %v9017_v12 = vor.u32 %v10009_v5, %v9016_v44  ;;  %v9178_v44 = vld [vmem:[#allocation12 + $0x78] sm:$0xf0] }
 0x33a   : > { %5664 = vmatpush.bf16.msrb.mxu1 %v8797_v43  ;;  %v8970_v43 = vld [vmem:[#allocation9 + $0x6d8] sm:$0xf0] }
 0x33b   : > { %5579 = vmatpush.bf16.msrb.mxu0 %v9065_v52  ;;  %v8973_v49 = vor.u32 %v9995_v39, %v8970_v43  ;;  %v9145_v52 = vor.u32 %v10041_v2, %v9144_v51  ;;  %v8522_v39 = vld [vmem:[#allocation9 + $0x358] sm:$0xf0]  ;;  %v9181_v43 = vor.u32 %v10048_v55, %v9178_v44  ;;  %v9224_v51 = vld [vmem:[#allocation12 + $0xd0] sm:$0xf]  ;;  %v9146_v55 = vld [vmem:[#allocation12 + $0x38] sm:$0xf0] }
 0x33c   : > { %5625 = vmatpush.bf16.msra.mxu2 %v8365_v1  ;;  %v8890_v1 = vld [vmem:[#allocation9 + $0x638] sm:$0xf0] }
 0x33d   : > { %5651 = vmatpush.bf16.msrb.mxu3 %v8653_v56  ;;  %v8954_v56 = vld [vmem:[#allocation9 + $0x6b8] sm:$0xf0] }
 0x33e   : > { %5665 = vmatpush.bf16.msrb.mxu1 %v8781_v8  ;;  %v9153_v8 = vor.u32 %v10043_v53, %v9152_v41  ;;  %v8957_v29 = vor.u32 %v9991_v30, %v8954_v56  ;;  %v11188_v53 = vld [vmem:[#allocation11] sm:$0xf]  ;;  %v8874_v30 = vld [vmem:[#allocation9 + $0x618] sm:$0xf0]  ;;  %v8525_v56 = vor.u32 %v9883_v11, %v8522_v39  ;;  %v10055_v11 = vld [vmem:[#allocation12 + $0xa4] sm:$0xf0] }
 0x33f   : > { %5580 = vmatpush.bf16.msrb.mxu0 %v9049_v20  ;;  %5626 = vmatmul.bf16.vlgmr.msra.gmra.mxu2 %v11117_v34  ;;  %v10039_v34 = vld [vmem:[#allocation12 + $0x24] sm:$0xf0]  ;;  %v8925_v20 = vor.u32 %v9983_v61, %v8922_v35  ;;  %v10061_v2 = vld [vmem:[#allocation12 + $0xd4] sm:$0xf0] }
 0x340   : > { %5674 = vmatpush.bf16.msrb.mxu2 %v8989_v22  ;;  %v9137_v46 = vor.u32 %v10039_v34, %v9136_v62  ;;  %v9121_v22 = vor.u32 %v10035_v63, %v9120_v50  ;;  %v9875_v62 = vld [vmem:[#allocation9 + $0x30c] sm:$0xf]  ;;  %v8490_v34 = vld [vmem:[#allocation9 + $0x318] sm:$0xf0]  ;;  %v9208_v50 = vld [vmem:[#allocation12 + $0xb0] sm:$0xf] }
 0x341   : > { %5652 = vmatpush.bf16.msrb.mxu3 %v8637_v42  ;;  %v8570_v42 = vld [vmem:[#allocation9 + $0x3b8] sm:$0xf0]  ;;  %v10031_v61 = vld [vmem:[#allocation9 + $0x7ec] sm:$0xf] }
 0x342   : > { %5666 = vmatpush.bf16.msrb.mxu1 %v8765_v60  ;;  %v11182_v60 = vpop.f32.mrf.mxu3  ;;  %v8573_v19 = vor.u32 %v9895_v4, %v8570_v42  ;;  %v9225_v4 = vor.u32 %v10061_v2, %v9224_v51  ;;  %v10057_v63 = vld [vmem:[#allocation12 + $0xb4] sm:$0xf0]  ;;  %v10015_v2 = vld [vmem:[#allocation9 + $0x76c] sm:$0xf] }
 0x343   : > { %5581 = vmatpush.bf16.msrb.mxu0 %v9033_v32  ;;  %v10065_v32 = vld [vmem:[#allocation12 + $0xf4] sm:$0xf0]  ;;  %v9209_v44 = vor.u32 %v10057_v63, %v9208_v50 }
 0x344   : > { %5675 = vmatpush.bf16.msrb.mxu2 %v8973_v49  ;;  %v9241_v5 = vor.u32 %v10065_v32, %v9240_v33  ;;  %v11190_v49 = vpop.f32.mrf.mxu1  ;;  %v9098_v32 = vld [vmem:[#allocation9 + $0x7d8] sm:$0xf0] }
 0x345   : > { %5653 = vmatpush.bf16.msrb.mxu3 %v8621_v45  ;;  %v11186_v45 = vpop.f32.mrf.mxu2 }
 0x346   : > { %5667 = vmatpush.bf16.msrb.mxu1 %v8749_v25  ;;  %v9979_v25 = vld [vmem:[#allocation9 + $0x64c] sm:$0xf] }
 0x347   : > { %5582 = vmatpush.bf16.msrb.mxu0 %v9017_v12  ;;  %v8909_v10 = vor.u32 %v9979_v25, %v8906_v18  ;;  %v8493_v18 = vor.u32 %v9875_v62, %v8490_v34  ;;  %v9122_v34 = vld [vmem:[#allocation12 + $0x8] sm:$0xf0] }
 0x348   : > { %5654 = vmatmul.bf16.vlgmr.msrb.gmra.mxu3 %v11136_v58  ;;  %v9001_v58 = vor.u32 %v10005_v17, %v9000_v40  ;;  %5676 = vmatpush.bf16.msrb.mxu2 %v8957_v29  ;;  %v9232_v40 = vld [vmem:[#allocation12 + $0xe0] sm:$0xf]  ;;  %v10063_v17 = vld [vmem:[#allocation12 + $0xe4] sm:$0xf0]  ;;  %v3966_v29 = vperm.slane %v11188_v53, 0 }
 0x349   : > { %6112 = vmatpush.bf16.msra.mxu3 %v9177_v28  ;;  %5668 = vmatmul.bf16.vlgmr.msrb.gmra.mxu1 %v11139_v54  ;;  %v8605_v54 = vor.u32 %v9903_v16, %v8602_v13  ;;  %v9887_v28 = vld [vmem:[#allocation9 + $0x36c] sm:$0xf]  ;;  %v9170_v13 = vld [vmem:[#allocation12 + $0x68] sm:$0xf0]  ;;  %v9233_v41 = vor.u32 %v10063_v17, %v9232_v40 }
 0x34a   : > { %v8541_v31 = vor.u32 %v9887_v28, %v8538_v48  ;;  %v5265_v12 = vpop.f32.mrf.mxu3  ;;  %6126 = vmatpush.bf16.msra.mxu1 %v9241_v5  ;;  %v9117_v28 = vor.u32 %v10031_v61, %v9114_v57  ;;  %v10027_v48 = vld [vmem:[#allocation9 + $0x7cc] sm:$0xf] }
 0x34b   : > { %5583 = vmatpush.bf16.msrb.mxu0 %v9001_v58  ;;  %v9971_v58 = vld [vmem:[#allocation9 + $0x60c] sm:$0xf]  ;;  %v5266_v33 = vadd.f32 %v5265_v12, %v3966_v29  ;;  %v10038_v12 = vld [vmem:[#allocation12 + $0x24] sm:$0xf] }
 0x34c   : > { %5677 = vmatpush.bf16.msrb.mxu2 %v8941_v15  ;;  %v8877_v37 = vor.u32 %v9971_v58, %v8874_v30  ;;  %v11200_v25 = vpop.f32.mrf.mxu1  ;;  %v9192_v58 = vld [vmem:[#allocation12 + $0x90] sm:$0xf]  ;;  %v10053_v30 = vld [vmem:[#allocation12 + $0x94] sm:$0xf0] }
 0x34d   : > { %6113 = vmatpush.bf16.msra.mxu3 %v9169_v27  ;;  %v9975_v27 = vld [vmem:[#allocation9 + $0x62c] sm:$0xf]  ;;  %v11192_v3 = vpop.f32.mrf.mxu2  ;;  %v5280_v39 = vadd.f32 %v11190_v49, %v5266_v33 }
 0x34e   : > { %5584 = vmatmul.bf16.vlgmr.msrb.gmra.mxu0 %v11166_v36  ;;  %v8893_v16 = vor.u32 %v9975_v27, %v8890_v1  ;;  %6127 = vmatpush.bf16.msra.mxu1 %v9233_v41  ;;  %v9101_v27 = vor.u32 %v10027_v48, %v9098_v32  ;;  %v10023_v1 = vld [vmem:[#allocation9 + $0x7ac] sm:$0xf]  ;;  %v9034_v48 = vld [vmem:[#allocation9 + $0x758] sm:$0xf0] }
 0x34f   : > { %5632 = vmatpush.bf16.msra.mxu0 %v8605_v54  ;;  %v9879_v54 = vld [vmem:[#allocation9 + $0x32c] sm:$0xf] }
 0x350   : > { %5678 = vmatpush.bf16.msrb.mxu2 %v8925_v20 }
 0x351   : > { %6114 = vmatpush.bf16.msra.mxu3 %v9161_v0  ;;  %v10046_v0 = vld [vmem:[#allocation12 + $0x64] sm:$0xf] }
 0x352   : > { %v9173_v14 = vor.u32 %v10046_v0, %v9170_v13  ;;  %v11197_v15 = vpop.f32.mrf.mxu3  ;;  %6128 = vmatpush.bf16.msra.mxu1 %v9225_v4  ;;  %v10019_v13 = vld [vmem:[#allocation9 + $0x78c] sm:$0xf]  ;;  %v10034_v4 = vld [vmem:[#allocation12 + $0x4] sm:$0xf] }
 0x353   : > { %5633 = vmatpush.bf16.msra.mxu0 %v8589_v38  ;;  %v9162_v38 = vld [vmem:[#allocation12 + $0x58] sm:$0xf0] }
 0x354   : > { %5679 = vmatpush.bf16.msrb.mxu2 %v8909_v10  ;;  %v9165_v35 = vor.u32 %v10044_v7, %v9162_v38  ;;  %v10040_v10 = vld [vmem:[#allocation12 + $0x34] sm:$0xf] }
 0x355   : > { %6115 = vmatpush.bf16.msra.mxu3 %v9153_v8  ;;  %v8506_v8 = vld [vmem:[#allocation9 + $0x338] sm:$0xf0] }
 0x356   : > { %v8509_v42 = vor.u32 %v9879_v54, %v8506_v8  ;;  %v10036_v54 = vld [vmem:[#allocation12 + $0x14] sm:$0xf]  ;;  %v9130_v8 = vld [vmem:[#allocation12 + $0x18] sm:$0xf0] }
 0x357   : > { %5634 = vmatpush.bf16.msra.mxu0 %v8573_v19  ;;  %v9216_v19 = vld [vmem:[#allocation12 + $0xc0] sm:$0xf]  ;;  %v9133_v38 = vor.u32 %v10036_v54, %v9130_v8 }
 0x358   : > { %5680 = vmatpush.bf16.msrb.mxu2 %v8893_v16  ;;  %v9217_v20 = vor.u32 %v10059_v47, %v9216_v19  ;;  %v5335_v16 = vpop.f32.mrf.mxu1  ;;  %v9242_v19 = vld [vmem:[#allocation12 + $0xf8] sm:$0xf0] }
 0x359   : > { %6116 = vmatpush.bf16.msra.mxu3 %v9145_v52  ;;  %v11195_v52 = vpop.f32.mrf.mxu0 }
 0x35a   : > { %6129 = vmatpush.bf16.msra.mxu1 %v9217_v20  ;;  %v5321_v17 = vpop.f32.mrf.mxu3  ;;  %v9125_v20 = vor.u32 %v10034_v4, %v9122_v34  ;;  %v9194_v34 = vld [vmem:[#allocation12 + $0x98] sm:$0xf0] }
 0x35b   : > { %5635 = vmatpush.bf16.msra.mxu0 %v8557_v24  ;;  %v11202_v24 = vpop.f32.mrf.mxu2 }
 0x35c   : > { %5681 = vmatpush.bf16.msrb.mxu2 %v8877_v37 }
 0x35d   : > { %6117 = vmatpush.bf16.msra.mxu3 %v9137_v46  ;;  %v5264_v46 = vadd.f32 %v11182_v60, %v3966_v29  ;;  %v9050_v29 = vld [vmem:[#allocation9 + $0x778] sm:$0xf0] }
 0x35e   : > { %6130 = vmatpush.bf16.msra.mxu1 %v9209_v44 }
 0x35f   : > { %5636 = vmatpush.bf16.msra.mxu0 %v8541_v31  ;;  %5682 = vmatmul.bf16.vlgmr.msrb.gmra.mxu2 %v11157_v9  ;;  %v5278_v60 = vadd.f32 %v11184_v26, %v5264_v46  ;;  %v9149_v9 = vor.u32 %v10040_v10, %v9146_v55  ;;  %v9200_v31 = vld [vmem:[#allocation12 + $0xa0] sm:$0xf]  ;;  %v9082_v26 = vld [vmem:[#allocation9 + $0x7b8] sm:$0xf0] }
 0x360   : > { %v9201_v40 = vor.u32 %v10055_v11, %v9200_v31  ;;  %v9085_v0 = vor.u32 %v10023_v1, %v9082_v26  ;;  %v5389_v50 = vpop.f32.mrf.mxu1  ;;  %v9018_v55 = vld [vmem:[#allocation9 + $0x738] sm:$0xf0]  ;;  %v9226_v1 = vld [vmem:[#allocation12 + $0xd8] sm:$0xf0]  ;;  %v3967_v31 = vperm.slane %v11188_v53, 1 }
 0x361   : > { %6118 = vmatpush.bf16.msra.mxu3 %v9129_v23  ;;  %v9157_v23 = vor.u32 %v10042_v6, %v9154_v21  ;;  %v5307_v5 = vpop.f32.mrf.mxu0  ;;  %v9053_v6 = vor.u32 %v10015_v2, %v9050_v29  ;;  %v10011_v21 = vld [vmem:[#allocation9 + $0x74c] sm:$0xf]  ;;  %v10054_v29 = vld [vmem:[#allocation12 + $0xa4] sm:$0xf] }
 0x362   : > { %6131 = vmatpush.bf16.msra.mxu1 %v9201_v40  ;;  %v5375_v47 = vpop.f32.mrf.mxu3  ;;  %v9037_v10 = vor.u32 %v10011_v21, %v9034_v48  ;;  %v10003_v26 = vld [vmem:[#allocation9 + $0x70c] sm:$0xf]  ;;  %v9002_v40 = vld [vmem:[#allocation9 + $0x718] sm:$0xf0] }
 0x363   : > { %5637 = vmatpush.bf16.msra.mxu0 %v8525_v56  ;;  %v9066_v56 = vld [vmem:[#allocation9 + $0x798] sm:$0xf0]  ;;  %v5349_v51 = vpop.f32.mrf.mxu2 }
 0x364   : > { %v9069_v7 = vor.u32 %v10019_v13, %v9066_v56  ;;  %v5376_v13 = vadd.f32 %v5375_v47, %v3967_v31  ;;  %v9210_v56 = vld [vmem:[#allocation12 + $0xb8] sm:$0xf0] }
 0x365   : > { %6119 = vmatpush.bf16.msra.mxu3 %v9121_v22  ;;  %v5292_v22 = vadd.f32 %v11186_v45, %v5278_v60  ;;  %v5294_v45 = vadd.f32 %v11192_v3, %v5280_v39  ;;  %v10051_v3 = vld [vmem:[#allocation12 + $0x84] sm:$0xf0] }
 0x367   : > { %5638 = vmatpush.bf16.msra.mxu0 %v8509_v42  ;;  %v5306_v49 = vadd.f32 %v11195_v52, %v5292_v22  ;;  %v9184_v42 = vld [vmem:[#allocation12 + $0x80] sm:$0xf]  ;;  %v5308_v62 = vadd.f32 %v5307_v5, %v5294_v45  ;;  %v9005_v45 = vor.u32 %v10003_v26, %v9002_v40  ;;  %v10073_v40 = vld [vmem:[#allocation12 + $0x134] sm:$0xf0] }
 0x368   : > { %v9185_v61 = vor.u32 %v10051_v3, %v9184_v42 }
 0x369   : > { %6168 = vmatpush.bf16.msrb.mxu3 %v9181_v43  ;;  %v9138_v43 = vld [vmem:[#allocation12 + $0x28] sm:$0xf0]  ;;  %v5361_v37 = vpop.f32.mrf.mxu0  ;;  %v5322_v46 = vadd.f32 %v5321_v17, %v5308_v62  ;;  %v10058_v17 = vld [vmem:[#allocation12 + $0xc4] sm:$0xf] }
 0x36a   : > { %v9141_v41 = vor.u32 %v10038_v12, %v9138_v43  ;;  %v5377_v22 = vpop.f32.mrf.mxu3 }
 0x36b   : > { %5639 = vmatpush.bf16.msra.mxu0 %v8493_v18  ;;  %v5336_v18 = vadd.f32 %v5335_v16, %v5322_v46  ;;  %v5403_v33 = vpop.f32.mrf.mxu2  ;;  %v9218_v16 = vld [vmem:[#allocation12 + $0xc8] sm:$0xf0]  ;;  %v10081_v46 = vld [vmem:[#allocation12 + $0x174] sm:$0xf0] }
 0x36d   : > { %6169 = vmatpush.bf16.msrb.mxu3 %v9173_v14  ;;  %v9193_v14 = vor.u32 %v10053_v30, %v9192_v58  ;;  %v5350_v60 = vadd.f32 %v5349_v51, %v5336_v18  ;;  %v5391_v58 = vpop.f32.mrf.mxu1  ;;  %v5390_v51 = vadd.f32 %v5389_v50, %v5376_v13  ;;  %v10071_v13 = vld [vmem:[#allocation12 + $0x124] sm:$0xf0] }
 0x36e   : > { %5640 = vmatmul.bf16.vlgmr.msra.gmra.mxu0 %v11119_v59  ;;  %v5320_v59 = vadd.f32 %v11197_v15, %v5306_v49  ;;  %v10056_v49 = vld [vmem:[#allocation12 + $0xb4] sm:$0xf] }
 0x36f   : > { %5688 = vmatpush.bf16.msrb.mxu0 %v9117_v28  ;;  %6132 = vmatpush.bf16.msra.mxu1 %v9193_v14  ;;  %v9213_v8 = vor.u32 %v10056_v49, %v9210_v56  ;;  %v5378_v14 = vadd.f32 %v5377_v22, %v3967_v31  ;;  %v5404_v2 = vadd.f32 %v5403_v33, %v5390_v51  ;;  %v9280_v31 = vld [vmem:[#allocation12 + $0x140] sm:$0xf]  ;;  %v10067_v56 = vld [vmem:[#allocation12 + $0x104] sm:$0xf0] }
 0x370   : > { %v5334_v52 = vadd.f32 %v11200_v25, %v5320_v59  ;;  %v10062_v25 = vld [vmem:[#allocation12 + $0xe4] sm:$0xf]  ;;  %v9248_v49 = vld [vmem:[#allocation12 + $0x100] sm:$0xf] }
 0x371   : > { %6170 = vmatpush.bf16.msrb.mxu3 %v9165_v35  ;;  %v10064_v35 = vld [vmem:[#allocation12 + $0xf4] sm:$0xf]  ;;  %v5363_v32 = vpop.f32.mrf.mxu0 }
 0x372   : > { %v9245_v15 = vor.u32 %v10064_v35, %v9242_v19  ;;  %v5348_v57 = vadd.f32 %v11202_v24, %v5334_v52  ;;  %v10007_v24 = vld [vmem:[#allocation9 + $0x72c] sm:$0xf]  ;;  %v5364_v5 = vadd.f32 %v5363_v32, %v5350_v60  ;;  %v5431_v59 = vpop.f32.mrf.mxu3  ;;  %v10052_v52 = vld [vmem:[#allocation12 + $0x94] sm:$0xf] }
 0x373   : > { %5689 = vmatpush.bf16.msrb.mxu0 %v9101_v27  ;;  %6133 = vmatpush.bf16.msra.mxu1 %v9185_v61  ;;  %v10060_v27 = vld [vmem:[#allocation12 + $0xd4] sm:$0xf]  ;;  %v9021_v39 = vor.u32 %v10007_v24, %v9018_v55  ;;  %v5405_v54 = vpop.f32.mrf.mxu2  ;;  %v9197_v61 = vor.u32 %v10052_v52, %v9194_v34  ;;  %v10077_v24 = vld [vmem:[#allocation12 + $0x154] sm:$0xf0]  ;;  %v10074_v34 = vld [vmem:[#allocation12 + $0x144] sm:$0xf] }
 0x374   : > { %v5362_v28 = vadd.f32 %v5361_v37, %v5348_v57  ;;  %v5706_v11 = vmul.f32 0.2, %v5364_v5  ;;  %v9202_v37 = vld [vmem:[#allocation12 + $0xa8] sm:$0xf0]  ;;  %v10050_v57 = vld [vmem:[#allocation12 + $0x84] sm:$0xf] }
 0x375   : > { %6171 = vmatpush.bf16.msrb.mxu3 %v9157_v23  ;;  %v9234_v23 = vld [vmem:[#allocation12 + $0xe8] sm:$0xf0]  ;;  %v5445_v42 = vpop.f32.mrf.mxu1 }
 0x376   : > { %v9237_v63 = vor.u32 %v10062_v25, %v9234_v23  ;;  %v5702_v44 = vmul.f32 0.2, %v5362_v28  ;;  %v5714_v43 = vmax.f32 %v5364_v5, %v5706_v11  ;;  %v9296_v25 = vld [vmem:[#allocation12 + $0x160] sm:$0xf]  ;;  %v10079_v23 = vld [vmem:[#allocation12 + $0x164] sm:$0xf0] }
 0x377   : > { %5690 = vmatpush.bf16.msrb.mxu0 %v9085_v0  ;;  %6182 = vmatpush.bf16.msrb.mxu1 %v9245_v15  ;;  %v9221_v0 = vor.u32 %v10058_v17, %v9218_v16  ;;  %v9304_v15 = vld [vmem:[#allocation12 + $0x170] sm:$0xf]  ;;  %v10075_v11 = vld [vmem:[#allocation12 + $0x144] sm:$0xf0] }
 0x378   : > { %v5710_v12 = vmax.f32 %v5362_v28, %v5702_v44  ;;  %v9305_v21 = vor.u32 %v10081_v46, %v9304_v15  ;;  %v9281_v22 = vor.u32 %v10075_v11, %v9280_v31  ;;  %v10072_v46 = vld [vmem:[#allocation12 + $0x134] sm:$0xf]  ;;  %v9368_v11 = vld [vmem:[#allocation12 + $0x1f0] sm:$0xf] }
 0x379   : > { %6172 = vmatpush.bf16.msrb.mxu3 %v9149_v9  ;;  %v9229_v9 = vor.u32 %v10060_v27, %v9226_v1  ;;  %v5417_v30 = vpop.f32.mrf.mxu0 }
 0x37a   : > { %v5418_v4 = vadd.f32 %v5417_v30, %v5404_v2  ;;  %6140 = vmatpush.bf16.msra.mxu2 %v9305_v21  ;;  %v10069_v30 = vld [vmem:[#allocation12 + $0x114] sm:$0xf0]  ;;  %v10078_v2 = vld [vmem:[#allocation12 + $0x164] sm:$0xf] }
 0x37b   : > { %5691 = vmatpush.bf16.msrb.mxu0 %v9069_v7  ;;  %6183 = vmatpush.bf16.msrb.mxu1 %v9237_v63  ;;  %v9205_v7 = vor.u32 %v10054_v29, %v9202_v37  ;;  %v5459_v47 = vpop.f32.mrf.mxu2  ;;  %v9297_v63 = vor.u32 %v10079_v23, %v9296_v25  ;;  %v9298_v29 = vld [vmem:[#allocation12 + $0x168] sm:$0xf0]  ;;  %v10070_v21 = vld [vmem:[#allocation12 + $0x124] sm:$0xf]  ;;  %v10068_v23 = vld [vmem:[#allocation12 + $0x114] sm:$0xf] }
 0x37c   : > { %v5432_v35 = vadd.f32 %v5431_v59, %v5418_v4  ;;  %v9301_v37 = vor.u32 %v10078_v2, %v9298_v29  ;;  %v9290_v4 = vld [vmem:[#allocation12 + $0x158] sm:$0xf0]  ;;  %v9344_v2 = vld [vmem:[#allocation12 + $0x1c0] sm:$0xf]  ;;  %v10091_v29 = vld [vmem:[#allocation12 + $0x1c4] sm:$0xf0] }
 0x37d   : > { %6173 = vmatpush.bf16.msrb.mxu3 %v9141_v41  ;;  %v5718_v41 = vpack.c.bf16 %v5714_v43, %v5710_v12  ;;  %v5447_v50 = vpop.f32.mrf.mxu1  ;;  %v9272_v43 = vld [vmem:[#allocation12 + $0x130] sm:$0xf] }
 0x37e   : > { %v5446_v28 = vadd.f32 %v5445_v42, %v5432_v35  ;;  %6141 = vmatpush.bf16.msra.mxu2 %v9297_v63  ;;  %v9273_v17 = vor.u32 %v10073_v40, %v9272_v43 }
 0x37f   : > { %5692 = vmatpush.bf16.msrb.mxu0 %v9053_v6  ;;  %6184 = vmatpush.bf16.msrb.mxu1 %v9229_v9  ;;  %v5433_v6 = vpop.f32.mrf.mxu3 }
 0x380   : > { %6120 = vmatmul.bf16.vlgmr.msra.gmra.mxu3 %v5718_v41  ;;  %v5460_v60 = vadd.f32 %v5459_v47, %v5446_v28 }
 0x381   : > { %6174 = vmatpush.bf16.msrb.mxu3 %v9133_v38  ;;  %v5392_v38 = vadd.f32 %v5391_v58, %v5378_v14  ;;  %v5419_v3 = vpop.f32.mrf.mxu0  ;;  %v9256_v58 = vld [vmem:[#allocation12 + $0x110] sm:$0xf]  ;;  %v9306_v14 = vld [vmem:[#allocation12 + $0x178] sm:$0xf0] }
 0x383   : > { %5693 = vmatpush.bf16.msrb.mxu0 %v9037_v10  ;;  %6185 = vmatpush.bf16.msrb.mxu1 %v9221_v0  ;;  %v5406_v62 = vadd.f32 %v5405_v54, %v5392_v38  ;;  %v9288_v10 = vld [vmem:[#allocation12 + $0x150] sm:$0xf]  ;;  %v5461_v55 = vpop.f32.mrf.mxu2  ;;  %v9264_v0 = vld [vmem:[#allocation12 + $0x120] sm:$0xf]  ;;  %v9249_v54 = vor.u32 %v10067_v56, %v9248_v49  ;;  %v10076_v38 = vld [vmem:[#allocation12 + $0x154] sm:$0xf] }
 0x384   : > { %v9289_v44 = vor.u32 %v10077_v24, %v9288_v10  ;;  %v9293_v42 = vor.u32 %v10076_v38, %v9290_v4  ;;  %v10093_v49 = vld [vmem:[#allocation12 + $0x1d4] sm:$0xf0]  ;;  %v9336_v38 = vld [vmem:[#allocation12 + $0x1b0] sm:$0xf] }
 0x385   : > { %6175 = vmatpush.bf16.msrb.mxu3 %v9125_v20  ;;  %v5420_v19 = vadd.f32 %v5419_v3, %v5406_v62  ;;  %v9186_v20 = vld [vmem:[#allocation12 + $0x88] sm:$0xf0]  ;;  %v3968_v62 = vperm.slane %v11188_v53, 2  ;;  %v10089_v4 = vld [vmem:[#allocation12 + $0x1b4] sm:$0xf0] }
 0x386   : > { %6142 = vmatpush.bf16.msra.mxu2 %v9289_v44 }
 0x387   : > { %5694 = vmatpush.bf16.msrb.mxu0 %v9021_v39  ;;  %6186 = vmatpush.bf16.msrb.mxu1 %v9213_v8  ;;  %v5434_v18 = vadd.f32 %v5433_v6, %v5420_v19  ;;  %v10080_v8 = vld [vmem:[#allocation12 + $0x174] sm:$0xf]  ;;  %v5487_v59 = vpop.f32.mrf.mxu3 }
 0x388   : > { %v9309_v51 = vor.u32 %v10080_v8, %v9306_v14  ;;  %v5488_v47 = vadd.f32 %v5487_v59, %v3968_v62 }
 0x389   : > { %v5473_v48 = vpop.f32.mrf.mxu0  ;;  %v5448_v33 = vadd.f32 %v5447_v50, %v5434_v18  ;;  %v9258_v50 = vld [vmem:[#allocation12 + $0x118] sm:$0xf0] }
 0x38a   : > { %v5474_v32 = vadd.f32 %v5473_v48, %v5460_v60  ;;  %6143 = vmatpush.bf16.msra.mxu2 %v9281_v22  ;;  %v10097_v22 = vld [vmem:[#allocation12 + $0x1f4] sm:$0xf0] }
 0x38b   : > { %5695 = vmatpush.bf16.msrb.mxu0 %v9005_v45  ;;  %6187 = vmatpush.bf16.msrb.mxu1 %v9205_v7  ;;  %v5462_v5 = vadd.f32 %v5461_v55, %v5448_v33  ;;  %v9257_v45 = vor.u32 %v10069_v30, %v9256_v58  ;;  %v5501_v7 = vpop.f32.mrf.mxu1  ;;  %v5515_v3 = vpop.f32.mrf.mxu2 }
 0x38c   : > { %v5703_v1 = vmul.f32 0.2, %v5474_v32  ;;  %v5502_v28 = vadd.f32 %v5501_v7, %v5488_v47  ;;  %v10085_v47 = vld [vmem:[#allocation12 + $0x194] sm:$0xf0] }
 0x38e   : > { %5696 = vmatmul.bf16.vlgmr.msrb.gmra.mxu0 %v11166_v36  ;;  %v9189_v36 = vor.u32 %v10050_v57, %v9186_v20  ;;  %v5711_v26 = vmax.f32 %v5474_v32, %v5703_v1  ;;  %6144 = vmatpush.bf16.msra.mxu2 %v9273_v17  ;;  %v9274_v57 = vld [vmem:[#allocation12 + $0x138] sm:$0xf0]  ;;  %v9266_v20 = vld [vmem:[#allocation12 + $0x128] sm:$0xf0]  ;;  %v5516_v63 = vadd.f32 %v5515_v3, %v5502_v28  ;;  %v10066_v1 = vld [vmem:[#allocation12 + $0x104] sm:$0xf] }
 0x38f   : > { %6188 = vmatpush.bf16.msrb.mxu1 %v9197_v61  ;;  %v5489_v52 = vpop.f32.mrf.mxu3  ;;  %v9282_v61 = vld [vmem:[#allocation12 + $0x148] sm:$0xf0]  ;;  %v9277_v6 = vor.u32 %v10072_v46, %v9274_v57  ;;  %v9261_v32 = vor.u32 %v10068_v23, %v9258_v50  ;;  %v9360_v17 = vld [vmem:[#allocation12 + $0x1e0] sm:$0xf]  ;;  %v10083_v57 = vld [vmem:[#allocation12 + $0x184] sm:$0xf0] }
 0x390   : > { %6176 = vmatmul.bf16.vlgmr.msrb.gmra.mxu3 %v5718_v41  ;;  %v9265_v41 = vor.u32 %v10071_v13, %v9264_v0  ;;  %v9285_v35 = vor.u32 %v10074_v34, %v9282_v61  ;;  %v5490_v18 = vadd.f32 %v5489_v52, %v3968_v62  ;;  %v9337_v62 = vor.u32 %v10089_v4, %v9336_v38  ;;  %v9328_v52 = vld [vmem:[#allocation12 + $0x1a0] sm:$0xf]  ;;  %v10087_v34 = vld [vmem:[#allocation12 + $0x1a4] sm:$0xf0]  ;;  %v10092_v50 = vld [vmem:[#allocation12 + $0x1d4] sm:$0xf] }
 0x391   : > { %v5475_v27 = vpop.f32.mrf.mxu0  ;;  %v9312_v46 = vld [vmem:[#allocation12 + $0x180] sm:$0xf] }
 0x392   : > { %v5476_v9 = vadd.f32 %v5475_v27, %v5462_v5  ;;  %6145 = vmatpush.bf16.msra.mxu2 %v9265_v41 }
 0x393   : > { %6189 = vmatpush.bf16.msrb.mxu1 %v9189_v36  ;;  %v5503_v15 = vpop.f32.mrf.mxu1  ;;  %v9269_v36 = vor.u32 %v10070_v21, %v9266_v20  ;;  %v5517_v25 = vpop.f32.mrf.mxu2  ;;  %v10096_v21 = vld [vmem:[#allocation12 + $0x1f4] sm:$0xf]  ;;  %v9370_v20 = vld [vmem:[#allocation12 + $0x1f8] sm:$0xf0] }
 0x394   : > { %v5707_v39 = vmul.f32 0.2, %v5476_v9  ;;  %v5504_v60 = vadd.f32 %v5503_v15, %v5490_v18  ;;  %v9373_v18 = vor.u32 %v10096_v21, %v9370_v20 }
 0x396   : > { %v5715_v12 = vmax.f32 %v5476_v9, %v5707_v39  ;;  %6146 = vmatpush.bf16.msra.mxu2 %v9257_v45  ;;  %v5518_v55 = vadd.f32 %v5517_v25, %v5504_v60  ;;  %v9250_v9 = vld [vmem:[#allocation12 + $0x108] sm:$0xf0]  ;;  %v9352_v45 = vld [vmem:[#allocation12 + $0x1d0] sm:$0xf] }
 0x397   : > { %v5543_v48 = vpop.f32.mrf.mxu3  ;;  %v9253_v31 = vor.u32 %v10066_v1, %v9250_v9  ;;  %v10088_v9 = vld [vmem:[#allocation12 + $0x1b4] sm:$0xf] }
 0x398   : > { %v5719_v16 = vpack.c.bf16 %v5715_v12, %v5711_v26  ;;  %v9369_v26 = vor.u32 %v10097_v22, %v9368_v11  ;;  %v10086_v22 = vld [vmem:[#allocation12 + $0x1a4] sm:$0xf] }
 0x39a   : > { %6134 = vmatmul.bf16.vlgmr.msra.gmra.mxu1 %v5719_v16  ;;  %6147 = vmatpush.bf16.msra.mxu2 %v9249_v54  ;;  %v9353_v54 = vor.u32 %v10093_v49, %v9352_v45 }
 0x39b   : > { %v5557_v10 = vpop.f32.mrf.mxu1  ;;  %6154 = vmatpush.bf16.msra.mxu0 %v9369_v26 }
 0x39e   : > { %6196 = vmatpush.bf16.msrb.mxu2 %v9309_v51 }
 0x39f   : > { %v5545_v39 = vpop.f32.mrf.mxu3 }
 0x3a2   : > { %6197 = vmatpush.bf16.msrb.mxu2 %v9301_v37  ;;  %v5571_v27 = vpop.f32.mrf.mxu2  ;;  %v9345_v37 = vor.u32 %v10091_v29, %v9344_v2 }
 0x3a3   : > { %v5559_v0 = vpop.f32.mrf.mxu1 }
 0x3a6   : > { %6198 = vmatpush.bf16.msrb.mxu2 %v9293_v42 }
 0x3aa   : > { %6190 = vmatmul.bf16.vlgmr.msrb.gmra.mxu1 %v5719_v16  ;;  %6199 = vmatpush.bf16.msrb.mxu2 %v9285_v35  ;;  %v10095_v16 = vld [vmem:[#allocation12 + $0x1e4] sm:$0xf0]  ;;  %v5573_v56 = vpop.f32.mrf.mxu2  ;;  %v9329_v35 = vor.u32 %v10087_v34, %v9328_v52 }
 0x3ab   : > { %v5529_v19 = vpop.f32.mrf.mxu0  ;;  %v9361_v13 = vor.u32 %v10095_v16, %v9360_v17  ;;  %v5599_v28 = vpop.f32.mrf.mxu3 }
 0x3ac   : > { %v5530_v33 = vadd.f32 %v5529_v19, %v5516_v63  ;;  %v9320_v19 = vld [vmem:[#allocation12 + $0x190] sm:$0xf]  ;;  %v5613_v23 = vpop.f32.mrf.mxu1  ;;  %v9354_v63 = vld [vmem:[#allocation12 + $0x1d8] sm:$0xf0] }
 0x3ad   : > { %6155 = vmatpush.bf16.msra.mxu0 %v9361_v13  ;;  %v9321_v15 = vor.u32 %v10085_v47, %v9320_v19  ;;  %v9357_v60 = vor.u32 %v10092_v50, %v9354_v63 }
 0x3ae   : > { %6200 = vmatpush.bf16.msrb.mxu2 %v9277_v6  ;;  %v5544_v44 = vadd.f32 %v5543_v48, %v5530_v33  ;;  %v9313_v6 = vor.u32 %v10083_v57, %v9312_v46  ;;  %v9362_v48 = vld [vmem:[#allocation12 + $0x1e8] sm:$0xf0] }
 0x3b0   : > { %v5558_v12 = vadd.f32 %v5557_v10, %v5544_v44 }
 0x3b1   : > { %6156 = vmatpush.bf16.msra.mxu0 %v9353_v54 }
 0x3b2   : > { %6201 = vmatpush.bf16.msrb.mxu2 %v9269_v36  ;;  %v5572_v41 = vadd.f32 %v5571_v27, %v5558_v12  ;;  %v10094_v36 = vld [vmem:[#allocation12 + $0x1e4] sm:$0xf] }
 0x3b3   : > { %v5531_v24 = vpop.f32.mrf.mxu0  ;;  %v9365_v25 = vor.u32 %v10094_v36, %v9362_v48  ;;  %v5601_v10 = vpop.f32.mrf.mxu3 }
 0x3b4   : > { %v5532_v5 = vadd.f32 %v5531_v24, %v5518_v55  ;;  %v10090_v24 = vld [vmem:[#allocation12 + $0x1c4] sm:$0xf]  ;;  %v9346_v55 = vld [vmem:[#allocation12 + $0x1c8] sm:$0xf0]  ;;  %v5615_v1 = vpop.f32.mrf.mxu1 }
 0x3b5   : > { %6157 = vmatpush.bf16.msra.mxu0 %v9345_v37  ;;  %v9349_v44 = vor.u32 %v10090_v24, %v9346_v55 }
 0x3b6   : > { %6202 = vmatpush.bf16.msrb.mxu2 %v9261_v32  ;;  %v5546_v43 = vadd.f32 %v5545_v39, %v5532_v5  ;;  %v3969_v32 = vperm.slane %v11188_v53, 3  ;;  %v9330_v39 = vld [vmem:[#allocation12 + $0x1a8] sm:$0xf0] }
 0x3b8   : > { %v5560_v58 = vadd.f32 %v5559_v0, %v5546_v43  ;;  %v5600_v27 = vadd.f32 %v5599_v28, %v3969_v32  ;;  %v5602_v26 = vadd.f32 %v5601_v10, %v3969_v32  ;;  %v9333_v43 = vor.u32 %v10086_v22, %v9330_v39  ;;  %v5786_v28 = vld [vmem:[#allocation14] sm:$0x3] }
 0x3b9   : > { %6158 = vmatpush.bf16.msra.mxu0 %v9337_v62  ;;  %v5789_v63 = vperm.slane %v5786_v28, 1 }
 0x3ba   : > { %6203 = vmatpush.bf16.msrb.mxu2 %v9253_v31  ;;  %v5574_v8 = vadd.f32 %v5573_v56, %v5560_v58  ;;  %v9338_v31 = vld [vmem:[#allocation12 + $0x1b8] sm:$0xf0]  ;;  %v5614_v12 = vadd.f32 %v5613_v23, %v5600_v27  ;;  %v5616_v16 = vadd.f32 %v5615_v1, %v5602_v26  ;;  %v10084_v58 = vld [vmem:[#allocation12 + $0x194] sm:$0xf] }
 0x3bb   : > { %v9341_v11 = vor.u32 %v10088_v9, %v9338_v31 }
 0x3bd   : > { %6159 = vmatpush.bf16.msra.mxu0 %v9329_v35 }
 0x3c1   : > { %6160 = vmatpush.bf16.msra.mxu0 %v9321_v15 }
 0x3c2   : > { %v5627_v33 = vpop.f32.mrf.mxu2 }
 0x3c3   : > { %v5628_v17 = vadd.f32 %v5627_v33, %v5614_v12 }
 0x3c5   : > { %6161 = vmatpush.bf16.msra.mxu0 %v9313_v6 }
 0x3c6   : > { %v5669_v13 = vpop.f32.mrf.mxu1 }
 0x3c9   : > { %6210 = vmatpush.bf16.msrb.mxu0 %v9373_v18 }
 0x3ca   : > { %v5629_v53 = vpop.f32.mrf.mxu2 }
 0x3cb   : > { %v5585_v40 = vpop.f32.mrf.mxu0  ;;  %v5630_v45 = vadd.f32 %v5629_v53, %v5616_v16 }
 0x3cc   : > { %v5586_v30 = vadd.f32 %v5585_v40, %v5572_v41  ;;  %v5655_v40 = vpop.f32.mrf.mxu3 }
 0x3cd   : > { %6211 = vmatpush.bf16.msrb.mxu0 %v9365_v25  ;;  %v5788_v25 = vperm.slane %v5786_v28, 0 }
 0x3ce   : > { %v5704_v51 = vmul.f32 0.2, %v5586_v30  ;;  %v5671_v38 = vpop.f32.mrf.mxu1 }
 0x3d0   : > { %v5712_v42 = vmax.f32 %v5586_v30, %v5704_v51  ;;  %v9322_v30 = vld [vmem:[#allocation12 + $0x198] sm:$0xf0] }
 0x3d1   : > { %6212 = vmatpush.bf16.msrb.mxu0 %v9357_v60  ;;  %v9325_v49 = vor.u32 %v10084_v58, %v9322_v30 }
 0x3d3   : > { %v5587_v14 = vpop.f32.mrf.mxu0 }
 0x3d4   : > { %v5588_v59 = vadd.f32 %v5587_v14, %v5574_v8  ;;  %v10082_v8 = vld [vmem:[#allocation12 + $0x184] sm:$0xf]  ;;  %v9314_v14 = vld [vmem:[#allocation12 + $0x188] sm:$0xf0]  ;;  %v5657_v2 = vpop.f32.mrf.mxu3 }
 0x3d5   : > { %6213 = vmatpush.bf16.msrb.mxu0 %v9349_v44 }
 0x3d6   : > { %v5708_v7 = vmul.f32 0.2, %v5588_v59 }
 0x3d8   : > { %v5716_v3 = vmax.f32 %v5588_v59, %v5708_v7  ;;  %v9317_v59 = vor.u32 %v10082_v8, %v9314_v14 }
 0x3d9   : > { %6214 = vmatpush.bf16.msrb.mxu0 %v9341_v11 }
 0x3da   : > { %v5720_v61 = vpack.c.bf16 %v5716_v3, %v5712_v42 }
 0x3dc   : > { %6148 = vmatmul.bf16.vlgmr.msra.gmra.mxu2 %v5720_v61 }
 0x3dd   : > { %6215 = vmatpush.bf16.msrb.mxu0 %v9333_v43 }
 0x3e1   : > { %6216 = vmatpush.bf16.msrb.mxu0 %v9325_v49 }
 0x3e2   : > { %v5683_v51 = vpop.f32.mrf.mxu2 }
 0x3e5   : > { %6217 = vmatpush.bf16.msrb.mxu0 %v9317_v59 }
 0x3ea   : > { %v5685_v62 = vpop.f32.mrf.mxu2 }
 0x3eb   : > { %v5641_v5 = vpop.f32.mrf.mxu0 }
 0x3ec   : > { %6204 = vmatmul.bf16.vlgmr.msrb.gmra.mxu2 %v5720_v61  ;;  %v5642_v0 = vadd.f32 %v5641_v5, %v5628_v17  ;;  %v6238_v17 = vld [vmem:[#allocation15] sm:$0x3] }
 0x3ed   : > { %v6241_v49 = vperm.slane %v6238_v17, 1 }
 0x3ee   : > { %v5656_v56 = vadd.f32 %v5655_v40, %v5642_v0 }
 0x3f0   : > { %v5670_v29 = vadd.f32 %v5669_v13, %v5656_v56 }
 0x3f2   : > { %v5684_v4 = vadd.f32 %v5683_v51, %v5670_v29 }
 0x3f3   : > { %v5643_v41 = vpop.f32.mrf.mxu0 }
 0x3f4   : > { %v5644_v54 = vadd.f32 %v5643_v41, %v5630_v45  ;;  %v6240_v45 = vperm.slane %v6238_v17, 0 }
 0x3f6   : > { %v5658_v37 = vadd.f32 %v5657_v2, %v5644_v54 }
 0x3f8   : > { %v5672_v42 = vadd.f32 %v5671_v38, %v5658_v37 }
 0x3fa   : > { %v5686_v52 = vadd.f32 %v5685_v62, %v5672_v42 }
 0x403   : > { %v6121_v57 = vpop.f32.mrf.mxu3 }
 0x404   : > { %v6122_v50 = vadd.f32 %v6121_v57, %v5788_v25 }
 0x40b   : > { %v5697_v7 = vpop.f32.mrf.mxu0  ;;  %v6123_v20 = vpop.f32.mrf.mxu3 }
 0x40c   : > { %v5698_v3 = vadd.f32 %v5697_v7, %v5684_v4  ;;  %v6124_v27 = vadd.f32 %v6123_v20, %v5788_v25 }
 0x40e   : > { %v5705_v61 = vmul.f32 0.2, %v5698_v3 }
 0x410   : > { %v5713_v47 = vmax.f32 %v5698_v3, %v5705_v61  ;;  %v10592_v61 = vmov 0  }
 0x411   : > { %10235 = vset.pattern.permute.xlu1 %v10592_v61  ;;  %10241 = vset.pattern.permute.xlu0 %v10592_v61 }
 0x413   : > { %v5699_v34 = vpop.f32.mrf.mxu0  ;;  %v6177_v23 = vpop.f32.mrf.mxu3 }
 0x414   : > { %v5700_v35 = vadd.f32 %v5699_v34, %v5686_v52  ;;  %v6178_v24 = vadd.f32 %v6177_v23, %v5789_v63 }
 0x416   : > { %v5709_v19 = vmul.f32 0.2, %v5700_v35 }
 0x417   : > { %v6135_v6 = vpop.f32.mrf.mxu1 }
 0x418   : > { %v5717_v15 = vmax.f32 %v5700_v35, %v5709_v19  ;;  %v6136_v32 = vadd.f32 %v6135_v6, %v6122_v50  ;;  %v10242_v35 = vld [vmem:[#allocation2] ss:$0 sm:$0xff] }
 0x41a   : > { %v5721_v46 = vpack.c.bf16 %v5717_v15, %v5713_v47 }
 0x41b   : > { %v6179_v9 = vpop.f32.mrf.mxu3 }
 0x41c   : > { %6162 = vmatmul.bf16.vlgmr.msra.gmra.mxu0 %v5721_v46  ;;  %v6180_v12 = vadd.f32 %v6179_v9, %v5789_v63 }
 0x41f   : > { %v6137_v18 = vpop.f32.mrf.mxu1 }
 0x420   : > { %v6138_v11 = vadd.f32 %v6137_v18, %v6124_v27 }
 0x427   : > { %v6191_v60 = vpop.f32.mrf.mxu1 }
 0x428   : > { %v6192_v44 = vadd.f32 %v6191_v60, %v6178_v24 }
 0x42c   : > { %6218 = vmatmul.bf16.vlgmr.msrb.gmra.mxu0 %v5721_v46 }
 0x42f   : > { %v6193_v26 = vpop.f32.mrf.mxu1 }
 0x430   : > { %v6194_v16 = vadd.f32 %v6193_v26, %v6180_v12 }
 0x45f   : > { %v6149_v21 = vpop.f32.mrf.mxu2 }
 0x460   : > { %v6150_v55 = vadd.f32 %v6149_v21, %v6136_v32 }
 0x467   : > { %v6151_v36 = vpop.f32.mrf.mxu2 }
 0x468   : > { %v6152_v43 = vadd.f32 %v6151_v36, %v6138_v11 }
 0x46f   : > { %v6205_v10 = vpop.f32.mrf.mxu2 }
 0x470   : > { %v6206_v1 = vadd.f32 %v6205_v10, %v6192_v44 }
 0x477   : > { %v6207_v53 = vpop.f32.mrf.mxu2 }
 0x478   : > { %v6208_v58 = vadd.f32 %v6207_v53, %v6194_v16 }
 0x499   : > { %v6163_v48 = vpop.f32.mrf.mxu0 }
 0x49a   : > { %v6164_v5 = vadd.f32 %v6163_v48, %v6150_v55 }
 0x49c   : > { %v6224_v22 = vmul.f32 0.2, %v6164_v5 }
 0x49e   : > { %v6228_v0 = vmax.f32 %v6164_v5, %v6224_v22 }
 0x4a1   : > { %v6165_v33 = vpop.f32.mrf.mxu0 }
 0x4a2   : > { %v6166_v13 = vadd.f32 %v6165_v33, %v6152_v43 }
 0x4a4   : > { %v6226_v54 = vmul.f32 0.2, %v6166_v13 }
 0x4a6   : > { %v6230_v37 = vmax.f32 %v6166_v13, %v6226_v54 }
 0x4a9   : > { %v6219_v31 = vpop.f32.mrf.mxu0 }
 0x4aa   : > { %v6220_v39 = vadd.f32 %v6219_v31, %v6206_v1 }
 0x4ac   : > { %v6225_v40 = vmul.f32 0.2, %v6220_v39 }
 0x4ae   : > { %v6229_v41 = vmax.f32 %v6220_v39, %v6225_v40 }
 0x4b0   : > { %v6232_v30 = vpack.c.bf16 %v6229_v41, %v6228_v0 }
 0x4b1   : > { %v6221_v56 = vpop.f32.mrf.mxu0 }
 0x4b2   : > { %v6222_v8 = vadd.f32 %v6221_v56, %v6208_v58  ;;  %v6234_v14 = vunpack.c.l.bf16 %v6232_v30  ;;  %v6235_v51 = vunpack.c.h.bf16 %v6232_v30 }
 0x4b4   : > { %v6227_v59 = vmul.f32 0.2, %v6222_v8  ;;  %v6244_v2 = vmul.f32 %v6240_v45, %v6234_v14  ;;  %v6245_v29 = vmul.f32 %v6241_v49, %v6235_v51 }
 0x4b6   : > { %v6231_v7 = vmax.f32 %v6222_v8, %v6227_v59  ;;  %v6248_v38 = vadd.f32 %v6245_v29, %v6244_v2 }
 0x4b8   : > { %v6233_v4 = vpack.c.bf16 %v6231_v7, %v6230_v37  ;;  %6249 = vadd.xlane.f32.xlu0 %v6248_v38 }
 0x4ba   : > { %v6236_v42 = vunpack.c.l.bf16 %v6233_v4  ;;  %v6237_v3 = vunpack.c.h.bf16 %v6233_v4 }
 0x4bc   : > { %v6246_v62 = vmul.f32 %v6240_v45, %v6236_v42  ;;  %v6247_v52 = vmul.f32 %v6241_v49, %v6237_v3 }
 0x4be   : > { %v6251_v34 = vadd.f32 %v6247_v52, %v6246_v62 }
 0x4c0   : > { %6252 = vadd.xlane.f32.xlu0 %v6251_v34 }
 0x52b   : > { %v6250_v19 = vpop.xlane.xlu0 %6249 }
 0x52c   : > { %v6258_v47 = vadd.f32 %v10242_v35, %v6250_v19 }
 0x52e   : > { %v6260_v15 = vsub.f32 0.0, %v6258_v47 }
 0x530   : > { %v6262_v46 = vmul.f32 1.442695, %v6260_v15 }
 0x532   : > { %10243 = vpow2.f32 %v6262_v46 }
 0x533   : > { %v6253_v57 = vpop.xlane.xlu0 %6252 }
 0x534   : > { %v6259_v6 = vadd.f32 %v10242_v35, %v6253_v57 }
 0x536   : > { %v6261_v21 = vsub.f32 0.0, %v6259_v6 }
 0x538   : > { %v10244_v20 = vpop.eup %10243  ;;  %v6264_v18 = vmul.f32 1.442695, %v6261_v21 }
 0x539   : > { %v6266_v28 = vadd.f32 1.0, %v10244_v20 }
 0x53a   : > { %10245 = vpow2.f32 %v6264_v18 }
 0x53b   : > { %10247 = vrcp.f32 %v6266_v28  ;;  %vm6273_vm2 = vweird.f32 %v6266_v28  ;;  %v6279_v24 = vand.u32 2147483648, %v6266_v28  ;;  %v6277_v44 = vand.u32 2147483647, %v6266_v28 }
 0x53d   : > { %v6280_v31 = vor.u32 1.1754944e-38, %v6279_v24  ;;  %vm6278_vm7 = vcmp.eq.f32.partialorder %v6277_v44, 8.507059e+37 }
 0x540   : > { %v10246_v36 = vpop.eup %10245 }
 0x541   : > { %v10248_v48 = vpop.eup %10247  ;;  %v6267_v25 = vadd.f32 1.0, %v10246_v36 }
 0x542   : > { %v6269_v23 = vmul.f32 %v10248_v48, %v6266_v28  ;;  %vm6274_vm1 = vweird.f32 %v10248_v48 }
 0x543   : > { %10249 = vrcp.f32 %v6267_v25  ;;  %v6294_v55 = vand.u32 2147483648, %v6267_v25  ;;  %v6292_v27 = vand.u32 2147483647, %v6267_v25  ;;  %vm6275_vm4 = vmor %vm6273_vm2, %vm6274_vm1  ;;  %vm6288_vm5 = vweird.f32 %v6267_v25 }
 0x544   : > { %v6270_v50 = vsub.f32 1.0, %v6269_v23 }
 0x545   : > { %v6295_v11 = vor.u32 1.1754944e-38, %v6294_v55  ;;  %vm6293_vm8 = vcmp.eq.f32.partialorder %v6292_v27, 8.507059e+37 }
 0x546   : > { %v6271_v63 = vmul.f32 %v10248_v48, %v6270_v50 }
 0x548   : > { %v6272_v32 = vadd.f32 %v10248_v48, %v6271_v63 }
 0x549   : > { %v10250_v60 = vpop.eup %10249 }
 0x54a   : > { %v6284_v33 = vmul.f32 %v10250_v60, %v6267_v25  ;;  %vm6289_vm3 = vweird.f32 %v10250_v60  ;;  %v6276_v1 = vsel %vm6275_vm4, %v10248_v48, %v6272_v32 }
 0x54b   : > { %vm6290_vm6 = vmor %vm6288_vm5, %vm6289_vm3  ;;  %v6281_v39 = vsel %vm6278_vm7, %v6280_v31, %v6276_v1 }
 0x54c   : > { %v6285_v10 = vsub.f32 1.0, %v6284_v33 }
 0x54e   : > { %v6286_v5 = vmul.f32 %v10250_v60, %v6285_v10 }
 0x550   : > { %v6287_v9 = vadd.f32 %v10250_v60, %v6286_v5 }
 0x552   : > { %v6291_v22 = vsel %vm6290_vm6, %v10250_v60, %v6287_v9 }
 0x553   : > { %v6296_v26 = vsel %vm6293_vm8, %v6295_v11, %v6291_v22 }
 0x554   : > { %v10236_v12 = vpack.i.bf16 %v6296_v26, %v6281_v39 }
 0x556   : > { %10237 = vperm.xlu1 %10235, %v10236_v12  }
 0x5c8   : > { %v10238_v43 = vpop.permute.xlu1 %10237 }
 0x5c9   : > { %v10240_v40 = vunpack.i.h.bf16 %v10238_v43  ;;  %v10239_v53 = vunpack.i.l.bf16 %v10238_v43 }
 0x5cb   : > { %v10102_v17 = vpack.c.bf16 %v10240_v40, %v10239_v53 }
 0x5cd   : > { %10103 = vst [vmem:[%s463_s20] sm:$0xff] %v10102_v17  }
 0x5ce   : > { %10520 = shalt.err (!%p10517_p8)
}
 0x5cf   : > { %s10593_s3 = smov 64   ;;  %s10594_s25 = smov 4  }
 0x5d0   : > { %10137 = dma.vmem_to_hbm [thread:$0]  (%p10743_p13), %s6326_s23, 128, %s6328_s26, %s6313_s28, %s10593_s3, %s10593_s3, %s10594_s25  }
 0x5d1 PF: > { %p10184_p9 = scmp.ge.s32.totalorder %s10575_s14, 2  ;;  %s6342_s2 = sand.u32 1, %s10563_s11  }
 0x5d2   : > { %s6343_s5 = scalar_lea.sflag [#allocation5], %s6342_s2 }
 0x5d3   : > { %p10166_p10 = pnand %p10184_p9, %p10749_p4 }
 0x5d5   : > { %p10167_p11 = pneg %p10166_p10 }
 0x5d7   : > { %10558 = dma.done.wait (%p10167_p11), %s6343_s5, 128  }
 0x5d8   : > { %10560 = vsyncadd (%p10167_p11), %s6343_s5, 4294967168  ;;  %p28_p0 = scmp.ge.s32.totalorder %s10723_s27, 5   ;;  %s11307_s11 = smov %s10567_s12 }
 0x5d9   : > { %s11308_s12 = smov %s10571_s13  ;;  %s11309_s13 = smov %s10735_s30 }
 0x5da   : > { %s11310_s14 = smov %s10723_s27  ;;  %30 = sbr.rel (!%p28_p0) target bundleno = 15 (0xf), region = 129 }
 0x5df   :  { %6349 = vsyncpa [#allocation4], 1 }
 0x5e0   :  { %6351 = vsyncpa [#allocation4 + $0x1], 1 }
 0x5e1   :  { %6352 = vsyncpa [#allocation7], 1 }
 0x5e2   :  { %6353 = vsyncpa [#allocation10], 1 }
 0x5e3   :  { %6354 = vsyncpa [#allocation13], 1 }
 0x5e4   :  { %6355 = vsyncpa [#allocation16], 1 }
 0x5e5   :  { %6356 = vsyncpa [#allocation5], 1 }
 0x5e6   :  { %6358 = vsyncpa [#allocation5 + $0x1], 1 }

</bundles_post_ra>
